<compile_context>
chip_gen: v5e
topology: v5e:2x2
jax: 0.10.0
libtpu: 0.0.40
codegen_flags: <defaults>
</compile_context>

<pallas_src>
import functools

import jax
import jax.numpy as jnp
from jax.experimental import pallas as pl
from jax.experimental.pallas import tpu as pltpu

D_IN = 32                        # input_size
H1, H2, H3 = 400, 200, 100       # true hidden widths (LayerNorm dims)
H1P, H2P, H3P = 512, 256, 128    # lane/sublane-aligned padded widths
D_OUT = 1
LN_EPS = 1e-5


def _ln_relu(h, bias, gamma, beta, true_n, out_dtype):
    """Bias add + LayerNorm over axis 0 + ReLU on a feature-major block.

    h: (H_pad, block_b) f32 with padded feature rows exactly zero.
    bias/gamma/beta: (H_pad, 1) f32, zero on padded rows.
    Single-pass, mask-free statistics using the true feature count.
    """
    h = h + bias                                              # padded rows stay 0
    inv_n = 1.0 / float(true_n)
    mean = jnp.sum(h, axis=0, keepdims=True) * inv_n          # (1, block_b)
    msq = jnp.sum(h * h, axis=0, keepdims=True) * inv_n
    var = msq - mean * mean
    inv = jax.lax.rsqrt(var + LN_EPS)
    y = (h - mean) * inv * gamma + beta                       # padded rows -> 0
    return jnp.maximum(y, 0.0).astype(out_dtype)


def mlp_kernel(x_ref,
               w1_ref, p1_ref,
               w2_ref, p2_ref,
               w3_ref, p3_ref,
               b4_ref,
               o_ref):
    # x_ref: (block_b, D_IN) f32.  All activations are feature-major
    # (H_pad, block_b) so the batch lives on the 128-lane axis.
    x = x_ref[...]

    # Block 1: fc1 (f32 x f32, K=32) -> LayerNorm -> ReLU (-> bf16 for fc2)
    h = jax.lax.dot_general(
        w1_ref[...], x, (((1,), (1,)), ((), ())),
        preferred_element_type=jnp.float32)                   # (H1P, block_b)
    h = _ln_relu(h, p1_ref[0], p1_ref[1], p1_ref[2], H1, jnp.bfloat16)

    # Block 2: fc2 (bf16 x bf16 -> f32 acc) -> LayerNorm -> ReLU (-> bf16)
    h = jnp.dot(w2_ref[...], h, preferred_element_type=jnp.float32)
    h = _ln_relu(h, p2_ref[0], p2_ref[1], p2_ref[2], H2, jnp.bfloat16)

    # Block 3: fc3 -> LayerNorm -> ReLU (kept f32: feeds the VPU fc4)
    h = jnp.dot(w3_ref[...], h, preferred_element_type=jnp.float32)
    h = _ln_relu(h, p3_ref[0], p3_ref[1], p3_ref[2], H3, jnp.float32)

    # fc4 (single output feature): VPU multiply + sublane (XLU) reduction
    # gives a lane-dense (1, block_b) row -> unmasked store.
    out = jnp.sum(h * p3_ref[3], axis=0, keepdims=True) + b4_ref[...]
    o_ref[...] = out.astype(o_ref.dtype)
    # TODO(synk): dropout layers are identity here (inference/eval semantics);
    # training-mode dropout would need pltpu.prng_random_bits + masking.


@functools.partial(jax.jit, static_argnames=("block_b",))
def mlp_forward(x, kparams, block_b=None):
    """x: (B, D_IN) f32.  kparams: output of prepare_params (padded/packed)."""
    B, d_in = x.shape
    assert d_in == D_IN

    if block_b is None:
        # Prefer >= 2 lane-aligned grid steps (both v7x TensorCores get work);
        # cap so per-block scratch stays well under scoped-VMEM defaults.
        half = -(-B // 2)
        block_b = min(2048, max(128, -(-half // 128) * 128))
    assert block_b % 128 == 0, "batch tile must be lane-aligned"

    bp = -(-B // block_b) * block_b           # round batch up to tile multiple
    if bp != B:
        x = jnp.pad(x, ((0, bp - B), (0, 0)))

    def full_spec(arr):
        # Small grid-invariant parameter: fully resident, same block each step.
        nd = arr.ndim
        return pl.BlockSpec(arr.shape, lambda i, _nd=nd: (0,) * _nd)

    grid = (bp // block_b,)
    in_specs = [pl.BlockSpec((block_b, D_IN), lambda i: (i, 0))] + [
        full_spec(p) for p in kparams
    ]
    out_specs = pl.BlockSpec((1, block_b), lambda i: (0, i))

    out_t = pl.pallas_call(
        mlp_kernel,
        out_shape=jax.ShapeDtypeStruct((1, bp), jnp.float32),
        grid_spec=pltpu.PrefetchScalarGridSpec(
            num_scalar_prefetch=0,
            grid=grid,
            in_specs=in_specs,
            out_specs=out_specs,
        ),
        compiler_params=pltpu.CompilerParams(
            dimension_semantics=("parallel",)),
    )(x, *kparams)

    return out_t.reshape(bp, 1)[:B]           # (B, 1)


def init_params(key):
    """PyTorch-shaped params: Linear W is (out, in), b is (out,);
    LayerNorm gamma=1, beta=0 (PyTorch defaults)."""
    dims = [(D_IN, H1), (H1, H2), (H2, H3), (H3, D_OUT)]
    lin = []
    for fan_in, fan_out in dims:
        key, kw, kb = jax.random.split(key, 3)
        bound = 1.0 / (fan_in ** 0.5)
        W = jax.random.uniform(kw, (fan_out, fan_in), jnp.float32, -bound, bound)
        b = jax.random.uniform(kb, (fan_out,), jnp.float32, -bound, bound)
        lin.append((W, b))
    (W1, b1), (W2, b2), (W3, b3), (W4, b4) = lin
    ones = lambda n: jnp.ones((n,), jnp.float32)
    zeros = lambda n: jnp.zeros((n,), jnp.float32)
    return (W1, b1, ones(H1), zeros(H1),
            W2, b2, ones(H2), zeros(H2),
            W3, b3, ones(H3), zeros(H3),
            W4, b4)


def prepare_params(params):
    """Zero-pad hidden dims to lane-aligned widths and pack for the kernel.

    * W1 stays f32 (K=32 matmul is free; keeps fc1 exact).
    * W2/W3 are bf16 (MXU-native) with f32 accumulation in-kernel.
    * Per-layer (bias, gamma, beta[, w4]) are stacked into a single f32
      (3-or-4, H_pad, 1) array -> one DMA per layer instead of 3-4.
    """
    (W1, b1, g1, be1, W2, b2, g2, be2, W3, b3, g3, be3, W4, b4) = params

    def pad2(w, rows, cols):
        r, c = w.shape
        return jnp.pad(w, ((0, rows - r), (0, cols - c)))

    def col(v, rows):
        return jnp.pad(v.reshape(-1, 1).astype(jnp.float32),
                       ((0, rows - v.shape[0]), (0, 0)))

    w1p = pad2(W1, H1P, D_IN).astype(jnp.float32)
    w2p = pad2(W2, H2P, H1P).astype(jnp.bfloat16)
    w3p = pad2(W3, H3P, H2P).astype(jnp.bfloat16)

    p1 = jnp.stack([col(b1, H1P), col(g1, H1P), col(be1, H1P)])          # (3,H1P,1)
    p2 = jnp.stack([col(b2, H2P), col(g2, H2P), col(be2, H2P)])          # (3,H2P,1)
    p3 = jnp.stack([col(b3, H3P), col(g3, H3P), col(be3, H3P),
                    col(W4.reshape(-1), H3P)])                           # (4,H3P,1)
    b4p = b4.reshape(1, 1).astype(jnp.float32)

    return (w1p, p1, w2p, p2, w3p, p3, b4p)


def reference_forward(x, params):
    """Pure-JAX f32 reference matching the PyTorch module (eval mode)."""
    (W1, b1, g1, be1, W2, b2, g2, be2, W3, b3, g3, be3, W4, b4) = params

    def ln(h, g, b):
        mean = jnp.mean(h, axis=-1, keepdims=True)
        xc = h - mean
        var = jnp.mean(xc * xc, axis=-1, keepdims=True)
        return xc * jax.lax.rsqrt(var + LN_EPS) * g + b

    h = jnp.maximum(ln(x @ W1.T + b1, g1, be1), 0.0)
    h = jnp.maximum(ln(h @ W2.T + b2, g2, be2), 0.0)
    h = jnp.maximum(ln(h @ W3.T + b3, g3, be3), 0.0)
    return h @ W4.T + b4


if __name__ == "__main__":
    key = jax.random.PRNGKey(0)
    kx, kp = jax.random.split(key)

    B = 512                                   # -> block_b=256, 2 parallel steps
    x = jax.random.normal(kx, (B, D_IN), jnp.float32)
    params = init_params(kp)
    kparams = prepare_params(params)

    out = mlp_forward(x, kparams)
    out = jax.block_until_ready(out)

    ref = reference_forward(x, params)
    assert out.shape == (B, D_OUT)
    max_diff = float(jnp.max(jnp.abs(out - ref)))
    # W2/W3 and intermediate activations are bf16 (f32 accumulation) -> a
    # slightly looser tolerance than pure f32.
    assert jnp.allclose(out, ref, atol=5e-2, rtol=5e-2), (
        f"max abs diff {max_diff}")
    print("KERNEL_OK")
</pallas_src>

<mosaic_0001>
module attributes {stable_mosaic.version = 11 : i64} {
  func.func @mlp_kernel(%arg0: i32, %arg1: memref<256x32xf32, #tpu.memory_space<vmem>>, %arg2: memref<512x32xf32, #tpu.memory_space<vmem>>, %arg3: memref<3x512x1xf32, #tpu.memory_space<vmem>>, %arg4: memref<256x512xbf16, #tpu.memory_space<vmem>>, %arg5: memref<3x256x1xf32, #tpu.memory_space<vmem>>, %arg6: memref<128x256xbf16, #tpu.memory_space<vmem>>, %arg7: memref<4x128x1xf32, #tpu.memory_space<vmem>>, %arg8: memref<1x1xf32, #tpu.memory_space<vmem>>, %arg9: memref<1x256xf32, #tpu.memory_space<vmem>>) attributes {dimension_semantics = [#tpu.dimension_semantics<parallel>], iteration_bounds = array<i64: 2>, scalar_prefetch = 0 : i64, scratch_operands = 0 : i64, tpu.core_type = #tpu.core_type<tc>, window_params = [{transform_indices = @transform_0, window_bounds = array<i64: 256, 32>}, {pipeline_mode = #tpu.pipeline_mode<synchronous>, transform_indices = @transform_1, window_bounds = array<i64: 512, 32>}, {pipeline_mode = #tpu.pipeline_mode<synchronous>, transform_indices = @transform_2, window_bounds = array<i64: 3, 512, 1>}, {pipeline_mode = #tpu.pipeline_mode<synchronous>, transform_indices = @transform_3, window_bounds = array<i64: 256, 512>}, {pipeline_mode = #tpu.pipeline_mode<synchronous>, transform_indices = @transform_4, window_bounds = array<i64: 3, 256, 1>}, {pipeline_mode = #tpu.pipeline_mode<synchronous>, transform_indices = @transform_5, window_bounds = array<i64: 128, 256>}, {pipeline_mode = #tpu.pipeline_mode<synchronous>, transform_indices = @transform_6, window_bounds = array<i64: 4, 128, 1>}, {pipeline_mode = #tpu.pipeline_mode<synchronous>, transform_indices = @transform_7, window_bounds = array<i64: 1, 1>}, {transform_indices = @transform_8, window_bounds = array<i64: 1, 256>}]} {
    %c0 = arith.constant 0 : index
    %c0_0 = arith.constant 0 : index
    %0 = vector.load %arg1[%c0, %c0_0] : memref<256x32xf32, #tpu.memory_space<vmem>>, vector<256x32xf32>
    %c0_1 = arith.constant 0 : index
    %c0_2 = arith.constant 0 : index
    %1 = vector.load %arg2[%c0_1, %c0_2] : memref<512x32xf32, #tpu.memory_space<vmem>>, vector<512x32xf32>
    %cst = arith.constant dense<0.000000e+00> : vector<512x256xf32>
    %2 = tpu.matmul %1, %0, %cst {dimension_numbers = #tpu.dot_dimension_numbers<[1], [1], [0], [0], [0, 0, 1, 0], [], []>} : vector<512x32xf32>, vector<256x32xf32>, vector<512x256xf32> -> vector<512x256xf32>
    %c0_3 = arith.constant 0 : index
    %c0_4 = arith.constant 0 : index
    %c0_5 = arith.constant 0 : index
    %3 = vector.load %arg3[%c0_3, %c0_4, %c0_5] : memref<3x512x1xf32, #tpu.memory_space<vmem>>, vector<1x512x1xf32>
    %4 = vector.shape_cast %3 : vector<1x512x1xf32> to vector<512x1xf32>
    %c1 = arith.constant 1 : index
    %c0_6 = arith.constant 0 : index
    %c0_7 = arith.constant 0 : index
    %5 = vector.load %arg3[%c1, %c0_6, %c0_7] : memref<3x512x1xf32, #tpu.memory_space<vmem>>, vector<1x512x1xf32>
    %6 = vector.shape_cast %5 : vector<1x512x1xf32> to vector<512x1xf32>
    %c2 = arith.constant 2 : index
    %c0_8 = arith.constant 0 : index
    %c0_9 = arith.constant 0 : index
    %7 = vector.load %arg3[%c2, %c0_8, %c0_9] : memref<3x512x1xf32, #tpu.memory_space<vmem>>, vector<1x512x1xf32>
    %8 = vector.shape_cast %7 : vector<1x512x1xf32> to vector<512x1xf32>
    %9 = vector.broadcast %4 : vector<512x1xf32> to vector<512x256xf32>
    %10 = arith.addf %2, %9 : vector<512x256xf32>
    %cst_10 = arith.constant dense<0.000000e+00> : vector<256xf32>
    %11 = vector.multi_reduction <add>, %10, %cst_10 [0] : vector<512x256xf32> to vector<256xf32>
    %12 = vector.shape_cast %11 : vector<256xf32> to vector<1x256xf32>
    %cst_11 = arith.constant 2.500000e-03 : f32
    %13 = vector.broadcast %cst_11 : f32 to vector<1x256xf32>
    %14 = arith.mulf %12, %13 : vector<1x256xf32>
    %15 = arith.mulf %10, %10 : vector<512x256xf32>
    %cst_12 = arith.constant dense<0.000000e+00> : vector<256xf32>
    %16 = vector.multi_reduction <add>, %15, %cst_12 [0] : vector<512x256xf32> to vector<256xf32>
    %17 = vector.shape_cast %16 : vector<256xf32> to vector<1x256xf32>
    %cst_13 = arith.constant 2.500000e-03 : f32
    %18 = vector.broadcast %cst_13 : f32 to vector<1x256xf32>
    %19 = arith.mulf %17, %18 : vector<1x256xf32>
    %20 = arith.mulf %14, %14 : vector<1x256xf32>
    %21 = arith.subf %19, %20 : vector<1x256xf32>
    %cst_14 = arith.constant 9.99999974E-6 : f32
    %22 = vector.broadcast %cst_14 : f32 to vector<1x256xf32>
    %23 = arith.addf %21, %22 : vector<1x256xf32>
    %24 = math.rsqrt %23 : vector<1x256xf32>
    %25 = vector.broadcast %14 : vector<1x256xf32> to vector<512x256xf32>
    %26 = arith.subf %10, %25 : vector<512x256xf32>
    %27 = vector.broadcast %24 : vector<1x256xf32> to vector<512x256xf32>
    %28 = arith.mulf %26, %27 : vector<512x256xf32>
    %29 = vector.broadcast %6 : vector<512x1xf32> to vector<512x256xf32>
    %30 = arith.mulf %28, %29 : vector<512x256xf32>
    %31 = vector.broadcast %8 : vector<512x1xf32> to vector<512x256xf32>
    %32 = arith.addf %30, %31 : vector<512x256xf32>
    %cst_15 = arith.constant 0.000000e+00 : f32
    %33 = vector.broadcast %cst_15 : f32 to vector<512x256xf32>
    %34 = arith.maximumf %32, %33 : vector<512x256xf32>
    %35 = arith.truncf %34 : vector<512x256xf32> to vector<512x256xbf16>
    %c0_16 = arith.constant 0 : index
    %c0_17 = arith.constant 0 : index
    %36 = vector.load %arg4[%c0_16, %c0_17] : memref<256x512xbf16, #tpu.memory_space<vmem>>, vector<256x512xbf16>
    %cst_18 = arith.constant dense<0.000000e+00> : vector<256x256xf32>
    %37 = tpu.matmul %36, %35, %cst_18 {dimension_numbers = #tpu.dot_dimension_numbers<[1], [0], [0], [1], [0, 0, 1, 1], [], []>} : vector<256x512xbf16>, vector<512x256xbf16>, vector<256x256xf32> -> vector<256x256xf32>
    %c0_19 = arith.constant 0 : index
    %c0_20 = arith.constant 0 : index
    %c0_21 = arith.constant 0 : index
    %38 = vector.load %arg5[%c0_19, %c0_20, %c0_21] : memref<3x256x1xf32, #tpu.memory_space<vmem>>, vector<1x256x1xf32>
    %39 = vector.shape_cast %38 : vector<1x256x1xf32> to vector<256x1xf32>
    %c1_22 = arith.constant 1 : index
    %c0_23 = arith.constant 0 : index
    %c0_24 = arith.constant 0 : index
    %40 = vector.load %arg5[%c1_22, %c0_23, %c0_24] : memref<3x256x1xf32, #tpu.memory_space<vmem>>, vector<1x256x1xf32>
    %41 = vector.shape_cast %40 : vector<1x256x1xf32> to vector<256x1xf32>
    %c2_25 = arith.constant 2 : index
    %c0_26 = arith.constant 0 : index
    %c0_27 = arith.constant 0 : index
    %42 = vector.load %arg5[%c2_25, %c0_26, %c0_27] : memref<3x256x1xf32, #tpu.memory_space<vmem>>, vector<1x256x1xf32>
    %43 = vector.shape_cast %42 : vector<1x256x1xf32> to vector<256x1xf32>
    %44 = vector.broadcast %39 : vector<256x1xf32> to vector<256x256xf32>
    %45 = arith.addf %37, %44 : vector<256x256xf32>
    %cst_28 = arith.constant dense<0.000000e+00> : vector<256xf32>
    %46 = vector.multi_reduction <add>, %45, %cst_28 [0] : vector<256x256xf32> to vector<256xf32>
    %47 = vector.shape_cast %46 : vector<256xf32> to vector<1x256xf32>
    %cst_29 = arith.constant 5.000000e-03 : f32
    %48 = vector.broadcast %cst_29 : f32 to vector<1x256xf32>
    %49 = arith.mulf %47, %48 : vector<1x256xf32>
    %50 = arith.mulf %45, %45 : vector<256x256xf32>
    %cst_30 = arith.constant dense<0.000000e+00> : vector<256xf32>
    %51 = vector.multi_reduction <add>, %50, %cst_30 [0] : vector<256x256xf32> to vector<256xf32>
    %52 = vector.shape_cast %51 : vector<256xf32> to vector<1x256xf32>
    %cst_31 = arith.constant 5.000000e-03 : f32
    %53 = vector.broadcast %cst_31 : f32 to vector<1x256xf32>
    %54 = arith.mulf %52, %53 : vector<1x256xf32>
    %55 = arith.mulf %49, %49 : vector<1x256xf32>
    %56 = arith.subf %54, %55 : vector<1x256xf32>
    %cst_32 = arith.constant 9.99999974E-6 : f32
    %57 = vector.broadcast %cst_32 : f32 to vector<1x256xf32>
    %58 = arith.addf %56, %57 : vector<1x256xf32>
    %59 = math.rsqrt %58 : vector<1x256xf32>
    %60 = vector.broadcast %49 : vector<1x256xf32> to vector<256x256xf32>
    %61 = arith.subf %45, %60 : vector<256x256xf32>
    %62 = vector.broadcast %59 : vector<1x256xf32> to vector<256x256xf32>
    %63 = arith.mulf %61, %62 : vector<256x256xf32>
    %64 = vector.broadcast %41 : vector<256x1xf32> to vector<256x256xf32>
    %65 = arith.mulf %63, %64 : vector<256x256xf32>
    %66 = vector.broadcast %43 : vector<256x1xf32> to vector<256x256xf32>
    %67 = arith.addf %65, %66 : vector<256x256xf32>
    %cst_33 = arith.constant 0.000000e+00 : f32
    %68 = vector.broadcast %cst_33 : f32 to vector<256x256xf32>
    %69 = arith.maximumf %67, %68 : vector<256x256xf32>
    %70 = arith.truncf %69 : vector<256x256xf32> to vector<256x256xbf16>
    %c0_34 = arith.constant 0 : index
    %c0_35 = arith.constant 0 : index
    %71 = vector.load %arg6[%c0_34, %c0_35] : memref<128x256xbf16, #tpu.memory_space<vmem>>, vector<128x256xbf16>
    %cst_36 = arith.constant dense<0.000000e+00> : vector<128x256xf32>
    %72 = tpu.matmul %71, %70, %cst_36 {dimension_numbers = #tpu.dot_dimension_numbers<[1], [0], [0], [1], [0, 0, 1, 1], [], []>} : vector<128x256xbf16>, vector<256x256xbf16>, vector<128x256xf32> -> vector<128x256xf32>
    %c0_37 = arith.constant 0 : index
    %c0_38 = arith.constant 0 : index
    %c0_39 = arith.constant 0 : index
    %73 = vector.load %arg7[%c0_37, %c0_38, %c0_39] : memref<4x128x1xf32, #tpu.memory_space<vmem>>, vector<1x128x1xf32>
    %74 = vector.shape_cast %73 : vector<1x128x1xf32> to vector<128x1xf32>
    %c1_40 = arith.constant 1 : index
    %c0_41 = arith.constant 0 : index
    %c0_42 = arith.constant 0 : index
    %75 = vector.load %arg7[%c1_40, %c0_41, %c0_42] : memref<4x128x1xf32, #tpu.memory_space<vmem>>, vector<1x128x1xf32>
    %76 = vector.shape_cast %75 : vector<1x128x1xf32> to vector<128x1xf32>
    %c2_43 = arith.constant 2 : index
    %c0_44 = arith.constant 0 : index
    %c0_45 = arith.constant 0 : index
    %77 = vector.load %arg7[%c2_43, %c0_44, %c0_45] : memref<4x128x1xf32, #tpu.memory_space<vmem>>, vector<1x128x1xf32>
    %78 = vector.shape_cast %77 : vector<1x128x1xf32> to vector<128x1xf32>
    %79 = vector.broadcast %74 : vector<128x1xf32> to vector<128x256xf32>
    %80 = arith.addf %72, %79 : vector<128x256xf32>
    %cst_46 = arith.constant dense<0.000000e+00> : vector<256xf32>
    %81 = vector.multi_reduction <add>, %80, %cst_46 [0] : vector<128x256xf32> to vector<256xf32>
    %82 = vector.shape_cast %81 : vector<256xf32> to vector<1x256xf32>
    %cst_47 = arith.constant 0.00999999977 : f32
    %83 = vector.broadcast %cst_47 : f32 to vector<1x256xf32>
    %84 = arith.mulf %82, %83 : vector<1x256xf32>
    %85 = arith.mulf %80, %80 : vector<128x256xf32>
    %cst_48 = arith.constant dense<0.000000e+00> : vector<256xf32>
    %86 = vector.multi_reduction <add>, %85, %cst_48 [0] : vector<128x256xf32> to vector<256xf32>
    %87 = vector.shape_cast %86 : vector<256xf32> to vector<1x256xf32>
    %cst_49 = arith.constant 0.00999999977 : f32
    %88 = vector.broadcast %cst_49 : f32 to vector<1x256xf32>
    %89 = arith.mulf %87, %88 : vector<1x256xf32>
    %90 = arith.mulf %84, %84 : vector<1x256xf32>
    %91 = arith.subf %89, %90 : vector<1x256xf32>
    %cst_50 = arith.constant 9.99999974E-6 : f32
    %92 = vector.broadcast %cst_50 : f32 to vector<1x256xf32>
    %93 = arith.addf %91, %92 : vector<1x256xf32>
    %94 = math.rsqrt %93 : vector<1x256xf32>
    %95 = vector.broadcast %84 : vector<1x256xf32> to vector<128x256xf32>
    %96 = arith.subf %80, %95 : vector<128x256xf32>
    %97 = vector.broadcast %94 : vector<1x256xf32> to vector<128x256xf32>
    %98 = arith.mulf %96, %97 : vector<128x256xf32>
    %99 = vector.broadcast %76 : vector<128x1xf32> to vector<128x256xf32>
    %100 = arith.mulf %98, %99 : vector<128x256xf32>
    %101 = vector.broadcast %78 : vector<128x1xf32> to vector<128x256xf32>
    %102 = arith.addf %100, %101 : vector<128x256xf32>
    %cst_51 = arith.constant 0.000000e+00 : f32
    %103 = vector.broadcast %cst_51 : f32 to vector<128x256xf32>
    %104 = arith.maximumf %102, %103 : vector<128x256xf32>
    %c3 = arith.constant 3 : index
    %c0_52 = arith.constant 0 : index
    %c0_53 = arith.constant 0 : index
    %105 = vector.load %arg7[%c3, %c0_52, %c0_53] : memref<4x128x1xf32, #tpu.memory_space<vmem>>, vector<1x128x1xf32>
    %106 = vector.shape_cast %105 : vector<1x128x1xf32> to vector<128x1xf32>
    %107 = vector.broadcast %106 : vector<128x1xf32> to vector<128x256xf32>
    %108 = arith.mulf %104, %107 : vector<128x256xf32>
    %cst_54 = arith.constant dense<0.000000e+00> : vector<256xf32>
    %109 = vector.multi_reduction <add>, %108, %cst_54 [0] : vector<128x256xf32> to vector<256xf32>
    %110 = vector.shape_cast %109 : vector<256xf32> to vector<1x256xf32>
    %c0_55 = arith.constant 0 : index
    %c0_56 = arith.constant 0 : index
    %111 = vector.load %arg8[%c0_55, %c0_56] : memref<1x1xf32, #tpu.memory_space<vmem>>, vector<1x1xf32>
    %112 = vector.broadcast %111 : vector<1x1xf32> to vector<1x256xf32>
    %113 = arith.addf %110, %112 : vector<1x256xf32>
    %c0_57 = arith.constant 0 : index
    %c0_58 = arith.constant 0 : index
    %114 = vector.load %arg9[%c0_57, %c0_58] : memref<1x256xf32, #tpu.memory_space<vmem>>, vector<1x256xf32>
    tpu.vector_store %arg9[%c0_57, %c0_58], %113 {strides = array<i32>} : memref<1x256xf32, #tpu.memory_space<vmem>>, vector<1x256xf32>,
    return
  }
  func.func @transform_0(%arg0: i32) -> (i32, i32) {
    %c0_i32 = arith.constant 0 : i32
    %c0_i32_0 = arith.constant 0 : i32
    return %arg0, %c0_i32 : i32, i32
  }
  func.func @transform_1(%arg0: i32) -> (i32, i32) {
    %c0_i32 = arith.constant 0 : i32
    %c0_i32_0 = arith.constant 0 : i32
    %c0_i32_1 = arith.constant 0 : i32
    return %c0_i32, %c0_i32_0 : i32, i32
  }
  func.func @transform_2(%arg0: i32) -> (i32, i32, i32) {
    %c0_i32 = arith.constant 0 : i32
    %c0_i32_0 = arith.constant 0 : i32
    %c0_i32_1 = arith.constant 0 : i32
    %c0_i32_2 = arith.constant 0 : i32
    return %c0_i32, %c0_i32_0, %c0_i32_1 : i32, i32, i32
  }
  func.func @transform_3(%arg0: i32) -> (i32, i32) {
    %c0_i32 = arith.constant 0 : i32
    %c0_i32_0 = arith.constant 0 : i32
    %c0_i32_1 = arith.constant 0 : i32
    return %c0_i32, %c0_i32_0 : i32, i32
  }
  func.func @transform_4(%arg0: i32) -> (i32, i32, i32) {
    %c0_i32 = arith.constant 0 : i32
    %c0_i32_0 = arith.constant 0 : i32
    %c0_i32_1 = arith.constant 0 : i32
    %c0_i32_2 = arith.constant 0 : i32
    return %c0_i32, %c0_i32_0, %c0_i32_1 : i32, i32, i32
  }
  func.func @transform_5(%arg0: i32) -> (i32, i32) {
    %c0_i32 = arith.constant 0 : i32
    %c0_i32_0 = arith.constant 0 : i32
    %c0_i32_1 = arith.constant 0 : i32
    return %c0_i32, %c0_i32_0 : i32, i32
  }
  func.func @transform_6(%arg0: i32) -> (i32, i32, i32) {
    %c0_i32 = arith.constant 0 : i32
    %c0_i32_0 = arith.constant 0 : i32
    %c0_i32_1 = arith.constant 0 : i32
    %c0_i32_2 = arith.constant 0 : i32
    return %c0_i32, %c0_i32_0, %c0_i32_1 : i32, i32, i32
  }
  func.func @transform_7(%arg0: i32) -> (i32, i32) {
    %c0_i32 = arith.constant 0 : i32
    %c0_i32_0 = arith.constant 0 : i32
    %c0_i32_1 = arith.constant 0 : i32
    return %c0_i32, %c0_i32_0 : i32, i32
  }
  func.func @transform_8(%arg0: i32) -> (i32, i32) {
    %c0_i32 = arith.constant 0 : i32
    %c0_i32_0 = arith.constant 0 : i32
    return %c0_i32, %arg0 : i32, i32
  }
}

</mosaic_0001>

<bundles_post_ra>
// kernel: mlp_forward.1
= control target key start
LH: loop header
LB: loop body
LE: loop exit
PB: predicated region body
PF: predicated region fallthrough
CT: control target
= control target key end

     0   :  { %s15041_s0 = inlined_call_operand.vmem [shape: f32[512,32], index: 0, kind: input, shape index: {}]   ;;  %s15042_s1 = inlined_call_operand.vmem [shape: f32[512,32], index: 1, kind: input, shape index: {}]   ;;  %s15043_s2 = inlined_call_operand.vmem [shape: f32[3,512,1], index: 2, kind: input, shape index: {}]   ;;  %s15044_s3 = inlined_call_operand.vmem [shape: bf16[256,512], index: 3, kind: input, shape index: {}]   ;;  %s15045_s4 = inlined_call_operand.vmem [shape: f32[3,256,1], index: 4, kind: input, shape index: {}]   ;;  %s15046_s5 = inlined_call_operand.vmem [shape: bf16[128,256], index: 5, kind: input, shape index: {}]   ;;  %s15047_s6 = inlined_call_operand.vmem [shape: f32[4,128,1], index: 6, kind: input, shape index: {}]   ;;  %s15048_s7 = inlined_call_operand.<no memory space> [shape: f32[1,1], index: 7, kind: input, shape index: {}]   ;;  %s15049_s8 = inlined_call_operand.hbm [shape: f32[1,512], index: 8, kind: output, shape index: {}]  }
   0x1   :  { %v13_v0 = vstv %s15048_s7 }
   0x2   :  { %14 = vst [vmem:[#allocation2] sm:$0x1] %v13_v0 }
   0x3   :  { %15 = vsyncpa [#allocation4], 0 }
   0x4   :  { %17 = vsyncpa [#allocation4 + $0x1], 0  ;;  %s7821_s29 = smov 0   ;;  %s7823_s30 = smov 0  }
   0x5   :  { %s7825_s9 = smov 0   ;;  %s7827_s10 = smov 0  }
   0x6 LB: > { %s7842_s7 = sadd.s32 4294967295, %s7770_s10   ;;  %s6826_s11 = sadd.s32 4294967294, %s7770_s10   ;;  %s7770_s10 = sphi %s7827_s10, %s17172_s10   ;;  %s7766_s9 = sphi %s7825_s9, %s17171_s9   ;;  %s7762_s30 = sphi %s7823_s30, %s17170_s30   ;;  %s7758_s29 = sphi %s7821_s29, %s17169_s29  }
   0x7   : > { %s7846_s12 = sadd.s32 1, %s7770_s10   ;;  %s203_s13 = sadd.s32 1, %s7766_s9 }
   0x8   : > { %s200_s14 = ssub.s32 %s7770_s10, %s7846_s12  ;;  %p213_p0 = scmp.ne.s32.totalorder %s7766_s9, %s7762_s30 }
   0x9   : > { %p201_p1 = scmp.eq.s32.totalorder %s200_s14, 0  ;;  %p214_p2 = scmp.eq.s32.totalorder %s7842_s7, 1 }
   0xa   : > { %p219_p3 = scmp.ne.s32.totalorder %s7762_s30, %s7758_s29  ;;  %p220_p4 = scmp.eq.s32.totalorder %s6826_s11, 1 }
   0xb   : > { %s7857_s15 = scalar_select %p201_p1, %s7766_s9, %s203_s13  }
   0xc   : > { %p7859_p5 = por %p214_p2, %p213_p0  ;;  %p7863_p6 = por %p220_p4, %p219_p3 }
   0xd   : > { %p6829_p7 = scmp.ge.s32.totalorder %s7770_s10, 1  ;;  %p268_p8 = scmp.lt.s32.totalorder %s7770_s10, 3 }
   0xf   : > { %p269_p9 = pnand %p6829_p7, %p268_p8 }
  0x11   : > { %272 = sbr.rel (%p269_p9) target bundleno = 2312 (0x908), region = 52 }
  0x16   : > { %v409_v1 = vld [vmem:[%s15043_s2 + $0x20] sm:$0xff]  ;;  %v407_v2 = vld [vmem:[%s15043_s2 + $0x10] sm:$0xff]  ;;  %s6831_s24 = sshll.u32 %s7842_s7, 5  ;;  %v7772_v4 = vmov 0   ;;  %vm919_vm0 = vcmask 261120   ;;  %v410_v7 = vld [vmem:[%s15043_s2 + $0x28] sm:$0xff] }
  0x17   : > { %v405_v3 = vld [vmem:[%s15043_s2] sm:$0xff]  ;;  %7695 = vset.pattern.permute.xlu2 %v7772_v4  ;;  %7694 = vset.pattern.permute.xlu1 %v7772_v4  ;;  %p303_p10 = scmp.lt.s32.totalorder %s6831_s24, 63  ;;  %v408_v8 = vld [vmem:[%s15043_s2 + $0x18] sm:$0xff]  ;;  %v406_v9 = vld [vmem:[%s15043_s2 + $0x8] sm:$0xff]  ;;  %s299_s13 = sand.u32 1, %s7762_s30  }
  0x18   : > { %7693 = vset.pattern.permute.xlu0 %v7772_v4  ;;  %621 = vperm.xlu2 %7695, %v409_v1   ;;  %v413_v14 = vld [vmem:[%s15043_s2 + $0x40] sm:$0xff]  ;;  %v412_v15 = vld [vmem:[%s15043_s2 + $0x38] sm:$0xff]  ;;  %v411_v16 = vld [vmem:[%s15043_s2 + $0x30] sm:$0xff]  ;;  %s6830_s14 = sshll.u32 %s299_s13, 1  ;;  %s7554_s18 = sshll.u32 %s7842_s7, 1 }
  0x19   : > { %611 = vperm.xlu1 %7694, %v407_v2   ;;  %601 = vperm.xlu0 %7693, %v405_v3   ;;  %s17174_s24 = smov (!%p303_p10, %s6831_s24), 63  ;;  %v416_v21 = vld [vmem:[%s15043_s2 + $0x58] sm:$0xff]  ;;  %v415_v22 = vld [vmem:[%s15043_s2 + $0x50] sm:$0xff]  ;;  %v414_v23 = vld [vmem:[%s15043_s2 + $0x48] sm:$0xff]  ;;  %s6762_s21 = scalar_lea.hbm %s15049_s8, %s7554_s18 }
  0x1a   : > { %s6832_s25 = sshll.u32 %s17174_s24, 3  ;;  %v419_v28 = vld [vmem:[%s15043_s2 + $0x70] sm:$0xff]  ;;  %v418_v29 = vld [vmem:[%s15043_s2 + $0x68] sm:$0xff]  ;;  %v417_v30 = vld [vmem:[%s15043_s2 + $0x60] sm:$0xff]  ;;  %s301_s22 = scalar_lea.vmem [#allocation3], %s6830_s14 }
  0x1b   : > { %s7882_s28 = scalar_lea.vmem %s15041_s0, %s6832_s25  ;;  %v422_v35 = vld [vmem:[%s15043_s2 + $0x88] sm:$0xff]  ;;  %v421_v36 = vld [vmem:[%s15043_s2 + $0x80] sm:$0xff]  ;;  %v420_v37 = vld [vmem:[%s15043_s2 + $0x78] sm:$0xff]  ;;  %s6764_s23 = sshll.u32 %s301_s22, 4  ;;  %s6765_s23 = int_to_ptr.vmem [resolvable:$true] %s6764_s23 }
  0x1c   : > { %v324_v5 = vld [vmem:[%s7882_s28 + $0x78] sm:$0xff]  ;;  %v323_v10 = vld [vmem:[%s7882_s28 + $0x70] sm:$0xff]  ;;  %v322_v12 = vld [vmem:[%s7882_s28 + $0x68] sm:$0xff]  ;;  %s6766_s24 = sshll.u32 %s6762_s21, 4  ;;  %s6752_s7 = scalar_lea.sflag [#allocation4], %s299_s13  ;;  %s6767_s24 = int_to_ptr.hbm [resolvable:$true] %s6766_s24 }
  0x1d   : > { %v340_v6 = vld [vmem:[%s7882_s28 + $0xf8] sm:$0xff]  ;;  %6961 = vmatpush.xpose.msk.msra.mxu0 %vm919_vm0, %v324_v5  ;;  %v339_v11 = vld [vmem:[%s7882_s28 + $0xf0] sm:$0xff]  ;;  %v338_v13 = vld [vmem:[%s7882_s28 + $0xe8] sm:$0xff]  ;;  %s7722_s25 = sshra.s32 %s6767_s24, 4  ;;  %s7728_s11 = scalar_lea.hbm %s15049_s8, 4  ;;  %s7723_s25 = int_to_ptr.hbm [resolvable:$true] %s7722_s25 }
  0x1e   : > { %7041 = vmatpush.xpose.msk.msra.mxu1 %vm919_vm0, %v340_v6  ;;  %v321_v17 = vld [vmem:[%s7882_s28 + $0x60] sm:$0xff]  ;;  %v320_v19 = vld [vmem:[%s7882_s28 + $0x58] sm:$0xff]  ;;  %v319_v24 = vld [vmem:[%s7882_s28 + $0x50] sm:$0xff]  ;;  %s7724_s26 = scalar_lea.hbm %s7723_s25, 2  ;;  %p7729_p0 = scmp.lt.s32.totalorder %s7723_s25, %s15049_s8 }
  0x1f   : > { %v337_v18 = vld [vmem:[%s7882_s28 + $0xe0] sm:$0xff]  ;;  %v336_v20 = vld [vmem:[%s7882_s28 + $0xd8] sm:$0xff]  ;;  %v335_v25 = vld [vmem:[%s7882_s28 + $0xd0] sm:$0xff]  ;;  %p7725_p11 = scmp.ne.s32.totalorder %s7723_s25, %s7724_s26  ;;  %p7730_p1 = scmp.lt.s32.totalorder %s7728_s11, %s7724_s26 }
  0x20   : > { %626 = vperm.xlu2 %7695, %v410_v7   ;;  %v318_v26 = vld [vmem:[%s7882_s28 + $0x48] sm:$0xff]  ;;  %v317_v31 = vld [vmem:[%s7882_s28 + $0x40] sm:$0xff]  ;;  %v316_v33 = vld [vmem:[%s7882_s28 + $0x38] sm:$0xff] }
  0x21   : > { %616 = vperm.xlu1 %7694, %v408_v8   ;;  %606 = vperm.xlu0 %7693, %v406_v9   ;;  %v334_v27 = vld [vmem:[%s7882_s28 + $0xc8] sm:$0xff]  ;;  %v333_v32 = vld [vmem:[%s7882_s28 + $0xc0] sm:$0xff]  ;;  %v332_v34 = vld [vmem:[%s7882_s28 + $0xb8] sm:$0xff]  ;;  %p7726_p12 = pnand %p7725_p11, %p7859_p5  ;;  %p7731_p2 = por %p7730_p1, %p7729_p0 }
  0x22   : > { %6962 = vmatpush.xpose.msk.msra.mxu0 %vm919_vm0, %v323_v10  ;;  %7042 = vmatpush.xpose.msk.msra.mxu1 %vm919_vm0, %v339_v11  ;;  %v315_v38 = vld [vmem:[%s7882_s28 + $0x30] sm:$0xff]  ;;  %v314_v40 = vld [vmem:[%s7882_s28 + $0x28] sm:$0xff]  ;;  %v425_v42 = vld [vmem:[%s15043_s2 + $0xa0] sm:$0xff] }
  0x23   : > { %v331_v39 = vld [vmem:[%s7882_s28 + $0xb0] sm:$0xff]  ;;  %v330_v41 = vld [vmem:[%s7882_s28 + $0xa8] sm:$0xff]  ;;  %v424_v43 = vld [vmem:[%s15043_s2 + $0x98] sm:$0xff]  ;;  %p7727_p13 = pneg %p7726_p12 }
  0x24   : > { %v423_v44 = vld [vmem:[%s15043_s2 + $0x90] sm:$0xff]  ;;  %v313_v45 = vld [vmem:[%s7882_s28 + $0x20] sm:$0xff]  ;;  %v312_v47 = vld [vmem:[%s7882_s28 + $0x18] sm:$0xff] }
  0x25   : > { %v329_v46 = vld [vmem:[%s7882_s28 + $0xa0] sm:$0xff]  ;;  %v328_v48 = vld [vmem:[%s7882_s28 + $0x98] sm:$0xff]  ;;  %v427_v50 = vld [vmem:[%s15043_s2 + $0xb0] sm:$0xff]  ;;  %p7732_p3 = pnand %p7731_p2, %p7727_p13 }
  0x26   : > { %6963 = vmatpush.xpose.msk.msra.mxu0 %vm919_vm0, %v322_v12  ;;  %7043 = vmatpush.xpose.msk.msra.mxu1 %vm919_vm0, %v338_v13  ;;  %v428_v49 = vld [vmem:[%s15043_s2 + $0xb8] sm:$0xff]  ;;  %v426_v51 = vld [vmem:[%s15043_s2 + $0xa8] sm:$0xff]  ;;  %v311_v52 = vld [vmem:[%s7882_s28 + $0x10] sm:$0xff] }
  0x27   : > { %v327_v53 = vld [vmem:[%s7882_s28 + $0x90] sm:$0xff]  ;;  %v310_v54 = vld [vmem:[%s7882_s28 + $0x8] sm:$0xff]  ;;  %v429_v58 = vld [vmem:[%s15043_s2 + $0xc0] sm:$0xff] }
  0x28   : > { %641 = vperm.xlu2 %7695, %v413_v14   ;;  %v326_v55 = vld [vmem:[%s7882_s28 + $0x88] sm:$0xff]  ;;  %v431_v56 = vld [vmem:[%s15043_s2 + $0xd0] sm:$0xff]  ;;  %v309_v59 = vld [vmem:[%s7882_s28] sm:$0xff] }
  0x29   : > { %636 = vperm.xlu1 %7694, %v412_v15   ;;  %631 = vperm.xlu0 %7693, %v411_v16   ;;  %v430_v57 = vld [vmem:[%s15043_s2 + $0xc8] sm:$0xff]  ;;  %v325_v60 = vld [vmem:[%s7882_s28 + $0x80] sm:$0xff]  ;;  %v432_v0 = vld [vmem:[%s15043_s2 + $0xd8] sm:$0xff] }
  0x2a   : > { %6964 = vmatpush.xpose.msk.msra.mxu0 %vm919_vm0, %v321_v17  ;;  %7044 = vmatpush.xpose.msk.msra.mxu1 %vm919_vm0, %v337_v18  ;;  %v341_v61 = vld [vmem:[%s15042_s1] sm:$0xff]  ;;  %v434_v62 = vld [vmem:[%s15043_s2 + $0xe8] sm:$0xff]  ;;  %v436_v3 = vld [vmem:[%s15043_s2 + $0xf8] sm:$0xff] }
  0x2b   : > { %v433_v63 = vld [vmem:[%s15043_s2 + $0xe0] sm:$0xff]  ;;  %v342_v1 = vld [vmem:[%s15042_s1 + $0x8] sm:$0xff]  ;;  %v435_v4 = vld [vmem:[%s15043_s2 + $0xf0] sm:$0xff] }
  0x2c   : > { %v437_v2 = vld [vmem:[%s15043_s2 + $0x100] sm:$0xff]  ;;  %v343_v5 = vld [vmem:[%s15042_s1 + $0x10] sm:$0xff]  ;;  %v440_v6 = vld [vmem:[%s15043_s2 + $0x118] sm:$0xff] }
  0x2d   : > { %v439_v7 = vld [vmem:[%s15043_s2 + $0x110] sm:$0xff]  ;;  %v438_v8 = vld [vmem:[%s15043_s2 + $0x108] sm:$0xff]  ;;  %v344_v9 = vld [vmem:[%s15042_s1 + $0x18] sm:$0xff] }
  0x2e   : > { %6965 = vmatpush.xpose.msk.msra.mxu0 %vm919_vm0, %v320_v19  ;;  %7045 = vmatpush.xpose.msk.msra.mxu1 %vm919_vm0, %v336_v20  ;;  %v443_v10 = vld [vmem:[%s15043_s2 + $0x130] sm:$0xff]  ;;  %v442_v11 = vld [vmem:[%s15043_s2 + $0x128] sm:$0xff]  ;;  %v441_v12 = vld [vmem:[%s15043_s2 + $0x120] sm:$0xff] }
  0x2f   : > { %v345_v13 = vld [vmem:[%s15042_s1 + $0x20] sm:$0xff]  ;;  %v446_v14 = vld [vmem:[%s15043_s2 + $0x148] sm:$0xff]  ;;  %v444_v16 = vld [vmem:[%s15043_s2 + $0x138] sm:$0xff] }
  0x30   : > { %656 = vperm.xlu2 %7695, %v416_v21   ;;  %v445_v15 = vld [vmem:[%s15043_s2 + $0x140] sm:$0xff]  ;;  %v346_v17 = vld [vmem:[%s15042_s1 + $0x28] sm:$0xff]  ;;  %v448_v19 = vld [vmem:[%s15043_s2 + $0x158] sm:$0xff] }
  0x31   : > { %651 = vperm.xlu1 %7694, %v415_v22   ;;  %646 = vperm.xlu0 %7693, %v414_v23   ;;  %v449_v18 = vld [vmem:[%s15043_s2 + $0x160] sm:$0xff]  ;;  %v447_v20 = vld [vmem:[%s15043_s2 + $0x150] sm:$0xff]  ;;  %v452_v22 = vld [vmem:[%s15043_s2 + $0x178] sm:$0xff] }
  0x32   : > { %6966 = vmatpush.xpose.msk.msra.mxu0 %vm919_vm0, %v319_v24  ;;  %7046 = vmatpush.xpose.msk.msra.mxu1 %vm919_vm0, %v335_v25  ;;  %v347_v21 = vld [vmem:[%s15042_s1 + $0x30] sm:$0xff]  ;;  %v450_v24 = vld [vmem:[%s15043_s2 + $0x168] sm:$0xff]  ;;  %v348_v25 = vld [vmem:[%s15042_s1 + $0x38] sm:$0xff] }
  0x33   : > { %v451_v23 = vld [vmem:[%s15043_s2 + $0x170] sm:$0xff] }
  0x36   : > { %6967 = vmatpush.xpose.msk.msra.mxu0 %vm919_vm0, %v318_v26  ;;  %7047 = vmatpush.xpose.msk.msra.mxu1 %vm919_vm0, %v334_v27  ;;  %v455_v26 = vld [vmem:[%s15043_s2 + $0x190] sm:$0xff]  ;;  %v454_v27 = vld [vmem:[%s15043_s2 + $0x188] sm:$0xff] }
  0x38   : > { %671 = vperm.xlu2 %7695, %v419_v28   ;;  %v453_v28 = vld [vmem:[%s15043_s2 + $0x180] sm:$0xff] }
  0x39   : > { %666 = vperm.xlu1 %7694, %v418_v29   ;;  %661 = vperm.xlu0 %7693, %v417_v30   ;;  %v349_v29 = vld [vmem:[%s15042_s1 + $0x40] sm:$0xff]  ;;  %v458_v30 = vld [vmem:[%s15043_s2 + $0x1a8] sm:$0xff] }
  0x3a   : > { %6968 = vmatpush.xpose.msk.msra.mxu0 %vm919_vm0, %v317_v31  ;;  %7048 = vmatpush.xpose.msk.msra.mxu1 %vm919_vm0, %v333_v32  ;;  %v457_v31 = vld [vmem:[%s15043_s2 + $0x1a0] sm:$0xff]  ;;  %v456_v32 = vld [vmem:[%s15043_s2 + $0x198] sm:$0xff] }
  0x3e   : > { %6969 = vmatpush.xpose.msk.msra.mxu0 %vm919_vm0, %v316_v33  ;;  %7049 = vmatpush.xpose.msk.msra.mxu1 %vm919_vm0, %v332_v34  ;;  %v350_v33 = vld [vmem:[%s15042_s1 + $0x48] sm:$0xff]  ;;  %v461_v34 = vld [vmem:[%s15043_s2 + $0x1c0] sm:$0xff] }
  0x40   : > { %686 = vperm.xlu2 %7695, %v422_v35   ;;  %v460_v35 = vld [vmem:[%s15043_s2 + $0x1b8] sm:$0xff] }
  0x41   : > { %681 = vperm.xlu1 %7694, %v421_v36   ;;  %676 = vperm.xlu0 %7693, %v420_v37   ;;  %v459_v36 = vld [vmem:[%s15043_s2 + $0x1b0] sm:$0xff] }
  0x42   : > { %6970 = vmatpush.xpose.msk.msra.mxu0 %vm919_vm0, %v315_v38  ;;  %7050 = vmatpush.xpose.msk.msra.mxu1 %vm919_vm0, %v331_v39  ;;  %v351_v37 = vld [vmem:[%s15042_s1 + $0x50] sm:$0xff]  ;;  %v464_v38 = vld [vmem:[%s15043_s2 + $0x1d8] sm:$0xff] }
  0x43   : > { %v463_v39 = vld [vmem:[%s15043_s2 + $0x1d0] sm:$0xff] }
  0x46   : > { %6971 = vmatpush.xpose.msk.msra.mxu0 %vm919_vm0, %v314_v40  ;;  %7051 = vmatpush.xpose.msk.msra.mxu1 %vm919_vm0, %v330_v41  ;;  %v462_v40 = vld [vmem:[%s15043_s2 + $0x1c8] sm:$0xff]  ;;  %v352_v41 = vld [vmem:[%s15042_s1 + $0x58] sm:$0xff] }
  0x48   : > { %701 = vperm.xlu2 %7695, %v425_v42   ;;  %v467_v42 = vld [vmem:[%s15043_s2 + $0x1f0] sm:$0xff] }
  0x49   : > { %696 = vperm.xlu1 %7694, %v424_v43   ;;  %691 = vperm.xlu0 %7693, %v423_v44   ;;  %v466_v43 = vld [vmem:[%s15043_s2 + $0x1e8] sm:$0xff]  ;;  %v465_v44 = vld [vmem:[%s15043_s2 + $0x1e0] sm:$0xff] }
  0x4a   : > { %6972 = vmatpush.xpose.msk.msra.mxu0 %vm919_vm0, %v313_v45  ;;  %7052 = vmatpush.xpose.msk.msra.mxu1 %vm919_vm0, %v329_v46  ;;  %v353_v45 = vld [vmem:[%s15042_s1 + $0x60] sm:$0xff]  ;;  %v6834_v46 = vld [vmem:[%s15043_s2 + $0x208] sm:$0xff] }
  0x4e   : > { %6973 = vmatpush.xpose.msk.msra.mxu0 %vm919_vm0, %v312_v47  ;;  %7053 = vmatpush.xpose.msk.msra.mxu1 %vm919_vm0, %v328_v48  ;;  %v6833_v47 = vld [vmem:[%s15043_s2 + $0x200] sm:$0xff]  ;;  %v468_v48 = vld [vmem:[%s15043_s2 + $0x1f8] sm:$0xff] }
  0x50   : > { %716 = vperm.xlu2 %7695, %v428_v49   ;;  %v354_v49 = vld [vmem:[%s15042_s1 + $0x68] sm:$0xff] }
  0x51   : > { %711 = vperm.xlu1 %7694, %v427_v50   ;;  %706 = vperm.xlu0 %7693, %v426_v51   ;;  %v6837_v50 = vld [vmem:[%s15043_s2 + $0x220] sm:$0xff]  ;;  %v6836_v51 = vld [vmem:[%s15043_s2 + $0x218] sm:$0xff] }
  0x52   : > { %6974 = vmatpush.xpose.msk.msra.mxu0 %vm919_vm0, %v311_v52  ;;  %7054 = vmatpush.xpose.msk.msra.mxu1 %vm919_vm0, %v327_v53  ;;  %v6835_v52 = vld [vmem:[%s15043_s2 + $0x210] sm:$0xff] }
  0x53   : > { %v355_v53 = vld [vmem:[%s15042_s1 + $0x70] sm:$0xff] }
  0x56   : > { %6975 = vmatpush.xpose.msk.msra.mxu0 %vm919_vm0, %v310_v54  ;;  %7055 = vmatpush.xpose.msk.msra.mxu1 %vm919_vm0, %v326_v55  ;;  %v6840_v54 = vld [vmem:[%s15043_s2 + $0x238] sm:$0xff]  ;;  %v6839_v55 = vld [vmem:[%s15043_s2 + $0x230] sm:$0xff] }
  0x58   : > { %731 = vperm.xlu2 %7695, %v431_v56   ;;  %v6838_v56 = vld [vmem:[%s15043_s2 + $0x228] sm:$0xff] }
  0x59   : > { %726 = vperm.xlu1 %7694, %v430_v57   ;;  %721 = vperm.xlu0 %7693, %v429_v58   ;;  %v356_v57 = vld [vmem:[%s15042_s1 + $0x78] sm:$0xff]  ;;  %v6843_v58 = vld [vmem:[%s15043_s2 + $0x250] sm:$0xff] }
  0x5a   : > { %6976 = vmatpush.xpose.msk.msra.mxu0 %vm919_vm0, %v309_v59  ;;  %7056 = vmatpush.xpose.msk.msra.mxu1 %vm919_vm0, %v325_v60  ;;  %v6842_v59 = vld [vmem:[%s15043_s2 + $0x248] sm:$0xff]  ;;  %v6841_v60 = vld [vmem:[%s15043_s2 + $0x240] sm:$0xff] }
  0x5d   : > { %6977 = vmatmul.msk.f32.vlgmr.msra.gmra.mxu0 %vm919_vm0, %v341_v61  ;;  %7057 = vmatmul.msk.f32.vlgmr.msra.gmra.mxu1 %vm919_vm0, %v341_v61 }
  0x60   : > { %746 = vperm.xlu2 %7695, %v434_v62   ;;  %v357_v62 = vld [vmem:[%s15042_s1 + $0x80] sm:$0xff] }
  0x61   : > { %741 = vperm.xlu1 %7694, %v433_v63   ;;  %736 = vperm.xlu0 %7693, %v432_v0   ;;  %v6846_v0 = vld [vmem:[%s15043_s2 + $0x268] sm:$0xff] }
  0x65   : > { %6978 = vmatmul.msk.f32.gmra.mxu0 %vm919_vm0, %v342_v1  ;;  %7058 = vmatmul.msk.f32.gmra.mxu1 %vm919_vm0, %v342_v1  ;;  %v6845_v1 = vld [vmem:[%s15043_s2 + $0x260] sm:$0xff] }
  0x68   : > { %761 = vperm.xlu2 %7695, %v437_v2   ;;  %v6844_v2 = vld [vmem:[%s15043_s2 + $0x258] sm:$0xff] }
  0x69   : > { %756 = vperm.xlu1 %7694, %v436_v3   ;;  %751 = vperm.xlu0 %7693, %v435_v4   ;;  %v358_v4 = vld [vmem:[%s15042_s1 + $0x88] sm:$0xff] }
  0x6d   : > { %6979 = vmatmul.msk.f32.gmra.mxu0 %vm919_vm0, %v343_v5  ;;  %7059 = vmatmul.msk.f32.gmra.mxu1 %vm919_vm0, %v343_v5 }
  0x70   : > { %776 = vperm.xlu2 %7695, %v440_v6   ;;  %v6849_v6 = vld [vmem:[%s15043_s2 + $0x280] sm:$0xff] }
  0x71   : > { %771 = vperm.xlu1 %7694, %v439_v7   ;;  %766 = vperm.xlu0 %7693, %v438_v8   ;;  %v6848_v7 = vld [vmem:[%s15043_s2 + $0x278] sm:$0xff]  ;;  %v6847_v8 = vld [vmem:[%s15043_s2 + $0x270] sm:$0xff] }
  0x75   : > { %6980 = vmatmul.msk.f32.gmra.mxu0 %vm919_vm0, %v344_v9  ;;  %7060 = vmatmul.msk.f32.gmra.mxu1 %vm919_vm0, %v344_v9 }
  0x78   : > { %791 = vperm.xlu2 %7695, %v443_v10  }
  0x79   : > { %786 = vperm.xlu1 %7694, %v442_v11   ;;  %781 = vperm.xlu0 %7693, %v441_v12   ;;  %v359_v11 = vld [vmem:[%s15042_s1 + $0x90] sm:$0xff] }
  0x7d   : > { %6981 = vmatmul.msk.f32.gmra.mxu0 %vm919_vm0, %v345_v13  ;;  %7061 = vmatmul.msk.f32.gmra.mxu1 %vm919_vm0, %v345_v13  ;;  %v6852_v13 = vld [vmem:[%s15043_s2 + $0x298] sm:$0xff] }
  0x80   : > { %806 = vperm.xlu2 %7695, %v446_v14   ;;  %v6851_v14 = vld [vmem:[%s15043_s2 + $0x290] sm:$0xff] }
  0x81   : > { %801 = vperm.xlu1 %7694, %v445_v15   ;;  %796 = vperm.xlu0 %7693, %v444_v16   ;;  %v6850_v15 = vld [vmem:[%s15043_s2 + $0x288] sm:$0xff] }
  0x85   : > { %6982 = vmatmul.msk.f32.gmra.mxu0 %vm919_vm0, %v346_v17  ;;  %7062 = vmatmul.msk.f32.gmra.mxu1 %vm919_vm0, %v346_v17 }
  0x88   : > { %821 = vperm.xlu2 %7695, %v449_v18  }
  0x89   : > { %816 = vperm.xlu1 %7694, %v448_v19   ;;  %811 = vperm.xlu0 %7693, %v447_v20   ;;  %v360_v19 = vld [vmem:[%s15042_s1 + $0x98] sm:$0xff] }
  0x8b   : > { %v8280_v9 = vpop.permute.xlu1 %611  ;;  %v8302_v17 = vpop.permute.xlu0 %601 }
  0x8d   : > { %6983 = vmatmul.msk.f32.gmra.mxu0 %vm919_vm0, %v347_v21  ;;  %7063 = vmatmul.msk.f32.gmra.mxu1 %vm919_vm0, %v347_v21  ;;  %v6855_v21 = vld [vmem:[%s15043_s2 + $0x2b0] sm:$0xff] }
  0x90   : > { %836 = vperm.xlu2 %7695, %v452_v22   ;;  %v6854_v22 = vld [vmem:[%s15043_s2 + $0x2a8] sm:$0xff] }
  0x91   : > { %831 = vperm.xlu1 %7694, %v451_v23   ;;  %826 = vperm.xlu0 %7693, %v450_v24   ;;  %v6853_v23 = vld [vmem:[%s15043_s2 + $0x2a0] sm:$0xff]  ;;  %v8322_v24 = vpop.permute.xlu2 %621 }
  0x93   : > { %v8300_v16 = vpop.permute.xlu1 %616 }
  0x95   : > { %6984 = vmatmul.msk.f32.gmra.mxu0 %vm919_vm0, %v348_v25  ;;  %7064 = vmatmul.msk.f32.gmra.mxu1 %vm919_vm0, %v348_v25 }
  0x98   : > { %851 = vperm.xlu2 %7695, %v455_v26   ;;  %v361_v26 = vld [vmem:[%s15042_s1 + $0xa0] sm:$0xff] }
  0x99   : > { %846 = vperm.xlu1 %7694, %v454_v27   ;;  %841 = vperm.xlu0 %7693, %v453_v28   ;;  %v8331_v28 = vpop.permute.xlu0 %606 }
  0x9b   : > { %v8329_v27 = vpop.permute.xlu1 %636 }
  0x9d   : > { %6985 = vmatmul.msk.f32.gmra.mxu0 %vm919_vm0, %v349_v29  ;;  %7065 = vmatmul.msk.f32.gmra.mxu1 %vm919_vm0, %v349_v29 }
  0xa0   : > { %866 = vperm.xlu2 %7695, %v458_v30   ;;  %v6858_v30 = vld [vmem:[%s15043_s2 + $0x2c8] sm:$0xff] }
  0xa1   : > { %861 = vperm.xlu1 %7694, %v457_v31   ;;  %856 = vperm.xlu0 %7693, %v456_v32   ;;  %v6857_v31 = vld [vmem:[%s15043_s2 + $0x2c0] sm:$0xff]  ;;  %v6856_v32 = vld [vmem:[%s15043_s2 + $0x2b8] sm:$0xff] }
  0xa5   : > { %6986 = vmatmul.msk.f32.gmra.mxu0 %vm919_vm0, %v350_v33  ;;  %7066 = vmatmul.msk.f32.gmra.mxu1 %vm919_vm0, %v350_v33 }
  0xa8   : > { %881 = vperm.xlu2 %7695, %v461_v34   ;;  %v362_v34 = vld [vmem:[%s15042_s1 + $0xa8] sm:$0xff] }
  0xa9   : > { %876 = vperm.xlu1 %7694, %v460_v35   ;;  %871 = vperm.xlu0 %7693, %v459_v36   ;;  %v8351_v35 = vpop.permute.xlu2 %626 }
  0xad   : > { %6987 = vmatmul.msk.f32.gmra.mxu0 %vm919_vm0, %v351_v37  ;;  %7067 = vmatmul.msk.f32.gmra.mxu1 %vm919_vm0, %v351_v37  ;;  %v8355_v37 = vpop.permute.xlu1 %651 }
  0xb0   : > { %896 = vperm.xlu2 %7695, %v464_v38   ;;  %v6861_v38 = vld [vmem:[%s15043_s2 + $0x2e0] sm:$0xff] }
  0xb1   : > { %891 = vperm.xlu1 %7694, %v463_v39   ;;  %886 = vperm.xlu0 %7693, %v462_v40   ;;  %v8362_v39 = vpop.permute.xlu0 %631  ;;  %v6860_v40 = vld [vmem:[%s15043_s2 + $0x2d8] sm:$0xff] }
  0xb5   : > { %6988 = vmatmul.msk.f32.gmra.mxu0 %vm919_vm0, %v352_v41  ;;  %7068 = vmatmul.msk.f32.gmra.mxu1 %vm919_vm0, %v352_v41  ;;  %v6859_v41 = vld [vmem:[%s15043_s2 + $0x2d0] sm:$0xff] }
  0xb8   : > { %911 = vperm.xlu2 %7695, %v467_v42  }
  0xb9   : > { %906 = vperm.xlu1 %7694, %v466_v43   ;;  %901 = vperm.xlu0 %7693, %v465_v44   ;;  %v363_v43 = vld [vmem:[%s15042_s1 + $0xb0] sm:$0xff] }
  0xbd   : > { %6989 = vmatmul.msk.f32.gmra.mxu0 %vm919_vm0, %v353_v45  ;;  %7069 = vmatmul.msk.f32.gmra.mxu1 %vm919_vm0, %v353_v45  ;;  %v8377_v45 = vpop.permute.xlu2 %641 }
  0xc0   : > { %2323 = vperm.xlu2 %7695, %v6834_v46   ;;  %v6864_v46 = vld [vmem:[%s15043_s2 + $0x2f8] sm:$0xff] }
  0xc1   : > { %2318 = vperm.xlu1 %7694, %v6833_v47   ;;  %916 = vperm.xlu0 %7693, %v468_v48   ;;  %v6863_v47 = vld [vmem:[%s15043_s2 + $0x2f0] sm:$0xff]  ;;  %v6862_v48 = vld [vmem:[%s15043_s2 + $0x2e8] sm:$0xff] }
  0xc5   : > { %6990 = vmatmul.msk.f32.gmra.mxu0 %vm919_vm0, %v354_v49  ;;  %7070 = vmatmul.msk.f32.gmra.mxu1 %vm919_vm0, %v354_v49  ;;  %v8390_v49 = vpop.permute.xlu1 %666 }
  0xc8   : > { %2338 = vperm.xlu2 %7695, %v6837_v50   ;;  %v8392_v50 = vpop.permute.xlu0 %646 }
  0xc9   : > { %2333 = vperm.xlu1 %7694, %v6836_v51   ;;  %2328 = vperm.xlu0 %7693, %v6835_v52   ;;  %v364_v52 = vld [vmem:[%s15042_s1 + $0xb8] sm:$0xff] }
  0xcd   : > { %6991 = vmatmul.msk.f32.gmra.mxu0 %vm919_vm0, %v355_v53  ;;  %7071 = vmatmul.msk.f32.gmra.mxu1 %vm919_vm0, %v355_v53 }
  0xd0   : > { %2353 = vperm.xlu2 %7695, %v6840_v54   ;;  %v6867_v54 = vld [vmem:[%s15043_s2 + $0x310] sm:$0xff] }
  0xd1   : > { %2348 = vperm.xlu1 %7694, %v6839_v55   ;;  %2343 = vperm.xlu0 %7693, %v6838_v56   ;;  %v6866_v55 = vld [vmem:[%s15043_s2 + $0x308] sm:$0xff]  ;;  %v6865_v56 = vld [vmem:[%s15043_s2 + $0x300] sm:$0xff] }
  0xd5   : > { %6992 = vmatmul.msk.f32.gmra.mxu0 %vm919_vm0, %v356_v57  ;;  %7072 = vmatmul.msk.f32.gmra.mxu1 %vm919_vm0, %v356_v57  ;;  %v8412_v57 = vpop.permute.xlu2 %656 }
  0xd8   : > { %2368 = vperm.xlu2 %7695, %v6843_v58   ;;  %v8414_v58 = vpop.permute.xlu1 %681 }
  0xd9   : > { %2363 = vperm.xlu1 %7694, %v6842_v59   ;;  %2358 = vperm.xlu0 %7693, %v6841_v60   ;;  %v8416_v59 = vpop.permute.xlu0 %661 }
  0xda   : > { %v8244_v61 = vpop.f32.mrf.mxu0  ;;  %v8249_v63 = vpop.f32.mrf.mxu1 }
  0xdd   : > { %6993 = vmatmul.msk.f32.gmra.mxu0 %vm919_vm0, %v357_v62  ;;  %7073 = vmatmul.msk.f32.gmra.mxu1 %vm919_vm0, %v357_v62  ;;  %v365_v62 = vld [vmem:[%s15042_s1 + $0xc0] sm:$0xff] }
  0xe0   : > { %2383 = vperm.xlu2 %7695, %v6846_v0  }
  0xe1   : > { %2378 = vperm.xlu1 %7694, %v6845_v1   ;;  %2373 = vperm.xlu0 %7693, %v6844_v2   ;;  %v6870_v1 = vld [vmem:[%s15043_s2 + $0x328] sm:$0xff]  ;;  %v6869_v2 = vld [vmem:[%s15043_s2 + $0x320] sm:$0xff] }
  0xe2   : > { %v8262_v3 = vpop.f32.mrf.mxu0  ;;  %v8267_v5 = vpop.f32.mrf.mxu1 }
  0xe5   : > { %6994 = vmatmul.msk.f32.gmra.mxu0 %vm919_vm0, %v358_v4  ;;  %7074 = vmatmul.msk.f32.gmra.mxu1 %vm919_vm0, %v358_v4  ;;  %v6868_v4 = vld [vmem:[%s15043_s2 + $0x318] sm:$0xff] }
  0xe8   : > { %2398 = vperm.xlu2 %7695, %v6849_v6   ;;  %v8436_v6 = vpop.permute.xlu2 %671 }
  0xe9   : > { %2393 = vperm.xlu1 %7694, %v6848_v7   ;;  %2388 = vperm.xlu0 %7693, %v6847_v8   ;;  %v366_v8 = vld [vmem:[%s15042_s1 + $0xc8] sm:$0xff] }
  0xea   : > { %v8282_v10 = vpop.f32.mrf.mxu0  ;;  %v8287_v12 = vpop.f32.mrf.mxu1 }
  0xed   : > { %6995 = vmatmul.msk.f32.gmra.mxu0 %vm919_vm0, %v359_v11  ;;  %7075 = vmatmul.msk.f32.gmra.mxu1 %vm919_vm0, %v359_v11  ;;  %v8443_v11 = vpop.permute.xlu1 %696 }
  0xee   : > { %15600 = vst [vmem:[#allocation6_spill] sm:$0xff] %v8443_v11 }
  0xf0   : > { %2413 = vperm.xlu2 %7695, %v6852_v13   ;;  %v8445_v13 = vpop.permute.xlu0 %676 }
  0xf1   : > { %2408 = vperm.xlu1 %7694, %v6851_v14   ;;  %2403 = vperm.xlu0 %7693, %v6850_v15   ;;  %v6873_v15 = vld [vmem:[%s15043_s2 + $0x340] sm:$0xff] }
  0xf2   : > { %v8304_v18 = vpop.f32.mrf.mxu0  ;;  %v8309_v20 = vpop.f32.mrf.mxu1 }
  0xf5   : > { %6996 = vmatmul.msk.f32.gmra.mxu0 %vm919_vm0, %v360_v19  ;;  %7076 = vmatmul.msk.f32.gmra.mxu1 %vm919_vm0, %v360_v19  ;;  %v6872_v19 = vld [vmem:[%s15043_s2 + $0x338] sm:$0xff] }
  0xf8   : > { %2428 = vperm.xlu2 %7695, %v6855_v21   ;;  %v6871_v21 = vld [vmem:[%s15043_s2 + $0x330] sm:$0xff] }
  0xf9   : > { %2423 = vperm.xlu1 %7694, %v6854_v22   ;;  %2418 = vperm.xlu0 %7693, %v6853_v23   ;;  %v367_v23 = vld [vmem:[%s15042_s1 + $0xd0] sm:$0xff] }
  0xfa   : > { %v8324_v25 = vpop.f32.mrf.mxu0  ;;  %v8333_v29 = vpop.f32.mrf.mxu1 }
  0xfd   : > { %6997 = vmatmul.msk.f32.gmra.mxu0 %vm919_vm0, %v361_v26  ;;  %7077 = vmatmul.msk.f32.gmra.mxu1 %vm919_vm0, %v361_v26  ;;  %v8465_v26 = vpop.permute.xlu2 %686 }
 0x100   : > { %2443 = vperm.xlu2 %7695, %v6858_v30  }
 0x101   : > { %2438 = vperm.xlu1 %7694, %v6857_v31   ;;  %2433 = vperm.xlu0 %7693, %v6856_v32   ;;  %v8469_v31 = vpop.permute.xlu1 %711  ;;  %v6876_v32 = vld [vmem:[%s15043_s2 + $0x358] sm:$0xff] }
 0x102   : > { %v8346_v33 = vpop.f32.mrf.mxu0  ;;  %v8353_v36 = vpop.f32.mrf.mxu1  ;;  %15601 = vst [vmem:[#allocation7_spill] sm:$0xff] %v8469_v31 }
 0x105   : > { %6998 = vmatmul.msk.f32.gmra.mxu0 %vm919_vm0, %v362_v34  ;;  %7078 = vmatmul.msk.f32.gmra.mxu1 %vm919_vm0, %v362_v34  ;;  %v8476_v34 = vpop.permute.xlu0 %691 }
 0x106   : > { %15602 = vst [vmem:[#allocation8_spill] sm:$0xff] %v8476_v34 }
 0x108   : > { %2458 = vperm.xlu2 %7695, %v6861_v38   ;;  %v6875_v38 = vld [vmem:[%s15043_s2 + $0x350] sm:$0xff] }
 0x109   : > { %2453 = vperm.xlu1 %7694, %v6860_v40   ;;  %2448 = vperm.xlu0 %7693, %v6859_v41   ;;  %v6874_v40 = vld [vmem:[%s15043_s2 + $0x348] sm:$0xff] }
 0x10a   : > { %v8370_v42 = vpop.f32.mrf.mxu0  ;;  %v8375_v44 = vpop.f32.mrf.mxu1 }
 0x10d   : > { %6999 = vmatmul.msk.f32.gmra.mxu0 %vm919_vm0, %v363_v43  ;;  %7079 = vmatmul.msk.f32.gmra.mxu1 %vm919_vm0, %v363_v43  ;;  %v368_v43 = vld [vmem:[%s15042_s1 + $0xd8] sm:$0xff] }
 0x110   : > { %2473 = vperm.xlu2 %7695, %v6864_v46  }
 0x111   : > { %2468 = vperm.xlu1 %7694, %v6863_v47   ;;  %2463 = vperm.xlu0 %7693, %v6862_v48   ;;  %v8491_v47 = vpop.permute.xlu2 %701  ;;  %v6879_v48 = vld [vmem:[%s15043_s2 + $0x370] sm:$0xff] }
 0x112   : > { %v8394_v51 = vpop.f32.mrf.mxu0  ;;  %v8399_v53 = vpop.f32.mrf.mxu1  ;;  %15603 = vst [vmem:[#allocation9_spill] sm:$0xff] %v8491_v47  ;;  %v375_v47 = vld [vmem:[%s15042_s1 + $0x110] sm:$0xff] }
 0x115   : > { %7000 = vmatmul.msk.f32.gmra.mxu0 %vm919_vm0, %v364_v52  ;;  %7080 = vmatmul.msk.f32.gmra.mxu1 %vm919_vm0, %v364_v52  ;;  %v6878_v52 = vld [vmem:[%s15043_s2 + $0x368] sm:$0xff] }
 0x118   : > { %2488 = vperm.xlu2 %7695, %v6867_v54   ;;  %v6877_v54 = vld [vmem:[%s15043_s2 + $0x360] sm:$0xff] }
 0x119   : > { %2483 = vperm.xlu1 %7694, %v6866_v55   ;;  %2478 = vperm.xlu0 %7693, %v6865_v56   ;;  %v8504_v55 = vpop.permute.xlu1 %726  ;;  %v8506_v56 = vpop.permute.xlu0 %706 }
 0x11a   : > { %v8418_v60 = vpop.f32.mrf.mxu0  ;;  %v8423_v0 = vpop.f32.mrf.mxu1  ;;  %15604 = vst [vmem:[#allocation10_spill] sm:$0xff] %v8504_v55 }
 0x11b   : > { %15605 = vst [vmem:[#allocation11_spill] sm:$0xff] %v8506_v56 }
 0x11d   : > { %7001 = vmatmul.msk.f32.gmra.mxu0 %vm919_vm0, %v365_v62  ;;  %7081 = vmatmul.msk.f32.gmra.mxu1 %vm919_vm0, %v365_v62 }
 0x120   : > { %2503 = vperm.xlu2 %7695, %v6870_v1   ;;  %v369_v1 = vld [vmem:[%s15042_s1 + $0xe0] sm:$0xff] }
 0x121   : > { %2498 = vperm.xlu1 %7694, %v6869_v2   ;;  %2493 = vperm.xlu0 %7693, %v6868_v4   ;;  %v6882_v4 = vld [vmem:[%s15043_s2 + $0x388] sm:$0xff] }
 0x122   : > { %v8438_v7 = vpop.f32.mrf.mxu0  ;;  %v8447_v14 = vpop.f32.mrf.mxu1 }
 0x125   : > { %7002 = vmatmul.msk.f32.gmra.mxu0 %vm919_vm0, %v366_v8  ;;  %7082 = vmatmul.msk.f32.gmra.mxu1 %vm919_vm0, %v366_v8  ;;  %v6881_v8 = vld [vmem:[%s15043_s2 + $0x380] sm:$0xff] }
 0x128   : > { %2518 = vperm.xlu2 %7695, %v6873_v15   ;;  %v6880_v15 = vld [vmem:[%s15043_s2 + $0x378] sm:$0xff] }
 0x129   : > { %2513 = vperm.xlu1 %7694, %v6872_v19   ;;  %2508 = vperm.xlu0 %7693, %v6871_v21   ;;  %v8526_v19 = vpop.permute.xlu2 %716  ;;  %v8528_v21 = vpop.permute.xlu1 %741 }
 0x12a   : > { %v8460_v22 = vpop.f32.mrf.mxu0  ;;  %v8467_v30 = vpop.f32.mrf.mxu1  ;;  %15606 = vst [vmem:[#allocation12_spill] sm:$0xff] %v8526_v19 }
 0x12b   : > { %15607 = vst [vmem:[#allocation13_spill] sm:$0xff] %v8528_v21 }
 0x12d   : > { %7003 = vmatmul.msk.f32.gmra.mxu0 %vm919_vm0, %v367_v23  ;;  %7083 = vmatmul.msk.f32.gmra.mxu1 %vm919_vm0, %v367_v23  ;;  %v8530_v23 = vpop.permute.xlu0 %721 }
 0x12e   : > { %15608 = vst [vmem:[#allocation14_spill] sm:$0xff] %v8530_v23 }
 0x130   : > { %2533 = vperm.xlu2 %7695, %v6876_v32  }
 0x131   : > { %2528 = vperm.xlu1 %7694, %v6875_v38   ;;  %2523 = vperm.xlu0 %7693, %v6874_v40   ;;  %v370_v38 = vld [vmem:[%s15042_s1 + $0xe8] sm:$0xff] }
 0x132   : > { %v8484_v41 = vpop.f32.mrf.mxu0  ;;  %v8489_v46 = vpop.f32.mrf.mxu1 }
 0x135   : > { %7004 = vmatmul.msk.f32.gmra.mxu0 %vm919_vm0, %v368_v43  ;;  %7084 = vmatmul.msk.f32.gmra.mxu1 %vm919_vm0, %v368_v43  ;;  %v6885_v43 = vld [vmem:[%s15043_s2 + $0x3a0] sm:$0xff] }
 0x138   : > { %2548 = vperm.xlu2 %7695, %v6879_v48   ;;  %v6884_v48 = vld [vmem:[%s15043_s2 + $0x398] sm:$0xff] }
 0x139   : > { %2543 = vperm.xlu1 %7694, %v6878_v52   ;;  %2538 = vperm.xlu0 %7693, %v6877_v54   ;;  %v6883_v52 = vld [vmem:[%s15043_s2 + $0x390] sm:$0xff]  ;;  %v8550_v54 = vpop.permute.xlu2 %731 }
 0x13a   : > { %v8508_v62 = vpop.f32.mrf.mxu0  ;;  %v8513_v2 = vpop.f32.mrf.mxu1  ;;  %15609 = vst [vmem:[#allocation15_spill] sm:$0xff] %v8550_v54 }
 0x13d   : > { %7005 = vmatmul.msk.f32.gmra.mxu0 %vm919_vm0, %v369_v1  ;;  %7085 = vmatmul.msk.f32.gmra.mxu1 %vm919_vm0, %v369_v1 }
 0x140   : > { %2563 = vperm.xlu2 %7695, %v6882_v4   ;;  %v371_v4 = vld [vmem:[%s15042_s1 + $0xf0] sm:$0xff] }
 0x141   : > { %2558 = vperm.xlu1 %7694, %v6881_v8   ;;  %2553 = vperm.xlu0 %7693, %v6880_v15   ;;  %v8557_v8 = vpop.permute.xlu1 %756  ;;  %v8559_v15 = vpop.permute.xlu0 %736 }
 0x142   : > { %v8532_v32 = vpop.f32.mrf.mxu0  ;;  %v8537_v40 = vpop.f32.mrf.mxu1  ;;  %15610 = vst [vmem:[#allocation16_spill] sm:$0xff] %v8557_v8 }
 0x143   : > { %15611 = vst [vmem:[#allocation17_spill] sm:$0xff] %v8559_v15  ;;  %v8579_v21 = vpop.permute.xlu2 %746 }
 0x144   : > { %15612 = vst [vmem:[#allocation18_spill] sm:$0xff] %v8579_v21  ;;  %v6889_v21 = vld [vmem:[%s15043_s2 + $0x3c0] sm:$0xff] }
 0x145   : > { %7006 = vmatmul.msk.f32.gmra.mxu0 %vm919_vm0, %v370_v38  ;;  %7086 = vmatmul.msk.f32.gmra.mxu1 %vm919_vm0, %v370_v38 }
 0x148   : > { %2578 = vperm.xlu2 %7695, %v6885_v43   ;;  %v6888_v43 = vld [vmem:[%s15043_s2 + $0x3b8] sm:$0xff] }
 0x149   : > { %2573 = vperm.xlu1 %7694, %v6884_v48   ;;  %2568 = vperm.xlu0 %7693, %v6883_v52   ;;  %v6887_v48 = vld [vmem:[%s15043_s2 + $0x3b0] sm:$0xff]  ;;  %v6886_v52 = vld [vmem:[%s15043_s2 + $0x3a8] sm:$0xff]  ;;  %v8583_v54 = vpop.permute.xlu1 %771 }
 0x14a   : > { %v8552_v1 = vpop.f32.mrf.mxu0  ;;  %v8561_v38 = vpop.f32.mrf.mxu1  ;;  %15613 = vst [vmem:[#allocation19_spill] sm:$0xff] %v8583_v54 }
 0x14d   : > { %7007 = vmatmul.msk.f32.gmra.mxu0 %vm919_vm0, %v371_v4  ;;  %7087 = vmatmul.msk.f32.gmra.mxu1 %vm919_vm0, %v371_v4  ;;  %v372_v4 = vld [vmem:[%s15042_s1 + $0xf8] sm:$0xff] }
 0x150   : > { %2593 = vperm.xlu2 %7695, %v6888_v43   ;;  %v6912_v43 = vld [vmem:[%s15043_s2 + $0x478] sm:$0xff] }
 0x151   : > { %2588 = vperm.xlu1 %7694, %v6887_v48   ;;  %2583 = vperm.xlu0 %7693, %v6886_v52   ;;  %v8590_v48 = vpop.permute.xlu0 %751  ;;  %v6911_v52 = vld [vmem:[%s15043_s2 + $0x470] sm:$0xff]  ;;  %v8618_v23 = vpop.permute.xlu1 %786 }
 0x152   : > { %v8574_v8 = vpop.f32.mrf.mxu0  ;;  %v8581_v15 = vpop.f32.mrf.mxu1  ;;  %15614 = vst [vmem:[#allocation20_spill] sm:$0xff] %v8590_v48 }
 0x153   : > { %v8605_v48 = vpop.permute.xlu2 %761  ;;  %15617 = vst [vmem:[#allocation23_spill] sm:$0xff] %v8618_v23  ;;  %v6926_v23 = vld [vmem:[%s15043_s2 + $0x4e8] sm:$0xff] }
 0x154   : > { %15616 = vst [vmem:[#allocation22_spill] sm:$0xff] %v8605_v48  ;;  %v374_v48 = vld [vmem:[%s15042_s1 + $0x108] sm:$0xff] }
 0x155   : > { %7008 = vmatmul.msk.f32.gmra.mxu0 %vm919_vm0, %v372_v4  ;;  %7088 = vmatmul.msk.f32.gmra.mxu1 %vm919_vm0, %v372_v4  ;;  %v373_v4 = vld [vmem:[%s15042_s1 + $0x100] sm:$0xff] }
 0x158   : > { %2841 = vperm.xlu2 %7695, %v6912_v43   ;;  %v6909_v43 = vld [vmem:[%s15043_s2 + $0x460] sm:$0xff] }
 0x159   : > { %2836 = vperm.xlu1 %7694, %v6911_v52   ;;  %2598 = vperm.xlu0 %7693, %v6889_v21   ;;  %v6928_v21 = vld [vmem:[%s15043_s2 + $0x4f8] sm:$0xff]  ;;  %v6927_v52 = vld [vmem:[%s15043_s2 + $0x4f0] sm:$0xff]  ;;  %v8620_v19 = vpop.permute.xlu0 %766 }
 0x15a   : > { %v8598_v54 = vpop.f32.mrf.mxu0  ;;  %v8603_v55 = vpop.f32.mrf.mxu1  ;;  %15618 = vst [vmem:[#allocation24_spill] sm:$0xff] %v8620_v19 }
 0x15b   : > { %15615 = vst [vmem:[#allocation21_spill] sm:$0xff] %v8598_v54  ;;  %v8642_v19 = vpop.permute.xlu1 %801  ;;  %v401_v54 = vld [vmem:[%s15042_s1 + $0x1e0] sm:$0xff] }
 0x15c   : > { %15621 = vst [vmem:[#allocation27_spill] sm:$0xff] %v8642_v19 }
 0x15d   : > { %7009 = vmatmul.msk.f32.gmra.mxu0 %vm919_vm0, %v373_v4  ;;  %7089 = vmatmul.msk.f32.gmra.mxu1 %vm919_vm0, %v373_v4 }
 0x160   : > { %2826 = vperm.xlu2 %7695, %v6909_v43   ;;  %v6925_v43 = vld [vmem:[%s15043_s2 + $0x4e0] sm:$0xff] }
 0x161   : > { %2921 = vperm.xlu1 %7694, %v6928_v21   ;;  %2916 = vperm.xlu0 %7693, %v6927_v52   ;;  %v6910_v21 = vld [vmem:[%s15043_s2 + $0x468] sm:$0xff]  ;;  %v8640_v52 = vpop.permute.xlu2 %776 }
 0x162   : > { %v8622_v4 = vpop.f32.mrf.mxu0  ;;  %v8627_v31 = vpop.f32.mrf.mxu1  ;;  %15620 = vst [vmem:[#allocation26_spill] sm:$0xff] %v8640_v52 }
 0x163   : > { %15619 = vst [vmem:[#allocation25_spill] sm:$0xff] %v8622_v4  ;;  %v8671_v52 = vpop.permute.xlu1 %816 }
 0x164   : > { %15627 = vst [vmem:[#allocation33_spill] sm:$0xff] %v8671_v52 }
 0x165   : > { %7010 = vmatmul.msk.f32.gmra.mxu0 %vm919_vm0, %v374_v48  ;;  %7090 = vmatmul.msk.f32.gmra.mxu1 %vm919_vm0, %v374_v48  ;;  %v8644_v48 = vpop.permute.xlu0 %781 }
 0x166   : > { %15622 = vst [vmem:[#allocation28_spill] sm:$0xff] %v8644_v48 }
 0x168   : > { %2911 = vperm.xlu2 %7695, %v6926_v23   ;;  %v6923_v23 = vld [vmem:[%s15043_s2 + $0x4d0] sm:$0xff] }
 0x169   : > { %2906 = vperm.xlu1 %7694, %v6925_v43   ;;  %2831 = vperm.xlu0 %7693, %v6910_v21   ;;  %v6908_v43 = vld [vmem:[%s15043_s2 + $0x458] sm:$0xff]  ;;  %v6907_v21 = vld [vmem:[%s15043_s2 + $0x450] sm:$0xff]  ;;  %v8664_v19 = vpop.permute.xlu2 %791 }
 0x16a   : > { %v8646_v56 = vpop.f32.mrf.mxu0  ;;  %v8651_v11 = vpop.f32.mrf.mxu1  ;;  %15625 = vst [vmem:[#allocation31_spill] sm:$0xff] %v8664_v19 }
 0x16b   : > { %15623 = vst [vmem:[#allocation29_spill] sm:$0xff] %v8646_v56 }
 0x16c   : > { %15624 = vst [vmem:[#allocation30_spill] sm:$0xff] %v8651_v11 }
 0x16d   : > { %7011 = vmatmul.msk.f32.gmra.mxu0 %vm919_vm0, %v375_v47  ;;  %7091 = vmatmul.msk.f32.gmra.mxu1 %vm919_vm0, %v375_v47  ;;  %v376_v47 = vld [vmem:[%s15042_s1 + $0x118] sm:$0xff]  ;;  %v8673_v56 = vpop.permute.xlu0 %796 }
 0x16e   : > { %15628 = vst [vmem:[#allocation34_spill] sm:$0xff] %v8673_v56 }
 0x170   : > { %2896 = vperm.xlu2 %7695, %v6923_v23   ;;  %v6906_v23 = vld [vmem:[%s15043_s2 + $0x448] sm:$0xff] }
 0x171   : > { %2821 = vperm.xlu1 %7694, %v6908_v43   ;;  %2816 = vperm.xlu0 %7693, %v6907_v21   ;;  %v6905_v43 = vld [vmem:[%s15043_s2 + $0x440] sm:$0xff]  ;;  %v6924_v21 = vld [vmem:[%s15043_s2 + $0x4d8] sm:$0xff]  ;;  %v8693_v56 = vpop.permute.xlu2 %806 }
 0x172   : > { %v8666_v48 = vpop.f32.mrf.mxu0  ;;  %v8675_v11 = vpop.f32.mrf.mxu1  ;;  %15631 = vst [vmem:[#allocation37_spill] sm:$0xff] %v8693_v56  ;;  %v6921_v56 = vld [vmem:[%s15043_s2 + $0x4c0] sm:$0xff] }
 0x173   : > { %15626 = vst [vmem:[#allocation32_spill] sm:$0xff] %v8666_v48 }
 0x174   : > { %15629 = vst [vmem:[#allocation35_spill] sm:$0xff] %v8675_v11  ;;  %v8697_v11 = vpop.permute.xlu1 %831 }
 0x175   : > { %7012 = vmatmul.msk.f32.gmra.mxu0 %vm919_vm0, %v376_v47  ;;  %7092 = vmatmul.msk.f32.gmra.mxu1 %vm919_vm0, %v376_v47  ;;  %v377_v47 = vld [vmem:[%s15042_s1 + $0x120] sm:$0xff]  ;;  %15633 = vst [vmem:[#allocation39_spill] sm:$0xff] %v8697_v11 }
 0x178   : > { %2811 = vperm.xlu2 %7695, %v6906_v23   ;;  %v6903_v23 = vld [vmem:[%s15043_s2 + $0x430] sm:$0xff] }
 0x179   : > { %2806 = vperm.xlu1 %7694, %v6905_v43   ;;  %2901 = vperm.xlu0 %7693, %v6924_v21   ;;  %v8704_v43 = vpop.permute.xlu0 %811  ;;  %v6922_v21 = vld [vmem:[%s15043_s2 + $0x4c8] sm:$0xff] }
 0x17a   : > { %v8688_v52 = vpop.f32.mrf.mxu0  ;;  %v8695_v19 = vpop.f32.mrf.mxu1  ;;  %15634 = vst [vmem:[#allocation40_spill] sm:$0xff] %v8704_v43 }
 0x17b   : > { %15630 = vst [vmem:[#allocation36_spill] sm:$0xff] %v8688_v52  ;;  %v8719_v43 = vpop.permute.xlu2 %821 }
 0x17c   : > { %15632 = vst [vmem:[#allocation38_spill] sm:$0xff] %v8695_v19 }
 0x17d   : > { %7013 = vmatmul.msk.f32.gmra.mxu0 %vm919_vm0, %v377_v47  ;;  %7093 = vmatmul.msk.f32.gmra.mxu1 %vm919_vm0, %v377_v47  ;;  %v378_v47 = vld [vmem:[%s15042_s1 + $0x128] sm:$0xff]  ;;  %15637 = vst [vmem:[#allocation43_spill] sm:$0xff] %v8719_v43  ;;  %v379_v43 = vld [vmem:[%s15042_s1 + $0x130] sm:$0xff] }
 0x180   : > { %2796 = vperm.xlu2 %7695, %v6903_v23   ;;  %v6920_v23 = vld [vmem:[%s15043_s2 + $0x4b8] sm:$0xff] }
 0x181   : > { %2891 = vperm.xlu1 %7694, %v6922_v21   ;;  %2886 = vperm.xlu0 %7693, %v6921_v56   ;;  %v6919_v56 = vld [vmem:[%s15043_s2 + $0x4b0] sm:$0xff]  ;;  %v6904_v21 = vld [vmem:[%s15043_s2 + $0x438] sm:$0xff] }
 0x182   : > { %v8712_v11 = vpop.f32.mrf.mxu0  ;;  %v8717_v19 = vpop.f32.mrf.mxu1 }
 0x183   : > { %15635 = vst [vmem:[#allocation41_spill] sm:$0xff] %v8712_v11  ;;  %v8732_v11 = vpop.permute.xlu1 %846 }
 0x184   : > { %15636 = vst [vmem:[#allocation42_spill] sm:$0xff] %v8717_v19  ;;  %v8734_v19 = vpop.permute.xlu0 %826 }
 0x185   : > { %7014 = vmatmul.msk.f32.gmra.mxu0 %vm919_vm0, %v378_v47  ;;  %7094 = vmatmul.msk.f32.gmra.mxu1 %vm919_vm0, %v378_v47  ;;  %15638 = vst [vmem:[#allocation44_spill] sm:$0xff] %v8732_v11  ;;  %v6917_v11 = vld [vmem:[%s15043_s2 + $0x4a0] sm:$0xff] }
 0x186   : > { %15639 = vst [vmem:[#allocation45_spill] sm:$0xff] %v8734_v19 }
 0x188   : > { %2881 = vperm.xlu2 %7695, %v6920_v23   ;;  %v6902_v23 = vld [vmem:[%s15043_s2 + $0x428] sm:$0xff] }
 0x189   : > { %2876 = vperm.xlu1 %7694, %v6919_v56   ;;  %2801 = vperm.xlu0 %7693, %v6904_v21   ;;  %v6901_v56 = vld [vmem:[%s15043_s2 + $0x420] sm:$0xff]  ;;  %v8754_v21 = vpop.permute.xlu2 %836 }
 0x18a   : > { %v8736_v47 = vpop.f32.mrf.mxu0  ;;  %v8741_v52 = vpop.f32.mrf.mxu1  ;;  %15642 = vst [vmem:[#allocation48_spill] sm:$0xff] %v8754_v21 }
 0x18b   : > { %15640 = vst [vmem:[#allocation46_spill] sm:$0xff] %v8736_v47  ;;  %v8756_v19 = vpop.permute.xlu1 %861  ;;  %v380_v47 = vld [vmem:[%s15042_s1 + $0x138] sm:$0xff] }
 0x18c   : > { %15641 = vst [vmem:[#allocation47_spill] sm:$0xff] %v8741_v52 }
 0x18d   : > { %7015 = vmatmul.msk.f32.gmra.mxu0 %vm919_vm0, %v379_v43  ;;  %7095 = vmatmul.msk.f32.gmra.mxu1 %vm919_vm0, %v379_v43  ;;  %15643 = vst [vmem:[#allocation49_spill] sm:$0xff] %v8756_v19  ;;  %v8758_v43 = vpop.permute.xlu0 %841 }
 0x18e   : > { %15644 = vst [vmem:[#allocation50_spill] sm:$0xff] %v8758_v43 }
 0x190   : > { %2866 = vperm.xlu2 %7695, %v6917_v11   ;;  %v6900_v11 = vld [vmem:[%s15043_s2 + $0x418] sm:$0xff] }
 0x191   : > { %2791 = vperm.xlu1 %7694, %v6902_v23   ;;  %2786 = vperm.xlu0 %7693, %v6901_v56   ;;  %v6899_v23 = vld [vmem:[%s15043_s2 + $0x410] sm:$0xff]  ;;  %v6918_v56 = vld [vmem:[%s15043_s2 + $0x4a8] sm:$0xff]  ;;  %v8778_v19 = vpop.permute.xlu2 %851 }
 0x192   : > { %v8760_v52 = vpop.f32.mrf.mxu0  ;;  %v8765_v48 = vpop.f32.mrf.mxu1  ;;  %15647 = vst [vmem:[#allocation53_spill] sm:$0xff] %v8778_v19 }
 0x193   : > { %15645 = vst [vmem:[#allocation51_spill] sm:$0xff] %v8760_v52  ;;  %v8785_v21 = vpop.permute.xlu1 %876 }
 0x194   : > { %15646 = vst [vmem:[#allocation52_spill] sm:$0xff] %v8765_v48 }
 0x195   : > { %7016 = vmatmul.msk.f32.gmra.mxu0 %vm919_vm0, %v380_v47  ;;  %7096 = vmatmul.msk.f32.gmra.mxu1 %vm919_vm0, %v380_v47  ;;  %v381_v47 = vld [vmem:[%s15042_s1 + $0x140] sm:$0xff]  ;;  %15649 = vst [vmem:[#allocation55_spill] sm:$0xff] %v8785_v21  ;;  %v8787_v48 = vpop.permute.xlu0 %856 }
 0x196   : > { %15650 = vst [vmem:[#allocation56_spill] sm:$0xff] %v8787_v48 }
 0x198   : > { %2781 = vperm.xlu2 %7695, %v6900_v11   ;;  %v6897_v11 = vld [vmem:[%s15043_s2 + $0x400] sm:$0xff] }
 0x199   : > { %2776 = vperm.xlu1 %7694, %v6899_v23   ;;  %2871 = vperm.xlu0 %7693, %v6918_v56   ;;  %v6916_v23 = vld [vmem:[%s15043_s2 + $0x498] sm:$0xff]  ;;  %v6915_v56 = vld [vmem:[%s15043_s2 + $0x490] sm:$0xff]  ;;  %v8807_v48 = vpop.permute.xlu2 %866 }
 0x19a   : > { %v8780_v43 = vpop.f32.mrf.mxu0  ;;  %v8789_v52 = vpop.f32.mrf.mxu1  ;;  %15653 = vst [vmem:[#allocation59_spill] sm:$0xff] %v8807_v48  ;;  %v6898_v48 = vld [vmem:[%s15043_s2 + $0x408] sm:$0xff] }
 0x19b   : > { %15648 = vst [vmem:[#allocation54_spill] sm:$0xff] %v8780_v43 }
 0x19c   : > { %15651 = vst [vmem:[#allocation57_spill] sm:$0xff] %v8789_v52  ;;  %v8811_v52 = vpop.permute.xlu1 %891 }
 0x19d   : > { %7017 = vmatmul.msk.f32.gmra.mxu0 %vm919_vm0, %v381_v47  ;;  %7097 = vmatmul.msk.f32.gmra.mxu1 %vm919_vm0, %v381_v47  ;;  %v382_v47 = vld [vmem:[%s15042_s1 + $0x148] sm:$0xff]  ;;  %15655 = vst [vmem:[#allocation61_spill] sm:$0xff] %v8811_v52 }
 0x1a0   : > { %2766 = vperm.xlu2 %7695, %v6897_v11   ;;  %v6914_v11 = vld [vmem:[%s15043_s2 + $0x488] sm:$0xff] }
 0x1a1   : > { %2861 = vperm.xlu1 %7694, %v6916_v23   ;;  %2856 = vperm.xlu0 %7693, %v6915_v56   ;;  %v8818_v23 = vpop.permute.xlu0 %871  ;;  %v6913_v56 = vld [vmem:[%s15043_s2 + $0x480] sm:$0xff] }
 0x1a2   : > { %v8802_v21 = vpop.f32.mrf.mxu0  ;;  %v8809_v19 = vpop.f32.mrf.mxu1  ;;  %15656 = vst [vmem:[#allocation62_spill] sm:$0xff] %v8818_v23 }
 0x1a3   : > { %15652 = vst [vmem:[#allocation58_spill] sm:$0xff] %v8802_v21  ;;  %v8833_v23 = vpop.permute.xlu2 %881 }
 0x1a4   : > { %15654 = vst [vmem:[#allocation60_spill] sm:$0xff] %v8809_v19 }
 0x1a5   : > { %7018 = vmatmul.msk.f32.gmra.mxu0 %vm919_vm0, %v382_v47  ;;  %7098 = vmatmul.msk.f32.gmra.mxu1 %vm919_vm0, %v382_v47  ;;  %v383_v47 = vld [vmem:[%s15042_s1 + $0x150] sm:$0xff]  ;;  %15659 = vst [vmem:[#allocation65_spill] sm:$0xff] %v8833_v23  ;;  %v384_v23 = vld [vmem:[%s15042_s1 + $0x158] sm:$0xff] }
 0x1a8   : > { %2851 = vperm.xlu2 %7695, %v6914_v11   ;;  %v6892_v11 = vld [vmem:[%s15043_s2 + $0x3d8] sm:$0xff] }
 0x1a9   : > { %2846 = vperm.xlu1 %7694, %v6913_v56   ;;  %2771 = vperm.xlu0 %7693, %v6898_v48   ;;  %v6891_v48 = vld [vmem:[%s15043_s2 + $0x3d0] sm:$0xff]  ;;  %v6890_v56 = vld [vmem:[%s15043_s2 + $0x3c8] sm:$0xff] }
 0x1aa   : > { %v8826_v52 = vpop.f32.mrf.mxu0  ;;  %v8831_v19 = vpop.f32.mrf.mxu1 }
 0x1ab   : > { %15657 = vst [vmem:[#allocation63_spill] sm:$0xff] %v8826_v52  ;;  %v8846_v52 = vpop.permute.xlu1 %906 }
 0x1ac   : > { %15658 = vst [vmem:[#allocation64_spill] sm:$0xff] %v8831_v19  ;;  %v8848_v19 = vpop.permute.xlu0 %886 }
 0x1ad   : > { %7019 = vmatmul.msk.f32.gmra.mxu0 %vm919_vm0, %v383_v47  ;;  %7099 = vmatmul.msk.f32.gmra.mxu1 %vm919_vm0, %v383_v47  ;;  %15660 = vst [vmem:[#allocation66_spill] sm:$0xff] %v8846_v52  ;;  %v6895_v52 = vld [vmem:[%s15043_s2 + $0x3f0] sm:$0xff] }
 0x1ae   : > { %15661 = vst [vmem:[#allocation67_spill] sm:$0xff] %v8848_v19 }
 0x1b0   : > { %2613 = vperm.xlu2 %7695, %v6892_v11   ;;  %v6894_v11 = vld [vmem:[%s15043_s2 + $0x3e8] sm:$0xff] }
 0x1b1   : > { %2608 = vperm.xlu1 %7694, %v6891_v48   ;;  %2603 = vperm.xlu0 %7693, %v6890_v56   ;;  %v6893_v48 = vld [vmem:[%s15043_s2 + $0x3e0] sm:$0xff]  ;;  %v8868_v56 = vpop.permute.xlu2 %896 }
 0x1b2   : > { %v8850_v47 = vpop.f32.mrf.mxu0  ;;  %v8855_v21 = vpop.f32.mrf.mxu1  ;;  %15664 = vst [vmem:[#allocation70_spill] sm:$0xff] %v8868_v56 }
 0x1b3   : > { %15662 = vst [vmem:[#allocation68_spill] sm:$0xff] %v8850_v47  ;;  %v8870_v19 = vpop.permute.xlu1 %2318  ;;  %v385_v47 = vld [vmem:[%s15042_s1 + $0x160] sm:$0xff] }
 0x1b4   : > { %15663 = vst [vmem:[#allocation69_spill] sm:$0xff] %v8855_v21 }
 0x1b5   : > { %7020 = vmatmul.msk.f32.gmra.mxu0 %vm919_vm0, %v384_v23  ;;  %7100 = vmatmul.msk.f32.gmra.mxu1 %vm919_vm0, %v384_v23  ;;  %15665 = vst [vmem:[#allocation71_spill] sm:$0xff] %v8870_v19  ;;  %v8872_v23 = vpop.permute.xlu0 %901 }
 0x1b6   : > { %15666 = vst [vmem:[#allocation72_spill] sm:$0xff] %v8872_v23 }
 0x1b8   : > { %2628 = vperm.xlu2 %7695, %v6895_v52   ;;  %v6930_v52 = vld [vmem:[%s15043_s2 + $0x508] sm:$0xff] }
 0x1b9   : > { %2623 = vperm.xlu1 %7694, %v6894_v11   ;;  %2618 = vperm.xlu0 %7693, %v6893_v48   ;;  %v6929_v11 = vld [vmem:[%s15043_s2 + $0x500] sm:$0xff]  ;;  %v6896_v48 = vld [vmem:[%s15043_s2 + $0x3f8] sm:$0xff]  ;;  %v8892_v19 = vpop.permute.xlu2 %911 }
 0x1ba   : > { %v8874_v21 = vpop.f32.mrf.mxu0  ;;  %v8879_v43 = vpop.f32.mrf.mxu1  ;;  %15669 = vst [vmem:[#allocation75_spill] sm:$0xff] %v8892_v19 }
 0x1bb   : > { %15667 = vst [vmem:[#allocation73_spill] sm:$0xff] %v8874_v21  ;;  %v8899_v56 = vpop.permute.xlu1 %2333 }
 0x1bc   : > { %15668 = vst [vmem:[#allocation74_spill] sm:$0xff] %v8879_v43 }
 0x1bd   : > { %7021 = vmatmul.msk.f32.gmra.mxu0 %vm919_vm0, %v385_v47  ;;  %7101 = vmatmul.msk.f32.gmra.mxu1 %vm919_vm0, %v385_v47  ;;  %v386_v47 = vld [vmem:[%s15042_s1 + $0x168] sm:$0xff]  ;;  %15671 = vst [vmem:[#allocation77_spill] sm:$0xff] %v8899_v56  ;;  %v8901_v43 = vpop.permute.xlu0 %916 }
 0x1be   : > { %15672 = vst [vmem:[#allocation78_spill] sm:$0xff] %v8901_v43 }
 0x1c0   : > { %2931 = vperm.xlu2 %7695, %v6930_v52   ;;  %v6943_v52 = vld [vmem:[%s15043_s2 + $0x570] sm:$0xff] }
 0x1c1   : > { %2926 = vperm.xlu1 %7694, %v6929_v11   ;;  %2633 = vperm.xlu0 %7693, %v6896_v48   ;;  %v6932_v11 = vld [vmem:[%s15043_s2 + $0x518] sm:$0xff]  ;;  %v6931_v48 = vld [vmem:[%s15043_s2 + $0x510] sm:$0xff]  ;;  %v8921_v43 = vpop.permute.xlu2 %2323 }
 0x1c2   : > { %v8894_v23 = vpop.f32.mrf.mxu0  ;;  %v8903_v21 = vpop.f32.mrf.mxu1  ;;  %15675 = vst [vmem:[#allocation81_spill] sm:$0xff] %v8921_v43  ;;  %v6944_v43 = vld [vmem:[%s15043_s2 + $0x578] sm:$0xff] }
 0x1c3   : > { %15670 = vst [vmem:[#allocation76_spill] sm:$0xff] %v8894_v23 }
 0x1c4   : > { %15673 = vst [vmem:[#allocation79_spill] sm:$0xff] %v8903_v21  ;;  %v8925_v21 = vpop.permute.xlu1 %2348 }
 0x1c5   : > { %7022 = vmatmul.msk.f32.gmra.mxu0 %vm919_vm0, %v386_v47  ;;  %7102 = vmatmul.msk.f32.gmra.mxu1 %vm919_vm0, %v386_v47  ;;  %v387_v47 = vld [vmem:[%s15042_s1 + $0x170] sm:$0xff]  ;;  %15677 = vst [vmem:[#allocation83_spill] sm:$0xff] %v8925_v21 }
 0x1c8   : > { %2996 = vperm.xlu2 %7695, %v6943_v52   ;;  %v6960_v52 = vld [vmem:[%s15043_s2 + $0x5f8] sm:$0xff] }
 0x1c9   : > { %2941 = vperm.xlu1 %7694, %v6932_v11   ;;  %2936 = vperm.xlu0 %7693, %v6931_v48   ;;  %v8932_v11 = vpop.permute.xlu0 %2328  ;;  %v6959_v48 = vld [vmem:[%s15043_s2 + $0x5f0] sm:$0xff] }
 0x1ca   : > { %v8916_v56 = vpop.f32.mrf.mxu0  ;;  %v8923_v19 = vpop.f32.mrf.mxu1  ;;  %15678 = vst [vmem:[#allocation84_spill] sm:$0xff] %v8932_v11 }
 0x1cb   : > { %15674 = vst [vmem:[#allocation80_spill] sm:$0xff] %v8916_v56  ;;  %v8947_v11 = vpop.permute.xlu2 %2338 }
 0x1cc   : > { %15676 = vst [vmem:[#allocation82_spill] sm:$0xff] %v8923_v19 }
 0x1cd   : > { %7023 = vmatmul.msk.f32.gmra.mxu0 %vm919_vm0, %v387_v47  ;;  %7103 = vmatmul.msk.f32.gmra.mxu1 %vm919_vm0, %v387_v47  ;;  %v388_v47 = vld [vmem:[%s15042_s1 + $0x178] sm:$0xff]  ;;  %15681 = vst [vmem:[#allocation87_spill] sm:$0xff] %v8947_v11  ;;  %v389_v11 = vld [vmem:[%s15042_s1 + $0x180] sm:$0xff] }
 0x1d0   : > { %3081 = vperm.xlu2 %7695, %v6960_v52   ;;  %v6957_v52 = vld [vmem:[%s15043_s2 + $0x5e0] sm:$0xff] }
 0x1d1   : > { %3076 = vperm.xlu1 %7694, %v6959_v48   ;;  %3001 = vperm.xlu0 %7693, %v6944_v43   ;;  %v6942_v43 = vld [vmem:[%s15043_s2 + $0x568] sm:$0xff]  ;;  %v6941_v48 = vld [vmem:[%s15043_s2 + $0x560] sm:$0xff] }
 0x1d2   : > { %v8940_v21 = vpop.f32.mrf.mxu0  ;;  %v8945_v19 = vpop.f32.mrf.mxu1 }
 0x1d3   : > { %15679 = vst [vmem:[#allocation85_spill] sm:$0xff] %v8940_v21  ;;  %v8960_v21 = vpop.permute.xlu1 %2363 }
 0x1d4   : > { %15680 = vst [vmem:[#allocation86_spill] sm:$0xff] %v8945_v19  ;;  %v8962_v19 = vpop.permute.xlu0 %2343 }
 0x1d5   : > { %7024 = vmatmul.msk.f32.gmra.mxu0 %vm919_vm0, %v388_v47  ;;  %7104 = vmatmul.msk.f32.gmra.mxu1 %vm919_vm0, %v388_v47  ;;  %15682 = vst [vmem:[#allocation88_spill] sm:$0xff] %v8960_v21  ;;  %v6940_v21 = vld [vmem:[%s15043_s2 + $0x558] sm:$0xff] }
 0x1d6   : > { %15683 = vst [vmem:[#allocation89_spill] sm:$0xff] %v8962_v19 }
 0x1d8   : > { %3066 = vperm.xlu2 %7695, %v6957_v52   ;;  %v6939_v52 = vld [vmem:[%s15043_s2 + $0x550] sm:$0xff] }
 0x1d9   : > { %2991 = vperm.xlu1 %7694, %v6942_v43   ;;  %2986 = vperm.xlu0 %7693, %v6941_v48   ;;  %v6958_v43 = vld [vmem:[%s15043_s2 + $0x5e8] sm:$0xff]  ;;  %v8982_v48 = vpop.permute.xlu2 %2353 }
 0x1da   : > { %v8964_v47 = vpop.f32.mrf.mxu0  ;;  %v8969_v56 = vpop.f32.mrf.mxu1  ;;  %15686 = vst [vmem:[#allocation92_spill] sm:$0xff] %v8982_v48 }
 0x1db   : > { %15684 = vst [vmem:[#allocation90_spill] sm:$0xff] %v8964_v47  ;;  %v8984_v19 = vpop.permute.xlu1 %2378  ;;  %v390_v47 = vld [vmem:[%s15042_s1 + $0x188] sm:$0xff] }
 0x1dc   : > { %15685 = vst [vmem:[#allocation91_spill] sm:$0xff] %v8969_v56 }
 0x1dd   : > { %7025 = vmatmul.msk.f32.gmra.mxu0 %vm919_vm0, %v389_v11  ;;  %7105 = vmatmul.msk.f32.gmra.mxu1 %vm919_vm0, %v389_v11  ;;  %15687 = vst [vmem:[#allocation93_spill] sm:$0xff] %v8984_v19  ;;  %v8986_v11 = vpop.permute.xlu0 %2358 }
 0x1de   : > { %15688 = vst [vmem:[#allocation94_spill] sm:$0xff] %v8986_v11 }
 0x1e0   : > { %2981 = vperm.xlu2 %7695, %v6940_v21   ;;  %v6937_v21 = vld [vmem:[%s15043_s2 + $0x540] sm:$0xff] }
 0x1e1   : > { %2976 = vperm.xlu1 %7694, %v6939_v52   ;;  %3071 = vperm.xlu0 %7693, %v6958_v43   ;;  %v6956_v52 = vld [vmem:[%s15043_s2 + $0x5d8] sm:$0xff]  ;;  %v6955_v43 = vld [vmem:[%s15043_s2 + $0x5d0] sm:$0xff]  ;;  %v9006_v19 = vpop.permute.xlu2 %2368 }
 0x1e2   : > { %v8988_v56 = vpop.f32.mrf.mxu0  ;;  %v8993_v23 = vpop.f32.mrf.mxu1  ;;  %15691 = vst [vmem:[#allocation97_spill] sm:$0xff] %v9006_v19 }
 0x1e3   : > { %15689 = vst [vmem:[#allocation95_spill] sm:$0xff] %v8988_v56  ;;  %v9013_v48 = vpop.permute.xlu1 %2393 }
 0x1e4   : > { %15690 = vst [vmem:[#allocation96_spill] sm:$0xff] %v8993_v23 }
 0x1e5   : > { %7026 = vmatmul.msk.f32.gmra.mxu0 %vm919_vm0, %v390_v47  ;;  %7106 = vmatmul.msk.f32.gmra.mxu1 %vm919_vm0, %v390_v47  ;;  %v391_v47 = vld [vmem:[%s15042_s1 + $0x190] sm:$0xff]  ;;  %15693 = vst [vmem:[#allocation99_spill] sm:$0xff] %v9013_v48  ;;  %v9015_v23 = vpop.permute.xlu0 %2373 }
 0x1e6   : > { %15694 = vst [vmem:[#allocation100_spill] sm:$0xff] %v9015_v23 }
 0x1e8   : > { %2966 = vperm.xlu2 %7695, %v6937_v21   ;;  %v6954_v21 = vld [vmem:[%s15043_s2 + $0x5c8] sm:$0xff] }
 0x1e9   : > { %3061 = vperm.xlu1 %7694, %v6956_v52   ;;  %3056 = vperm.xlu0 %7693, %v6955_v43   ;;  %v6953_v52 = vld [vmem:[%s15043_s2 + $0x5c0] sm:$0xff]  ;;  %v6938_v43 = vld [vmem:[%s15043_s2 + $0x548] sm:$0xff]  ;;  %v9035_v23 = vpop.permute.xlu2 %2383 }
 0x1ea   : > { %v9008_v11 = vpop.f32.mrf.mxu0  ;;  %v9017_v56 = vpop.f32.mrf.mxu1  ;;  %15697 = vst [vmem:[#allocation103_spill] sm:$0xff] %v9035_v23  ;;  %v6935_v23 = vld [vmem:[%s15043_s2 + $0x530] sm:$0xff] }
 0x1eb   : > { %15692 = vst [vmem:[#allocation98_spill] sm:$0xff] %v9008_v11 }
 0x1ec   : > { %15695 = vst [vmem:[#allocation101_spill] sm:$0xff] %v9017_v56  ;;  %v9039_v56 = vpop.permute.xlu1 %2408 }
 0x1ed   : > { %7027 = vmatmul.msk.f32.gmra.mxu0 %vm919_vm0, %v391_v47  ;;  %7107 = vmatmul.msk.f32.gmra.mxu1 %vm919_vm0, %v391_v47  ;;  %v392_v47 = vld [vmem:[%s15042_s1 + $0x198] sm:$0xff]  ;;  %15699 = vst [vmem:[#allocation105_spill] sm:$0xff] %v9039_v56 }
 0x1f0   : > { %3051 = vperm.xlu2 %7695, %v6954_v21   ;;  %v6951_v21 = vld [vmem:[%s15043_s2 + $0x5b0] sm:$0xff] }
 0x1f1   : > { %3046 = vperm.xlu1 %7694, %v6953_v52   ;;  %2971 = vperm.xlu0 %7693, %v6938_v43   ;;  %v9046_v52 = vpop.permute.xlu0 %2388  ;;  %v6936_v43 = vld [vmem:[%s15043_s2 + $0x538] sm:$0xff] }
 0x1f2   : > { %v9030_v48 = vpop.f32.mrf.mxu0  ;;  %v9037_v19 = vpop.f32.mrf.mxu1  ;;  %15700 = vst [vmem:[#allocation106_spill] sm:$0xff] %v9046_v52 }
 0x1f3   : > { %15696 = vst [vmem:[#allocation102_spill] sm:$0xff] %v9030_v48  ;;  %v9061_v52 = vpop.permute.xlu2 %2398 }
 0x1f4   : > { %15698 = vst [vmem:[#allocation104_spill] sm:$0xff] %v9037_v19 }
 0x1f5   : > { %7028 = vmatmul.msk.f32.gmra.mxu0 %vm919_vm0, %v392_v47  ;;  %7108 = vmatmul.msk.f32.gmra.mxu1 %vm919_vm0, %v392_v47  ;;  %v393_v47 = vld [vmem:[%s15042_s1 + $0x1a0] sm:$0xff]  ;;  %15703 = vst [vmem:[#allocation109_spill] sm:$0xff] %v9061_v52  ;;  %v394_v52 = vld [vmem:[%s15042_s1 + $0x1a8] sm:$0xff] }
 0x1f8   : > { %3036 = vperm.xlu2 %7695, %v6951_v21   ;;  %v6934_v21 = vld [vmem:[%s15043_s2 + $0x528] sm:$0xff] }
 0x1f9   : > { %2961 = vperm.xlu1 %7694, %v6936_v43   ;;  %2956 = vperm.xlu0 %7693, %v6935_v23   ;;  %v6933_v23 = vld [vmem:[%s15043_s2 + $0x520] sm:$0xff]  ;;  %v6952_v43 = vld [vmem:[%s15043_s2 + $0x5b8] sm:$0xff] }
 0x1fa   : > { %v9054_v56 = vpop.f32.mrf.mxu0  ;;  %v9059_v19 = vpop.f32.mrf.mxu1 }
 0x1fb   : > { %15701 = vst [vmem:[#allocation107_spill] sm:$0xff] %v9054_v56  ;;  %v9074_v56 = vpop.permute.xlu1 %2423 }
 0x1fc   : > { %15702 = vst [vmem:[#allocation108_spill] sm:$0xff] %v9059_v19  ;;  %v9076_v19 = vpop.permute.xlu0 %2403 }
 0x1fd   : > { %7029 = vmatmul.msk.f32.gmra.mxu0 %vm919_vm0, %v393_v47  ;;  %7109 = vmatmul.msk.f32.gmra.mxu1 %vm919_vm0, %v393_v47  ;;  %15704 = vst [vmem:[#allocation110_spill] sm:$0xff] %v9074_v56  ;;  %v6947_v56 = vld [vmem:[%s15043_s2 + $0x590] sm:$0xff] }
 0x1fe   : > { %15705 = vst [vmem:[#allocation111_spill] sm:$0xff] %v9076_v19 }
 0x200   : > { %2951 = vperm.xlu2 %7695, %v6934_v21   ;;  %v6950_v21 = vld [vmem:[%s15043_s2 + $0x5a8] sm:$0xff] }
 0x201   : > { %2946 = vperm.xlu1 %7694, %v6933_v23   ;;  %3041 = vperm.xlu0 %7693, %v6952_v43   ;;  %v6949_v23 = vld [vmem:[%s15043_s2 + $0x5a0] sm:$0xff]  ;;  %v9096_v43 = vpop.permute.xlu2 %2413 }
 0x202   : > { %v9078_v47 = vpop.f32.mrf.mxu0  ;;  %v9083_v48 = vpop.f32.mrf.mxu1  ;;  %15708 = vst [vmem:[#allocation114_spill] sm:$0xff] %v9096_v43 }
 0x203   : > { %15706 = vst [vmem:[#allocation112_spill] sm:$0xff] %v9078_v47  ;;  %v9098_v19 = vpop.permute.xlu1 %2438  ;;  %v395_v47 = vld [vmem:[%s15042_s1 + $0x1b0] sm:$0xff] }
 0x204   : > { %15707 = vst [vmem:[#allocation113_spill] sm:$0xff] %v9083_v48 }
 0x205   : > { %7030 = vmatmul.msk.f32.gmra.mxu0 %vm919_vm0, %v394_v52  ;;  %7110 = vmatmul.msk.f32.gmra.mxu1 %vm919_vm0, %v394_v52  ;;  %15709 = vst [vmem:[#allocation115_spill] sm:$0xff] %v9098_v19  ;;  %v9100_v52 = vpop.permute.xlu0 %2418 }
 0x206   : > { %15710 = vst [vmem:[#allocation116_spill] sm:$0xff] %v9100_v52 }
 0x208   : > { %3016 = vperm.xlu2 %7695, %v6947_v56   ;;  %v6946_v56 = vld [vmem:[%s15043_s2 + $0x588] sm:$0xff] }
 0x209   : > { %3031 = vperm.xlu1 %7694, %v6950_v21   ;;  %3026 = vperm.xlu0 %7693, %v6949_v23   ;;  %v6945_v21 = vld [vmem:[%s15043_s2 + $0x580] sm:$0xff]  ;;  %v6948_v23 = vld [vmem:[%s15043_s2 + $0x598] sm:$0xff]  ;;  %v9120_v19 = vpop.permute.xlu2 %2428 }
 0x20a   : > { %v9102_v48 = vpop.f32.mrf.mxu0  ;;  %v9107_v11 = vpop.f32.mrf.mxu1  ;;  %15713 = vst [vmem:[#allocation119_spill] sm:$0xff] %v9120_v19 }
 0x20b   : > { %15711 = vst [vmem:[#allocation117_spill] sm:$0xff] %v9102_v48  ;;  %v9127_v43 = vpop.permute.xlu1 %2453 }
 0x20c   : > { %15712 = vst [vmem:[#allocation118_spill] sm:$0xff] %v9107_v11 }
 0x20d   : > { %7031 = vmatmul.msk.f32.gmra.mxu0 %vm919_vm0, %v395_v47  ;;  %7111 = vmatmul.msk.f32.gmra.mxu1 %vm919_vm0, %v395_v47  ;;  %v396_v47 = vld [vmem:[%s15042_s1 + $0x1b8] sm:$0xff]  ;;  %15715 = vst [vmem:[#allocation121_spill] sm:$0xff] %v9127_v43  ;;  %v9129_v11 = vpop.permute.xlu0 %2433 }
 0x20e   : > { %15716 = vst [vmem:[#allocation122_spill] sm:$0xff] %v9129_v11 }
 0x210   : > { %3011 = vperm.xlu2 %7695, %v6946_v56   ;;  %v3470_v56 = vld [vmem:[%s15045_s4 + $0x10] sm:$0xff] }
 0x211   : > { %3006 = vperm.xlu1 %7694, %v6945_v21   ;;  %3021 = vperm.xlu0 %7693, %v6948_v23   ;;  %v3469_v21 = vld [vmem:[%s15045_s4 + $0x8] sm:$0xff]  ;;  %v3468_v23 = vld [vmem:[%s15045_s4] sm:$0xff]  ;;  %v9149_v11 = vpop.permute.xlu2 %2443 }
 0x212   : > { %v9122_v52 = vpop.f32.mrf.mxu0  ;;  %v9131_v48 = vpop.f32.mrf.mxu1  ;;  %15719 = vst [vmem:[#allocation125_spill] sm:$0xff] %v9149_v11  ;;  %v3471_v11 = vld [vmem:[%s15045_s4 + $0x18] sm:$0xff] }
 0x213   : > { %15714 = vst [vmem:[#allocation120_spill] sm:$0xff] %v9122_v52 }
 0x214   : > { %15717 = vst [vmem:[#allocation123_spill] sm:$0xff] %v9131_v48  ;;  %v9153_v48 = vpop.permute.xlu1 %2468 }
 0x215   : > { %7032 = vmatmul.msk.f32.gmra.mxu0 %vm919_vm0, %v396_v47  ;;  %7112 = vmatmul.msk.f32.gmra.mxu1 %vm919_vm0, %v396_v47  ;;  %v397_v47 = vld [vmem:[%s15042_s1 + $0x1c0] sm:$0xff]  ;;  %15721 = vst [vmem:[#allocation127_spill] sm:$0xff] %v9153_v48 }
 0x218   : > { %3578 = vperm.xlu2 %7695, %v3470_v56   ;;  %v3473_v56 = vld [vmem:[%s15045_s4 + $0x28] sm:$0xff] }
 0x219   : > { %3573 = vperm.xlu1 %7694, %v3469_v21   ;;  %3568 = vperm.xlu0 %7693, %v3468_v23   ;;  %v9160_v21 = vpop.permute.xlu0 %2448  ;;  %v3472_v23 = vld [vmem:[%s15045_s4 + $0x20] sm:$0xff] }
 0x21a   : > { %v9144_v43 = vpop.f32.mrf.mxu0  ;;  %v9151_v19 = vpop.f32.mrf.mxu1  ;;  %15722 = vst [vmem:[#allocation128_spill] sm:$0xff] %v9160_v21 }
 0x21b   : > { %15718 = vst [vmem:[#allocation124_spill] sm:$0xff] %v9144_v43  ;;  %v9175_v21 = vpop.permute.xlu2 %2458 }
 0x21c   : > { %15720 = vst [vmem:[#allocation126_spill] sm:$0xff] %v9151_v19 }
 0x21d   : > { %7033 = vmatmul.msk.f32.gmra.mxu0 %vm919_vm0, %v397_v47  ;;  %7113 = vmatmul.msk.f32.gmra.mxu1 %vm919_vm0, %v397_v47  ;;  %v398_v47 = vld [vmem:[%s15042_s1 + $0x1c8] sm:$0xff]  ;;  %15725 = vst [vmem:[#allocation131_spill] sm:$0xff] %v9175_v21  ;;  %v399_v21 = vld [vmem:[%s15042_s1 + $0x1d0] sm:$0xff] }
 0x220   : > { %3593 = vperm.xlu2 %7695, %v3473_v56   ;;  %v3476_v56 = vld [vmem:[%s15045_s4 + $0x40] sm:$0xff] }
 0x221   : > { %3588 = vperm.xlu1 %7694, %v3472_v23   ;;  %3583 = vperm.xlu0 %7693, %v3471_v11   ;;  %v3475_v11 = vld [vmem:[%s15045_s4 + $0x38] sm:$0xff]  ;;  %v3474_v23 = vld [vmem:[%s15045_s4 + $0x30] sm:$0xff] }
 0x222   : > { %v9168_v48 = vpop.f32.mrf.mxu0  ;;  %v9173_v19 = vpop.f32.mrf.mxu1 }
 0x223   : > { %15723 = vst [vmem:[#allocation129_spill] sm:$0xff] %v9168_v48  ;;  %v9188_v48 = vpop.permute.xlu1 %2483 }
 0x224   : > { %15724 = vst [vmem:[#allocation130_spill] sm:$0xff] %v9173_v19  ;;  %v9190_v19 = vpop.permute.xlu0 %2463 }
 0x225   : > { %7034 = vmatmul.msk.f32.gmra.mxu0 %vm919_vm0, %v398_v47  ;;  %7114 = vmatmul.msk.f32.gmra.mxu1 %vm919_vm0, %v398_v47  ;;  %15726 = vst [vmem:[#allocation132_spill] sm:$0xff] %v9188_v48  ;;  %v3479_v48 = vld [vmem:[%s15045_s4 + $0x58] sm:$0xff] }
 0x226   : > { %15727 = vst [vmem:[#allocation133_spill] sm:$0xff] %v9190_v19  ;;  %v9216_v19 = vadd.f32 %v8267_v5, %v8331_v28 }
 0x228   : > { %3608 = vperm.xlu2 %7695, %v3476_v56   ;;  %v3478_v56 = vld [vmem:[%s15045_s4 + $0x50] sm:$0xff]  ;;  %15731 = vst [vmem:[#allocation137_spill] sm:$0xff] %v9216_v19  ;;  %v1769_v5 = vmul.f32 %v9216_v19, %v9216_v19 }
 0x229   : > { %3603 = vperm.xlu1 %7694, %v3475_v11   ;;  %3598 = vperm.xlu0 %7693, %v3474_v23   ;;  %v3477_v11 = vld [vmem:[%s15045_s4 + $0x48] sm:$0xff]  ;;  %v9212_v23 = vadd.f32 %v8249_v63, %v8302_v17  ;;  %v400_v63 = vld [vmem:[%s15042_s1 + $0x1d8] sm:$0xff] }
 0x22a   : > { %v9192_v47 = vpop.f32.mrf.mxu0  ;;  %v9197_v43 = vpop.f32.mrf.mxu1 }
 0x22b   : > { %15728 = vst [vmem:[#allocation134_spill] sm:$0xff] %v9192_v47  ;;  %v1767_v34 = vmul.f32 %v9212_v23, %v9212_v23 }
 0x22c   : > { %15729 = vst [vmem:[#allocation135_spill] sm:$0xff] %v9197_v43  ;;  %v9220_v43 = vpop.permute.xlu1 %2498  ;;  %v9222_v47 = vpop.permute.xlu0 %2478 }
 0x22d   : > { %7035 = vmatmul.msk.f32.gmra.mxu0 %vm919_vm0, %v399_v21  ;;  %7115 = vmatmul.msk.f32.gmra.mxu1 %vm919_vm0, %v399_v21  ;;  %15730 = vst [vmem:[#allocation136_spill] sm:$0xff] %v9212_v23  ;;  %v9218_v21 = vpop.permute.xlu2 %2473 }
 0x22e   : > { %15732 = vst [vmem:[#allocation138_spill] sm:$0xff] %v9218_v21  ;;  %v3481_v21 = vld [vmem:[%s15045_s4 + $0x68] sm:$0xff] }
 0x22f   : > { %15733 = vst [vmem:[#allocation139_spill] sm:$0xff] %v9220_v43  ;;  %v3480_v43 = vld [vmem:[%s15045_s4 + $0x60] sm:$0xff] }
 0x230   : > { %3623 = vperm.xlu2 %7695, %v3479_v48   ;;  %15734 = vst [vmem:[#allocation140_spill] sm:$0xff] %v9222_v47  ;;  %v9235_v48 = vadd.f32 %v8287_v12, %v8280_v9  ;;  %v1695_v12 = vadd.f32 %v9216_v19, %v9212_v23  ;;  %v1963_v47 = vadd.f32 %v1769_v5, %v1767_v34 }
 0x231   : > { %3618 = vperm.xlu1 %7694, %v3478_v56   ;;  %3613 = vperm.xlu0 %7693, %v3477_v11   ;;  %v3482_v11 = vld [vmem:[%s15045_s4 + $0x70] sm:$0xff] }
 0x232   : > { %v9224_v52 = vpop.f32.mrf.mxu0  ;;  %15736 = vst [vmem:[#allocation142_spill] sm:$0xff] %v9235_v48  ;;  %v9237_v56 = vpop.f32.mrf.mxu1  ;;  %v1696_v34 = vadd.f32 %v1695_v12, %v9235_v48 }
 0x233   : > { %15735 = vst [vmem:[#allocation141_spill] sm:$0xff] %v9224_v52 }
 0x234   : > { %15737 = vst [vmem:[#allocation143_spill] sm:$0xff] %v9237_v56  ;;  %v1771_v56 = vmul.f32 %v9235_v48, %v9235_v48  ;;  %v402_v48 = vld [vmem:[%s15042_s1 + $0x1e8] sm:$0xff] }
 0x235   : > { %7036 = vmatmul.msk.f32.gmra.mxu0 %vm919_vm0, %v400_v63  ;;  %7116 = vmatmul.msk.f32.gmra.mxu1 %vm919_vm0, %v400_v63  ;;  %v9256_v63 = vadd.f32 %v8309_v20, %v8300_v16  ;;  %v9258_v52 = vpop.permute.xlu2 %2488  ;;  %v9270_v20 = vadd.f32 %v8333_v29, %v8322_v24  ;;  %v3483_v29 = vld [vmem:[%s15045_s4 + $0x78] sm:$0xff] }
 0x236   : > { %15739 = vst [vmem:[#allocation145_spill] sm:$0xff] %v9258_v52  ;;  %v1964_v5 = vadd.f32 %v1963_v47, %v1771_v56  ;;  %v3485_v47 = vld [vmem:[%s15045_s4 + $0x88] sm:$0xff]  ;;  %v3484_v56 = vld [vmem:[%s15045_s4 + $0x80] sm:$0xff] }
 0x237   : > { %15738 = vst [vmem:[#allocation144_spill] sm:$0xff] %v9256_v63  ;;  %v1773_v19 = vmul.f32 %v9256_v63, %v9256_v63  ;;  %v1697_v12 = vadd.f32 %v1696_v34, %v9256_v63 }
 0x238   : > { %3638 = vperm.xlu2 %7695, %v3482_v11   ;;  %15740 = vst [vmem:[#allocation146_spill] sm:$0xff] %v9270_v20  ;;  %v9272_v11 = vpop.permute.xlu1 %2513 }
 0x239   : > { %3633 = vperm.xlu1 %7694, %v3481_v21   ;;  %3628 = vperm.xlu0 %7693, %v3480_v43   ;;  %15741 = vst [vmem:[#allocation147_spill] sm:$0xff] %v9272_v11  ;;  %v9274_v21 = vpop.permute.xlu0 %2493  ;;  %v1965_v11 = vadd.f32 %v1964_v5, %v1773_v19  ;;  %v1698_v23 = vadd.f32 %v1697_v12, %v9270_v20 }
 0x23a   : > { %v9260_v4 = vpop.f32.mrf.mxu0  ;;  %15742 = vst [vmem:[#allocation148_spill] sm:$0xff] %v9274_v21  ;;  %v9276_v43 = vpop.f32.mrf.mxu1  ;;  %v1775_v21 = vmul.f32 %v9270_v20, %v9270_v20  ;;  %v9306_v5 = vadd.f32 %v8375_v44, %v8362_v39  ;;  %v3487_v44 = vld [vmem:[%s15045_s4 + $0x98] sm:$0xff]  ;;  %v403_v20 = vld [vmem:[%s15042_s1 + $0x1f0] sm:$0xff] }
 0x23c   : > { %v1966_v34 = vadd.f32 %v1965_v11, %v1775_v21  ;;  %15744 = vst [vmem:[#allocation150_spill] sm:$0xff] %v9306_v5  ;;  %v3488_v11 = vld [vmem:[%s15045_s4 + $0xa0] sm:$0xff] }
 0x23d   : > { %7037 = vmatmul.msk.f32.gmra.mxu0 %vm919_vm0, %v401_v54  ;;  %7117 = vmatmul.msk.f32.gmra.mxu1 %vm919_vm0, %v401_v54  ;;  %v9294_v54 = vadd.f32 %v8353_v36, %v8351_v35  ;;  %v9308_v36 = vpop.permute.xlu2 %2503 }
 0x23e   : > { %15745 = vst [vmem:[#allocation151_spill] sm:$0xff] %v9308_v36  ;;  %v9332_v36 = vadd.f32 %v8399_v53, %v8329_v27 }
 0x23f   : > { %15743 = vst [vmem:[#allocation149_spill] sm:$0xff] %v9294_v54  ;;  %v1777_v19 = vmul.f32 %v9294_v54, %v9294_v54  ;;  %v1699_v12 = vadd.f32 %v1698_v23, %v9294_v54  ;;  %v9374_v54 = vadd.f32 %v8262_v3, %v8331_v28  ;;  %v9390_v3 = vadd.f32 %v8244_v61, %v8302_v17 }
 0x240   : > { %3653 = vperm.xlu2 %7695, %v3485_v47   ;;  %15748 = vst [vmem:[#allocation154_spill] sm:$0xff] %v9332_v36  ;;  %v9394_v28 = vadd.f32 %v8282_v10, %v8280_v9  ;;  %v9407_v61 = vadd.f32 %v8304_v18, %v8300_v16  ;;  %v3493_v9 = vld [vmem:[%s15045_s4 + $0xc8] sm:$0xff]  ;;  %v3492_v10 = vld [vmem:[%s15045_s4 + $0xc0] sm:$0xff] }
 0x241   : > { %3648 = vperm.xlu1 %7694, %v3484_v56   ;;  %3643 = vperm.xlu0 %7693, %v3483_v29   ;;  %v9312_v56 = vpop.permute.xlu1 %2528  ;;  %v9319_v21 = vpop.permute.xlu0 %2508  ;;  %v3486_v29 = vld [vmem:[%s15045_s4 + $0x90] sm:$0xff]  ;;  %v1700_v63 = vadd.f32 %v1699_v12, %v9306_v5  ;;  %15754 = vst [vmem:[#allocation160_spill] sm:$0xff] %v9374_v54  ;;  %v1766_v18 = vmul.f32 %v9390_v3, %v9390_v3 }
 0x242   : > { %v9296_v52 = vpop.f32.mrf.mxu0  ;;  %v9310_v47 = vpop.f32.mrf.mxu1  ;;  %15746 = vst [vmem:[#allocation152_spill] sm:$0xff] %v9312_v56  ;;  %v1967_v56 = vadd.f32 %v1966_v34, %v1777_v19  ;;  %v1781_v34 = vmul.f32 %v9332_v36, %v9332_v36  ;;  %v9344_v19 = vadd.f32 %v8423_v0, %v8377_v45  ;;  %v3489_v0 = vld [vmem:[%s15045_s4 + $0xa8] sm:$0xff] }
 0x243   : > { %15747 = vst [vmem:[#allocation153_spill] sm:$0xff] %v9319_v21 }
 0x244   : > { %15749 = vst [vmem:[#allocation155_spill] sm:$0xff] %v9344_v19 }
 0x245   : > { %7038 = vmatmul.msk.f32.gmra.mxu0 %vm919_vm0, %v402_v48  ;;  %7118 = vmatmul.msk.f32.gmra.mxu1 %vm919_vm0, %v402_v48  ;;  %v1779_v48 = vmul.f32 %v9306_v5, %v9306_v5  ;;  %15756 = vst [vmem:[#allocation162_spill] sm:$0xff] %v9394_v28 }
 0x246   : > { %15757 = vst [vmem:[#allocation163_spill] sm:$0xff] %v9407_v61 }
 0x247   : > { %v1968_v23 = vadd.f32 %v1967_v56, %v1779_v48  ;;  %v3490_v56 = vld [vmem:[%s15045_s4 + $0xb0] sm:$0xff]  ;;  %v1783_v48 = vmul.f32 %v9344_v19, %v9344_v19 }
 0x248   : > { %3668 = vperm.xlu2 %7695, %v3488_v11   ;;  %v9348_v11 = vpop.permute.xlu2 %2518 }
 0x249   : > { %3663 = vperm.xlu1 %7694, %v3487_v44   ;;  %3658 = vperm.xlu0 %7693, %v3486_v29   ;;  %15750 = vst [vmem:[#allocation156_spill] sm:$0xff] %v9348_v11  ;;  %v3491_v44 = vld [vmem:[%s15045_s4 + $0xb8] sm:$0xff]  ;;  %v1701_v29 = vadd.f32 %v1700_v63, %v9332_v36  ;;  %v1969_v12 = vadd.f32 %v1968_v23, %v1781_v34  ;;  %v9368_v11 = vpop.permute.xlu1 %2543  ;;  %v9370_v5 = vpop.permute.xlu0 %2523 }
 0x24a   : > { %v9334_v21 = vpop.f32.mrf.mxu0  ;;  %v9346_v53 = vpop.f32.mrf.mxu1  ;;  %15752 = vst [vmem:[#allocation158_spill] sm:$0xff] %v9368_v11  ;;  %v404_v23 = vld [vmem:[%s15042_s1 + $0x1f8] sm:$0xff] }
 0x24b   : > { %15753 = vst [vmem:[#allocation159_spill] sm:$0xff] %v9370_v5  ;;  %v1970_v34 = vadd.f32 %v1969_v12, %v1783_v48  ;;  %v9420_v48 = vadd.f32 %v8489_v46, %v8412_v57  ;;  %v1770_v5 = vmul.f32 %v9394_v28, %v9394_v28 }
 0x24d   : > { %7039 = vmatmul.msk.f32.gmra.mxu0 %vm919_vm0, %v403_v20  ;;  %7119 = vmatmul.msk.f32.gmra.mxu1 %vm919_vm0, %v403_v20  ;;  %v9366_v20 = vadd.f32 %v8447_v14, %v8392_v50  ;;  %v1702_v14 = vadd.f32 %v1701_v29, %v9344_v19  ;;  %15758 = vst [vmem:[#allocation164_spill] sm:$0xff] %v9420_v48 }
 0x24f   : > { %15751 = vst [vmem:[#allocation157_spill] sm:$0xff] %v9366_v20  ;;  %v1785_v11 = vmul.f32 %v9366_v20, %v9366_v20  ;;  %v1703_v17 = vadd.f32 %v1702_v14, %v9366_v20  ;;  %v9441_v20 = vadd.f32 %v8346_v33, %v8351_v35  ;;  %v9459_v35 = vadd.f32 %v8370_v42, %v8362_v39  ;;  %v3496_v39 = vld [vmem:[%s15045_s4 + $0xe0] sm:$0xff]  ;;  %v3495_v42 = vld [vmem:[%s15045_s4 + $0xd8] sm:$0xff] }
 0x250   : > { %3683 = vperm.xlu2 %7695, %v3491_v44   ;;  %v9386_v44 = vadd.f32 %v8467_v30, %v8355_v37  ;;  %v1768_v30 = vmul.f32 %v9374_v54, %v9374_v54  ;;  %v9422_v16 = vpop.permute.xlu2 %2533 }
 0x251   : > { %3678 = vperm.xlu1 %7694, %v3490_v56   ;;  %3673 = vperm.xlu0 %7693, %v3489_v0   ;;  %v3494_v0 = vld [vmem:[%s15045_s4 + $0xd0] sm:$0xff]  ;;  %v1971_v29 = vadd.f32 %v1970_v34, %v1785_v11  ;;  %15759 = vst [vmem:[#allocation165_spill] sm:$0xff] %v9422_v16  ;;  %v9432_v11 = vadd.f32 %v8324_v25, %v8322_v24  ;;  %v9434_v14 = vpop.permute.xlu1 %2558  ;;  %v9443_v19 = vpop.permute.xlu0 %2538 }
 0x252   : > { %v9376_v63 = vpop.f32.mrf.mxu0  ;;  %15755 = vst [vmem:[#allocation161_spill] sm:$0xff] %v9386_v44  ;;  %v9396_v56 = vpop.f32.mrf.mxu1  ;;  %v1787_v12 = vmul.f32 %v9386_v44, %v9386_v44  ;;  %v1894_v46 = vadd.f32 %v1768_v30, %v1766_v18  ;;  %v1772_v16 = vmul.f32 %v9407_v61, %v9407_v61  ;;  %v1704_v24 = vadd.f32 %v1703_v17, %v9386_v44  ;;  %v3497_v17 = vld [vmem:[%s15045_s4 + $0xe8] sm:$0xff] }
 0x253   : > { %15760 = vst [vmem:[#allocation166_spill] sm:$0xff] %v9432_v11  ;;  %v9452_v30 = vadd.f32 %v8513_v2, %v8416_v59  ;;  %v1774_v33 = vmul.f32 %v9432_v11, %v9432_v11  ;;  %v15818_v44 = vld [vmem:[#allocation42_spill] sm:$0xff] }
 0x254   : > { %15761 = vst [vmem:[#allocation167_spill] sm:$0xff] %v9434_v14  ;;  %v1972_v25 = vadd.f32 %v1971_v29, %v1787_v12  ;;  %v9471_v12 = vadd.f32 %v8394_v51, %v8329_v27 }
 0x255   : > { %7040 = vmatmul.msk.f32.gmra.mxu0 %vm919_vm0, %v404_v23  ;;  %7120 = vmatmul.msk.f32.gmra.mxu1 %vm919_vm0, %v404_v23  ;;  %v1626_v23 = vadd.f32 %v9374_v54, %v9390_v3  ;;  %15762 = vst [vmem:[#allocation168_spill] sm:$0xff] %v9441_v20 }
 0x256   : > { %15763 = vst [vmem:[#allocation169_spill] sm:$0xff] %v9443_v19 }
 0x257   : > { %v1627_v34 = vadd.f32 %v1626_v23, %v9394_v28  ;;  %15764 = vst [vmem:[#allocation170_spill] sm:$0xff] %v9452_v30  ;;  %v1705_v23 = vadd.f32 %v1704_v24, %v9420_v48  ;;  %v15905_v28 = vld [vmem:[#allocation27_spill] sm:$0xff] }
 0x258   : > { %3698 = vperm.xlu2 %7695, %v3494_v0   ;;  %v1789_v0 = vmul.f32 %v9420_v48, %v9420_v48  ;;  %15765 = vst [vmem:[#allocation171_spill] sm:$0xff] %v9459_v35  ;;  %v9493_v24 = vpop.permute.xlu2 %2548 }
 0x259   : > { %3693 = vperm.xlu1 %7694, %v3493_v9   ;;  %3688 = vperm.xlu0 %7693, %v3492_v10   ;;  %v1895_v9 = vadd.f32 %v1894_v46, %v1770_v5  ;;  %v1628_v10 = vadd.f32 %v1627_v34, %v9407_v61  ;;  %v1776_v5 = vmul.f32 %v9441_v20, %v9441_v20 }
 0x25a   : > { %v9445_v36 = vpop.f32.mrf.mxu0  ;;  %v9461_v18 = vpop.f32.mrf.mxu1  ;;  %15766 = vst [vmem:[#allocation172_spill] sm:$0xff] %v9471_v12  ;;  %v1791_v46 = vmul.f32 %v9452_v30, %v9452_v30  ;;  %v9484_v34 = vadd.f32 %v8537_v40, %v8390_v49  ;;  %v1780_v40 = vmul.f32 %v9471_v12, %v9471_v12 }
 0x25b   : > { %v1896_v29 = vadd.f32 %v1895_v9, %v1772_v16  ;;  %v1629_v2 = vadd.f32 %v1628_v10, %v9432_v11  ;;  %v1973_v16 = vadd.f32 %v1972_v25, %v1789_v0  ;;  %v1778_v9 = vmul.f32 %v9459_v35, %v9459_v35  ;;  %15769 = vst [vmem:[#allocation175_spill] sm:$0xff] %v9493_v24 }
 0x25c   : > { %15767 = vst [vmem:[#allocation173_spill] sm:$0xff] %v9484_v34  ;;  %v9491_v10 = vadd.f32 %v8418_v60, %v8377_v45  ;;  %v1706_v45 = vadd.f32 %v1705_v23, %v9452_v30  ;;  %v9520_v23 = vpop.permute.xlu0 %2553 }
 0x25d   : > { %v1897_v27 = vadd.f32 %v1896_v29, %v1774_v33  ;;  %v1630_v51 = vadd.f32 %v1629_v2, %v9441_v20  ;;  %v9500_v33 = vadd.f32 %v8438_v7, %v8392_v50  ;;  %v1974_v60 = vadd.f32 %v1973_v16, %v1791_v46  ;;  %15774 = vst [vmem:[#allocation180_spill] sm:$0xff] %v9520_v23 }
 0x25e   : > { %15768 = vst [vmem:[#allocation174_spill] sm:$0xff] %v9491_v10  ;;  %v9509_v2 = vadd.f32 %v8561_v38, %v8436_v6  ;;  %v1782_v50 = vmul.f32 %v9491_v10, %v9491_v10  ;;  %v9518_v7 = vadd.f32 %v8460_v22, %v8355_v37  ;;  %v7121_v38 = vld [vmem:[%s15045_s4 + $0x100] sm:$0xff]  ;;  %v3499_v37 = vld [vmem:[%s15045_s4 + $0xf8] sm:$0xff]  ;;  %v3498_v22 = vld [vmem:[%s15045_s4 + $0xf0] sm:$0xff]  ;;  %v9552_v23 = vadd.f32 %v8508_v62, %v8416_v59 }
 0x25f   : > { %v1898_v25 = vadd.f32 %v1897_v27, %v1776_v5  ;;  %v1631_v0 = vadd.f32 %v1630_v51, %v9459_v35  ;;  %15770 = vst [vmem:[#allocation176_spill] sm:$0xff] %v9500_v33  ;;  %v9511_v5 = vpop.permute.xlu1 %2573  ;;  %v1784_v51 = vmul.f32 %v9500_v33, %v9500_v33  ;;  %v9568_v62 = vadd.f32 %v8603_v55, %v8414_v58  ;;  %v7124_v55 = vld [vmem:[%s15045_s4 + $0x118] sm:$0xff] }
 0x260   : > { %3713 = vperm.xlu2 %7695, %v3497_v17   ;;  %v1793_v17 = vmul.f32 %v9484_v34, %v9484_v34  ;;  %15771 = vst [vmem:[#allocation177_spill] sm:$0xff] %v9509_v2 }
 0x261   : > { %3708 = vperm.xlu1 %7694, %v3496_v39   ;;  %3703 = vperm.xlu0 %7693, %v3495_v42   ;;  %15772 = vst [vmem:[#allocation178_spill] sm:$0xff] %v9511_v5  ;;  %v1899_v39 = vadd.f32 %v1898_v25, %v1778_v9  ;;  %v1632_v42 = vadd.f32 %v1631_v0, %v9471_v12 }
 0x262   : > { %v9502_v29 = vpop.f32.mrf.mxu0  ;;  %15773 = vst [vmem:[#allocation179_spill] sm:$0xff] %v9518_v7  ;;  %v9522_v16 = vpop.f32.mrf.mxu1  ;;  %v9532_v9 = vadd.f32 %v8484_v41, %v8412_v57  ;;  %v1707_v25 = vadd.f32 %v1706_v45, %v9484_v34  ;;  %v1975_v0 = vadd.f32 %v1974_v60, %v1793_v17  ;;  %v9559_v17 = vadd.f32 %v8532_v32, %v8390_v49 }
 0x263   : > { %v1900_v46 = vadd.f32 %v1899_v39, %v1780_v40  ;;  %v1633_v27 = vadd.f32 %v1632_v42, %v9491_v10  ;;  %v1795_v40 = vmul.f32 %v9509_v2, %v9509_v2  ;;  %v9545_v39 = vadd.f32 %v8581_v15, %v8445_v13  ;;  %15777 = vst [vmem:[#allocation183_spill] sm:$0xff] %v9552_v23  ;;  %v15862_v10 = vld [vmem:[#allocation90_spill] sm:$0xff] }
 0x264   : > { %15775 = vst [vmem:[#allocation181_spill] sm:$0xff] %v9532_v9  ;;  %v1786_v42 = vmul.f32 %v9518_v7, %v9518_v7  ;;  %v1788_v15 = vmul.f32 %v9532_v9, %v9532_v9  ;;  %v1790_v49 = vmul.f32 %v9552_v23, %v9552_v23  ;;  %v9577_v32 = vadd.f32 %v8552_v1, %v8436_v6  ;;  %v9593_v6 = vpop.permute.xlu0 %2568  ;;  %v7123_v1 = vld [vmem:[%s15045_s4 + $0x110] sm:$0xff] }
 0x265   : > { %15776 = vst [vmem:[#allocation182_spill] sm:$0xff] %v9545_v39  ;;  %v1901_v57 = vadd.f32 %v1900_v46, %v1782_v50  ;;  %v1634_v41 = vadd.f32 %v1633_v27, %v9500_v33  ;;  %v1708_v46 = vadd.f32 %v1707_v25, %v9509_v2  ;;  %v1976_v27 = vadd.f32 %v1975_v0, %v1795_v40  ;;  %v15803_v2 = vld [vmem:[#allocation36_spill] sm:$0xff]  ;;  %v15861_v33 = vld [vmem:[#allocation22_spill] sm:$0xff] }
 0x266   : > { %15778 = vst [vmem:[#allocation184_spill] sm:$0xff] %v9559_v17  ;;  %v1797_v59 = vmul.f32 %v9545_v39, %v9545_v39  ;;  %v9860_v12 = vadd.f32 %v15862_v10, %v15861_v33 }
 0x267   : > { %v1902_v45 = vadd.f32 %v1901_v57, %v1784_v51  ;;  %v1635_v60 = vadd.f32 %v1634_v41, %v9518_v7  ;;  %15779 = vst [vmem:[#allocation185_spill] sm:$0xff] %v9568_v62  ;;  %v9581_v25 = vpop.permute.xlu1 %2588  ;;  %v1792_v57 = vmul.f32 %v9559_v17, %v9559_v17  ;;  %v9591_v41 = vadd.f32 %v8574_v8, %v8445_v13 }
 0x268   : > { %5130 = vperm.xlu2 %7695, %v7121_v38   ;;  %v9570_v38 = vpop.permute.xlu2 %2563  ;;  %15781 = vst [vmem:[#allocation187_spill] sm:$0xff] %v9577_v32  ;;  %v9606_v13 = vadd.f32 %v8627_v31, %v8465_v26 }
 0x269   : > { %3723 = vperm.xlu1 %7694, %v3499_v37   ;;  %3718 = vperm.xlu0 %7693, %v3498_v22   ;;  %15780 = vst [vmem:[#allocation186_spill] sm:$0xff] %v9570_v38  ;;  %v1903_v51 = vadd.f32 %v1902_v45, %v1786_v42  ;;  %v1636_v37 = vadd.f32 %v1635_v60, %v9532_v9  ;;  %v7122_v42 = vld [vmem:[%s15045_s4 + $0x108] sm:$0xff] }
 0x26a   : > { %v9561_v50 = vpop.f32.mrf.mxu0  ;;  %v9579_v22 = vpop.f32.mrf.mxu1  ;;  %15782 = vst [vmem:[#allocation188_spill] sm:$0xff] %v9581_v25  ;;  %v1709_v45 = vadd.f32 %v1708_v46, %v9545_v39  ;;  %v1977_v60 = vadd.f32 %v1976_v27, %v1797_v59  ;;  %v1796_v31 = vmul.f32 %v9591_v41, %v9591_v41  ;;  %v15788_v59 = vld [vmem:[#allocation25_spill] sm:$0xff] }
 0x26b   : > { %v1904_v0 = vadd.f32 %v1903_v51, %v1788_v15  ;;  %v1637_v40 = vadd.f32 %v1636_v37, %v9552_v23  ;;  %15783 = vst [vmem:[#allocation189_spill] sm:$0xff] %v9591_v41  ;;  %v1799_v15 = vmul.f32 %v9568_v62, %v9568_v62  ;;  %v1794_v37 = vmul.f32 %v9577_v32, %v9577_v32  ;;  %v15802_v39 = vld [vmem:[#allocation9_spill] sm:$0xff] }
 0x26c   : > { %15784 = vst [vmem:[#allocation190_spill] sm:$0xff] %v9593_v6  ;;  %v15786_v6 = vld [vmem:[#allocation21_spill] sm:$0xff]  ;;  %v9672_v34 = vadd.f32 %v15803_v2, %v15802_v39 }
 0x26d   : > { %15785 = vst [vmem:[#allocation191_spill] sm:$0xff] %v9606_v13  ;;  %v1905_v8 = vadd.f32 %v1904_v0, %v1790_v49  ;;  %v1638_v51 = vadd.f32 %v1637_v40, %v9559_v17  ;;  %v9613_v25 = vadd.f32 %v15786_v6, %v8414_v58  ;;  %v9620_v49 = vadd.f32 %v15788_v59, %v8465_v26  ;;  %v15791_v6 = vld [vmem:[#allocation30_spill] sm:$0xff]  ;;  %v15793_v26 = vld [vmem:[#allocation29_spill] sm:$0xff] }
 0x26e   : > { %v1710_v40 = vadd.f32 %v1709_v45, %v9568_v62  ;;  %v1978_v24 = vadd.f32 %v1977_v60, %v1799_v15  ;;  %v1801_v58 = vmul.f32 %v9606_v13, %v9606_v13  ;;  %v7127_v60 = vld [vmem:[%s15045_s4 + $0x130] sm:$0xff]  ;;  %15804 = vst [vmem:[#allocation9_spill] sm:$0xff] %v9672_v34 }
 0x26f   : > { %15787 = vst [vmem:[#allocation21_spill] sm:$0xff] %v9613_v25  ;;  %v1906_v46 = vadd.f32 %v1905_v8, %v1792_v57  ;;  %v1639_v27 = vadd.f32 %v1638_v51, %v9577_v32  ;;  %v1798_v8 = vmul.f32 %v9613_v25, %v9613_v25  ;;  %v15839_v32 = vld [vmem:[#allocation73_spill] sm:$0xff] }
 0x270   : > { %5145 = vperm.xlu2 %7695, %v7124_v55   ;;  %15789 = vst [vmem:[#allocation25_spill] sm:$0xff] %v9620_v49  ;;  %v15790_v55 = vld [vmem:[#allocation8_spill] sm:$0xff]  ;;  %v9640_v45 = vpop.permute.xlu2 %2578 }
 0x271   : > { %5140 = vperm.xlu1 %7694, %v7123_v1   ;;  %5135 = vperm.xlu0 %7693, %v7122_v42   ;;  %v9629_v57 = vadd.f32 %v15791_v6, %v15790_v55  ;;  %v1907_v1 = vadd.f32 %v1906_v46, %v1794_v37  ;;  %v1640_v42 = vadd.f32 %v1639_v27, %v9591_v41  ;;  %v15796_v27 = vld [vmem:[#allocation6_spill] sm:$0xff]  ;;  %v15797_v6 = vld [vmem:[#allocation32_spill] sm:$0xff] }
 0x272   : > { %v9622_v0 = vpop.f32.mrf.mxu0  ;;  %v9636_v51 = vadd.f32 %v15793_v26, %v15790_v55  ;;  %v9638_v59 = vpop.f32.mrf.mxu1  ;;  %15795 = vst [vmem:[#allocation29_spill] sm:$0xff] %v9640_v45  ;;  %v1800_v46 = vmul.f32 %v9620_v49, %v9620_v49  ;;  %v9650_v5 = vadd.f32 %v15797_v6, %v15796_v27  ;;  %v7126_v55 = vld [vmem:[%s15045_s4 + $0x128] sm:$0xff]  ;;  %v7125_v26 = vld [vmem:[%s15045_s4 + $0x120] sm:$0xff]  ;;  %v1711_v45 = vadd.f32 %v1710_v40, %v9606_v13 }
 0x273   : > { %15792 = vst [vmem:[#allocation8_spill] sm:$0xff] %v9629_v57  ;;  %v1908_v15 = vadd.f32 %v1907_v1, %v1796_v31  ;;  %v1641_v37 = vadd.f32 %v1640_v42, %v9613_v25  ;;  %v1979_v31 = vadd.f32 %v1978_v24, %v1801_v58  ;;  %v1803_v1 = vmul.f32 %v9629_v57, %v9629_v57  ;;  %v15799_v42 = vld [vmem:[#allocation35_spill] sm:$0xff]  ;;  %v9665_v6 = vpop.permute.xlu1 %2836  ;;  %v9674_v24 = vpop.permute.xlu0 %2583  ;;  %v15821_v25 = vld [vmem:[#allocation54_spill] sm:$0xff] }
 0x274   : > { %15794 = vst [vmem:[#allocation30_spill] sm:$0xff] %v9636_v51  ;;  %v9663_v38 = vadd.f32 %v15799_v42, %v15796_v27  ;;  %v1802_v62 = vmul.f32 %v9636_v51, %v9636_v51  ;;  %v1712_v2 = vadd.f32 %v1711_v45, %v9629_v57 }
 0x275   : > { %15798 = vst [vmem:[#allocation6_spill] sm:$0xff] %v9650_v5  ;;  %v1909_v14 = vadd.f32 %v1908_v15, %v1798_v8  ;;  %v1642_v19 = vadd.f32 %v1641_v37, %v9620_v49  ;;  %v1804_v8 = vmul.f32 %v9650_v5, %v9650_v5  ;;  %v15806_v15 = vld [vmem:[#allocation11_spill] sm:$0xff]  ;;  %v15807_v37 = vld [vmem:[#allocation41_spill] sm:$0xff]  ;;  %v15820_v49 = vld [vmem:[#allocation14_spill] sm:$0xff] }
 0x276   : > { %15800 = vst [vmem:[#allocation32_spill] sm:$0xff] %v9663_v38  ;;  %v9681_v27 = vadd.f32 %v15807_v37, %v15806_v15  ;;  %v1713_v57 = vadd.f32 %v1712_v2, %v9663_v38  ;;  %v9730_v41 = vadd.f32 %v15821_v25, %v15820_v49 }
 0x277   : > { %15801 = vst [vmem:[#allocation35_spill] sm:$0xff] %v9665_v6  ;;  %v1910_v40 = vadd.f32 %v1909_v14, %v1800_v46  ;;  %v1643_v58 = vadd.f32 %v1642_v19, %v9636_v51  ;;  %v1980_v6 = vadd.f32 %v1979_v31, %v1803_v1  ;;  %v1806_v46 = vmul.f32 %v9672_v34, %v9672_v34  ;;  %v7130_v31 = vld [vmem:[%s15045_s4 + $0x148] sm:$0xff] }
 0x278   : > { %15805 = vst [vmem:[#allocation36_spill] sm:$0xff] %v9674_v24  ;;  %5160 = vperm.xlu2 %7695, %v7127_v60   ;;  %v1805_v60 = vmul.f32 %v9663_v38, %v9663_v38  ;;  %v15812_v24 = vld [vmem:[#allocation46_spill] sm:$0xff]  ;;  %v9720_v48 = vpop.permute.xlu2 %2593 }
 0x279   : > { %5155 = vperm.xlu1 %7694, %v7126_v55   ;;  %5150 = vperm.xlu0 %7693, %v7125_v26   ;;  %15808 = vst [vmem:[#allocation11_spill] sm:$0xff] %v9681_v27  ;;  %v15809_v55 = vld [vmem:[#allocation38_spill] sm:$0xff]  ;;  %v1911_v19 = vadd.f32 %v1910_v40, %v1802_v62  ;;  %v15811_v26 = vld [vmem:[#allocation7_spill] sm:$0xff]  ;;  %v1644_v45 = vadd.f32 %v1643_v58, %v9650_v5  ;;  %v15814_v62 = vld [vmem:[#allocation12_spill] sm:$0xff] }
 0x27a   : > { %v9683_v42 = vpop.f32.mrf.mxu0  ;;  %v9690_v14 = vadd.f32 %v15809_v55, %v15802_v39  ;;  %v9696_v37 = vadd.f32 %v15812_v24, %v15811_v26  ;;  %v9698_v13 = vpop.f32.mrf.mxu1  ;;  %v1808_v39 = vmul.f32 %v9681_v27, %v9681_v27  ;;  %v15815_v40 = vld [vmem:[#allocation51_spill] sm:$0xff]  ;;  %v7129_v24 = vld [vmem:[%s15045_s4 + $0x140] sm:$0xff]  ;;  %v7128_v58 = vld [vmem:[%s15045_s4 + $0x138] sm:$0xff]  ;;  %v1981_v30 = vadd.f32 %v1980_v6, %v1805_v60  ;;  %15817 = vst [vmem:[#allocation46_spill] sm:$0xff] %v9720_v48 }
 0x27b   : > { %v1912_v1 = vadd.f32 %v1911_v19, %v1804_v8  ;;  %v9708_v55 = vadd.f32 %v15815_v40, %v15814_v62  ;;  %v1645_v8 = vadd.f32 %v1644_v45, %v9672_v34  ;;  %v9724_v5 = vadd.f32 %v15818_v44, %v15806_v15  ;;  %15822 = vst [vmem:[#allocation51_spill] sm:$0xff] %v9730_v41  ;;  %v9733_v2 = vpop.permute.xlu1 %2921  ;;  %v15824_v44 = vld [vmem:[#allocation10_spill] sm:$0xff]  ;;  %v15838_v34 = vld [vmem:[#allocation13_spill] sm:$0xff] }
 0x27c   : > { %15810 = vst [vmem:[#allocation41_spill] sm:$0xff] %v9690_v14  ;;  %v1807_v19 = vmul.f32 %v9690_v14, %v9690_v14  ;;  %v1810_v51 = vmul.f32 %v9696_v37, %v9696_v37  ;;  %v15825_v15 = vld [vmem:[#allocation58_spill] sm:$0xff]  ;;  %v1714_v25 = vadd.f32 %v1713_v57, %v9690_v14  ;;  %v7132_v14 = vld [vmem:[%s15045_s4 + $0x158] sm:$0xff]  ;;  %v9787_v17 = vadd.f32 %v15839_v32, %v15838_v34 }
 0x27d   : > { %15813 = vst [vmem:[#allocation38_spill] sm:$0xff] %v9696_v37  ;;  %v1913_v40 = vadd.f32 %v1912_v1, %v1806_v46  ;;  %v1646_v6 = vadd.f32 %v1645_v8, %v9681_v27  ;;  %v1812_v46 = vmul.f32 %v9708_v55, %v9708_v55  ;;  %v9739_v45 = vadd.f32 %v15825_v15, %v15824_v44  ;;  %v9741_v1 = vpop.permute.xlu0 %2598  ;;  %v7133_v57 = vld [vmem:[%s15045_s4 + $0x160] sm:$0xff] }
 0x27e   : > { %15816 = vst [vmem:[#allocation7_spill] sm:$0xff] %v9708_v55  ;;  %v15844_v32 = vld [vmem:[#allocation18_spill] sm:$0xff] }
 0x27f   : > { %15819 = vst [vmem:[#allocation12_spill] sm:$0xff] %v9724_v5  ;;  %v1914_v60 = vadd.f32 %v1913_v40, %v1808_v39  ;;  %v1647_v8 = vadd.f32 %v1646_v6, %v9696_v37  ;;  %v15828_v40 = vld [vmem:[#allocation15_spill] sm:$0xff]  ;;  %v15833_v6 = vld [vmem:[#allocation17_spill] sm:$0xff] }
 0x280   : > { %5175 = vperm.xlu2 %7695, %v7130_v31   ;;  %15823 = vst [vmem:[#allocation42_spill] sm:$0xff] %v9733_v2  ;;  %v1982_v31 = vadd.f32 %v1981_v30, %v1807_v19  ;;  %v15829_v2 = vld [vmem:[#allocation63_spill] sm:$0xff]  ;;  %v1816_v19 = vmul.f32 %v9739_v45, %v9739_v45 }
 0x281   : > { %5170 = vperm.xlu1 %7694, %v7129_v24   ;;  %5165 = vperm.xlu0 %7693, %v7128_v58   ;;  %15826 = vst [vmem:[#allocation14_spill] sm:$0xff] %v9739_v45  ;;  %v1809_v24 = vmul.f32 %v9724_v5, %v9724_v5  ;;  %v1915_v39 = vadd.f32 %v1914_v60, %v1810_v51  ;;  %v15834_v60 = vld [vmem:[#allocation68_spill] sm:$0xff] }
 0x282   : > { %15827 = vst [vmem:[#allocation54_spill] sm:$0xff] %v9741_v1  ;;  %v9743_v48 = vpop.f32.mrf.mxu0  ;;  %v1814_v58 = vmul.f32 %v9730_v41, %v9730_v41  ;;  %v9753_v15 = vadd.f32 %v15829_v2, %v15828_v40  ;;  %v9755_v38 = vpop.f32.mrf.mxu1  ;;  %v15831_v1 = vld [vmem:[#allocation47_spill] sm:$0xff]  ;;  %v1648_v30 = vadd.f32 %v1647_v8, %v9708_v55  ;;  %v9769_v2 = vadd.f32 %v15834_v60, %v15833_v6  ;;  %v15836_v8 = vld [vmem:[#allocation52_spill] sm:$0xff] }
 0x283   : > { %v9759_v27 = vadd.f32 %v15831_v1, %v15811_v26  ;;  %v1916_v51 = vadd.f32 %v1915_v39, %v1812_v46  ;;  %v7131_v26 = vld [vmem:[%s15045_s4 + $0x150] sm:$0xff]  ;;  %v1715_v1 = vadd.f32 %v1714_v25, %v9724_v5  ;;  %v9780_v46 = vadd.f32 %v15836_v8, %v15814_v62  ;;  %15840 = vst [vmem:[#allocation47_spill] sm:$0xff] %v9787_v17  ;;  %v15841_v25 = vld [vmem:[#allocation57_spill] sm:$0xff] }
 0x284   : > { %15830 = vst [vmem:[#allocation10_spill] sm:$0xff] %v9753_v15  ;;  %v1649_v39 = vadd.f32 %v1648_v30, %v9730_v41  ;;  %v1983_v55 = vadd.f32 %v1982_v31, %v1809_v24  ;;  %v1818_v60 = vmul.f32 %v9753_v15, %v9753_v15  ;;  %v9793_v5 = vadd.f32 %v15841_v25, %v15820_v49  ;;  %v9796_v30 = vpop.permute.xlu2 %2841  ;;  %v15847_v8 = vld [vmem:[#allocation60_spill] sm:$0xff] }
 0x285   : > { %15832 = vst [vmem:[#allocation58_spill] sm:$0xff] %v9759_v27  ;;  %v1917_v37 = vadd.f32 %v1916_v51, %v1814_v58  ;;  %v1811_v23 = vmul.f32 %v9759_v27, %v9759_v27  ;;  %v1820_v24 = vmul.f32 %v9769_v2, %v9769_v2  ;;  %v15845_v58 = vld [vmem:[#allocation76_spill] sm:$0xff]  ;;  %v1813_v49 = vmul.f32 %v9780_v46, %v9780_v46 }
 0x286   : > { %15835 = vst [vmem:[#allocation15_spill] sm:$0xff] %v9769_v2  ;;  %v1650_v62 = vadd.f32 %v1649_v39, %v9739_v45  ;;  %v9810_v39 = vadd.f32 %v15847_v8, %v15824_v44  ;;  %v15850_v25 = vld [vmem:[#allocation20_spill] sm:$0xff]  ;;  %v9821_v45 = vpop.permute.xlu0 %2916  ;;  %v1716_v9 = vadd.f32 %v1715_v1, %v9759_v27  ;;  %v15857_v1 = vld [vmem:[#allocation85_spill] sm:$0xff] }
 0x287   : > { %15837 = vst [vmem:[#allocation63_spill] sm:$0xff] %v9780_v46  ;;  %v1918_v31 = vadd.f32 %v1917_v37, %v1816_v19  ;;  %v1822_v19 = vmul.f32 %v9787_v17, %v9787_v17  ;;  %v1984_v44 = vadd.f32 %v1983_v55, %v1811_v23  ;;  %v7135_v55 = vld [vmem:[%s15045_s4 + $0x170] sm:$0xff] }
 0x288   : > { %5190 = vperm.xlu2 %7695, %v7133_v57   ;;  %15842 = vst [vmem:[#allocation17_spill] sm:$0xff] %v9793_v5  ;;  %v9802_v57 = vadd.f32 %v15845_v58, %v15844_v32  ;;  %v15851_v58 = vld [vmem:[#allocation80_spill] sm:$0xff]  ;;  %v1717_v27 = vadd.f32 %v1716_v9, %v9780_v46 }
 0x289   : > { %15843 = vst [vmem:[#allocation68_spill] sm:$0xff] %v9796_v30  ;;  %5185 = vperm.xlu1 %7694, %v7132_v14   ;;  %5180 = vperm.xlu0 %7693, %v7131_v26   ;;  %v1651_v14 = vadd.f32 %v1650_v62, %v9753_v15  ;;  %v9813_v26 = vpop.permute.xlu1 %2906  ;;  %v1919_v37 = vadd.f32 %v1918_v31, %v1818_v60  ;;  %v7136_v60 = vld [vmem:[%s15045_s4 + $0x178] sm:$0xff] }
 0x28a   : > { %15846 = vst [vmem:[#allocation52_spill] sm:$0xff] %v9802_v57  ;;  %v9804_v51 = vpop.f32.mrf.mxu0  ;;  %v9819_v30 = vadd.f32 %v15851_v58, %v15850_v25  ;;  %v9823_v41 = vpop.f32.mrf.mxu1  ;;  %v1815_v62 = vmul.f32 %v9793_v5, %v9793_v5  ;;  %v15854_v31 = vld [vmem:[#allocation64_spill] sm:$0xff]  ;;  %v1718_v9 = vadd.f32 %v1717_v27, %v9793_v5  ;;  %v15871_v5 = vld [vmem:[#allocation98_spill] sm:$0xff] }
 0x28b   : > { %15848 = vst [vmem:[#allocation13_spill] sm:$0xff] %v9810_v39  ;;  %v1652_v8 = vadd.f32 %v1651_v14, %v9769_v2  ;;  %v9834_v58 = vadd.f32 %v15854_v31, %v15828_v40  ;;  %v15856_v15 = vld [vmem:[#allocation16_spill] sm:$0xff]  ;;  %v7134_v14 = vld [vmem:[%s15045_s4 + $0x168] sm:$0xff]  ;;  %v1985_v40 = vadd.f32 %v1984_v44, %v1813_v49  ;;  %v15859_v31 = vld [vmem:[#allocation69_spill] sm:$0xff] }
 0x28c   : > { %15849 = vst [vmem:[#allocation73_spill] sm:$0xff] %v9813_v26  ;;  %v1920_v26 = vadd.f32 %v1919_v37, %v1820_v24  ;;  %v9840_v23 = vadd.f32 %v15857_v1, %v15856_v15  ;;  %v1817_v24 = vmul.f32 %v9810_v39, %v9810_v39  ;;  %v9854_v1 = vadd.f32 %v15859_v31, %v15833_v6  ;;  %v15865_v31 = vld [vmem:[#allocation95_spill] sm:$0xff] }
 0x28d   : > { %15852 = vst [vmem:[#allocation57_spill] sm:$0xff] %v9819_v30  ;;  %v1653_v37 = vadd.f32 %v1652_v8, %v9787_v17  ;;  %v1826_v7 = vmul.f32 %v9819_v30, %v9819_v30  ;;  %v1986_v49 = vadd.f32 %v1985_v40, %v1815_v62  ;;  %v1819_v6 = vmul.f32 %v9834_v58, %v9834_v58  ;;  %v15883_v17 = vld [vmem:[#allocation107_spill] sm:$0xff] }
 0x28e   : > { %15853 = vst [vmem:[#allocation18_spill] sm:$0xff] %v9821_v45  ;;  %v1824_v45 = vmul.f32 %v9802_v57, %v9802_v57  ;;  %v1921_v2 = vadd.f32 %v1920_v26, %v1822_v19  ;;  %v1828_v26 = vmul.f32 %v9840_v23, %v9840_v23  ;;  %v15864_v19 = vld [vmem:[#allocation24_spill] sm:$0xff]  ;;  %v1719_v27 = vadd.f32 %v1718_v9, %v9810_v39 }
 0x28f   : > { %15855 = vst [vmem:[#allocation76_spill] sm:$0xff] %v9834_v58  ;;  %v1654_v44 = vadd.f32 %v1653_v37, %v9802_v57  ;;  %v9870_v46 = vadd.f32 %v15865_v31, %v15864_v19  ;;  %v1987_v62 = vadd.f32 %v1986_v49, %v1817_v24  ;;  %v1830_v37 = vmul.f32 %v9860_v12, %v9860_v12  ;;  %v15870_v31 = vld [vmem:[#allocation19_spill] sm:$0xff] }
 0x290   : > { %15858 = vst [vmem:[#allocation60_spill] sm:$0xff] %v9840_v23  ;;  %5205 = vperm.xlu2 %7695, %v7136_v60   ;;  %v1922_v8 = vadd.f32 %v1921_v2, %v1824_v45  ;;  %v9875_v60 = vpop.permute.xlu2 %2826  ;;  %v1821_v2 = vmul.f32 %v9854_v1, %v9854_v1  ;;  %v9888_v57 = vadd.f32 %v15871_v5, %v15870_v31  ;;  %v9903_v5 = vpop.permute.xlu0 %2831 }
 0x291   : > { %15860 = vst [vmem:[#allocation20_spill] sm:$0xff] %v9854_v1  ;;  %5200 = vperm.xlu1 %7694, %v7135_v55   ;;  %5195 = vperm.xlu0 %7693, %v7134_v14   ;;  %v15868_v55 = vld [vmem:[#allocation74_spill] sm:$0xff]  ;;  %v1655_v45 = vadd.f32 %v1654_v44, %v9819_v30  ;;  %v1720_v9 = vadd.f32 %v1719_v27, %v9834_v58 }
 0x292   : > { %15863 = vst [vmem:[#allocation80_spill] sm:$0xff] %v9860_v12  ;;  %v9872_v10 = vpop.f32.mrf.mxu0  ;;  %v9879_v14 = vadd.f32 %v15868_v55, %v15838_v34  ;;  %v1923_v40 = vadd.f32 %v1922_v8, %v1826_v7  ;;  %v9890_v24 = vpop.f32.mrf.mxu1  ;;  %v15873_v34 = vld [vmem:[#allocation79_spill] sm:$0xff]  ;;  %v1988_v8 = vadd.f32 %v1987_v62, %v1819_v6  ;;  %v1832_v39 = vmul.f32 %v9870_v46, %v9870_v46  ;;  %v15877_v27 = vld [vmem:[#allocation26_spill] sm:$0xff] }
 0x293   : > { %15866 = vst [vmem:[#allocation64_spill] sm:$0xff] %v9870_v46  ;;  %v9895_v49 = vadd.f32 %v15873_v34, %v15844_v32  ;;  %v1656_v44 = vadd.f32 %v1655_v45, %v9840_v23  ;;  %v9898_v55 = vpop.permute.xlu1 %2821  ;;  %v7139_v7 = vld [vmem:[%s15045_s4 + $0x190] sm:$0xff]  ;;  %v15878_v58 = vld [vmem:[#allocation102_spill] sm:$0xff]  ;;  %v1721_v6 = vadd.f32 %v1720_v9, %v9854_v1 }
 0x294   : > { %15867 = vst [vmem:[#allocation16_spill] sm:$0xff] %v9875_v60  ;;  %v1924_v60 = vadd.f32 %v1923_v40, %v1828_v26  ;;  %v9909_v30 = vadd.f32 %v15878_v58, %v15877_v27  ;;  %v7138_v32 = vld [vmem:[%s15045_s4 + $0x188] sm:$0xff]  ;;  %v7137_v45 = vld [vmem:[%s15045_s4 + $0x180] sm:$0xff]  ;;  %v1823_v26 = vmul.f32 %v9879_v14, %v9879_v14  ;;  %v1989_v34 = vadd.f32 %v1988_v8, %v1821_v2  ;;  %v15882_v23 = vld [vmem:[#allocation28_spill] sm:$0xff] }
 0x295   : > { %15869 = vst [vmem:[#allocation85_spill] sm:$0xff] %v9879_v14  ;;  %v15880_v62 = vld [vmem:[#allocation82_spill] sm:$0xff]  ;;  %v1657_v58 = vadd.f32 %v1656_v44, %v9860_v12  ;;  %v9929_v35 = vadd.f32 %v15883_v17, %v15882_v23  ;;  %v1825_v9 = vmul.f32 %v9895_v49, %v9895_v49  ;;  %v15887_v17 = vld [vmem:[#allocation23_spill] sm:$0xff]  ;;  %v15888_v44 = vld [vmem:[#allocation112_spill] sm:$0xff] }
 0x296   : > { %15872 = vst [vmem:[#allocation69_spill] sm:$0xff] %v9888_v57  ;;  %v9922_v40 = vadd.f32 %v15880_v62, %v15850_v25  ;;  %v15885_v1 = vld [vmem:[#allocation86_spill] sm:$0xff]  ;;  %v1990_v62 = vadd.f32 %v1989_v34, %v1823_v26 }
 0x297   : > { %15874 = vst [vmem:[#allocation22_spill] sm:$0xff] %v9895_v49  ;;  %v9935_v20 = vadd.f32 %v15885_v1, %v15856_v15  ;;  %v1658_v25 = vadd.f32 %v1657_v58, %v9870_v46  ;;  %v15890_v1 = vld [vmem:[#allocation91_spill] sm:$0xff]  ;;  %v15893_v58 = vld [vmem:[#allocation117_spill] sm:$0xff] }
 0x298   : > { %15875 = vst [vmem:[#allocation90_spill] sm:$0xff] %v9898_v55  ;;  %v1834_v55 = vmul.f32 %v9888_v57, %v9888_v57  ;;  %5220 = vperm.xlu2 %7695, %v7139_v7   ;;  %v9943_v7 = vadd.f32 %v15888_v44, %v15887_v17  ;;  %v1827_v15 = vmul.f32 %v9922_v40, %v9922_v40  ;;  %v9962_v26 = vpop.permute.xlu2 %2911 }
 0x299   : > { %15876 = vst [vmem:[#allocation24_spill] sm:$0xff] %v9903_v5  ;;  %v1925_v5 = vadd.f32 %v1924_v60, %v1830_v37  ;;  %5215 = vperm.xlu1 %7694, %v7138_v32   ;;  %5210 = vperm.xlu0 %7693, %v7137_v45   ;;  %v1722_v60 = vadd.f32 %v1721_v6, %v9879_v14  ;;  %v15892_v6 = vld [vmem:[#allocation31_spill] sm:$0xff] }
 0x29a   : > { %15879 = vst [vmem:[#allocation95_spill] sm:$0xff] %v9909_v30  ;;  %v1836_v37 = vmul.f32 %v9909_v30, %v9909_v30  ;;  %v9945_v8 = vpop.f32.mrf.mxu0  ;;  %v9951_v32 = vadd.f32 %v15890_v1, %v15861_v33  ;;  %v1659_v45 = vadd.f32 %v1658_v25, %v9888_v57  ;;  %v9958_v44 = vadd.f32 %v15893_v58, %v15892_v6  ;;  %v9960_v14 = vpop.f32.mrf.mxu1  ;;  %v15898_v57 = vld [vmem:[#allocation34_spill] sm:$0xff] }
 0x29b   : > { %15881 = vst [vmem:[#allocation74_spill] sm:$0xff] %v9922_v40  ;;  %v1926_v2 = vadd.f32 %v1925_v5, %v1832_v39  ;;  %v1838_v5 = vmul.f32 %v9929_v35, %v9929_v35  ;;  %v1723_v34 = vadd.f32 %v1722_v60, %v9895_v49  ;;  %v1991_v46 = vadd.f32 %v1990_v62, %v1825_v9  ;;  %v15899_v60 = vld [vmem:[#allocation120_spill] sm:$0xff]  ;;  %v7141_v62 = vld [vmem:[%s15045_s4 + $0x1a0] sm:$0xff] }
 0x29c   : > { %15884 = vst [vmem:[#allocation19_spill] sm:$0xff] %v9929_v35  ;;  %v1829_v33 = vmul.f32 %v9935_v20, %v9935_v20  ;;  %v1660_v25 = vadd.f32 %v1659_v45, %v9909_v30  ;;  %v9979_v9 = vadd.f32 %v15899_v60, %v15898_v57  ;;  %v7140_v45 = vld [vmem:[%s15045_s4 + $0x198] sm:$0xff]  ;;  %v9993_v60 = vpop.permute.xlu0 %2816  ;;  %v1842_v61 = vmul.f32 %v9958_v44, %v9958_v44 }
 0x29d   : > { %15886 = vst [vmem:[#allocation98_spill] sm:$0xff] %v9935_v20  ;;  %v1927_v39 = vadd.f32 %v1926_v2, %v1834_v55  ;;  %v7142_v55 = vld [vmem:[%s15045_s4 + $0x1a8] sm:$0xff]  ;;  %v15896_v2 = vld [vmem:[#allocation96_spill] sm:$0xff]  ;;  %v1724_v49 = vadd.f32 %v1723_v34, %v9922_v40  ;;  %v15903_v30 = vld [vmem:[#allocation101_spill] sm:$0xff] }
 0x29e   : > { %15889 = vst [vmem:[#allocation79_spill] sm:$0xff] %v9943_v7  ;;  %v9973_v1 = vadd.f32 %v15896_v2, %v15864_v19  ;;  %v1992_v19 = vadd.f32 %v1991_v46, %v1827_v15  ;;  %v1661_v2 = vadd.f32 %v1660_v25, %v9929_v35  ;;  %v9997_v12 = vadd.f32 %v15903_v30, %v15870_v31  ;;  %v15906_v34 = vld [vmem:[#allocation124_spill] sm:$0xff]  ;;  %v15922_v35 = vld [vmem:[#allocation43_spill] sm:$0xff] }
 0x29f   : > { %15891 = vst [vmem:[#allocation26_spill] sm:$0xff] %v9951_v32  ;;  %v1928_v58 = vadd.f32 %v1927_v39, %v1836_v37  ;;  %v1831_v37 = vmul.f32 %v9951_v32, %v9951_v32  ;;  %v9990_v39 = vpop.permute.xlu1 %2806  ;;  %v10003_v46 = vadd.f32 %v15906_v34, %v15905_v28  ;;  %v1725_v15 = vadd.f32 %v1724_v49, %v9935_v20 }
 0x2a0   : > { %15894 = vst [vmem:[#allocation102_spill] sm:$0xff] %v9958_v44  ;;  %5235 = vperm.xlu2 %7695, %v7142_v55   ;;  %v1662_v25 = vadd.f32 %v1661_v2, %v9943_v7  ;;  %v1833_v30 = vmul.f32 %v9973_v1, %v9973_v1  ;;  %v15909_v55 = vld [vmem:[#allocation104_spill] sm:$0xff]  ;;  %v10068_v54 = vadd.f32 %v9260_v4, %v15922_v35 }
 0x2a1   : > { %15895 = vst [vmem:[#allocation82_spill] sm:$0xff] %v9962_v26  ;;  %v1840_v26 = vmul.f32 %v9943_v7, %v9943_v7  ;;  %v1929_v11 = vadd.f32 %v1928_v58, %v1838_v5  ;;  %5230 = vperm.xlu1 %7694, %v7141_v62   ;;  %5225 = vperm.xlu0 %7693, %v7140_v45   ;;  %v15907_v58 = vld [vmem:[#allocation37_spill] sm:$0xff]  ;;  %v15911_v2 = vld [vmem:[#allocation40_spill] sm:$0xff] }
 0x2a2   : > { %15897 = vst [vmem:[#allocation28_spill] sm:$0xff] %v9973_v1  ;;  %v1844_v5 = vmul.f32 %v9979_v9, %v9979_v9  ;;  %v10015_v34 = vpop.f32.mrf.mxu0  ;;  %v1726_v49 = vadd.f32 %v1725_v15, %v9951_v32  ;;  %v10020_v62 = vadd.f32 %v15909_v55, %v15877_v27  ;;  %v1663_v45 = vadd.f32 %v1662_v25, %v9958_v44  ;;  %v10031_v7 = vpop.f32.mrf.mxu1  ;;  %v15914_v27 = vld [vmem:[#allocation108_spill] sm:$0xff]  ;;  %v15917_v32 = vld [vmem:[#allocation141_spill] sm:$0xff] }
 0x2a3   : > { %15900 = vst [vmem:[#allocation107_spill] sm:$0xff] %v9979_v9  ;;  %v1930_v31 = vadd.f32 %v1929_v11, %v1840_v26  ;;  %v1835_v11 = vmul.f32 %v9997_v12, %v9997_v12 }
 0x2a4   : > { %15901 = vst [vmem:[#allocation86_spill] sm:$0xff] %v9990_v39  ;;  %v1993_v39 = vadd.f32 %v1992_v19, %v1829_v33  ;;  %v1846_v19 = vmul.f32 %v10003_v46, %v10003_v46  ;;  %v1664_v15 = vadd.f32 %v1663_v45, %v9979_v9  ;;  %v10054_v45 = vpop.permute.xlu2 %2896 }
 0x2a5   : > { %15902 = vst [vmem:[#allocation23_spill] sm:$0xff] %v9993_v60  ;;  %v15908_v60 = vld [vmem:[#allocation129_spill] sm:$0xff]  ;;  %v1931_v26 = vadd.f32 %v1930_v31, %v1842_v61 }
 0x2a6   : > { %15904 = vst [vmem:[#allocation112_spill] sm:$0xff] %v9997_v12  ;;  %v10013_v40 = vadd.f32 %v15908_v60, %v15907_v58  ;;  %v1994_v33 = vadd.f32 %v1993_v39, %v1831_v37  ;;  %v15912_v60 = vld [vmem:[#allocation134_spill] sm:$0xff]  ;;  %v1727_v37 = vadd.f32 %v1726_v49, %v9973_v1  ;;  %v10036_v39 = vadd.f32 %v15914_v27, %v15882_v23  ;;  %v7144_v23 = vld [vmem:[%s15045_s4 + $0x1b8] sm:$0xff]  ;;  %v7143_v49 = vld [vmem:[%s15045_s4 + $0x1b0] sm:$0xff] }
 0x2a7   : > { %15910 = vst [vmem:[#allocation91_spill] sm:$0xff] %v10020_v62  ;;  %v10029_v20 = vadd.f32 %v15912_v60, %v15911_v2  ;;  %v7145_v61 = vld [vmem:[%s15045_s4 + $0x1c0] sm:$0xff]  ;;  %v1932_v31 = vadd.f32 %v1931_v26, %v1844_v5  ;;  %v1837_v5 = vmul.f32 %v10020_v62, %v10020_v62 }
 0x2a8   : > { %15915 = vst [vmem:[#allocation117_spill] sm:$0xff] %v10036_v39  ;;  %v1995_v25 = vadd.f32 %v1994_v33, %v1833_v30  ;;  %v1848_v55 = vmul.f32 %v10013_v40, %v10013_v40  ;;  %v15916_v60 = vld [vmem:[#allocation33_spill] sm:$0xff]  ;;  %v1728_v30 = vadd.f32 %v1727_v37, %v9997_v12  ;;  %5250 = vperm.xlu2 %7695, %v7145_v61   ;;  %v10070_v37 = vpop.permute.xlu1 %2891 }
 0x2a9   : > { %15913 = vst [vmem:[#allocation31_spill] sm:$0xff] %v10029_v20  ;;  %v10046_v44 = vadd.f32 %v15917_v32, %v15916_v60  ;;  %v15920_v33 = vld [vmem:[#allocation113_spill] sm:$0xff]  ;;  %v1665_v32 = vadd.f32 %v1664_v15, %v10003_v46  ;;  %v1933_v1 = vadd.f32 %v1932_v31, %v1846_v19  ;;  %v1850_v9 = vmul.f32 %v10029_v20, %v10029_v20  ;;  %v10079_v19 = vpop.permute.xlu0 %2901 }
 0x2aa   : > { %15919 = vst [vmem:[#allocation34_spill] sm:$0xff] %v10054_v45  ;;  %v10061_v26 = vadd.f32 %v15920_v33, %v15887_v17  ;;  %v1996_v27 = vadd.f32 %v1995_v25, %v1835_v11  ;;  %v1839_v45 = vmul.f32 %v10036_v39, %v10036_v39  ;;  %v15924_v17 = vld [vmem:[#allocation118_spill] sm:$0xff]  ;;  %5245 = vperm.xlu1 %7694, %v7144_v23   ;;  %v15927_v25 = vld [vmem:[#allocation45_spill] sm:$0xff]  ;;  %v15928_v23 = vld [vmem:[#allocation123_spill] sm:$0xff] }
 0x2ab   : > { %15918 = vst [vmem:[#allocation96_spill] sm:$0xff] %v10046_v44  ;;  %v10076_v33 = vadd.f32 %v15924_v17, %v15892_v6  ;;  %v1666_v11 = vadd.f32 %v1665_v32, %v10013_v40  ;;  %5240 = vperm.xlu0 %7693, %v7143_v49   ;;  %v1729_v15 = vadd.f32 %v1728_v30, %v10020_v62 }
 0x2ac   : > { %15921 = vst [vmem:[#allocation120_spill] sm:$0xff] %v10061_v26  ;;  %v1934_v4 = vadd.f32 %v1933_v1, %v1848_v55  ;;  %v1852_v61 = vmul.f32 %v10046_v44, %v10046_v44  ;;  %v10086_v31 = vadd.f32 %v9296_v52, %v15927_v25  ;;  %v1997_v6 = vadd.f32 %v1996_v27, %v1837_v5  ;;  %v15930_v52 = vld [vmem:[#allocation39_spill] sm:$0xff]  ;;  %v10104_v5 = vpop.f32.mrf.mxu1 }
 0x2ad   : > { %15923 = vst [vmem:[#allocation101_spill] sm:$0xff] %v10070_v37  ;;  %v10088_v37 = vpop.f32.mrf.mxu0  ;;  %v1841_v32 = vmul.f32 %v10061_v26, %v10061_v26  ;;  %v10094_v49 = vadd.f32 %v15928_v23, %v15898_v57  ;;  %v1667_v30 = vadd.f32 %v1666_v11, %v10029_v20  ;;  %v1730_v1 = vadd.f32 %v1729_v15, %v10036_v39  ;;  %v15931_v57 = vld [vmem:[#allocation126_spill] sm:$0xff] }
 0x2ae   : > { %15925 = vst [vmem:[#allocation27_spill] sm:$0xff] %v10076_v33  ;;  %v1935_v55 = vadd.f32 %v1934_v4, %v1850_v9  ;;  %v1854_v17 = vmul.f32 %v10068_v54, %v10068_v54  ;;  %v1998_v27 = vadd.f32 %v1997_v6, %v1839_v45  ;;  %v1843_v62 = vmul.f32 %v10076_v33, %v10076_v33  ;;  %v7148_v9 = vld [vmem:[%s15045_s4 + $0x1d8] sm:$0xff] }
 0x2af   : > { %15926 = vst [vmem:[#allocation124_spill] sm:$0xff] %v10079_v19  ;;  %v10102_v19 = vadd.f32 %v9334_v21, %v15930_v52  ;;  %v10110_v23 = vadd.f32 %v15931_v57, %v15905_v28  ;;  %v1668_v11 = vadd.f32 %v1667_v30, %v10046_v44  ;;  %v1731_v15 = vadd.f32 %v1730_v1, %v10061_v26  ;;  %v15933_v45 = vld [vmem:[#allocation48_spill] sm:$0xff]  ;;  %v7146_v30 = vld [vmem:[%s15045_s4 + $0x1c8] sm:$0xff] }
 0x2b0   : > { %15929 = vst [vmem:[#allocation37_spill] sm:$0xff] %v10094_v49  ;;  %v1936_v21 = vadd.f32 %v1935_v55, %v1852_v61  ;;  %v1856_v4 = vmul.f32 %v10086_v31, %v10086_v31  ;;  %v10121_v6 = vadd.f32 %v9376_v63, %v15933_v45  ;;  %v7147_v28 = vld [vmem:[%s15045_s4 + $0x1d0] sm:$0xff]  ;;  %v1999_v57 = vadd.f32 %v1998_v27, %v1841_v32  ;;  %v15935_v61 = vld [vmem:[#allocation130_spill] sm:$0xff]  ;;  %v10143_v32 = vpop.permute.xlu2 %2811 }
 0x2b1   : > { %15932 = vst [vmem:[#allocation129_spill] sm:$0xff] %v10110_v23  ;;  %v1845_v1 = vmul.f32 %v10094_v49, %v10094_v49  ;;  %v10133_v55 = vadd.f32 %v15935_v61, %v15907_v58  ;;  %v1669_v26 = vadd.f32 %v1668_v11, %v10068_v54  ;;  %v1732_v63 = vadd.f32 %v1731_v15, %v10076_v33  ;;  %v15937_v44 = vld [vmem:[#allocation50_spill] sm:$0xff] }
 0x2b2   : > { %15934 = vst [vmem:[#allocation104_spill] sm:$0xff] %v10121_v6  ;;  %v1937_v39 = vadd.f32 %v1936_v21, %v1854_v17  ;;  %v1858_v12 = vmul.f32 %v10102_v19, %v10102_v19  ;;  %v10141_v20 = vadd.f32 %v9445_v36, %v15937_v44  ;;  %5265 = vperm.xlu2 %7695, %v7148_v9   ;;  %v15939_v21 = vld [vmem:[#allocation44_spill] sm:$0xff] }
 0x2b3   : > { %15936 = vst [vmem:[#allocation40_spill] sm:$0xff] %v10133_v55  ;;  %v2000_v27 = vadd.f32 %v1999_v57, %v1843_v62  ;;  %v1847_v58 = vmul.f32 %v10110_v23, %v10110_v23  ;;  %v1670_v61 = vadd.f32 %v1669_v26, %v10086_v31  ;;  %5260 = vperm.xlu1 %7694, %v7147_v28   ;;  %v10157_v62 = vpop.permute.xlu1 %2876  ;;  %v15941_v28 = vld [vmem:[#allocation135_spill] sm:$0xff] }
 0x2b4   : > { %15938 = vst [vmem:[#allocation134_spill] sm:$0xff] %v10143_v32  ;;  %5255 = vperm.xlu0 %7693, %v7146_v30   ;;  %v1733_v17 = vadd.f32 %v1732_v63, %v10094_v49  ;;  %v1938_v11 = vadd.f32 %v1937_v39, %v1856_v4  ;;  %v1860_v15 = vmul.f32 %v10121_v6, %v10121_v6  ;;  %v10166_v4 = vpop.permute.xlu0 %2886  ;;  %v15944_v49 = vld [vmem:[#allocation53_spill] sm:$0xff] }
 0x2b5   : > { %v10153_v36 = vadd.f32 %v9502_v29, %v15939_v21  ;;  %v10155_v9 = vpop.f32.mrf.mxu0  ;;  %15940 = vst [vmem:[#allocation108_spill] sm:$0xff] %v10157_v62  ;;  %v2001_v57 = vadd.f32 %v2000_v27, %v1845_v1  ;;  %v1849_v26 = vmul.f32 %v10133_v55, %v10133_v55  ;;  %v10163_v30 = vadd.f32 %v15941_v28, %v15911_v2  ;;  %v10175_v27 = vpop.f32.mrf.mxu1  ;;  %v15945_v2 = vld [vmem:[#allocation143_spill] sm:$0xff] }
 0x2b6   : > { %v1671_v39 = vadd.f32 %v1670_v61, %v10102_v19  ;;  %15943 = vst [vmem:[#allocation141_spill] sm:$0xff] %v10166_v4  ;;  %v1734_v63 = vadd.f32 %v1733_v17, %v10110_v23  ;;  %v1939_v29 = vadd.f32 %v1938_v11, %v1858_v12  ;;  %v1862_v32 = vmul.f32 %v10141_v20, %v10141_v20  ;;  %v7151_v12 = vld [vmem:[%s15045_s4 + $0x1f0] sm:$0xff] }
 0x2b7   : > { %15942 = vst [vmem:[#allocation33_spill] sm:$0xff] %v10163_v30  ;;  %v10173_v1 = vadd.f32 %v9561_v50, %v15944_v49  ;;  %v2002_v62 = vadd.f32 %v2001_v57, %v1847_v58  ;;  %v10179_v28 = vadd.f32 %v15945_v2, %v15916_v60  ;;  %v1864_v50 = vmul.f32 %v10153_v36, %v10153_v36  ;;  %v15947_v4 = vld [vmem:[#allocation56_spill] sm:$0xff]  ;;  %v7150_v60 = vld [vmem:[%s15045_s4 + $0x1e8] sm:$0xff]  ;;  %v7149_v58 = vld [vmem:[%s15045_s4 + $0x1e0] sm:$0xff] }
 0x2b8   : > { %v1672_v61 = vadd.f32 %v1671_v39, %v10121_v6  ;;  %v1735_v17 = vadd.f32 %v1734_v63, %v10133_v55  ;;  %v1940_v11 = vadd.f32 %v1939_v29, %v1860_v15  ;;  %v10190_v23 = vadd.f32 %v9622_v0, %v15947_v4  ;;  %v15949_v55 = vld [vmem:[#allocation49_spill] sm:$0xff] }
 0x2b9   : > { %15946 = vst [vmem:[#allocation113_spill] sm:$0xff] %v10179_v28  ;;  %v2003_v57 = vadd.f32 %v2002_v62, %v1849_v26  ;;  %v1851_v39 = vmul.f32 %v10163_v30, %v10163_v30  ;;  %v10202_v15 = vadd.f32 %v9276_v43, %v15922_v35  ;;  %v1866_v2 = vmul.f32 %v10173_v1, %v10173_v1 }
 0x2ba   : > { %v1673_v63 = vadd.f32 %v1672_v61, %v10141_v20  ;;  %v1736_v0 = vadd.f32 %v1735_v17, %v10163_v30  ;;  %v1941_v29 = vadd.f32 %v1940_v11, %v1862_v32  ;;  %v10210_v33 = vadd.f32 %v9683_v42, %v15949_v55  ;;  %5280 = vperm.xlu2 %7695, %v7151_v12   ;;  %v15951_v42 = vld [vmem:[#allocation59_spill] sm:$0xff]  ;;  %v10228_v11 = vpop.permute.xlu2 %2796 }
 0x2bb   : > { %15948 = vst [vmem:[#allocation43_spill] sm:$0xff] %v10202_v15  ;;  %v1853_v62 = vmul.f32 %v10179_v28, %v10179_v28  ;;  %v10216_v43 = vadd.f32 %v9310_v47, %v15927_v25  ;;  %5275 = vperm.xlu1 %7694, %v7150_v60   ;;  %v1868_v61 = vmul.f32 %v10190_v23, %v10190_v23 }
 0x2bc   : > { %v1674_v35 = vadd.f32 %v1673_v63, %v10153_v36  ;;  %5270 = vperm.xlu0 %7693, %v7149_v58   ;;  %v1737_v32 = vadd.f32 %v1736_v0, %v10179_v28  ;;  %v1942_v26 = vadd.f32 %v1941_v29, %v1864_v50  ;;  %v10224_v12 = vadd.f32 %v9743_v48, %v15951_v42  ;;  %v15954_v0 = vld [vmem:[#allocation62_spill] sm:$0xff] }
 0x2bd   : > { %15950 = vst [vmem:[#allocation118_spill] sm:$0xff] %v10216_v43  ;;  %v10226_v17 = vpop.f32.mrf.mxu0  ;;  %v2004_v47 = vadd.f32 %v2003_v57, %v1851_v39  ;;  %v1855_v25 = vmul.f32 %v10202_v15, %v10202_v15  ;;  %v10234_v60 = vadd.f32 %v9346_v53, %v15930_v52  ;;  %v1870_v48 = vmul.f32 %v10210_v33, %v10210_v33  ;;  %v10244_v57 = vpop.permute.xlu1 %2791 }
 0x2be   : > { %15952 = vst [vmem:[#allocation45_spill] sm:$0xff] %v10224_v12  ;;  %v1675_v50 = vadd.f32 %v1674_v35, %v10173_v1  ;;  %v1738_v58 = vadd.f32 %v1737_v32, %v10202_v15  ;;  %v1943_v63 = vadd.f32 %v1942_v26, %v1866_v2  ;;  %v10242_v29 = vadd.f32 %v9804_v51, %v15954_v0  ;;  %v10253_v2 = vpop.f32.mrf.mxu1  ;;  %v7154_v35 = vld [vmem:[%s15045_s4 + $0x208] sm:$0xff]  ;;  %v10258_v51 = vpop.permute.xlu0 %2801  ;;  %v15960_v15 = vld [vmem:[#allocation65_spill] sm:$0xff] }
 0x2bf   : > { %15953 = vst [vmem:[#allocation123_spill] sm:$0xff] %v10228_v11  ;;  %v2005_v39 = vadd.f32 %v2004_v47, %v1853_v62  ;;  %v1857_v11 = vmul.f32 %v10216_v43, %v10216_v43  ;;  %v10250_v53 = vadd.f32 %v9396_v56, %v15933_v45  ;;  %v1872_v26 = vmul.f32 %v10224_v12, %v10224_v12  ;;  %v15958_v47 = vld [vmem:[#allocation55_spill] sm:$0xff]  ;;  %v7153_v45 = vld [vmem:[%s15045_s4 + $0x200] sm:$0xff] }
 0x2c0   : > { %15955 = vst [vmem:[#allocation39_spill] sm:$0xff] %v10244_v57  ;;  %v1676_v52 = vadd.f32 %v1675_v50, %v10190_v23  ;;  %v1739_v32 = vadd.f32 %v1738_v58, %v10216_v43  ;;  %v1944_v62 = vadd.f32 %v1943_v63, %v1868_v61  ;;  %v10265_v56 = vadd.f32 %v9872_v10, %v15958_v47  ;;  %v7152_v50 = vld [vmem:[%s15045_s4 + $0x1f8] sm:$0xff] }
 0x2c1   : > { %15956 = vst [vmem:[#allocation126_spill] sm:$0xff] %v10250_v53  ;;  %v2006_v57 = vadd.f32 %v2005_v39, %v1855_v25  ;;  %v1859_v58 = vmul.f32 %v10234_v60, %v10234_v60  ;;  %v10277_v61 = vadd.f32 %v9461_v18, %v15937_v44  ;;  %v1874_v43 = vmul.f32 %v10242_v29, %v10242_v29 }
 0x2c2   : > { %15957 = vst [vmem:[#allocation48_spill] sm:$0xff] %v10258_v51  ;;  %v1677_v63 = vadd.f32 %v1676_v52, %v10210_v33  ;;  %v1740_v10 = vadd.f32 %v1739_v32, %v10234_v60  ;;  %v1945_v51 = vadd.f32 %v1944_v62, %v1870_v48  ;;  %v10285_v28 = vadd.f32 %v9945_v8, %v15960_v15  ;;  %v15963_v62 = vld [vmem:[#allocation67_spill] sm:$0xff] }
 0x2c3   : > { %15959 = vst [vmem:[#allocation130_spill] sm:$0xff] %v10265_v56  ;;  %5359 = vperm.xlu2 %7695, %v7154_v35   ;;  %v2007_v25 = vadd.f32 %v2006_v57, %v1857_v11  ;;  %v1861_v39 = vmul.f32 %v10250_v53, %v10250_v53  ;;  %5354 = vperm.xlu1 %7694, %v7153_v45  }
 0x2c4   : > { %15961 = vst [vmem:[#allocation50_spill] sm:$0xff] %v10285_v28  ;;  %v1678_v18 = vadd.f32 %v1677_v63, %v10224_v12  ;;  %5285 = vperm.xlu0 %7693, %v7152_v50   ;;  %v1741_v44 = vadd.f32 %v1740_v10, %v10250_v53  ;;  %v10293_v48 = vadd.f32 %v9522_v16, %v15939_v21  ;;  %v15966_v10 = vld [vmem:[#allocation61_spill] sm:$0xff]  ;;  %v16069_v12 = vld [vmem:[#allocation182_spill] sm:$0xff]  ;;  %v16129_v53 = vld [vmem:[#allocation184_spill] sm:$0xff] }
 0x2c5   : > { %v1946_v52 = vadd.f32 %v1945_v51, %v1872_v26  ;;  %v1876_v8 = vmul.f32 %v10265_v56, %v10265_v56  ;;  %v1408_v32 = vpop.f32.mrf.mxu0  ;;  %v2008_v35 = vadd.f32 %v2007_v25, %v1859_v58  ;;  %v1863_v11 = vmul.f32 %v10277_v61, %v10277_v61  ;;  %v10311_v26 = vpop.permute.xlu2 %2881 }
 0x2c6   : > { %15962 = vst [vmem:[#allocation44_spill] sm:$0xff] %v10293_v48  ;;  %v1679_v57 = vadd.f32 %v1678_v18, %v10242_v29  ;;  %v10302_v45 = vadd.f32 %v10015_v34, %v15963_v62  ;;  %v1742_v50 = vadd.f32 %v1741_v44, %v10277_v61  ;;  %v10307_v16 = vadd.f32 %v9579_v22, %v15944_v49  ;;  %v7157_v34 = vld [vmem:[%s15045_s4 + $0x220] sm:$0xff]  ;;  %v7156_v18 = vld [vmem:[%s15045_s4 + $0x218] sm:$0xff]  ;;  %v10334_v44 = vpop.permute.xlu1 %2776 }
 0x2c7   : > { %v1947_v21 = vadd.f32 %v1946_v52, %v1874_v43  ;;  %v1878_v51 = vmul.f32 %v10285_v28, %v10285_v28  ;;  %15965 = vst [vmem:[#allocation53_spill] sm:$0xff] %v10311_v26  ;;  %v2009_v58 = vadd.f32 %v2008_v35, %v1861_v39  ;;  %v10316_v25 = vadd.f32 %v10088_v37, %v15966_v10  ;;  %v7155_v37 = vld [vmem:[%s15045_s4 + $0x210] sm:$0xff] }
 0x2c8   : > { %15964 = vst [vmem:[#allocation135_spill] sm:$0xff] %v10302_v45  ;;  %v1680_v63 = vadd.f32 %v1679_v57, %v10265_v56  ;;  %v1743_v22 = vadd.f32 %v1742_v50, %v10293_v48  ;;  %v1865_v49 = vmul.f32 %v10293_v48, %v10293_v48  ;;  %v10326_v43 = vadd.f32 %v9638_v59, %v15947_v4  ;;  %v15969_v50 = vld [vmem:[#allocation70_spill] sm:$0xff]  ;;  %v10343_v4 = vpop.f32.mrf.mxu1 }
 0x2c9   : > { %15967 = vst [vmem:[#allocation143_spill] sm:$0xff] %v10316_v25  ;;  %v1948_v39 = vadd.f32 %v1947_v21, %v1876_v8  ;;  %v2010_v52 = vadd.f32 %v2009_v58, %v1863_v11  ;;  %v1880_v57 = vmul.f32 %v10302_v45, %v10302_v45  ;;  %v10341_v59 = vadd.f32 %v10155_v9, %v15969_v50  ;;  %v10345_v8 = vpop.permute.xlu0 %2786 }
 0x2ca   : > { %15968 = vst [vmem:[#allocation56_spill] sm:$0xff] %v10334_v44  ;;  %v1681_v35 = vadd.f32 %v1680_v63, %v10285_v28  ;;  %v1744_v21 = vadd.f32 %v1743_v22, %v10307_v16  ;;  %v1867_v26 = vmul.f32 %v10307_v16, %v10307_v16  ;;  %v10352_v11 = vadd.f32 %v9698_v13, %v15949_v55  ;;  %v15972_v44 = vld [vmem:[#allocation72_spill] sm:$0xff] }
 0x2cb   : > { %15970 = vst [vmem:[#allocation49_spill] sm:$0xff] %v10341_v59  ;;  %v1949_v58 = vadd.f32 %v1948_v39, %v1878_v51  ;;  %5374 = vperm.xlu2 %7695, %v7157_v34   ;;  %v1882_v9 = vmul.f32 %v10316_v25, %v10316_v25  ;;  %v10359_v48 = vadd.f32 %v10226_v17, %v15972_v44 }
 0x2cc   : > { %15971 = vst [vmem:[#allocation59_spill] sm:$0xff] %v10345_v8  ;;  %v1682_v63 = vadd.f32 %v1681_v35, %v10302_v45  ;;  %5369 = vperm.xlu1 %7694, %v7156_v18   ;;  %5364 = vperm.xlu0 %7693, %v7155_v37   ;;  %v2011_v22 = vadd.f32 %v2010_v52, %v1865_v49  ;;  %v15975_v35 = vld [vmem:[#allocation66_spill] sm:$0xff] }
 0x2cd   : > { %15973 = vst [vmem:[#allocation62_spill] sm:$0xff] %v10359_v48  ;;  %v1745_v8 = vadd.f32 %v1744_v21, %v10326_v43  ;;  %v1869_v13 = vmul.f32 %v10326_v43, %v10326_v43  ;;  %v10366_v55 = vadd.f32 %v9755_v38, %v15951_v42  ;;  %v1411_v51 = vpop.f32.mrf.mxu0  ;;  %v1950_v34 = vadd.f32 %v1949_v58, %v1880_v57  ;;  %v15977_v58 = vld [vmem:[#allocation75_spill] sm:$0xff] }
 0x2ce   : > { %v1683_v39 = vadd.f32 %v1682_v63, %v10316_v25  ;;  %v1884_v17 = vmul.f32 %v10341_v59, %v10341_v59  ;;  %v10372_v18 = vadd.f32 %v1408_v32, %v15975_v35  ;;  %v2012_v49 = vadd.f32 %v2011_v22, %v1867_v26  ;;  %v7160_v32 = vld [vmem:[%s15045_s4 + $0x238] sm:$0xff]  ;;  %v7158_v22 = vld [vmem:[%s15045_s4 + $0x228] sm:$0xff]  ;;  %v7167_v25 = vld [vmem:[%s15045_s4 + $0x270] sm:$0xff] }
 0x2cf   : > { %15974 = vst [vmem:[#allocation55_spill] sm:$0xff] %v10366_v55  ;;  %v1746_v37 = vadd.f32 %v1745_v8, %v10352_v11  ;;  %v1871_v52 = vmul.f32 %v10352_v11, %v10352_v11  ;;  %v10379_v38 = vadd.f32 %v9823_v41, %v15954_v0  ;;  %v1951_v42 = vadd.f32 %v1950_v34, %v1882_v9  ;;  %v7159_v9 = vld [vmem:[%s15045_s4 + $0x230] sm:$0xff]  ;;  %v7166_v45 = vld [vmem:[%s15045_s4 + $0x268] sm:$0xff] }
 0x2d0   : > { %15976 = vst [vmem:[#allocation65_spill] sm:$0xff] %v10372_v18  ;;  %v1684_v57 = vadd.f32 %v1683_v39, %v10341_v59  ;;  %v1886_v21 = vmul.f32 %v10359_v48, %v10359_v48  ;;  %v10385_v63 = vadd.f32 %v1411_v51, %v15977_v58  ;;  %v2013_v26 = vadd.f32 %v2012_v49, %v1869_v13  ;;  %v10403_v51 = vpop.permute.xlu2 %2866 }
 0x2d1   : > { %v1747_v8 = vadd.f32 %v1746_v37, %v10366_v55  ;;  %v1873_v41 = vmul.f32 %v10366_v55, %v10366_v55  ;;  %v10395_v0 = vadd.f32 %v9890_v24, %v15958_v47  ;;  %15980 = vst [vmem:[#allocation70_spill] sm:$0xff] %v10403_v51  ;;  %v1952_v13 = vadd.f32 %v1951_v42, %v1884_v17  ;;  %v10415_v55 = vpop.permute.xlu1 %2861 }
 0x2d2   : > { %15978 = vst [vmem:[#allocation67_spill] sm:$0xff] %v10385_v63  ;;  %v1685_v34 = vadd.f32 %v1684_v57, %v10359_v48  ;;  %v1888_v39 = vmul.f32 %v10372_v18, %v10372_v18  ;;  %v2014_v49 = vadd.f32 %v2013_v26, %v1871_v52  ;;  %v1875_v47 = vmul.f32 %v10379_v38, %v10379_v38  ;;  %v1620_v57 = vpop.f32.mrf.mxu1  ;;  %v10420_v52 = vpop.permute.xlu0 %2871 }
 0x2d3   : > { %15979 = vst [vmem:[#allocation61_spill] sm:$0xff] %v10395_v0  ;;  %v1748_v24 = vadd.f32 %v1747_v8, %v10379_v38  ;;  %v10413_v37 = vadd.f32 %v9960_v14, %v15960_v15  ;;  %5389 = vperm.xlu2 %7695, %v7160_v32   ;;  %v1953_v51 = vadd.f32 %v1952_v13, %v1886_v21 }
 0x2d4   : > { %15981 = vst [vmem:[#allocation72_spill] sm:$0xff] %v10415_v55  ;;  %v1686_v17 = vadd.f32 %v1685_v34, %v10372_v18  ;;  %v1890_v42 = vmul.f32 %v10385_v63, %v10385_v63  ;;  %5384 = vperm.xlu1 %7694, %v7159_v9   ;;  %5379 = vperm.xlu0 %7693, %v7158_v22   ;;  %v15984_v34 = vld [vmem:[#allocation78_spill] sm:$0xff]  ;;  %v16091_v18 = vld [vmem:[#allocation117_spill] sm:$0xff] }
 0x2d5   : > { %15982 = vst [vmem:[#allocation66_spill] sm:$0xff] %v10420_v52  ;;  %v2015_v26 = vadd.f32 %v2014_v49, %v1873_v41  ;;  %v1749_v8 = vadd.f32 %v1748_v24, %v10395_v0  ;;  %v1877_v14 = vmul.f32 %v10395_v0, %v10395_v0  ;;  %v10427_v15 = vadd.f32 %v10031_v7, %v15963_v62  ;;  %v1414_v21 = vpop.f32.mrf.mxu0 }
 0x2d6   : > { %v1954_v32 = vadd.f32 %v1953_v51, %v1888_v39  ;;  %v1687_v13 = vadd.f32 %v1686_v17, %v10385_v63  ;;  %v10431_v55 = vadd.f32 %v1414_v21, %v15984_v34  ;;  %v1879_v41 = vmul.f32 %v10413_v37, %v10413_v37  ;;  %v16074_v63 = vld [vmem:[#allocation41_spill] sm:$0xff] }
 0x2d7   : > { %15983 = vst [vmem:[#allocation75_spill] sm:$0xff] %v10427_v15  ;;  %v2016_v9 = vadd.f32 %v2015_v26, %v1875_v47  ;;  %v1750_v22 = vadd.f32 %v1749_v8, %v10413_v37  ;;  %v10438_v49 = vadd.f32 %v10104_v5, %v15966_v10  ;;  %v1881_v47 = vmul.f32 %v10427_v15, %v10427_v15 }
 0x2d8   : > { %15985 = vst [vmem:[#allocation78_spill] sm:$0xff] %v10431_v55  ;;  %v1955_v24 = vadd.f32 %v1954_v32, %v1890_v42  ;;  %v1688_v7 = vadd.f32 %v1687_v13, %v10431_v55  ;;  %v1892_v62 = vmul.f32 %v10431_v55, %v10431_v55  ;;  %v10448_v17 = vadd.f32 %v10175_v27, %v15969_v50  ;;  %v10457_v21 = vpop.permute.xlu2 %2781 }
 0x2d9   : > { %v2017_v51 = vadd.f32 %v2016_v9, %v1877_v14  ;;  %v1751_v39 = vadd.f32 %v1750_v22, %v10427_v15  ;;  %v1883_v42 = vmul.f32 %v10438_v49, %v10438_v49  ;;  %v10455_v14 = vadd.f32 %v10253_v2, %v15972_v44  ;;  %15987 = vst [vmem:[#allocation193_spill] sm:$0xff] %v10457_v21 }
 0x2da   : > { %15986 = vst [vmem:[#allocation192_spill] sm:$0xff] %v10448_v17  ;;  %v1689_v26 = vrot.slane %v1688_v7, 4  ;;  %v1956_v8 = vadd.f32 %v1955_v24, %v1892_v62  ;;  %v1885_v50 = vmul.f32 %v10448_v17, %v10448_v17  ;;  %v10464_v22 = vadd.f32 %v10343_v4, %v15975_v35  ;;  %v1623_v2 = vpop.f32.mrf.mxu1  ;;  %v10468_v44 = vpop.permute.xlu0 %2856  ;;  %v7163_v4 = vld [vmem:[%s15045_s4 + $0x250] sm:$0xff] }
 0x2db   : > { %v2018_v5 = vadd.f32 %v2017_v51, %v1879_v41  ;;  %v1752_v10 = vadd.f32 %v1751_v39, %v10438_v49  ;;  %v10466_v41 = vpop.permute.xlu1 %2846  ;;  %15990 = vst [vmem:[#allocation196_spill] sm:$0xff] %v10468_v44  ;;  %v1887_v39 = vmul.f32 %v10455_v14, %v10455_v14  ;;  %5404 = vperm.xlu2 %7695, %v7163_v4   ;;  %v7162_v44 = vld [vmem:[%s15045_s4 + $0x248] sm:$0xff] }
 0x2dc   : > { %v1690_v32 = vadd.f32 %v1689_v26, %v1688_v7  ;;  %v1957_v13 = vrot.slane %v1956_v8, 4  ;;  %15988 = vst [vmem:[#allocation194_spill] sm:$0xff] %v10464_v22  ;;  %5399 = vperm.xlu1 %7694, %v7162_v44  }
 0x2dd   : > { %v2019_v9 = vadd.f32 %v2018_v5, %v1881_v47  ;;  %v1753_v27 = vadd.f32 %v1752_v10, %v10448_v17  ;;  %15989 = vst [vmem:[#allocation195_spill] sm:$0xff] %v10466_v41  ;;  %v10474_v47 = vadd.f32 %v1620_v57, %v15977_v58  ;;  %v10483_v5 = vadd.f32 %v1623_v2, %v15984_v34  ;;  %v16026_v41 = vld [vmem:[#allocation9_spill] sm:$0xff]  ;;  %v16126_v17 = vld [vmem:[#allocation183_spill] sm:$0xff] }
 0x2de   : > { %v1691_v24 = vrot.slane %v1690_v32, 2  ;;  %v1958_v62 = vadd.f32 %v1957_v13, %v1956_v8  ;;  %v1889_v8 = vmul.f32 %v10464_v22, %v10464_v22 }
 0x2df   : > { %v2020_v51 = vadd.f32 %v2019_v9, %v1883_v42  ;;  %v1754_v7 = vadd.f32 %v1753_v27, %v10455_v14  ;;  %15991 = vst [vmem:[#allocation197_spill] sm:$0xff] %v10483_v5  ;;  %v1891_v57 = vmul.f32 %v10474_v47, %v10474_v47 }
 0x2e0   : > { %v1692_v10 = vadd.f32 %v1691_v24, %v1690_v32  ;;  %v1959_v42 = vrot.slane %v1958_v62, 2 }
 0x2e1   : > { %v2021_v35 = vadd.f32 %v2020_v51, %v1885_v50  ;;  %v1755_v26 = vadd.f32 %v1754_v7, %v10464_v22  ;;  %v1893_v50 = vmul.f32 %v10483_v5, %v10483_v5  ;;  %v10491_v51 = vpop.permute.xlu2 %2766 }
 0x2e2   : > { %15992 = vst [vmem:[#allocation198_spill] sm:$0xff] %v10491_v51  ;;  %v1693_v7 = vrot.slane %v1692_v10, 1  ;;  %v1960_v34 = vadd.f32 %v1959_v42, %v1958_v62  ;;  %v10495_v32 = vpop.permute.xlu0 %2771 }
 0x2e3   : > { %v2022_v13 = vadd.f32 %v2021_v35, %v1887_v39  ;;  %v1756_v58 = vadd.f32 %v1755_v26, %v10474_v47  ;;  %v10493_v4 = vpop.permute.xlu1 %2608  ;;  %15994 = vst [vmem:[#allocation200_spill] sm:$0xff] %v10495_v32  ;;  %v16048_v32 = vld [vmem:[#allocation31_spill] sm:$0xff]  ;;  %5419 = vperm.xlu2 %7695, %v7166_v45  }
 0x2e4   : > { %15993 = vst [vmem:[#allocation199_spill] sm:$0xff] %v10493_v4  ;;  %v1694_v35 = vadd.f32 %v1693_v7, %v1692_v10  ;;  %v1961_v26 = vrot.slane %v1960_v34, 1 }
 0x2e5   : > { %v2023_v9 = vadd.f32 %v2022_v13, %v1889_v8  ;;  %v1757_v27 = vadd.f32 %v1756_v58, %v10483_v5 }
 0x2e6   : > { %v10497_v13 = vmul.f32 0.0025, %v1694_v35  ;;  %v1962_v58 = vadd.f32 %v1961_v26, %v1960_v34 }
 0x2e7   : > { %v2024_v2 = vadd.f32 %v2023_v9, %v1891_v57  ;;  %v1758_v24 = vrot.slane %v1757_v27, 4 }
 0x2e8   : > { %15995 = vst [vmem:[#allocation201_spill] sm:$0xff] %v10497_v13  ;;  %v2032_v4 = vmul.f32 0.0025, %v1962_v58  ;;  %v2034_v10 = vmul.f32 %v10497_v13, %v10497_v13 }
 0x2e9   : > { %v2025_v39 = vadd.f32 %v2024_v2, %v1893_v50  ;;  %v1759_v52 = vadd.f32 %v1758_v24, %v1757_v27  ;;  %v10502_v62 = vpop.permute.xlu2 %2851  ;;  %v16006_v2 = vld [vmem:[#allocation160_spill] sm:$0xff] }
 0x2ea   : > { %15996 = vst [vmem:[#allocation202_spill] sm:$0xff] %v10502_v62  ;;  %v10508_v27 = vpop.permute.xlu0 %2603  ;;  %v2036_v34 = vsub.f32 %v2032_v4, %v2034_v10 }
 0x2eb   : > { %v2026_v8 = vrot.slane %v2025_v39, 4  ;;  %v1760_v42 = vrot.slane %v1759_v52, 2  ;;  %v10504_v9 = vpop.permute.xlu1 %2623  ;;  %15998 = vst [vmem:[#allocation204_spill] sm:$0xff] %v10508_v27 }
 0x2ec   : > { %15997 = vst [vmem:[#allocation203_spill] sm:$0xff] %v10504_v9  ;;  %v10514_v26 = vadd.f32 1e-05, %v2036_v34 }
 0x2ed   : > { %v2027_v57 = vadd.f32 %v2026_v8, %v2025_v39  ;;  %v1761_v50 = vadd.f32 %v1760_v42, %v1759_v52 }
 0x2ee   : > { %7696 = vrsqrt.f32 %v10514_v26  ;;  %vm2046_vm1 = vweird.f32 %v10514_v26 }
 0x2ef   : > { %v2028_v7 = vrot.slane %v2027_v57, 2  ;;  %v1762_v24 = vrot.slane %v1761_v50, 1 }
 0x2f1   : > { %v2029_v44 = vadd.f32 %v2028_v7, %v2027_v57  ;;  %v10512_v35 = vpop.permute.xlu2 %2613  ;;  %v1763_v27 = vadd.f32 %v1762_v24, %v1761_v50  ;;  %v7161_v57 = vld [vmem:[%s15045_s4 + $0x240] sm:$0xff] }
 0x2f2   : > { %15999 = vst [vmem:[#allocation205_spill] sm:$0xff] %v10512_v35  ;;  %v10520_v58 = vpop.permute.xlu0 %2618  ;;  %5394 = vperm.xlu0 %7693, %v7161_v57   ;;  %v16008_v35 = vld [vmem:[#allocation163_spill] sm:$0xff] }
 0x2f3   : > { %v10518_v8 = vpop.permute.xlu1 %2926  ;;  %16001 = vst [vmem:[#allocation207_spill] sm:$0xff] %v10520_v58  ;;  %v2030_v52 = vrot.slane %v2029_v44, 1  ;;  %v10523_v4 = vmul.f32 0.0025, %v1763_v27  ;;  %v16009_v58 = vld [vmem:[#allocation166_spill] sm:$0xff]  ;;  %v16047_v57 = vld [vmem:[#allocation107_spill] sm:$0xff] }
 0x2f4   : > { %16000 = vst [vmem:[#allocation206_spill] sm:$0xff] %v10518_v8  ;;  %v10528_v10 = vpop.eup %7696 }
 0x2f5   : > { %16002 = vst [vmem:[#allocation208_spill] sm:$0xff] %v10523_v4  ;;  %v2031_v42 = vadd.f32 %v2030_v52, %v2029_v44  ;;  %v2035_v39 = vmul.f32 %v10523_v4, %v10523_v4  ;;  %v2041_v27 = vmul.f32 %v10528_v10, %v10514_v26  ;;  %v16011_v44 = vld [vmem:[#allocation171_spill] sm:$0xff]  ;;  %vm2047_vm2 = vweird.f32 %v10528_v10  ;;  %v7164_v26 = vld [vmem:[%s15045_s4 + $0x258] sm:$0xff] }
 0x2f6   : > { %vm2048_vm3 = vmor %vm2046_vm1, %vm2047_vm2 }
 0x2f7   : > { %v2033_v34 = vmul.f32 0.0025, %v2031_v42  ;;  %v16007_v42 = vld [vmem:[#allocation162_spill] sm:$0xff]  ;;  %v2042_v9 = vmul.f32 %v10528_v10, %v2041_v27  ;;  %v16045_v27 = vld [vmem:[#allocation79_spill] sm:$0xff] }
 0x2f9   : > { %v10530_v7 = vpop.permute.xlu2 %2628  ;;  %v2037_v8 = vsub.f32 %v2033_v34, %v2035_v39 }
 0x2fa   : > { %16003 = vst [vmem:[#allocation209_spill] sm:$0xff] %v10530_v7  ;;  %v10536_v24 = vpop.permute.xlu0 %2633  ;;  %v16010_v7 = vld [vmem:[#allocation168_spill] sm:$0xff]  ;;  %5409 = vperm.xlu0 %7693, %v7164_v26  }
 0x2fb   : > { %v10534_v50 = vpop.permute.xlu1 %2941  ;;  %16005 = vst [vmem:[#allocation211_spill] sm:$0xff] %v10536_v24  ;;  %v10583_v52 = vadd.f32 1e-05, %v2037_v8 }
 0x2fc   : > { %16004 = vst [vmem:[#allocation210_spill] sm:$0xff] %v10534_v50  ;;  %v2043_v50 = vmul.f32 0.5, %v2042_v9  ;;  %v16042_v9 = vld [vmem:[#allocation69_spill] sm:$0xff] }
 0x2fd   : > { %7698 = vrsqrt.f32 %v10583_v52  ;;  %vm2056_vm4 = vweird.f32 %v10583_v52 }
 0x2fe   : > { %v2044_v51 = vsub.f32 1.5, %v2043_v50  ;;  %v7168_v50 = vld [vmem:[%s15045_s4 + $0x278] sm:$0xff] }
 0x300   : > { %v2045_v21 = vmul.f32 %v10528_v10, %v2044_v51 }
 0x301   : > { %v10585_v62 = vpop.permute.xlu2 %2931 }
 0x302   : > { %16025 = vst [vmem:[#allocation160_spill] sm:$0xff] %v10585_v62  ;;  %v10611_v39 = vpop.permute.xlu0 %2936  ;;  %v16046_v62 = vld [vmem:[#allocation102_spill] sm:$0xff]  ;;  %v10702_v59 = vsel %vm2048_vm3, %v10528_v10, %v2045_v21  ;;  %v16079_v21 = vld [vmem:[#allocation13_spill] sm:$0xff]  ;;  %5424 = vperm.xlu0 %7693, %v7167_v25   ;;  %v16106_v25 = vsub.f32 %v16007_v42, %v10497_v13  ;;  %vm6743_vm3 = vcmask 1040384  }
 0x303   : > { %v10601_v48 = vpop.permute.xlu1 %3076  ;;  %16038 = vst [vmem:[#allocation163_spill] sm:$0xff] %v10611_v39  ;;  %v16049_v39 = vld [vmem:[#allocation96_spill] sm:$0xff]  ;;  %v10658_v55 = vpop.eup %7698  ;;  %v7165_v10 = vld [vmem:[%s15045_s4 + $0x260] sm:$0xff] }
 0x304   : > { %16033 = vst [vmem:[#allocation162_spill] sm:$0xff] %v10601_v48  ;;  %v2051_v51 = vmul.f32 %v10658_v55, %v10583_v52  ;;  %5414 = vperm.xlu1 %7694, %v7165_v10   ;;  %vm2057_vm5 = vweird.f32 %v10658_v55  ;;  %v10866_v34 = vmul.f32 %v16106_v25, %v10702_v59  ;;  %v16110_v25 = vsub.f32 %v16010_v7, %v10497_v13  ;;  %v16116_v7 = vld [vmem:[#allocation176_spill] sm:$0xff] }
 0x305   : > { %16057 = vst [vmem:[#allocation9_spill] sm:$0xff] %v10702_v59  ;;  %vm2058_vm6 = vmor %vm2056_vm4, %vm2057_vm5  ;;  %v16111_v52 = vsub.f32 %v16011_v44, %v10497_v13  ;;  %v16118_v44 = vld [vmem:[#allocation179_spill] sm:$0xff] }
 0x306   : > { %v2052_v5 = vmul.f32 %v10658_v55, %v2051_v51  ;;  %v7169_v51 = vld [vmem:[%s15045_s4 + $0x280] sm:$0xff] }
 0x307   : > { %5434 = vperm.xlu2 %7695, %v7169_v51  }
 0x308   : > { %v2053_v8 = vmul.f32 0.5, %v2052_v5  ;;  %v16100_v5 = vld [vmem:[#allocation43_spill] sm:$0xff] }
 0x309   : > { %v10667_v24 = vpop.permute.xlu2 %2996 }
 0x30a   : > { %16050 = vst [vmem:[#allocation166_spill] sm:$0xff] %v10667_v24  ;;  %v10699_v56 = vpop.permute.xlu0 %3001 }
 0x30b   : > { %v10685_v6 = vpop.permute.xlu1 %2991  ;;  %16056 = vst [vmem:[#allocation171_spill] sm:$0xff] %v10699_v56  ;;  %v16102_v56 = vld [vmem:[#allocation44_spill] sm:$0xff] }
 0x30c   : > { %16052 = vst [vmem:[#allocation168_spill] sm:$0xff] %v10685_v6  ;;  %5429 = vperm.xlu1 %7694, %v7168_v50   ;;  %v16104_v50 = vsub.f32 %v9390_v3, %v10497_v13  ;;  %v16108_v3 = vsub.f32 %v16008_v35, %v10497_v13  ;;  %v16112_v35 = vld [vmem:[#allocation172_spill] sm:$0xff] }
 0x30e   : > { %v10854_v26 = vmul.f32 %v16104_v50, %v10702_v59  ;;  %v16109_v50 = vsub.f32 %v16009_v58, %v10497_v13  ;;  %v16114_v58 = vld [vmem:[#allocation174_spill] sm:$0xff] }
 0x310   : > { %v10884_v42 = vmul.f32 %v16109_v50, %v10702_v59  ;;  %v16115_v50 = vsub.f32 %v16114_v58, %v10497_v13  ;;  %v7170_v58 = vld [vmem:[%s15045_s4 + $0x288] sm:$0xff] }
 0x311   : > { %v10766_v6 = vpop.permute.xlu2 %3081  ;;  %5439 = vperm.xlu0 %7693, %v7170_v58   ;;  %v16162_v58 = vld [vmem:[#allocation14_spill] sm:$0xff] }
 0x312   : > { %16084 = vst [vmem:[#allocation69_spill] sm:$0xff] %v10766_v6  ;;  %v16090_v6 = vld [vmem:[#allocation91_spill] sm:$0xff]  ;;  %v10793_v10 = vpop.permute.xlu0 %2986  ;;  %v10908_v51 = vmul.f32 %v16115_v50, %v10702_v59 }
 0x313   : > { %v10783_v48 = vpop.permute.xlu1 %2976  ;;  %16097 = vst [vmem:[#allocation102_spill] sm:$0xff] %v10793_v10  ;;  %v2054_v10 = vsub.f32 1.5, %v2053_v8  ;;  %v10896_v8 = vmul.f32 %v16111_v52, %v10702_v59  ;;  %v16119_v52 = vsub.f32 %v16118_v44, %v10497_v13 }
 0x314   : > { %16092 = vst [vmem:[#allocation79_spill] sm:$0xff] %v10783_v48  ;;  %v16101_v48 = vld [vmem:[#allocation118_spill] sm:$0xff] }
 0x315   : > { %v2055_v24 = vmul.f32 %v10658_v55, %v2054_v10  ;;  %v16105_v10 = vsub.f32 %v16006_v2, %v10497_v13  ;;  %v10878_v2 = vmul.f32 %v16108_v3, %v10702_v59  ;;  %v16113_v3 = vsub.f32 %v16112_v35, %v10497_v13  ;;  %v7172_v35 = vld [vmem:[%s15045_s4 + $0x298] sm:$0xff] }
 0x316   : > { %v10920_v15 = vmul.f32 %v16119_v52, %v10702_v59  ;;  %5449 = vperm.xlu2 %7695, %v7172_v35   ;;  %v16140_v35 = vld [vmem:[#allocation25_spill] sm:$0xff] }
 0x317   : > { %v10860_v45 = vmul.f32 %v16105_v10, %v10702_v59  ;;  %v10890_v10 = vmul.f32 %v16110_v25, %v10702_v59  ;;  %v10902_v28 = vmul.f32 %v16113_v3, %v10702_v59  ;;  %v16117_v25 = vsub.f32 %v16116_v7, %v10497_v13  ;;  %v7171_v3 = vld [vmem:[%s15045_s4 + $0x290] sm:$0xff] }
 0x318   : > { %16120 = vst [vmem:[#allocation31_spill] sm:$0xff] %v10920_v15  ;;  %v10934_v7 = vsel %vm2058_vm6, %v10658_v55, %v2055_v24  ;;  %v16130_v15 = vsub.f32 %v16129_v53, %v10497_v13  ;;  %v16133_v24 = vld [vmem:[#allocation187_spill] sm:$0xff]  ;;  %5444 = vperm.xlu1 %7694, %v7171_v3  }
 0x319   : > { %v10868_v30 = vpop.permute.xlu2 %3066  ;;  %v10914_v0 = vmul.f32 %v16117_v25, %v10702_v59  ;;  %16122 = vst [vmem:[#allocation182_spill] sm:$0xff] %v10934_v7  ;;  %v16123_v25 = vld [vmem:[#allocation181_spill] sm:$0xff]  ;;  %v16150_v3 = vld [vmem:[#allocation11_spill] sm:$0xff] }
 0x31a   : > { %16107 = vst [vmem:[#allocation107_spill] sm:$0xff] %v10868_v30  ;;  %v16124_v44 = vsub.f32 %v16123_v25, %v10497_v13  ;;  %v16127_v30 = vsub.f32 %v16126_v17, %v10497_v13  ;;  %v10954_v55 = vpop.permute.xlu0 %3071  ;;  %v16134_v25 = vsub.f32 %v16133_v24, %v10497_v13  ;;  %v16143_v24 = vld [vmem:[#allocation30_spill] sm:$0xff] }
 0x31b   : > { %v10931_v50 = vpop.permute.xlu1 %3061  ;;  %16132 = vst [vmem:[#allocation117_spill] sm:$0xff] %v10954_v55  ;;  %v16141_v55 = vsub.f32 %v16140_v35, %v10497_v13 }
 0x31c   : > { %16121 = vst [vmem:[#allocation96_spill] sm:$0xff] %v10931_v50  ;;  %v10940_v52 = vmul.f32 %v16124_v44, %v10702_v59  ;;  %v10946_v22 = vmul.f32 %v16127_v30, %v10702_v59  ;;  %v10952_v50 = vmul.f32 %v16130_v15, %v10702_v59  ;;  %v10960_v44 = vmul.f32 %v16134_v25, %v10702_v59 }
 0x31d   : > { %v16144_v25 = vsub.f32 %v16143_v24, %v10497_v13  ;;  %v16153_v24 = vld [vmem:[#allocation38_spill] sm:$0xff] }
 0x31e   : > { %16125 = vst [vmem:[#allocation41_spill] sm:$0xff] %v10940_v52  ;;  %v16135_v52 = vld [vmem:[#allocation189_spill] sm:$0xff] }
 0x31f   : > { %16128 = vst [vmem:[#allocation13_spill] sm:$0xff] %v10946_v22  ;;  %v16136_v30 = vsub.f32 %v16135_v52, %v10497_v13  ;;  %v16138_v22 = vld [vmem:[#allocation21_spill] sm:$0xff]  ;;  %v10984_v52 = vmul.f32 %v16144_v25, %v10702_v59  ;;  %v16154_v25 = vsub.f32 %v16153_v24, %v10497_v13  ;;  %v16165_v24 = vld [vmem:[#allocation10_spill] sm:$0xff] }
 0x320   : > { %16131 = vst [vmem:[#allocation91_spill] sm:$0xff] %v10952_v50  ;;  %v16139_v53 = vsub.f32 %v16138_v22, %v10497_v13  ;;  %v10978_v50 = vmul.f32 %v16141_v55, %v10702_v59  ;;  %v16151_v55 = vsub.f32 %v16150_v3, %v10497_v13 }
 0x321   : > { %v10966_v17 = vmul.f32 %v16136_v30, %v10702_v59  ;;  %v16145_v30 = vld [vmem:[#allocation6_spill] sm:$0xff] }
 0x322   : > { %v10972_v15 = vmul.f32 %v16139_v53, %v10702_v59  ;;  %16142 = vst [vmem:[#allocation118_spill] sm:$0xff] %v10978_v50  ;;  %v16148_v53 = vsub.f32 %v16026_v41, %v10497_v13  ;;  %v11002_v50 = vmul.f32 %v16151_v55, %v10702_v59  ;;  %v16163_v55 = vsub.f32 %v16162_v58, %v10497_v13  ;;  %v16173_v58 = vld [vmem:[#allocation80_spill] sm:$0xff] }
 0x323   : > { %16137 = vst [vmem:[#allocation43_spill] sm:$0xff] %v10966_v17  ;;  %v16146_v17 = vsub.f32 %v16145_v30, %v10497_v13  ;;  %v11008_v30 = vmul.f32 %v16154_v25, %v10702_v59  ;;  %v16166_v25 = vsub.f32 %v16165_v24, %v10497_v13  ;;  %v16176_v24 = vld [vmem:[#allocation64_spill] sm:$0xff] }
 0x324   : > { %v10996_v35 = vmul.f32 %v16148_v53, %v10702_v59  ;;  %16152 = vst [vmem:[#allocation174_spill] sm:$0xff] %v11002_v50  ;;  %v16159_v53 = vld [vmem:[#allocation51_spill] sm:$0xff]  ;;  %v11026_v50 = vmul.f32 %v16163_v55, %v10702_v59  ;;  %v16174_v55 = vsub.f32 %v16173_v58, %v10497_v13 }
 0x325   : > { %v10990_v22 = vmul.f32 %v16146_v17, %v10702_v59  ;;  %16155 = vst [vmem:[#allocation176_spill] sm:$0xff] %v11008_v30  ;;  %v16156_v17 = vld [vmem:[#allocation7_spill] sm:$0xff]  ;;  %v11032_v30 = vmul.f32 %v16166_v25, %v10702_v59  ;;  %v16177_v25 = vsub.f32 %v16176_v24, %v10497_v13  ;;  %v16183_v24 = vsub.f32 %v16045_v27, %v10497_v13 }
 0x326   : > { %16149 = vst [vmem:[#allocation172_spill] sm:$0xff] %v10996_v35  ;;  %v16160_v35 = vsub.f32 %v16159_v53, %v10497_v13  ;;  %v16181_v58 = vld [vmem:[#allocation19_spill] sm:$0xff]  ;;  %v16187_v27 = vsub.f32 %v10013_v40, %v10497_v13 }
 0x327   : > { %16147 = vst [vmem:[#allocation44_spill] sm:$0xff] %v10990_v22  ;;  %v16157_v22 = vsub.f32 %v16156_v17, %v10497_v13  ;;  %v7175_v40 = vld [vmem:[%s15045_s4 + $0x2b0] sm:$0xff] }
 0x328   : > { %v11020_v3 = vmul.f32 %v16160_v35, %v10702_v59  ;;  %16164 = vst [vmem:[#allocation183_spill] sm:$0xff] %v11026_v50  ;;  %v16170_v35 = vld [vmem:[#allocation47_spill] sm:$0xff]  ;;  %v11050_v50 = vmul.f32 %v16174_v55, %v10702_v59  ;;  %v16182_v55 = vsub.f32 %v16181_v58, %v10497_v13  ;;  %v16186_v58 = vsub.f32 %v10003_v46, %v10497_v13 }
 0x329   : > { %v11014_v41 = vmul.f32 %v16157_v22, %v10702_v59  ;;  %16167 = vst [vmem:[#allocation184_spill] sm:$0xff] %v11032_v30  ;;  %v16168_v22 = vld [vmem:[#allocation15_spill] sm:$0xff]  ;;  %v16171_v53 = vsub.f32 %v16170_v35, %v10497_v13  ;;  %v11056_v30 = vmul.f32 %v16177_v25, %v10702_v59  ;;  %v11080_v25 = vmul.f32 %v16183_v24, %v10702_v59 }
 0x32a   : > { %16161 = vst [vmem:[#allocation181_spill] sm:$0xff] %v11020_v3  ;;  %v16169_v17 = vsub.f32 %v16168_v22, %v10497_v13  ;;  %v16178_v22 = vsub.f32 %v16042_v9, %v10497_v13  ;;  %v16179_v35 = vld [vmem:[#allocation95_spill] sm:$0xff]  ;;  %v16184_v9 = vsub.f32 %v16046_v62, %v10497_v13  ;;  %v11104_v24 = vmul.f32 %v16187_v27, %v10702_v59  ;;  %v11133_v27 = vpop.permute.xlu2 %2981 }
 0x32b   : > { %16158 = vst [vmem:[#allocation179_spill] sm:$0xff] %v11014_v41  ;;  %v11044_v3 = vmul.f32 %v16171_v53, %v10702_v59  ;;  %v16180_v53 = vsub.f32 %v16179_v35, %v10497_v13  ;;  %v16185_v35 = vsub.f32 %v16047_v57, %v10497_v13  ;;  %v16188_v62 = vsub.f32 %v16048_v32, %v10497_v13  ;;  %v7174_v32 = vld [vmem:[%s15045_s4 + $0x2a8] sm:$0xff] }
 0x32c   : > { %v11038_v41 = vmul.f32 %v16169_v17, %v10702_v59  ;;  %16175 = vst [vmem:[#allocation189_spill] sm:$0xff] %v11050_v50  ;;  %v11062_v17 = vmul.f32 %v16178_v22, %v10702_v59  ;;  %v11074_v50 = vmul.f32 %v16182_v55, %v10702_v59  ;;  %v11086_v22 = vmul.f32 %v16184_v9, %v10702_v59 }
 0x32d   : > { %16172 = vst [vmem:[#allocation187_spill] sm:$0xff] %v11044_v3  ;;  %v11068_v3 = vmul.f32 %v16180_v53, %v10702_v59  ;;  %v11092_v53 = vmul.f32 %v16185_v35, %v10702_v59  ;;  %v11098_v55 = vmul.f32 %v16186_v58, %v10702_v59  ;;  %v11110_v9 = vmul.f32 %v16188_v62, %v10702_v59 }
 0x32e   : > { %v16190_v57 = vsub.f32 %v16049_v39, %v10497_v13  ;;  %v16192_v46 = vsub.f32 %v10068_v54, %v10497_v13  ;;  %v7173_v39 = vld [vmem:[%s15045_s4 + $0x2a0] sm:$0xff]  ;;  %16194 = vst [vmem:[#allocation6_spill] sm:$0xff] %v11133_v27  ;;  %v16195_v54 = vsub.f32 %v10086_v31, %v10497_v13  ;;  %v16199_v27 = vsub.f32 %v10153_v36, %v10497_v13 }
 0x32f   : > { %16189 = vst [vmem:[#allocation21_spill] sm:$0xff] %v11110_v9  ;;  %5464 = vperm.xlu2 %7695, %v7175_v40   ;;  %v16200_v31 = vsub.f32 %v10173_v1, %v10497_v13  ;;  %v16206_v40 = vsub.f32 %v10242_v29, %v10497_v13  ;;  %5459 = vperm.xlu1 %7694, %v7174_v32   ;;  %v11183_v1 = vpop.permute.xlu1 %3046  ;;  %v16218_v32 = vld [vmem:[#allocation67_spill] sm:$0xff] }
 0x330   : > { %v11116_v35 = vmul.f32 %v16190_v57, %v10702_v59  ;;  %v11122_v58 = vmul.f32 %v16192_v46, %v10702_v59  ;;  %v11139_v62 = vmul.f32 %v16195_v54, %v10702_v59  ;;  %v16196_v57 = vsub.f32 %v10102_v19, %v10497_v13  ;;  %16208 = vst [vmem:[#allocation10_spill] sm:$0xff] %v11183_v1 }
 0x331   : > { %v11157_v9 = vmul.f32 %v16199_v27, %v10702_v59  ;;  %v11163_v19 = vmul.f32 %v16200_v31, %v10702_v59  ;;  %v16202_v54 = vsub.f32 %v10190_v23, %v10497_v13  ;;  %v11181_v27 = vmul.f32 %v16206_v40, %v10702_v59  ;;  %5454 = vperm.xlu0 %7693, %v7173_v39   ;;  %v16231_v39 = vld [vmem:[#allocation144_spill] sm:$0xff] }
 0x332   : > { %16191 = vst [vmem:[#allocation25_spill] sm:$0xff] %v11116_v35  ;;  %v11145_v46 = vmul.f32 %v16196_v57, %v10702_v59  ;;  %v16209_v57 = vld [vmem:[#allocation50_spill] sm:$0xff] }
 0x333   : > { %16193 = vst [vmem:[#allocation30_spill] sm:$0xff] %v11122_v58  ;;  %v16198_v58 = vsub.f32 %v10141_v20, %v10497_v13  ;;  %v11169_v20 = vmul.f32 %v16202_v54, %v10702_v59  ;;  %v16210_v23 = vsub.f32 %v16209_v57, %v10497_v13  ;;  %v16212_v54 = vld [vmem:[#allocation143_spill] sm:$0xff]  ;;  %v11209_v57 = vpop.permute.xlu0 %3056 }
 0x334   : > { %16197 = vst [vmem:[#allocation11_spill] sm:$0xff] %v11145_v46 }
 0x335   : > { %v11151_v35 = vmul.f32 %v16198_v58, %v10702_v59  ;;  %16201 = vst [vmem:[#allocation38_spill] sm:$0xff] %v11163_v19  ;;  %v16204_v58 = vsub.f32 %v10210_v33, %v10497_v13  ;;  %v11189_v31 = vmul.f32 %v16210_v23, %v10702_v59  ;;  %v16213_v33 = vsub.f32 %v16212_v54, %v10497_v13  ;;  %v16215_v19 = vld [vmem:[#allocation62_spill] sm:$0xff]  ;;  %v16222_v23 = vld [vmem:[#allocation136_spill] sm:$0xff] }
 0x336   : > { %16203 = vst [vmem:[#allocation7_spill] sm:$0xff] %v11169_v20  ;;  %v16216_v29 = vsub.f32 %v16215_v19, %v10497_v13  ;;  %v16223_v54 = vsub.f32 %v16222_v23, %v10523_v4  ;;  %v16225_v20 = vld [vmem:[#allocation137_spill] sm:$0xff]  ;;  %v16234_v23 = vld [vmem:[#allocation146_spill] sm:$0xff] }
 0x337   : > { %v11175_v36 = vmul.f32 %v16204_v58, %v10702_v59  ;;  %16207 = vst [vmem:[#allocation14_spill] sm:$0xff] %v11181_v27  ;;  %v11195_v58 = vmul.f32 %v16213_v33, %v10702_v59  ;;  %v16226_v19 = vsub.f32 %v16225_v20, %v10523_v4  ;;  %v16237_v20 = vld [vmem:[#allocation149_spill] sm:$0xff] }
 0x338   : > { %16211 = vst [vmem:[#allocation15_spill] sm:$0xff] %v11189_v31  ;;  %v11201_v40 = vmul.f32 %v16216_v29, %v10702_v59  ;;  %v11215_v33 = vmul.f32 %v16223_v54, %v10934_v7  ;;  %v16228_v31 = vld [vmem:[#allocation142_spill] sm:$0xff]  ;;  %v16235_v54 = vsub.f32 %v16234_v23, %v10523_v4  ;;  %v16246_v23 = vld [vmem:[#allocation155_spill] sm:$0xff] }
 0x339   : > { %16205 = vst [vmem:[#allocation51_spill] sm:$0xff] %v11175_v36  ;;  %v16219_v36 = vsub.f32 %v16218_v32, %v10497_v13  ;;  %v11221_v29 = vmul.f32 %v16226_v19, %v10934_v7  ;;  %v16238_v19 = vsub.f32 %v16237_v20, %v10523_v4  ;;  %v16249_v20 = vld [vmem:[#allocation157_spill] sm:$0xff]  ;;  %v16335_v13 = vsub.f32 %v16101_v48, %v10523_v4 }
 0x33a   : > { %16214 = vst [vmem:[#allocation47_spill] sm:$0xff] %v11195_v58  ;;  %v16232_v58 = vsub.f32 %v16231_v39, %v10523_v4  ;;  %v16340_v48 = vsub.f32 %v10307_v16, %v10523_v4  ;;  %v16347_v16 = vsub.f32 %v10413_v37, %v10523_v4  ;;  %v16355_v37 = vld [vmem:[#allocation71_spill] sm:$0xff] }
 0x33b   : > { %16217 = vst [vmem:[#allocation80_spill] sm:$0xff] %v11201_v40  ;;  %v11207_v27 = vmul.f32 %v16219_v36, %v10702_v59  ;;  %v16229_v36 = vsub.f32 %v16228_v31, %v10523_v4  ;;  %v16240_v31 = vld [vmem:[#allocation150_spill] sm:$0xff]  ;;  %v11488_v59 = vmul.f32 %v16335_v13, %v10934_v7 }
 0x33c   : > { %16221 = vst [vmem:[#allocation95_spill] sm:$0xff] %v11209_v57  ;;  %v11233_v40 = vmul.f32 %v16232_v58, %v10934_v7  ;;  %v16243_v58 = vld [vmem:[#allocation154_spill] sm:$0xff]  ;;  %v16332_v57 = vld [vmem:[#allocation113_spill] sm:$0xff]  ;;  %v11512_v13 = vmul.f32 %v16340_v48, %v10934_v7  ;;  %v11536_v48 = vmul.f32 %v16347_v16, %v10934_v7  ;;  %v11558_v16 = vmul.f32 %v16355_v37, %v10854_v26  ;;  %v16361_v37 = vld [vmem:[#allocation83_spill] sm:$0xff] }
 0x33d   : > { %16220 = vst [vmem:[#allocation64_spill] sm:$0xff] %v11207_v27  ;;  %v11227_v32 = vmul.f32 %v16229_v36, %v10934_v7  ;;  %v16241_v36 = vsub.f32 %v16240_v31, %v10523_v4  ;;  %v16244_v39 = vsub.f32 %v16243_v58, %v10523_v4  ;;  %v16252_v31 = vld [vmem:[#allocation161_spill] sm:$0xff]  ;;  %v16255_v58 = vld [vmem:[#allocation164_spill] sm:$0xff] }
 0x33e   : > { %16224 = vst [vmem:[#allocation19_spill] sm:$0xff] %v11215_v33  ;;  %v11239_v33 = vmul.f32 %v16235_v54, %v10934_v7  ;;  %v16247_v54 = vsub.f32 %v16246_v23, %v10523_v4  ;;  %v16258_v23 = vld [vmem:[#allocation170_spill] sm:$0xff]  ;;  %v16327_v27 = vld [vmem:[#allocation40_spill] sm:$0xff] }
 0x33f   : > { %16227 = vst [vmem:[#allocation50_spill] sm:$0xff] %v11221_v29  ;;  %v11245_v29 = vmul.f32 %v16238_v19, %v10934_v7  ;;  %v16250_v19 = vsub.f32 %v16249_v20, %v10523_v4  ;;  %v16261_v20 = vld [vmem:[#allocation173_spill] sm:$0xff]  ;;  %v16328_v46 = vsub.f32 %v16327_v27, %v10523_v4  ;;  %v16334_v27 = vsub.f32 %v16100_v5, %v10523_v4 }
 0x340   : > { %16230 = vst [vmem:[#allocation143_spill] sm:$0xff] %v11227_v32  ;;  %v11251_v32 = vmul.f32 %v16241_v36, %v10934_v7  ;;  %v16253_v36 = vsub.f32 %v16252_v31, %v10523_v4  ;;  %v16264_v31 = vld [vmem:[#allocation177_spill] sm:$0xff]  ;;  %v16339_v5 = vsub.f32 %v16102_v56, %v10523_v4  ;;  %v16345_v56 = vsub.f32 %v10379_v38, %v10523_v4 }
 0x341   : > { %16233 = vst [vmem:[#allocation62_spill] sm:$0xff] %v11233_v40  ;;  %v11257_v40 = vmul.f32 %v16244_v39, %v10934_v7  ;;  %v16256_v39 = vsub.f32 %v16255_v58, %v10523_v4  ;;  %v16267_v58 = vsub.f32 %v16069_v12, %v10523_v4  ;;  %v16277_v12 = vld [vmem:[#allocation12_spill] sm:$0xff]  ;;  %v11462_v1 = vmul.f32 %v16328_v46, %v10934_v7 }
 0x342   : > { %16236 = vst [vmem:[#allocation67_spill] sm:$0xff] %v11239_v33  ;;  %v11263_v33 = vmul.f32 %v16247_v54, %v10934_v7  ;;  %v16259_v54 = vsub.f32 %v16258_v23, %v10523_v4  ;;  %v16269_v23 = vld [vmem:[#allocation185_spill] sm:$0xff]  ;;  %v11482_v46 = vmul.f32 %v16334_v27, %v10934_v7  ;;  %v11506_v27 = vmul.f32 %v16339_v5, %v10934_v7 }
 0x343   : > { %16239 = vst [vmem:[#allocation136_spill] sm:$0xff] %v11245_v29  ;;  %v11269_v29 = vmul.f32 %v16250_v19, %v10934_v7  ;;  %v16262_v19 = vsub.f32 %v16261_v20, %v10523_v4  ;;  %v16272_v20 = vld [vmem:[#allocation8_spill] sm:$0xff]  ;;  %v11530_v5 = vmul.f32 %v16345_v56, %v10934_v7  ;;  %v16353_v38 = vsub.f32 %v10474_v47, %v10523_v4  ;;  %v16359_v47 = vld [vmem:[#allocation87_spill] sm:$0xff] }
 0x344   : > { %16242 = vst [vmem:[#allocation137_spill] sm:$0xff] %v11251_v32  ;;  %v11275_v32 = vmul.f32 %v16253_v36, %v10934_v7  ;;  %v16265_v36 = vsub.f32 %v16264_v31, %v10523_v4  ;;  %v16275_v31 = vsub.f32 %v16074_v63, %v10523_v4  ;;  %v7183_v63 = vld [vmem:[%s15045_s4 + $0x2f0] sm:$0xff] }
 0x345   : > { %16245 = vst [vmem:[#allocation142_spill] sm:$0xff] %v11257_v40  ;;  %v11281_v40 = vmul.f32 %v16256_v39, %v10934_v7  ;;  %v11305_v39 = vmul.f32 %v16267_v58, %v10934_v7  ;;  %v16278_v58 = vsub.f32 %v16277_v12, %v10523_v4  ;;  %v16283_v12 = vld [vmem:[#allocation63_spill] sm:$0xff]  ;;  %5504 = vperm.xlu0 %7693, %v7183_v63  }
 0x346   : > { %16248 = vst [vmem:[#allocation144_spill] sm:$0xff] %v11263_v33  ;;  %v11287_v33 = vmul.f32 %v16259_v54, %v10934_v7  ;;  %v16270_v54 = vsub.f32 %v16269_v23, %v10523_v4  ;;  %v7181_v23 = vld [vmem:[%s15045_s4 + $0x2e0] sm:$0xff]  ;;  %v11554_v56 = vmul.f32 %v16353_v38, %v10934_v7  ;;  %v11574_v38 = vmul.f32 %v16359_v47, %v10884_v42  ;;  %v16365_v47 = vld [vmem:[#allocation31_spill] sm:$0xff] }
 0x347   : > { %16251 = vst [vmem:[#allocation146_spill] sm:$0xff] %v11269_v29  ;;  %v11293_v29 = vmul.f32 %v16262_v19, %v10934_v7  ;;  %v16273_v19 = vsub.f32 %v16272_v20, %v10523_v4  ;;  %v16280_v20 = vld [vmem:[#allocation58_spill] sm:$0xff]  ;;  %5494 = vperm.xlu2 %7695, %v7181_v23  }
 0x348   : > { %16254 = vst [vmem:[#allocation149_spill] sm:$0xff] %v11275_v32  ;;  %v11299_v32 = vmul.f32 %v16265_v36, %v10934_v7  ;;  %v11323_v36 = vmul.f32 %v16275_v31, %v10934_v7 }
 0x349   : > { %16257 = vst [vmem:[#allocation150_spill] sm:$0xff] %v11281_v40 }
 0x34a   : > { %16260 = vst [vmem:[#allocation154_spill] sm:$0xff] %v11287_v33  ;;  %v11311_v33 = vmul.f32 %v16270_v54, %v10934_v7  ;;  %v7184_v54 = vld [vmem:[%s15045_s4 + $0x2f8] sm:$0xff] }
 0x34b   : > { %16263 = vst [vmem:[#allocation155_spill] sm:$0xff] %v11293_v29  ;;  %v11317_v29 = vmul.f32 %v16273_v19, %v10934_v7  ;;  %v16281_v19 = vsub.f32 %v16280_v20, %v10523_v4  ;;  %v16291_v20 = vld [vmem:[#allocation76_spill] sm:$0xff]  ;;  %5509 = vperm.xlu1 %7694, %v7184_v54  }
 0x34c   : > { %16266 = vst [vmem:[#allocation157_spill] sm:$0xff] %v11299_v32  ;;  %v16289_v32 = vsub.f32 %v16079_v21, %v10523_v4  ;;  %v16312_v54 = vld [vmem:[#allocation28_spill] sm:$0xff] }
 0x34d   : > { %16268 = vst [vmem:[#allocation161_spill] sm:$0xff] %v11305_v39  ;;  %v11329_v39 = vmul.f32 %v16278_v58, %v10934_v7  ;;  %v11344_v31 = vmul.f32 %v16281_v19, %v10934_v7  ;;  %v16284_v58 = vsub.f32 %v16283_v12, %v10523_v4  ;;  %v16292_v19 = vsub.f32 %v16291_v20, %v10523_v4  ;;  %v11388_v20 = vpop.permute.xlu2 %2966 }
 0x34e   : > { %16271 = vst [vmem:[#allocation164_spill] sm:$0xff] %v11311_v33  ;;  %v11362_v40 = vmul.f32 %v16289_v32, %v10934_v7  ;;  %v16300_v32 = vld [vmem:[#allocation22_spill] sm:$0xff] }
 0x34f   : > { %16274 = vst [vmem:[#allocation170_spill] sm:$0xff] %v11317_v29  ;;  %v11350_v33 = vmul.f32 %v16284_v58, %v10934_v7  ;;  %v16286_v29 = vld [vmem:[#allocation17_spill] sm:$0xff]  ;;  %v11368_v12 = vmul.f32 %v16292_v19, %v10934_v7  ;;  %v16294_v58 = vld [vmem:[#allocation20_spill] sm:$0xff]  ;;  %v16301_v23 = vsub.f32 %v16300_v32, %v10523_v4  ;;  %v16304_v19 = vld [vmem:[#allocation74_spill] sm:$0xff] }
 0x350   : > { %16276 = vst [vmem:[#allocation173_spill] sm:$0xff] %v11323_v36 }
 0x351   : > { %16279 = vst [vmem:[#allocation177_spill] sm:$0xff] %v11329_v39  ;;  %v16287_v39 = vsub.f32 %v16286_v29, %v10523_v4 }
 0x352   : > { %16282 = vst [vmem:[#allocation185_spill] sm:$0xff] %v11344_v31 }
 0x353   : > { %16285 = vst [vmem:[#allocation8_spill] sm:$0xff] %v11350_v33  ;;  %v11356_v36 = vmul.f32 %v16287_v39, %v10934_v7  ;;  %v16295_v33 = vsub.f32 %v16294_v58, %v10523_v4  ;;  %v16297_v39 = vld [vmem:[#allocation85_spill] sm:$0xff] }
 0x354   : > { %16290 = vst [vmem:[#allocation58_spill] sm:$0xff] %v11362_v40  ;;  %v16298_v31 = vsub.f32 %v16297_v39, %v10523_v4  ;;  %v11386_v40 = vmul.f32 %v16301_v23, %v10934_v7 }
 0x355   : > { %16288 = vst [vmem:[#allocation12_spill] sm:$0xff] %v11356_v36  ;;  %v11374_v29 = vmul.f32 %v16295_v33, %v10934_v7  ;;  %v16305_v33 = vsub.f32 %v16304_v19, %v10523_v4  ;;  %v16314_v19 = vld [vmem:[#allocation112_spill] sm:$0xff]  ;;  %v16325_v36 = vld [vmem:[#allocation129_spill] sm:$0xff] }
 0x356   : > { %16293 = vst [vmem:[#allocation63_spill] sm:$0xff] %v11368_v12  ;;  %v11380_v21 = vmul.f32 %v16298_v31, %v10934_v7  ;;  %v16310_v12 = vld [vmem:[#allocation26_spill] sm:$0xff] }
 0x357   : > { %16296 = vst [vmem:[#allocation17_spill] sm:$0xff] %v11374_v29  ;;  %v11394_v58 = vmul.f32 %v16305_v33, %v10934_v7  ;;  %v16307_v29 = vld [vmem:[#allocation98_spill] sm:$0xff]  ;;  %v16311_v32 = vsub.f32 %v16310_v12, %v10523_v4  ;;  %v16315_v33 = vsub.f32 %v16314_v19, %v10523_v4  ;;  %v11438_v19 = vpop.permute.xlu1 %2961 }
 0x358   : > { %16299 = vst [vmem:[#allocation76_spill] sm:$0xff] %v11380_v21  ;;  %v16308_v31 = vsub.f32 %v16307_v29, %v10523_v4 }
 0x359   : > { %16302 = vst [vmem:[#allocation20_spill] sm:$0xff] %v11386_v40  ;;  %v11406_v23 = vmul.f32 %v16311_v32, %v10934_v7  ;;  %v16313_v40 = vsub.f32 %v16312_v54, %v10523_v4  ;;  %v11418_v29 = vmul.f32 %v16315_v33, %v10934_v7  ;;  %v16317_v32 = vsub.f32 %v16091_v18, %v10523_v4  ;;  %v16321_v33 = vld [vmem:[#allocation27_spill] sm:$0xff] }
 0x35a   : > { %16303 = vst [vmem:[#allocation85_spill] sm:$0xff] %v11388_v20  ;;  %v11400_v39 = vmul.f32 %v16308_v31, %v10934_v7  ;;  %v16316_v31 = vsub.f32 %v16090_v6, %v10523_v4  ;;  %v16322_v6 = vsub.f32 %v16321_v33, %v10523_v4  ;;  %v11464_v33 = vpop.permute.xlu0 %2971 }
 0x35b   : > { %16306 = vst [vmem:[#allocation22_spill] sm:$0xff] %v11394_v58  ;;  %v11412_v21 = vmul.f32 %v16313_v40, %v10934_v7  ;;  %v11430_v54 = vmul.f32 %v16317_v32, %v10934_v7  ;;  %v16318_v40 = vld [vmem:[#allocation120_spill] sm:$0xff]  ;;  %v16323_v58 = vld [vmem:[#allocation37_spill] sm:$0xff] }
 0x35c   : > { %16309 = vst [vmem:[#allocation74_spill] sm:$0xff] %v11400_v39  ;;  %v11424_v12 = vmul.f32 %v16316_v31, %v10934_v7  ;;  %v16319_v63 = vsub.f32 %v16318_v40, %v10523_v4  ;;  %v11444_v31 = vmul.f32 %v16322_v6, %v10934_v7  ;;  %v16324_v18 = vsub.f32 %v16323_v58, %v10523_v4  ;;  %v16330_v6 = vld [vmem:[#allocation33_spill] sm:$0xff] }
 0x35d   : > { %16320 = vst [vmem:[#allocation98_spill] sm:$0xff] %v11438_v19  ;;  %v16326_v40 = vsub.f32 %v16325_v36, %v10523_v4  ;;  %v16331_v58 = vsub.f32 %v16330_v6, %v10523_v4  ;;  %v16333_v36 = vsub.f32 %v16332_v57, %v10523_v4  ;;  %v16336_v6 = vsub.f32 %v10234_v60, %v10523_v4 }
 0x35e   : > { %v11436_v39 = vmul.f32 %v16319_v63, %v10934_v7  ;;  %v11450_v32 = vmul.f32 %v16324_v18, %v10934_v7  ;;  %16329 = vst [vmem:[#allocation26_spill] sm:$0xff] %v11464_v33  ;;  %v16338_v57 = vsub.f32 %v10277_v61, %v10523_v4  ;;  %v16342_v60 = vsub.f32 %v10326_v43, %v10523_v4 }
 0x35f   : > { %v11456_v63 = vmul.f32 %v16326_v40, %v10934_v7  ;;  %v11470_v18 = vmul.f32 %v16331_v58, %v10934_v7  ;;  %v11476_v40 = vmul.f32 %v16333_v36, %v10934_v7  ;;  %v11494_v58 = vmul.f32 %v16336_v6, %v10934_v7  ;;  %16341 = vst [vmem:[#allocation112_spill] sm:$0xff] %v11512_v13  ;;  %v16357_v13 = vld [vmem:[#allocation84_spill] sm:$0xff] }
 0x360   : > { %v11500_v36 = vmul.f32 %v16338_v57, %v10934_v7  ;;  %v11518_v6 = vmul.f32 %v16342_v60, %v10934_v7  ;;  %v16343_v61 = vsub.f32 %v10352_v11, %v10523_v4  ;;  %16346 = vst [vmem:[#allocation27_spill] sm:$0xff] %v11530_v5  ;;  %v16349_v43 = vsub.f32 %v10438_v49, %v10523_v4  ;;  %v16356_v49 = vld [vmem:[#allocation81_spill] sm:$0xff] }
 0x361   : > { %16337 = vst [vmem:[#allocation28_spill] sm:$0xff] %v11494_v58  ;;  %v16351_v11 = vsub.f32 %v10455_v14, %v10523_v4  ;;  %v16358_v14 = vld [vmem:[#allocation77_spill] sm:$0xff] }
 0x362   : > { %v11524_v57 = vmul.f32 %v16343_v61, %v10934_v7  ;;  %16348 = vst [vmem:[#allocation37_spill] sm:$0xff] %v11536_v48  ;;  %v11542_v60 = vmul.f32 %v16349_v43, %v10934_v7  ;;  %v11562_v43 = vmul.f32 %v16356_v49, %v10860_v45  ;;  %v16360_v5 = vld [vmem:[#allocation89_spill] sm:$0xff]  ;;  %v11582_v45 = vmul.f32 %v16361_v37, %v10896_v8  ;;  %v16362_v49 = vld [vmem:[#allocation92_spill] sm:$0xff] }
 0x363   : > { %v11548_v61 = vmul.f32 %v16351_v11, %v10934_v7  ;;  %16354 = vst [vmem:[#allocation33_spill] sm:$0xff] %v11554_v56  ;;  %v11570_v11 = vmul.f32 %v16358_v14, %v10878_v2  ;;  %v11578_v26 = vmul.f32 %v16360_v5, %v10890_v10  ;;  %v16364_v14 = vld [vmem:[#allocation88_spill] sm:$0xff]  ;;  %v16366_v48 = vld [vmem:[#allocation97_spill] sm:$0xff]  ;;  %v16384_v7 = vld [vmem:[#allocation114_spill] sm:$0xff] }
 0x364   : > { %16344 = vst [vmem:[#allocation120_spill] sm:$0xff] %v11524_v57  ;;  %v11566_v57 = vmul.f32 %v16357_v13, %v10866_v34  ;;  %v11586_v34 = vmul.f32 %v16362_v49, %v10902_v28  ;;  %v16363_v13 = vld [vmem:[#allocation94_spill] sm:$0xff]  ;;  %v11594_v42 = vmul.f32 %v16364_v14, %v10914_v0  ;;  %v11598_v10 = vmul.f32 %v16366_v48, %v16365_v47  ;;  %v16367_v5 = vld [vmem:[#allocation41_spill] sm:$0xff]  ;;  %v11608_v49 = vpop.permute.xlu2 %3051  ;;  %v16376_v47 = vld [vmem:[#allocation43_spill] sm:$0xff] }
 0x365   : > { %16350 = vst [vmem:[#allocation129_spill] sm:$0xff] %v11542_v60  ;;  %v11590_v2 = vmul.f32 %v16363_v13, %v10908_v51  ;;  %v16368_v60 = vld [vmem:[#allocation100_spill] sm:$0xff]  ;;  %v16369_v37 = vld [vmem:[#allocation13_spill] sm:$0xff]  ;;  %v16372_v51 = vld [vmem:[#allocation91_spill] sm:$0xff] }
 0x366   : > { %16352 = vst [vmem:[#allocation40_spill] sm:$0xff] %v11548_v61  ;;  %v11602_v8 = vmul.f32 %v16368_v60, %v16367_v5  ;;  %v16370_v61 = vld [vmem:[#allocation93_spill] sm:$0xff]  ;;  %v16373_v13 = vld [vmem:[#allocation103_spill] sm:$0xff]  ;;  %v16374_v0 = vld [vmem:[#allocation106_spill] sm:$0xff] }
 0x367   : > { %v11606_v28 = vmul.f32 %v16370_v61, %v16369_v37  ;;  %16371 = vst [vmem:[#allocation113_spill] sm:$0xff] %v11608_v49  ;;  %v11612_v56 = vmul.f32 %v16373_v13, %v16372_v51  ;;  %v11616_v14 = vmul.f32 %v16374_v0, %v10960_v44  ;;  %v16377_v48 = vld [vmem:[#allocation99_spill] sm:$0xff]  ;;  %v16379_v5 = vld [vmem:[#allocation109_spill] sm:$0xff]  ;;  %v16380_v37 = vld [vmem:[#allocation118_spill] sm:$0xff] }
 0x368   : > { %v11620_v58 = vmul.f32 %v16377_v48, %v16376_v47  ;;  %v11624_v60 = vmul.f32 %v16379_v5, %v10972_v15  ;;  %v16381_v61 = vld [vmem:[#allocation111_spill] sm:$0xff]  ;;  %v16382_v49 = vld [vmem:[#allocation105_spill] sm:$0xff]  ;;  %v16383_v13 = vld [vmem:[#allocation44_spill] sm:$0xff]  ;;  %v11642_v48 = vpop.permute.xlu1 %2946 }
 0x369   : > { %16375 = vst [vmem:[#allocation31_spill] sm:$0xff] %v11616_v14  ;;  %v11628_v4 = vmul.f32 %v16381_v61, %v16380_v37  ;;  %v11632_v51 = vmul.f32 %v16382_v49, %v10984_v52  ;;  %v11636_v44 = vmul.f32 %v16384_v7, %v16383_v13  ;;  %v16385_v0 = vld [vmem:[#allocation172_spill] sm:$0xff]  ;;  %v16389_v15 = vld [vmem:[#allocation174_spill] sm:$0xff]  ;;  %v16393_v61 = vld [vmem:[#allocation119_spill] sm:$0xff] }
 0x36a   : > { %16378 = vst [vmem:[#allocation41_spill] sm:$0xff] %v11620_v58  ;;  %v16386_v14 = vld [vmem:[#allocation116_spill] sm:$0xff]  ;;  %v16390_v5 = vld [vmem:[#allocation110_spill] sm:$0xff]  ;;  %v16395_v52 = vld [vmem:[#allocation179_spill] sm:$0xff] }
 0x36b   : > { %v11640_v47 = vmul.f32 %v16386_v14, %v16385_v0  ;;  %16388 = vst [vmem:[#allocation91_spill] sm:$0xff] %v11642_v48  ;;  %v11646_v58 = vmul.f32 %v16390_v5, %v16389_v15  ;;  %v16392_v37 = vld [vmem:[#allocation176_spill] sm:$0xff]  ;;  %v16396_v49 = vld [vmem:[#allocation122_spill] sm:$0xff]  ;;  %v16398_v13 = vld [vmem:[#allocation181_spill] sm:$0xff]  ;;  %v11660_v0 = vpop.permute.xlu0 %2956 }
 0x36c   : > { %v11650_v33 = vmul.f32 %v16393_v61, %v16392_v37  ;;  %v11654_v20 = vmul.f32 %v16396_v49, %v16395_v52  ;;  %v16399_v7 = vld [vmem:[#allocation115_spill] sm:$0xff]  ;;  %16401 = vst [vmem:[#allocation174_spill] sm:$0xff] %v11660_v0  ;;  %v16403_v48 = vld [vmem:[#allocation125_spill] sm:$0xff]  ;;  %v16405_v15 = vld [vmem:[#allocation184_spill] sm:$0xff] }
 0x36d   : > { %16387 = vst [vmem:[#allocation13_spill] sm:$0xff] %v11640_v47  ;;  %v11658_v19 = vmul.f32 %v16399_v7, %v16398_v13  ;;  %v16402_v14 = vld [vmem:[#allocation183_spill] sm:$0xff]  ;;  %v16406_v5 = vld [vmem:[#allocation128_spill] sm:$0xff]  ;;  %v16408_v37 = vld [vmem:[#allocation121_spill] sm:$0xff] }
 0x36e   : > { %16391 = vst [vmem:[#allocation43_spill] sm:$0xff] %v11646_v58  ;;  %v11664_v47 = vmul.f32 %v16403_v48, %v16402_v14  ;;  %v11668_v58 = vmul.f32 %v16406_v5, %v16405_v15  ;;  %v11672_v61 = vmul.f32 %v16408_v37, %v11038_v41  ;;  %v16410_v52 = vld [vmem:[#allocation187_spill] sm:$0xff]  ;;  %v7180_v13 = vld [vmem:[%s15045_s4 + $0x2d8] sm:$0xff] }
 0x36f   : > { %16394 = vst [vmem:[#allocation118_spill] sm:$0xff] %v11650_v33  ;;  %v16411_v49 = vld [vmem:[#allocation131_spill] sm:$0xff]  ;;  %v16413_v48 = vld [vmem:[#allocation189_spill] sm:$0xff]  ;;  %v16414_v5 = vld [vmem:[#allocation140_spill] sm:$0xff]  ;;  %5489 = vperm.xlu2 %7695, %v7180_v13  }
 0x370   : > { %16397 = vst [vmem:[#allocation44_spill] sm:$0xff] %v11654_v20  ;;  %v11676_v20 = vmul.f32 %v16411_v49, %v16410_v52  ;;  %v7179_v14 = vld [vmem:[%s15045_s4 + $0x2d0] sm:$0xff]  ;;  %v7182_v15 = vld [vmem:[%s15045_s4 + $0x2e8] sm:$0xff]  ;;  %v11689_v41 = vmul.f32 %v16414_v5, %v16413_v48  ;;  %v16418_v49 = vld [vmem:[#allocation145_spill] sm:$0xff] }
 0x371   : > { %16400 = vst [vmem:[#allocation172_spill] sm:$0xff] %v11658_v19  ;;  %v16416_v37 = vld [vmem:[#allocation132_spill] sm:$0xff]  ;;  %v11697_v7 = vmul.f32 %v16418_v49, %v11062_v17  ;;  %v16424_v48 = vld [vmem:[#allocation151_spill] sm:$0xff]  ;;  %5484 = vperm.xlu1 %7694, %v7179_v14   ;;  %v16437_v19 = vld [vmem:[#allocation165_spill] sm:$0xff]  ;;  %5499 = vperm.xlu0 %7693, %v7182_v15   ;;  %v2705_v15 = vmul.f32 %v16418_v49, %v11418_v29 }
 0x372   : > { %16404 = vst [vmem:[#allocation176_spill] sm:$0xff] %v11664_v47  ;;  %v11693_v52 = vmul.f32 %v16416_v37, %v11056_v30  ;;  %v16420_v0 = vld [vmem:[#allocation148_spill] sm:$0xff]  ;;  %v16426_v30 = vld [vmem:[#allocation153_spill] sm:$0xff]  ;;  %v16428_v17 = vld [vmem:[#allocation147_spill] sm:$0xff] }
 0x373   : > { %16407 = vst [vmem:[#allocation179_spill] sm:$0xff] %v11668_v58  ;;  %v16436_v47 = vld [vmem:[#allocation25_spill] sm:$0xff]  ;;  %v16441_v14 = vld [vmem:[#allocation158_spill] sm:$0xff] }
 0x374   : > { %16409 = vst [vmem:[#allocation181_spill] sm:$0xff] %v11672_v61  ;;  %v16422_v61 = vld [vmem:[#allocation139_spill] sm:$0xff]  ;;  %v11737_v33 = vmul.f32 %v16441_v14, %v11139_v62  ;;  %v2707_v62 = vmul.f32 %v16420_v0, %v11424_v12 }
 0x375   : > { %16412 = vst [vmem:[#allocation183_spill] sm:$0xff] %v11676_v20  ;;  %v11701_v20 = vmul.f32 %v16420_v0, %v11068_v3  ;;  %v11705_v58 = vmul.f32 %v16422_v61, %v11074_v50  ;;  %v16430_v3 = vld [vmem:[#allocation156_spill] sm:$0xff]  ;;  %v16432_v50 = vld [vmem:[#allocation159_spill] sm:$0xff]  ;;  %v16456_v0 = vld [vmem:[#allocation193_spill] sm:$0xff] }
 0x376   : > { %16415 = vst [vmem:[#allocation184_spill] sm:$0xff] %v11689_v41  ;;  %v11709_v41 = vmul.f32 %v16424_v48, %v11080_v25  ;;  %v11721_v13 = vmul.f32 %v16430_v3, %v11098_v55  ;;  %v16435_v25 = vld [vmem:[#allocation152_spill] sm:$0xff]  ;;  %v16443_v55 = vld [vmem:[#allocation167_spill] sm:$0xff]  ;;  %v2719_v29 = vmul.f32 %v16432_v50, %v11462_v1  ;;  %v11783_v1 = vpop.permute.xlu1 %3031 }
 0x377   : > { %16417 = vst [vmem:[#allocation187_spill] sm:$0xff] %v11693_v52  ;;  %v11713_v52 = vmul.f32 %v16426_v30, %v11086_v22  ;;  %v11731_v22 = vmul.f32 %v16437_v19, %v16436_v47  ;;  %v2703_v47 = vmul.f32 %v16416_v37, %v11412_v21  ;;  %v2717_v21 = vmul.f32 %v16430_v3, %v11456_v63 }
 0x378   : > { %16419 = vst [vmem:[#allocation189_spill] sm:$0xff] %v11697_v7  ;;  %v11717_v7 = vmul.f32 %v16428_v17, %v11092_v53  ;;  %v16440_v53 = vld [vmem:[#allocation169_spill] sm:$0xff]  ;;  %v2721_v12 = vmul.f32 %v16435_v25, %v11470_v18  ;;  %v16449_v18 = vld [vmem:[#allocation178_spill] sm:$0xff]  ;;  %v11805_v37 = vadd.f32 %v16456_v0, %v11570_v11 }
 0x379   : > { %16421 = vst [vmem:[#allocation140_spill] sm:$0xff] %v11701_v20  ;;  %v11725_v20 = vmul.f32 %v16432_v50, %v11104_v24  ;;  %v16445_v24 = vld [vmem:[#allocation186_spill] sm:$0xff] }
 0x37a   : > { %16423 = vst [vmem:[#allocation132_spill] sm:$0xff] %v11705_v58  ;;  %v16434_v58 = vld [vmem:[#allocation21_spill] sm:$0xff]  ;;  %v11781_v63 = vmul.f32 %v16445_v24, %v11506_v27  ;;  %v11801_v27 = vpop.permute.xlu0 %3041  ;;  %v16462_v50 = vld [vmem:[#allocation86_spill] sm:$0xff] }
 0x37b   : > { %16425 = vst [vmem:[#allocation145_spill] sm:$0xff] %v11709_v41  ;;  %v2720_v41 = vmul.f32 %v16435_v25, %v16434_v58  ;;  %v2701_v58 = vmul.f32 %v16414_v5, %v11406_v23  ;;  %v2715_v23 = vmul.f32 %v16428_v17, %v11450_v32  ;;  %v11763_v5 = vpop.permute.xlu2 %3036  ;;  %v2733_v32 = vmul.f32 %v16443_v55, %v11500_v36  ;;  %v16454_v36 = vld [vmem:[#allocation56_spill] sm:$0xff]  ;;  %v16463_v25 = vld [vmem:[#allocation134_spill] sm:$0xff] }
 0x37c   : > { %16427 = vst [vmem:[#allocation148_spill] sm:$0xff] %v11713_v52  ;;  %v16439_v52 = vld [vmem:[#allocation30_spill] sm:$0xff]  ;;  %v11799_v49 = vadd.f32 %v16454_v36, %v11566_v57  ;;  %v16461_v57 = vld [vmem:[#allocation48_spill] sm:$0xff]  ;;  %v11825_v11 = vadd.f32 %v16462_v50, %v11590_v2 }
 0x37d   : > { %16429 = vst [vmem:[#allocation139_spill] sm:$0xff] %v11717_v7  ;;  %v2724_v7 = vmul.f32 %v16440_v53, %v16439_v52  ;;  %v2711_v52 = vmul.f32 %v16424_v48, %v11436_v39  ;;  %v2723_v39 = vmul.f32 %v16437_v19, %v11476_v40  ;;  %v16450_v19 = vld [vmem:[#allocation198_spill] sm:$0xff]  ;;  %v11821_v3 = vadd.f32 %v16461_v57, %v11586_v34  ;;  %v16482_v50 = vld [vmem:[#allocation44_spill] sm:$0xff] }
 0x37e   : > { %16431 = vst [vmem:[#allocation151_spill] sm:$0xff] %v11721_v13  ;;  %v11741_v13 = vmul.f32 %v16443_v55, %v11151_v35  ;;  %v2709_v35 = vmul.f32 %v16422_v61, %v11430_v54  ;;  %v2725_v54 = vmul.f32 %v16440_v53, %v11482_v46  ;;  %v11787_v61 = vmul.f32 %v16449_v18, %v11518_v6  ;;  %v16452_v46 = vld [vmem:[#allocation200_spill] sm:$0xff]  ;;  %v16458_v6 = vld [vmem:[#allocation59_spill] sm:$0xff]  ;;  %v7177_v2 = vld [vmem:[%s15045_s4 + $0x2c0] sm:$0xff] }
 0x37f   : > { %16433 = vst [vmem:[#allocation153_spill] sm:$0xff] %v11725_v20  ;;  %v11745_v20 = vmul.f32 %v16445_v24, %v11157_v9  ;;  %v2713_v9 = vmul.f32 %v16426_v30, %v11444_v31  ;;  %v2727_v31 = vmul.f32 %v16441_v14, %v11488_v59  ;;  %v11791_v40 = vadd.f32 %v16450_v19, %v11558_v16  ;;  %v16459_v16 = vld [vmem:[#allocation39_spill] sm:$0xff]  ;;  %v16465_v14 = vld [vmem:[#allocation90_spill] sm:$0xff]  ;;  %v16466_v55 = vld [vmem:[#allocation16_spill] sm:$0xff] }
 0x380   : > { %16438 = vst [vmem:[#allocation147_spill] sm:$0xff] %v11731_v22  ;;  %v11795_v59 = vadd.f32 %v16452_v46, %v11562_v43  ;;  %v11809_v48 = vadd.f32 %v16458_v6, %v11574_v38  ;;  %v11813_v30 = vadd.f32 %v16459_v16, %v11578_v26  ;;  %v16460_v43 = vld [vmem:[#allocation123_spill] sm:$0xff]  ;;  %v11829_v38 = vadd.f32 %v16463_v25, %v11594_v42  ;;  %v16467_v24 = vld [vmem:[#allocation24_spill] sm:$0xff]  ;;  %v16470_v36 = vld [vmem:[#allocation202_spill] sm:$0xff] }
 0x381   : > { %16442 = vst [vmem:[#allocation156_spill] sm:$0xff] %v11737_v33  ;;  %v11817_v17 = vadd.f32 %v16460_v43, %v11582_v45  ;;  %v16464_v53 = vld [vmem:[#allocation23_spill] sm:$0xff]  ;;  %v7176_v45 = vld [vmem:[%s15045_s4 + $0x2b8] sm:$0xff]  ;;  %v11846_v42 = vadd.f32 %v16465_v14, %v11602_v8  ;;  %v11854_v46 = vadd.f32 %v16467_v24, %v11612_v56  ;;  %v11862_v16 = vadd.f32 %v16470_v36, %v11628_v4  ;;  %v16480_v25 = vld [vmem:[#allocation118_spill] sm:$0xff] }
 0x382   : > { %16444 = vst [vmem:[#allocation159_spill] sm:$0xff] %v11741_v13  ;;  %v11833_v26 = vadd.f32 %v16464_v53, %v11598_v10  ;;  %v7178_v34 = vld [vmem:[%s15045_s4 + $0x2c8] sm:$0xff]  ;;  %v11850_v10 = vadd.f32 %v16466_v55, %v11606_v28  ;;  %5469 = vperm.xlu2 %7695, %v7176_v45   ;;  %v16472_v8 = vld [vmem:[#allocation196_spill] sm:$0xff]  ;;  %5474 = vperm.xlu0 %7693, %v7177_v2   ;;  %v16476_v56 = vld [vmem:[#allocation13_spill] sm:$0xff] }
 0x383   : > { %16446 = vst [vmem:[#allocation21_spill] sm:$0xff] %v11745_v20  ;;  %5479 = vperm.xlu1 %7694, %v7178_v34   ;;  %v16468_v19 = vld [vmem:[#allocation195_spill] sm:$0xff]  ;;  %v11866_v6 = vadd.f32 %v16472_v8, %v11632_v51  ;;  %v16474_v28 = vld [vmem:[#allocation72_spill] sm:$0xff]  ;;  %v16477_v45 = vld [vmem:[#allocation70_spill] sm:$0xff]  ;;  %v11917_v18 = vpop.permute.xlu2 %2951 }
 0x384   : > { %16447 = vst [vmem:[#allocation152_spill] sm:$0xff] %v11781_v63  ;;  %v11858_v0 = vadd.f32 %v16468_v19, %v11624_v60  ;;  %v11870_v57 = vadd.f32 %v16474_v28, %v11636_v44  ;;  %v11874_v34 = vadd.f32 %v16477_v45, %v16476_v56  ;;  %v16478_v43 = vld [vmem:[#allocation43_spill] sm:$0xff]  ;;  %v16479_v60 = vld [vmem:[#allocation66_spill] sm:$0xff]  ;;  %v16481_v4 = vld [vmem:[#allocation108_spill] sm:$0xff] }
 0x385   : > { %16448 = vst [vmem:[#allocation25_spill] sm:$0xff] %v11783_v1  ;;  %v11878_v19 = vadd.f32 %v16479_v60, %v16478_v43  ;;  %v11882_v36 = vadd.f32 %v16481_v4, %v16480_v25  ;;  %v16483_v51 = vld [vmem:[#allocation53_spill] sm:$0xff]  ;;  %v16484_v14 = vld [vmem:[#allocation172_spill] sm:$0xff]  ;;  %v16488_v45 = vld [vmem:[#allocation179_spill] sm:$0xff] }
 0x386   : > { %16451 = vst [vmem:[#allocation165_spill] sm:$0xff] %v11791_v40  ;;  %v11886_v8 = vadd.f32 %v16483_v51, %v16482_v50  ;;  %v16485_v44 = vld [vmem:[#allocation141_spill] sm:$0xff]  ;;  %v16486_v2 = vld [vmem:[#allocation176_spill] sm:$0xff]  ;;  %v16489_v24 = vld [vmem:[#allocation34_spill] sm:$0xff] }
 0x387   : > { %16453 = vst [vmem:[#allocation30_spill] sm:$0xff] %v11795_v59  ;;  %v11890_v28 = vadd.f32 %v16485_v44, %v16484_v14  ;;  %v16487_v53 = vld [vmem:[#allocation101_spill] sm:$0xff]  ;;  %v11898_v43 = vadd.f32 %v16489_v24, %v16488_v45  ;;  %v16491_v55 = vld [vmem:[#allocation124_spill] sm:$0xff]  ;;  %v16492_v4 = vld [vmem:[#allocation183_spill] sm:$0xff] }
 0x388   : > { %16455 = vst [vmem:[#allocation169_spill] sm:$0xff] %v11799_v49  ;;  %v11894_v56 = vadd.f32 %v16487_v53, %v16486_v2  ;;  %v16490_v60 = vld [vmem:[#allocation181_spill] sm:$0xff]  ;;  %v16494_v51 = vld [vmem:[#allocation79_spill] sm:$0xff]  ;;  %v16496_v14 = vld [vmem:[#allocation102_spill] sm:$0xff] }
 0x389   : > { %16457 = vst [vmem:[#allocation158_spill] sm:$0xff] %v11805_v37  ;;  %v11902_v25 = vadd.f32 %v16491_v55, %v16490_v60  ;;  %v16493_v20 = vld [vmem:[#allocation73_spill] sm:$0xff]  ;;  %v11909_v13 = vadd.f32 %v16494_v51, %v2720_v41  ;;  %v11912_v44 = vadd.f32 %v16496_v14, %v2724_v7  ;;  %v16498_v2 = vld [vmem:[#allocation206_spill] sm:$0xff]  ;;  %v16501_v45 = vld [vmem:[#allocation160_spill] sm:$0xff]  ;;  %v11932_v7 = vadd.f32 %v11917_v18, %v2711_v52 }
 0x38a   : > { %16469 = vst [vmem:[#allocation167_spill] sm:$0xff] %v11858_v0  ;;  %v11906_v50 = vadd.f32 %v16493_v20, %v16492_v4  ;;  %v11915_v53 = vadd.f32 %v16498_v2, %v2701_v58  ;;  %v11920_v24 = vadd.f32 %v16501_v45, %v2703_v47  ;;  %v16503_v60 = vld [vmem:[#allocation163_spill] sm:$0xff]  ;;  %v16505_v22 = vld [vmem:[#allocation210_spill] sm:$0xff]  ;;  %v16510_v47 = vld [vmem:[#allocation85_spill] sm:$0xff] }
 0x38b   : > { %16471 = vst [vmem:[#allocation186_spill] sm:$0xff] %v11862_v16  ;;  %v11923_v55 = vadd.f32 %v16503_v60, %v2705_v15  ;;  %v11926_v4 = vadd.f32 %v16505_v22, %v2707_v62  ;;  %v16507_v20 = vld [vmem:[#allocation91_spill] sm:$0xff]  ;;  %v16509_v2 = vld [vmem:[#allocation98_spill] sm:$0xff]  ;;  %v11941_v45 = vadd.f32 %v16510_v47, %v2717_v21  ;;  %v11943_v15 = vpop.permute.xlu1 %3006  ;;  %v16520_v47 = vld [vmem:[#allocation68_spill] sm:$0xff] }
 0x38c   : > { %16473 = vst [vmem:[#allocation212_spill] sm:$0xff] %v11866_v6  ;;  %v11929_v41 = vadd.f32 %v16507_v20, %v2709_v35  ;;  %v16512_v60 = vld [vmem:[#allocation26_spill] sm:$0xff]  ;;  %v11949_v35 = vadd.f32 %v16494_v51, %v2721_v12  ;;  %v11961_v21 = vadd.f32 %v11943_v15, %v2733_v32  ;;  %v16521_v32 = vld [vmem:[#allocation9_spill] sm:$0xff]  ;;  %v16532_v16 = vld [vmem:[#allocation175_spill] sm:$0xff] }
 0x38d   : > { %16475 = vst [vmem:[#allocation213_spill] sm:$0xff] %v11870_v57  ;;  %v11946_v62 = vadd.f32 %v16512_v60, %v2719_v29  ;;  %v16513_v22 = vld [vmem:[#allocation6_spill] sm:$0xff]  ;;  %v16519_v60 = vld [vmem:[#allocation41_spill] sm:$0xff] }
 0x38e   : > { %16495 = vst [vmem:[#allocation13_spill] sm:$0xff] %v11909_v13  ;;  %v16508_v13 = vld [vmem:[#allocation174_spill] sm:$0xff]  ;;  %v11952_v52 = vadd.f32 %v16513_v22, %v2723_v39  ;;  %v3114_v12 = vadd.f32 %v16520_v47, %v16519_v60  ;;  %v5690_v39 = vld [vmem:[%s15047_s6 + $0x10] sm:$0xff]  ;;  %v16522_v51 = vld [vmem:[#allocation57_spill] sm:$0xff] }
 0x38f   : > { %16497 = vst [vmem:[#allocation43_spill] sm:$0xff] %v11912_v44  ;;  %v11935_v58 = vadd.f32 %v16508_v13, %v2713_v9  ;;  %v11938_v44 = vadd.f32 %v16509_v2, %v2715_v23  ;;  %v11955_v9 = vadd.f32 %v16496_v14, %v2725_v54  ;;  %v16515_v23 = vld [vmem:[#allocation168_spill] sm:$0xff]  ;;  %v16517_v2 = vld [vmem:[#allocation31_spill] sm:$0xff]  ;;  %v16523_v14 = vld [vmem:[#allocation201_spill] sm:$0xff]  ;;  %5750 = vperm.xlu2 %7695, %v5690_v39  }
 0x390   : > { %16499 = vst [vmem:[#allocation118_spill] sm:$0xff] %v11915_v53  ;;  %v3175_v20 = vadd.f32 %v16515_v23, %v2727_v31  ;;  %v16518_v13 = vld [vmem:[#allocation35_spill] sm:$0xff]  ;;  %v5688_v31 = vld [vmem:[%s15047_s6] sm:$0xff]  ;;  %v16529_v23 = vld [vmem:[#allocation208_spill] sm:$0xff]  ;;  %v3242_v40 = vmax.f32 %v3114_v12, 0.0 }
 0x391   : > { %16500 = vst [vmem:[#allocation44_spill] sm:$0xff] %v11917_v18  ;;  %v11957_v18 = vpop.permute.xlu0 %3026  ;;  %v3112_v29 = vadd.f32 %v16518_v13, %v16517_v2  ;;  %v5689_v54 = vld [vmem:[%s15047_s6 + $0x8] sm:$0xff]  ;;  %v16525_v13 = vld [vmem:[#allocation60_spill] sm:$0xff]  ;;  %v16533_v63 = vld [vmem:[#allocation197_spill] sm:$0xff]  ;;  %5740 = vperm.xlu0 %7693, %v5688_v31  }
 0x392   : > { %16502 = vst [vmem:[#allocation172_spill] sm:$0xff] %v11920_v24  ;;  %v16526_v60 = vsub.f32 %v16525_v13, %v16523_v14  ;;  %v16527_v22 = vld [vmem:[#allocation182_spill] sm:$0xff]  ;;  %v16531_v53 = vld [vmem:[#allocation28_spill] sm:$0xff]  ;;  %v16536_v57 = vld [vmem:[#allocation209_spill] sm:$0xff]  ;;  %5745 = vperm.xlu1 %7694, %v5689_v54  }
 0x393   : > { %16504 = vst [vmem:[#allocation176_spill] sm:$0xff] %v11923_v55  ;;  %v2729_v0 = vmul.f32 %v16532_v16, %v16531_v53  ;;  %v3240_v59 = vmax.f32 %v3112_v29, 0.0  ;;  %v16539_v55 = vld [vmem:[#allocation180_spill] sm:$0xff]  ;;  %v16540_v53 = vld [vmem:[#allocation166_spill] sm:$0xff]  ;;  %v16541_v12 = vld [vmem:[#allocation211_spill] sm:$0xff] }
 0x394   : > { %16506 = vst [vmem:[#allocation179_spill] sm:$0xff] %v11926_v4  ;;  %v2250_v47 = vmul.f32 %v16526_v60, %v16521_v32  ;;  %v16535_v4 = vld [vmem:[#allocation33_spill] sm:$0xff]  ;;  %v16537_v60 = vld [vmem:[#allocation127_spill] sm:$0xff] }
 0x395   : > { %16511 = vst [vmem:[#allocation181_spill] sm:$0xff] %v11943_v15  ;;  %v16524_v15 = vsub.f32 %v16522_v51, %v16523_v14  ;;  %v2761_v13 = vmul.f32 %v16536_v57, %v16535_v4  ;;  %v3177_v39 = vadd.f32 %v16540_v53, %v2729_v0  ;;  %v3354_v29 = vpack.c.bf16 %v3242_v40, %v3240_v59  ;;  %v16544_v4 = vld [vmem:[#allocation42_spill] sm:$0xff]  ;;  %v16545_v31 = vld [vmem:[#allocation171_spill] sm:$0xff]  ;;  %v16547_v40 = vld [vmem:[#allocation52_spill] sm:$0xff] }
 0x396   : > { %16514 = vst [vmem:[#allocation183_spill] sm:$0xff] %v11957_v18  ;;  %v16542_v18 = vld [vmem:[#allocation162_spill] sm:$0xff]  ;;  %v3238_v0 = vmax.f32 %v11854_v46, 0.0  ;;  %v16548_v59 = vsub.f32 %v16547_v40, %v16523_v14 }
 0x397   : > { %16516 = vst [vmem:[#allocation79_spill] sm:$0xff] %v11961_v21  ;;  %v2248_v2 = vmul.f32 %v16524_v15, %v16521_v32  ;;  %v16528_v21 = vld [vmem:[#allocation126_spill] sm:$0xff]  ;;  %v16534_v15 = vsub.f32 %v16533_v63, %v16529_v23  ;;  %v3209_v37 = vadd.f32 %v16542_v18, %v2761_v13  ;;  %v3236_v63 = vmax.f32 %v11850_v10, 0.0  ;;  %4046 = vmatpush.bf16.msra.mxu2 %v3354_v29 }
 0x398   : > { %v16530_v33 = vsub.f32 %v16528_v21, %v16529_v23  ;;  %v16538_v21 = vld [vmem:[#allocation138_spill] sm:$0xff]  ;;  %v3301_v29 = vmax.f32 %v11955_v9, 0.0  ;;  %v5691_v9 = vld [vmem:[%s15047_s6 + $0x18] sm:$0xff] }
 0x399   : > { %v2315_v51 = vmul.f32 %v16534_v15, %v16527_v22  ;;  %v2696_v1 = vmul.f32 %v16537_v60, %v2248_v2  ;;  %v16543_v15 = vld [vmem:[#allocation18_spill] sm:$0xff]  ;;  %v3305_v2 = vmax.f32 %v3177_v39, 0.0  ;;  %5755 = vperm.xlu0 %7693, %v5691_v9  }
 0x39a   : > { %v2283_v24 = vmul.f32 %v16530_v33, %v16527_v22  ;;  %v2698_v33 = vmul.f32 %v16538_v21, %v2250_v47  ;;  %v16546_v47 = vld [vmem:[#allocation69_spill] sm:$0xff]  ;;  %v5693_v46 = vld [vmem:[%s15047_s6 + $0x28] sm:$0xff] }
 0x39b   : > { %v2763_v16 = vmul.f32 %v16541_v12, %v2315_v51  ;;  %v3144_v49 = vadd.f32 %v16543_v15, %v2696_v1  ;;  %v2246_v51 = vmul.f32 %v16548_v59, %v16521_v32  ;;  %v3268_v1 = vmax.f32 %v11906_v50, 0.0  ;;  %5765 = vperm.xlu2 %7695, %v5693_v46   ;;  %v16552_v40 = vld [vmem:[#allocation82_spill] sm:$0xff]  ;;  %v16555_v46 = vld [vmem:[#allocation203_spill] sm:$0xff] }
 0x39c   : > { %v2731_v6 = vmul.f32 %v16539_v55, %v2283_v24  ;;  %v3146_v54 = vadd.f32 %v16544_v4, %v2698_v33  ;;  %v3337_v24 = vmax.f32 %v3209_v37, 0.0  ;;  %v3352_v4 = vpack.c.bf16 %v3238_v0, %v3236_v63  ;;  %v5692_v37 = vld [vmem:[%s15047_s6 + $0x20] sm:$0xff]  ;;  %v12028_v63 = vpop.permute.xlu0 %3021 }
 0x39d   : > { %v3211_v21 = vadd.f32 %v16546_v47, %v2763_v16  ;;  %v3272_v13 = vmax.f32 %v3144_v49, 0.0  ;;  %5760 = vperm.xlu1 %7694, %v5692_v37   ;;  %v16557_v37 = vld [vmem:[#allocation117_spill] sm:$0xff] }
 0x39e   : > { %v3179_v57 = vadd.f32 %v16545_v31, %v2731_v6  ;;  %v3274_v10 = vmax.f32 %v3146_v54, 0.0  ;;  %v16549_v6 = vld [vmem:[#allocation133_spill] sm:$0xff]  ;;  %v3303_v54 = vmax.f32 %v3175_v20, 0.0  ;;  %4047 = vmatpush.bf16.msra.mxu2 %v3352_v4  ;;  %v3232_v20 = vmax.f32 %v11833_v26, 0.0 }
 0x39f   : > { %v3339_v33 = vmax.f32 %v3211_v21, 0.0  ;;  %v2694_v39 = vmul.f32 %v16549_v6, %v2246_v51  ;;  %v16553_v51 = vld [vmem:[#allocation40_spill] sm:$0xff]  ;;  %v3297_v26 = vmax.f32 %v11949_v35, 0.0  ;;  %v5696_v35 = vld [vmem:[%s15047_s6 + $0x40] sm:$0xff] }
 0x3a0   : > { %v3307_v60 = vmax.f32 %v3179_v57, 0.0  ;;  %v3370_v16 = vpack.c.bf16 %v3274_v10, %v3272_v13  ;;  %v16550_v57 = vld [vmem:[#allocation194_spill] sm:$0xff]  ;;  %v16554_v13 = vld [vmem:[#allocation207_spill] sm:$0xff]  ;;  %v3385_v10 = vpack.c.bf16 %v3303_v54, %v3301_v29  ;;  %v16558_v29 = vld [vmem:[#allocation192_spill] sm:$0xff] }
 0x3a1   : > { %v16551_v50 = vsub.f32 %v16550_v57, %v16529_v23  ;;  %v3403_v0 = vpack.c.bf16 %v3339_v33, %v3337_v24  ;;  %v3142_v59 = vadd.f32 %v16552_v40, %v2694_v39  ;;  %v3234_v24 = vmax.f32 %v11846_v42, 0.0  ;;  %v16556_v33 = vld [vmem:[#allocation107_spill] sm:$0xff] }
 0x3a2   : > { %v3387_v49 = vpack.c.bf16 %v3307_v60, %v3305_v2  ;;  %v2757_v60 = vmul.f32 %v16554_v13, %v16553_v51  ;;  %v12036_v2 = vadd.f32 %v12028_v63, %v11787_v61  ;;  %4135 = vmatpush.bf16.msra.mxu3 %v3370_v16  ;;  %v3299_v16 = vmax.f32 %v11952_v52, 0.0 }
 0x3a3   : > { %v2311_v21 = vmul.f32 %v16551_v50, %v16527_v22  ;;  %4669 = vmatpush.bf16.msrb.mxu1 %v3403_v0  ;;  %v3270_v4 = vmax.f32 %v3142_v59, 0.0  ;;  %v3264_v50 = vmax.f32 %v11898_v43, 0.0  ;;  %v3350_v61 = vpack.c.bf16 %v3234_v24, %v3232_v20  ;;  %v16560_v59 = vld [vmem:[#allocation129_spill] sm:$0xff]  ;;  %5780 = vperm.xlu2 %7695, %v5696_v35  }
 0x3a4   : > { %4580 = vmatpush.bf16.msrb.mxu0 %v3387_v49  ;;  %v3205_v39 = vadd.f32 %v16556_v33, %v2757_v60  ;;  %v16559_v49 = vsub.f32 %v16558_v29, %v16529_v23  ;;  %v3266_v0 = vmax.f32 %v11902_v25, 0.0  ;;  %v16561_v60 = vld [vmem:[#allocation199_spill] sm:$0xff]  ;;  %v3383_v52 = vpack.c.bf16 %v3299_v16, %v3297_v26  ;;  %v16562_v20 = vld [vmem:[#allocation205_spill] sm:$0xff] }
 0x3a5   : > { %v2759_v57 = vmul.f32 %v16555_v46, %v2311_v21  ;;  %v3368_v42 = vpack.c.bf16 %v3270_v4, %v3268_v1  ;;  %v2753_v43 = vmul.f32 %v16561_v60, %v16560_v59  ;;  %4048 = vmatpush.bf16.msra.mxu2 %v3350_v61  ;;  %v3228_v24 = vmax.f32 %v11825_v11, 0.0  ;;  %v16563_v1 = vld [vmem:[#allocation95_spill] sm:$0xff]  ;;  %v16564_v61 = vld [vmem:[#allocation96_spill] sm:$0xff] }
 0x3a6   : > { %v2307_v54 = vmul.f32 %v16559_v49, %v16527_v22  ;;  %v3333_v21 = vmax.f32 %v3205_v39, 0.0  ;;  %v3230_v25 = vmax.f32 %v11829_v38, 0.0  ;;  %v3260_v39 = vmax.f32 %v11890_v28, 0.0  ;;  %v16565_v38 = vld [vmem:[#allocation75_spill] sm:$0xff] }
 0x3a7   : > { %v3207_v51 = vadd.f32 %v16557_v37, %v2759_v57  ;;  %4136 = vmatpush.bf16.msra.mxu3 %v3368_v42  ;;  %v3201_v4 = vadd.f32 %v16563_v1, %v2753_v43  ;;  %v3262_v29 = vmax.f32 %v11894_v56, 0.0  ;;  %v3293_v16 = vmax.f32 %v11941_v45, 0.0  ;;  %v16567_v43 = vld [vmem:[#allocation37_spill] sm:$0xff] }
 0x3a8   : > { %4581 = vmatpush.bf16.msrb.mxu0 %v3385_v10  ;;  %v2755_v57 = vmul.f32 %v16562_v20, %v2307_v54  ;;  %v5695_v10 = vld [vmem:[%s15047_s6 + $0x38] sm:$0xff]  ;;  %v3295_v11 = vmax.f32 %v11946_v62, 0.0  ;;  %v3366_v49 = vpack.c.bf16 %v3266_v0, %v3264_v50  ;;  %v3348_v42 = vpack.c.bf16 %v3230_v25, %v3228_v24  ;;  %v16568_v62 = vld [vmem:[#allocation54_spill] sm:$0xff]  ;;  %v12077_v0 = vpop.permute.xlu2 %3016 }
 0x3a9   : > { %v3335_v9 = vmax.f32 %v3207_v51, 0.0  ;;  %v3329_v54 = vmax.f32 %v3201_v4, 0.0  ;;  %v16566_v28 = vsub.f32 %v16565_v38, %v16529_v23  ;;  %5775 = vperm.xlu1 %7694, %v5695_v10   ;;  %v3364_v45 = vpack.c.bf16 %v3262_v29, %v3260_v39 }
 0x3aa   : > { %v3203_v26 = vadd.f32 %v16564_v61, %v2755_v57  ;;  %v2749_v35 = vmul.f32 %v16568_v62, %v16567_v43  ;;  %v3224_v50 = vmax.f32 %v11817_v17, 0.0  ;;  %4049 = vmatpush.bf16.msra.mxu2 %v3348_v42  ;;  %v16569_v57 = vld [vmem:[#allocation204_spill] sm:$0xff]  ;;  %v3226_v4 = vmax.f32 %v11821_v3, 0.0  ;;  %v16571_v17 = vld [vmem:[#allocation113_spill] sm:$0xff] }
 0x3ab   : > { %v3401_v51 = vpack.c.bf16 %v3335_v9, %v3333_v21  ;;  %v2303_v56 = vmul.f32 %v16566_v28, %v16527_v22  ;;  %v5694_v21 = vld [vmem:[%s15047_s6 + $0x30] sm:$0xff]  ;;  %4137 = vmatpush.bf16.msra.mxu3 %v3366_v49  ;;  %v3381_v9 = vpack.c.bf16 %v3295_v11, %v3293_v16  ;;  %v3256_v25 = vmax.f32 %v11882_v36, 0.0  ;;  %v16572_v16 = vld [vmem:[#allocation61_spill] sm:$0xff] }
 0x3ac   : > { %4582 = vmatpush.bf16.msrb.mxu0 %v3383_v52  ;;  %v3331_v59 = vmax.f32 %v3203_v26, 0.0  ;;  %v16570_v52 = vld [vmem:[#allocation10_spill] sm:$0xff]  ;;  %v3289_v39 = vmax.f32 %v11935_v58, 0.0  ;;  %v3291_v29 = vmax.f32 %v11938_v44, 0.0  ;;  %5770 = vperm.xlu0 %7693, %v5694_v21   ;;  %v3346_v38 = vpack.c.bf16 %v3226_v4, %v3224_v50  ;;  %v5699_v36 = vld [vmem:[%s15047_s6 + $0x58] sm:$0xff]  ;;  %v16574_v44 = vld [vmem:[#allocation27_spill] sm:$0xff] }
 0x3ad   : > { %4670 = vmatpush.bf16.msrb.mxu1 %v3401_v51  ;;  %v2751_v24 = vmul.f32 %v16569_v57, %v2303_v56  ;;  %v3197_v51 = vadd.f32 %v16570_v52, %v2749_v35  ;;  %v3258_v49 = vmax.f32 %v11886_v8, 0.0  ;;  %v16573_v11 = vsub.f32 %v16572_v16, %v16529_v23  ;;  %v16575_v42 = vld [vmem:[#allocation188_spill] sm:$0xff]  ;;  %5795 = vperm.xlu2 %7695, %v5699_v36  }
 0x3ae   : > { %v3399_v10 = vpack.c.bf16 %v3331_v59, %v3329_v54  ;;  %v3379_v54 = vpack.c.bf16 %v3291_v29, %v3289_v39  ;;  %v2745_v28 = vmul.f32 %v16575_v42, %v16574_v44  ;;  %v3220_v56 = vmax.f32 %v11809_v48, 0.0  ;;  %v5698_v8 = vld [vmem:[%s15047_s6 + $0x50] sm:$0xff]  ;;  %4050 = vmatpush.bf16.msra.mxu2 %v3346_v38  ;;  %v16576_v59 = vld [vmem:[#allocation46_spill] sm:$0xff]  ;;  %v16580_v38 = vld [vmem:[#allocation29_spill] sm:$0xff] }
 0x3af   : > { %v3199_v26 = vadd.f32 %v16571_v17, %v2751_v24  ;;  %v2299_v3 = vmul.f32 %v16573_v11, %v16527_v22  ;;  %v3325_v58 = vmax.f32 %v3197_v51, 0.0  ;;  %4138 = vmatpush.bf16.msra.mxu3 %v3364_v45  ;;  %v3222_v35 = vmax.f32 %v11813_v30, 0.0  ;;  %v16577_v39 = vld [vmem:[#allocation55_spill] sm:$0xff] }
 0x3b0   : > { %4583 = vmatpush.bf16.msrb.mxu0 %v3381_v9  ;;  %v3252_v50 = vmax.f32 %v11874_v34, 0.0  ;;  %v3193_v9 = vadd.f32 %v11763_v5, %v2745_v28  ;;  %v3254_v24 = vmax.f32 %v11878_v19, 0.0  ;;  %v3285_v4 = vmax.f32 %v11929_v41, 0.0  ;;  %v5697_v34 = vld [vmem:[%s15047_s6 + $0x48] sm:$0xff] }
 0x3b1   : > { %4671 = vmatpush.bf16.msrb.mxu1 %v3399_v10  ;;  %v3327_v21 = vmax.f32 %v3199_v26, 0.0  ;;  %v2747_v43 = vmul.f32 %v16576_v59, %v2299_v3  ;;  %v3287_v48 = vmax.f32 %v11932_v7, 0.0  ;;  %v3362_v51 = vpack.c.bf16 %v3258_v49, %v3256_v25  ;;  %5790 = vperm.xlu1 %7694, %v5698_v8   ;;  %v16579_v7 = vld [vmem:[#allocation120_spill] sm:$0xff]  ;;  %v16582_v3 = vld [vmem:[#allocation169_spill] sm:$0xff]  ;;  %v16584_v8 = vld [vmem:[#allocation183_spill] sm:$0xff] }
 0x3b2   : > { %v16578_v29 = vsub.f32 %v16577_v39, %v16529_v23  ;;  %v3321_v19 = vmax.f32 %v3193_v9, 0.0  ;;  %v3344_v41 = vpack.c.bf16 %v3222_v35, %v3220_v56  ;;  %v3360_v26 = vpack.c.bf16 %v3254_v24, %v3252_v50  ;;  %v16581_v49 = vld [vmem:[#allocation36_spill] sm:$0xff]  ;;  %v12123_v50 = vpop.permute.xlu2 %3011  ;;  %v16587_v24 = vld [vmem:[#allocation25_spill] sm:$0xff]  ;;  %v16589_v39 = vld [vmem:[#allocation179_spill] sm:$0xff] }
 0x3b3   : > { %v3397_v10 = vpack.c.bf16 %v3327_v21, %v3325_v58  ;;  %v3195_v45 = vadd.f32 %v11801_v27, %v2747_v43  ;;  %v2741_v16 = vmul.f32 %v16580_v38, %v16579_v7  ;;  %4139 = vmatpush.bf16.msra.mxu3 %v3362_v51  ;;  %v3216_v36 = vmax.f32 %v16582_v3, 0.0  ;;  %v16583_v58 = vld [vmem:[#allocation158_spill] sm:$0xff]  ;;  %v16586_v56 = vld [vmem:[#allocation176_spill] sm:$0xff]  ;;  %v16588_v51 = vld [vmem:[#allocation213_spill] sm:$0xff] }
 0x3b4   : > { %v2295_v30 = vmul.f32 %v16578_v29, %v16527_v22  ;;  %4584 = vmatpush.bf16.msrb.mxu0 %v3379_v54  ;;  %v3218_v44 = vmax.f32 %v16583_v58, 0.0  ;;  %4051 = vmatpush.bf16.msra.mxu2 %v3344_v41  ;;  %v3377_v28 = vpack.c.bf16 %v3287_v48, %v3285_v4  ;;  %v16585_v54 = vld [vmem:[#allocation212_spill] sm:$0xff]  ;;  %v3281_v35 = vmax.f32 %v16586_v56, 0.0  ;;  %v16593_v3 = vld [vmem:[#allocation165_spill] sm:$0xff] }
 0x3b5   : > { %4672 = vmatpush.bf16.msrb.mxu1 %v3397_v10  ;;  %v3323_v25 = vmax.f32 %v3195_v45, 0.0  ;;  %v3189_v21 = vadd.f32 %v16584_v8, %v2741_v16  ;;  %v3248_v43 = vmax.f32 %v16585_v54, 0.0  ;;  %5785 = vperm.xlu0 %7693, %v5697_v34   ;;  %v3250_v45 = vmax.f32 %v16588_v51, 0.0  ;;  %v5702_v4 = vld [vmem:[%s15047_s6 + $0x70] sm:$0xff]  ;;  %v16592_v16 = vld [vmem:[#allocation190_spill] sm:$0xff] }
 0x3b6   : > { %v2743_v11 = vmul.f32 %v16581_v49, %v2295_v30  ;;  %v3283_v29 = vmax.f32 %v16589_v39, 0.0  ;;  %v16590_v48 = vld [vmem:[#allocation152_spill] sm:$0xff]  ;;  %v3342_v34 = vpack.c.bf16 %v3218_v44, %v3216_v36  ;;  %v3212_v58 = vmax.f32 %v16593_v3, 0.0  ;;  %v16594_v54 = vld [vmem:[#allocation30_spill] sm:$0xff]  ;;  %5810 = vperm.xlu2 %7695, %v5702_v4  }
 0x3b7   : > { %v3395_v9 = vpack.c.bf16 %v3323_v25, %v3321_v19  ;;  %v12133_v30 = vadd.f32 %v12123_v50, %v16590_v48  ;;  %v3317_v41 = vmax.f32 %v3189_v21, 0.0  ;;  %v16591_v7 = vld [vmem:[#allocation112_spill] sm:$0xff]  ;;  %4140 = vmatpush.bf16.msra.mxu3 %v3360_v26  ;;  %v3214_v56 = vmax.f32 %v16594_v54, 0.0  ;;  %v5701_v51 = vld [vmem:[%s15047_s6 + $0x68] sm:$0xff] }
 0x3b8   : > { %v3191_v10 = vadd.f32 %v16587_v24, %v2743_v11  ;;  %4585 = vmatpush.bf16.msrb.mxu0 %v3377_v28  ;;  %v2737_v19 = vmul.f32 %v16592_v16, %v16591_v7  ;;  %v3375_v11 = vpack.c.bf16 %v3283_v29, %v3281_v35  ;;  %4052 = vmatpush.bf16.msra.mxu2 %v3342_v34  ;;  %v16595_v21 = vld [vmem:[#allocation167_spill] sm:$0xff]  ;;  %v16596_v44 = vld [vmem:[#allocation186_spill] sm:$0xff]  ;;  %v16598_v29 = vld [vmem:[#allocation172_spill] sm:$0xff] }
 0x3b9   : > { %4673 = vmatpush.bf16.msrb.mxu1 %v3395_v9  ;;  %v3244_v36 = vmax.f32 %v16595_v21, 0.0  ;;  %v3246_v39 = vmax.f32 %v16596_v44, 0.0  ;;  %v16597_v48 = vld [vmem:[#allocation118_spill] sm:$0xff]  ;;  %v3358_v35 = vpack.c.bf16 %v3250_v45, %v3248_v43  ;;  %v3279_v7 = vmax.f32 %v16598_v29, 0.0  ;;  %5805 = vperm.xlu1 %7694, %v5701_v51   ;;  %v16599_v3 = vld [vmem:[#allocation156_spill] sm:$0xff] }
 0x3ba   : > { %v3319_v25 = vmax.f32 %v3191_v10, 0.0  ;;  %v3185_v28 = vadd.f32 %v12077_v0, %v2737_v19  ;;  %v3277_v9 = vmax.f32 %v16597_v48, 0.0  ;;  %v3315_v10 = vmax.f32 %v12036_v2, 0.0  ;;  %v16600_v54 = vld [vmem:[#allocation168_spill] sm:$0xff]  ;;  %v7187_v43 = vld [vmem:[%s15044_s3] sm:$0xf] }
 0x3bb   : > { %v12150_v23 = vadd.f32 %v16600_v54, %v16599_v3  ;;  %v3340_v19 = vpack.c.bf16 %v3214_v56, %v3212_v58  ;;  %v16601_v21 = vld [vmem:[#allocation104_spill] sm:$0xff]  ;;  %v7559_v2 = vld [vmem:[%s15044_s3 + $0xc] sm:$0xf0]  ;;  %v5700_v45 = vld [vmem:[%s15047_s6 + $0x60] sm:$0xff]  ;;  %4141 = vmatpush.bf16.msra.mxu3 %v3358_v35  ;;  %v3356_v4 = vpack.c.bf16 %v3246_v39, %v3244_v36  ;;  %v3311_v39 = vmax.f32 %v12133_v30, 0.0 }
 0x3bc   : > { %v3393_v26 = vpack.c.bf16 %v3319_v25, %v3317_v41  ;;  %4586 = vmatpush.bf16.msrb.mxu0 %v3375_v11  ;;  %v3313_v34 = vmax.f32 %v3185_v28, 0.0  ;;  %v16602_v44 = vsub.f32 %v16601_v21, %v16523_v14  ;;  %v16603_v41 = vld [vmem:[#allocation79_spill] sm:$0xff]  ;;  %v16606_v51 = vld [vmem:[#allocation78_spill] sm:$0xff]  ;;  %v3373_v36 = vpack.c.bf16 %v3279_v7, %v3277_v9  ;;  %v16608_v54 = vld [vmem:[#allocation64_spill] sm:$0xff] }
 0x3bd   : > { %v3309_v25 = vmax.f32 %v16603_v41, 0.0  ;;  %v16604_v11 = vld [vmem:[#allocation11_spill] sm:$0xff]  ;;  %v16607_v28 = vsub.f32 %v16606_v51, %v16523_v14  ;;  %v7557_v3 = vld [vmem:[%s15044_s3 + $0x4] sm:$0xf]  ;;  %4053 = vmatpush.bf16.msra.mxu2 %v3340_v19  ;;  %v12184_v51 = vor.u32 %v7559_v2, %v7187_v43  ;;  %5800 = vperm.xlu0 %7693, %v5700_v45  }
 0x3be   : > { %v2282_v48 = vmul.f32 %v16602_v44, %v16521_v32  ;;  %4674 = vmatpush.bf16.msrb.mxu1 %v3393_v26  ;;  %v16605_v58 = vld [vmem:[#allocation175_spill] sm:$0xff]  ;;  %v16609_v21 = vld [vmem:[#allocation209_spill] sm:$0xff]  ;;  %v3391_v41 = vpack.c.bf16 %v3315_v10, %v3313_v34 }
 0x3bf   : > { %v2728_v56 = vmul.f32 %v16605_v58, %v16604_v11  ;;  %v2314_v29 = vmul.f32 %v16607_v28, %v16521_v32  ;;  %v7189_v26 = vld [vmem:[%s15044_s3 + $0x10] sm:$0xf0]  ;;  %v2760_v44 = vmul.f32 %v16609_v21, %v16608_v54  ;;  %v7442_v19 = vld [vmem:[%s15047_s6 + $0x88] sm:$0xff]  ;;  %v16610_v10 = vld [vmem:[#allocation65_spill] sm:$0xff]  ;;  %4142 = vmatpush.bf16.msra.mxu3 %v3356_v4 }
 0x3c0   : > { %v2730_v35 = vmul.f32 %v16539_v55, %v2282_v48  ;;  %4587 = vmatpush.bf16.msrb.mxu0 %v3373_v36  ;;  %v12191_v9 = vor.u32 %v7557_v3, %v7189_v26  ;;  %v16612_v34 = vld [vmem:[#allocation147_spill] sm:$0xff]  ;;  %v16613_v48 = vld [vmem:[#allocation6_spill] sm:$0xff]  ;;  %4054 = vmatmul.bf16.vlgmr.msra.gmra.mxu2 %v12184_v51  ;;  %v3389_v36 = vpack.c.bf16 %v3311_v39, %v3309_v25  ;;  %v16616_v4 = vld [vmem:[#allocation49_spill] sm:$0xff] }
 0x3c1   : > { %v3176_v11 = vadd.f32 %v16540_v53, %v2728_v56  ;;  %v2762_v58 = vmul.f32 %v16541_v12, %v2314_v29  ;;  %v3208_v55 = vadd.f32 %v16542_v18, %v2760_v44  ;;  %v16611_v53 = vsub.f32 %v16610_v10, %v16523_v14  ;;  %v7441_v12 = vld [vmem:[%s15047_s6 + $0x80] sm:$0xff]  ;;  %v16614_v18 = vld [vmem:[#allocation80_spill] sm:$0xff]  ;;  %v16615_v29 = vld [vmem:[#allocation43_spill] sm:$0xff]  ;;  %6311 = vperm.xlu2 %7695, %v7442_v19  }
 0x3c2   : > { %v3178_v30 = vadd.f32 %v16545_v31, %v2730_v35  ;;  %v3170_v43 = vadd.f32 %v16613_v48, %v16612_v34  ;;  %4675 = vmatpush.bf16.msrb.mxu1 %v3391_v41  ;;  %v2756_v45 = vmul.f32 %v16554_v13, %v16614_v18  ;;  %v3300_v3 = vmax.f32 %v16615_v29, 0.0  ;;  %6306 = vperm.xlu1 %7694, %v7441_v12   ;;  %v16619_v25 = vld [vmem:[#allocation151_spill] sm:$0xff]  ;;  %v16620_v39 = vld [vmem:[#allocation85_spill] sm:$0xff] }
 0x3c3   : > { %v2310_v7 = vmul.f32 %v16611_v53, %v16521_v32  ;;  %v3304_v2 = vmax.f32 %v3176_v11, 0.0  ;;  %v3210_v31 = vadd.f32 %v16546_v47, %v2762_v58  ;;  %v3336_v28 = vmax.f32 %v3208_v55, 0.0  ;;  %4143 = vmatmul.bf16.vlgmr.msra.gmra.mxu3 %v12191_v9  ;;  %v16618_v11 = vld [vmem:[#allocation47_spill] sm:$0xff]  ;;  %v16621_v10 = vld [vmem:[#allocation153_spill] sm:$0xff] }
 0x3c4   : > { %v3306_v56 = vmax.f32 %v3178_v30, 0.0  ;;  %v3204_v54 = vadd.f32 %v16556_v33, %v2756_v45  ;;  %v16617_v47 = vsub.f32 %v16616_v4, %v16523_v14  ;;  %v3302_v44 = vmax.f32 %v12150_v23, 0.0  ;;  %v5703_v33 = vld [vmem:[%s15047_s6 + $0x78] sm:$0xff]  ;;  %v16622_v23 = vld [vmem:[#allocation26_spill] sm:$0xff]  ;;  %v16626_v45 = vld [vmem:[#allocation15_spill] sm:$0xff] }
 0x3c5   : > { %v2758_v26 = vmul.f32 %v16555_v46, %v2310_v7  ;;  %v3338_v35 = vmax.f32 %v3210_v31, 0.0  ;;  %v2752_v46 = vmul.f32 %v16561_v60, %v16618_v11  ;;  %v12223_v58 = vadd.f32 %v16620_v39, %v16619_v25  ;;  %v16623_v7 = vld [vmem:[#allocation135_spill] sm:$0xff]  ;;  %v16625_v48 = vld [vmem:[#allocation13_spill] sm:$0xff]  ;;  %5815 = vperm.xlu0 %7693, %v5703_v33   ;;  %v16629_v4 = vld [vmem:[#allocation130_spill] sm:$0xff] }
 0x3c6   : > { %v2306_v21 = vmul.f32 %v16617_v47, %v16521_v32  ;;  %v3386_v13 = vpack.c.bf16 %v3306_v56, %v3304_v2  ;;  %4676 = vmatpush.bf16.msrb.mxu1 %v3389_v36  ;;  %v3332_v30 = vmax.f32 %v3204_v54, 0.0  ;;  %v3166_v53 = vadd.f32 %v16622_v23, %v16621_v10  ;;  %v16627_v56 = vld [vmem:[#allocation7_spill] sm:$0xff]  ;;  %v16635_v33 = vld [vmem:[#allocation14_spill] sm:$0xff] }
 0x3c7   : > { %v3206_v41 = vadd.f32 %v16557_v37, %v2758_v26  ;;  %v3402_v19 = vpack.c.bf16 %v3338_v35, %v3336_v28  ;;  %v3200_v60 = vadd.f32 %v16563_v1, %v2752_v46  ;;  %v16624_v12 = vsub.f32 %v16623_v7, %v16523_v14  ;;  %v16628_v28 = vld [vmem:[#allocation178_spill] sm:$0xff] }
 0x3c8   : > { %v2754_v55 = vmul.f32 %v16562_v20, %v2306_v21  ;;  %4224 = vmatpush.bf16.msrb.mxu2 %v3386_v13  ;;  %v3296_v2 = vmax.f32 %v16625_v48, 0.0  ;;  %v3298_v31 = vmax.f32 %v3170_v43, 0.0  ;;  %v2748_v20 = vmul.f32 %v16568_v62, %v16626_v45  ;;  %v7445_v35 = vld [vmem:[%s15047_s6 + $0xa0] sm:$0xff]  ;;  %v16631_v21 = vld [vmem:[#allocation148_spill] sm:$0xff] }
 0x3c9   : > { %v3334_v37 = vmax.f32 %v3206_v41, 0.0  ;;  %v2302_v34 = vmul.f32 %v16624_v12, %v16521_v32  ;;  %4313 = vmatpush.bf16.msrb.mxu3 %v3402_v19  ;;  %v12239_v29 = vmul.f32 %v16628_v28, %v16627_v56  ;;  %v3384_v1 = vpack.c.bf16 %v3302_v44, %v3300_v3  ;;  %v7444_v3 = vld [vmem:[%s15047_s6 + $0x98] sm:$0xff]  ;;  %v16632_v13 = vld [vmem:[#allocation174_spill] sm:$0xff]  ;;  %v16633_v44 = vld [vmem:[#allocation139_spill] sm:$0xff]  ;;  %6326 = vperm.xlu2 %7695, %v7445_v35  }
 0x3ca   : > { %v3202_v18 = vadd.f32 %v16564_v61, %v2754_v55  ;;  %v3328_v54 = vmax.f32 %v3200_v60, 0.0  ;;  %v3196_v61 = vadd.f32 %v16570_v52, %v2748_v20  ;;  %v16630_v62 = vsub.f32 %v16629_v4, %v16523_v14  ;;  %v16634_v41 = vld [vmem:[#allocation98_spill] sm:$0xff]  ;;  %v7203_v55 = vld [vmem:[%s15044_s3 + $0x20] sm:$0xf]  ;;  %6321 = vperm.xlu1 %7694, %v7444_v3   ;;  %v16638_v60 = vld [vmem:[#allocation144_spill] sm:$0xff] }
 0x3cb   : > { %v3400_v26 = vpack.c.bf16 %v3334_v37, %v3332_v30  ;;  %v2750_v36 = vmul.f32 %v16569_v57, %v2302_v34  ;;  %v3160_v57 = vadd.f32 %v16632_v13, %v16631_v21  ;;  %v3162_v11 = vadd.f32 %v16634_v41, %v16633_v44  ;;  %v16639_v7 = vld [vmem:[#allocation94_spill] sm:$0xff]  ;;  %v16643_v20 = vld [vmem:[#allocation149_spill] sm:$0xff] }
 0x3cc   : > { %v3330_v43 = vmax.f32 %v3202_v18, 0.0  ;;  %v2298_v47 = vmul.f32 %v16630_v62, %v16521_v32  ;;  %4225 = vmatpush.bf16.msrb.mxu2 %v3384_v1  ;;  %v2744_v52 = vmul.f32 %v16575_v42, %v16635_v33  ;;  %v3382_v25 = vpack.c.bf16 %v3298_v31, %v3296_v2  ;;  %v16636_v42 = vld [vmem:[#allocation45_spill] sm:$0xff]  ;;  %v16641_v31 = vld [vmem:[#allocation146_spill] sm:$0xff]  ;;  %v16642_v18 = vld [vmem:[#allocation88_spill] sm:$0xff] }
 0x3cd   : > { %v3198_v46 = vadd.f32 %v16571_v17, %v2750_v36  ;;  %4314 = vmatpush.bf16.msrb.mxu3 %v3400_v26  ;;  %v3292_v39 = vmax.f32 %v12223_v58, 0.0  ;;  %v3294_v19 = vmax.f32 %v3166_v53, 0.0  ;;  %v3324_v10 = vmax.f32 %v3196_v61, 0.0  ;;  %v7563_v17 = vld [vmem:[%s15044_s3 + $0x2c] sm:$0xf0]  ;;  %v16644_v56 = vld [vmem:[#allocation97_spill] sm:$0xff] }
 0x3ce   : > { %v2746_v30 = vmul.f32 %v16576_v59, %v2298_v47  ;;  %v3192_v37 = vadd.f32 %v11763_v5, %v2744_v52  ;;  %v16637_v58 = vsub.f32 %v16636_v42, %v16523_v14  ;;  %v7443_v59 = vld [vmem:[%s15047_s6 + $0x90] sm:$0xff]  ;;  %v12278_v12 = vmul.f32 %v16639_v7, %v16638_v60  ;;  %v7561_v48 = vld [vmem:[%s15044_s3 + $0x24] sm:$0xf] }
 0x3cf   : > { %v3326_v23 = vmax.f32 %v3198_v46, 0.0  ;;  %v3398_v34 = vpack.c.bf16 %v3330_v43, %v3328_v54  ;;  %v16640_v14 = vld [vmem:[#allocation51_spill] sm:$0xff]  ;;  %v12291_v45 = vmul.f32 %v16642_v18, %v16641_v31  ;;  %v12295_v28 = vmul.f32 %v16644_v56, %v16643_v20  ;;  %v16647_v35 = vld [vmem:[#allocation145_spill] sm:$0xff]  ;;  %v16648_v54 = vld [vmem:[#allocation44_spill] sm:$0xff]  ;;  %6316 = vperm.xlu0 %7693, %v7443_v59  }
 0x3d0   : > { %v2294_v53 = vmul.f32 %v16637_v58, %v16521_v32  ;;  %v3194_v5 = vadd.f32 %v11801_v27, %v2746_v30  ;;  %v7205_v32 = vld [vmem:[%s15044_s3 + $0x30] sm:$0xf0]  ;;  %v2740_v2 = vmul.f32 %v16580_v38, %v16640_v14  ;;  %4226 = vmatpush.bf16.msrb.mxu2 %v3382_v25  ;;  %v3158_v43 = vadd.f32 %v16648_v54, %v16647_v35  ;;  %v16652_v25 = vld [vmem:[#allocation154_spill] sm:$0xff]  ;;  %v16660_v58 = vld [vmem:[#allocation189_spill] sm:$0xff] }
 0x3d1   : > { %v16645_v27 = vld [vmem:[#allocation132_spill] sm:$0xff]  ;;  %v16646_v1 = vld [vmem:[#allocation91_spill] sm:$0xff]  ;;  %4315 = vmatpush.bf16.msrb.mxu3 %v3398_v34  ;;  %v3288_v61 = vmax.f32 %v3160_v57, 0.0  ;;  %v3290_v38 = vmax.f32 %v3162_v11, 0.0  ;;  %v12302_v4 = vor.u32 %v7563_v17, %v7203_v55  ;;  %v3380_v62 = vpack.c.bf16 %v3294_v19, %v3292_v39  ;;  %v16650_v11 = vld [vmem:[#allocation150_spill] sm:$0xff] }
 0x3d2   : > { %v3156_v26 = vadd.f32 %v16646_v1, %v16645_v27  ;;  %v2742_v36 = vmul.f32 %v16581_v49, %v2294_v53  ;;  %v3396_v47 = vpack.c.bf16 %v3326_v23, %v3324_v10  ;;  %v3320_v3 = vmax.f32 %v3192_v37, 0.0  ;;  %v16649_v49 = vld [vmem:[#allocation38_spill] sm:$0xff]  ;;  %v7448_v57 = vld [vmem:[%s15047_s6 + $0xb8] sm:$0xff]  ;;  %v16654_v30 = vld [vmem:[#allocation155_spill] sm:$0xff] }
 0x3d3   : > { %v12304_v21 = vor.u32 %v7561_v48, %v7205_v32  ;;  %v3322_v13 = vmax.f32 %v3194_v5, 0.0  ;;  %v3188_v44 = vadd.f32 %v16584_v8, %v2740_v2  ;;  %v2736_v46 = vmul.f32 %v16592_v16, %v16649_v49  ;;  %v16651_v33 = vld [vmem:[#allocation100_spill] sm:$0xff]  ;;  %v16653_v39 = vld [vmem:[#allocation93_spill] sm:$0xff]  ;;  %v16655_v55 = vld [vmem:[#allocation103_spill] sm:$0xff]  ;;  %4059 = vmatmul.bf16.gmra.mxu2 %v12302_v4  ;;  %6341 = vperm.xlu2 %7695, %v7448_v57  }
 0x3d4   : > { %v3190_v41 = vadd.f32 %v16587_v24, %v2742_v36  ;;  %v12315_v52 = vmul.f32 %v16651_v33, %v16650_v11  ;;  %v2661_v19 = vmul.f32 %v16653_v39, %v16652_v25  ;;  %v2663_v10 = vmul.f32 %v16655_v55, %v16654_v30  ;;  %v16656_v8 = vld [vmem:[#allocation157_spill] sm:$0xff]  ;;  %v16657_v23 = vld [vmem:[#allocation106_spill] sm:$0xff]  ;;  %4227 = vmatpush.bf16.msrb.mxu2 %v3380_v62  ;;  %v7447_v16 = vld [vmem:[%s15047_s6 + $0xb0] sm:$0xff] }
 0x3d5   : > { %v2665_v24 = vmul.f32 %v16657_v23, %v16656_v8  ;;  %v16658_v37 = vld [vmem:[#allocation161_spill] sm:$0xff]  ;;  %v16659_v17 = vld [vmem:[#allocation99_spill] sm:$0xff]  ;;  %v16662_v60 = vld [vmem:[#allocation140_spill] sm:$0xff]  ;;  %4316 = vmatpush.bf16.msrb.mxu3 %v3396_v47  ;;  %v3186_v5 = vadd.f32 %v12028_v63, %v12239_v29  ;;  %v3378_v48 = vpack.c.bf16 %v3290_v38, %v3288_v61  ;;  %v3284_v32 = vmax.f32 %v3156_v26, 0.0  ;;  %6336 = vperm.xlu1 %7694, %v7447_v16  }
 0x3d6   : > { %v2667_v42 = vmul.f32 %v16659_v17, %v16658_v37  ;;  %v16661_v53 = vld [vmem:[#allocation163_spill] sm:$0xff]  ;;  %v16663_v7 = vld [vmem:[#allocation210_spill] sm:$0xff]  ;;  %4148 = vmatmul.bf16.gmra.mxu3 %v12304_v21  ;;  %v3286_v14 = vmax.f32 %v3158_v43, 0.0  ;;  %v3394_v31 = vpack.c.bf16 %v3322_v13, %v3320_v3  ;;  %v3316_v18 = vmax.f32 %v3188_v44, 0.0  ;;  %v16664_v27 = vld [vmem:[#allocation12_spill] sm:$0xff] }
 0x3d7   : > { %v3152_v59 = vadd.f32 %v16661_v53, %v16660_v58  ;;  %v3154_v34 = vadd.f32 %v16663_v7, %v16662_v60  ;;  %v7446_v2 = vld [vmem:[%s15047_s6 + $0xa8] sm:$0xff]  ;;  %v3318_v20 = vmax.f32 %v3190_v41, 0.0  ;;  %v3184_v56 = vadd.f32 %v12077_v0, %v2736_v46  ;;  %v16670_v61 = vld [vmem:[#allocation184_spill] sm:$0xff]  ;;  %v16675_v0 = vld [vmem:[#allocation181_spill] sm:$0xff] }
 0x3d8   : > { %v16665_v1 = vld [vmem:[#allocation115_spill] sm:$0xff]  ;;  %v16666_v63 = vld [vmem:[#allocation22_spill] sm:$0xff]  ;;  %4228 = vmatpush.bf16.msrb.mxu2 %v3378_v48  ;;  %v16673_v3 = vld [vmem:[#allocation160_spill] sm:$0xff]  ;;  %6331 = vperm.xlu0 %7693, %v7446_v2   ;;  %v3376_v33 = vpack.c.bf16 %v3286_v14, %v3284_v32  ;;  %v3314_v16 = vmax.f32 %v3186_v5, 0.0 }
 0x3d9   : > { %v12342_v36 = vmul.f32 %v16665_v1, %v16664_v27  ;;  %v16667_v29 = vld [vmem:[#allocation127_spill] sm:$0xff]  ;;  %v16668_v26 = vld [vmem:[#allocation74_spill] sm:$0xff]  ;;  %4317 = vmatpush.bf16.msrb.mxu3 %v3394_v31  ;;  %v16677_v57 = vld [vmem:[#allocation68_spill] sm:$0xff]  ;;  %v3280_v25 = vmax.f32 %v3152_v59, 0.0  ;;  %v3282_v39 = vmax.f32 %v3154_v34, 0.0  ;;  %v3392_v8 = vpack.c.bf16 %v3318_v20, %v3316_v18 }
 0x3da   : > { %v2697_v35 = vmul.f32 %v16667_v29, %v16666_v63  ;;  %v16669_v54 = vld [vmem:[#allocation138_spill] sm:$0xff]  ;;  %v16672_v47 = vld [vmem:[#allocation187_spill] sm:$0xff]  ;;  %v3115_v11 = vadd.f32 %v16677_v57, %v2667_v42  ;;  %v16678_v30 = vld [vmem:[#allocation21_spill] sm:$0xff]  ;;  %v3312_v23 = vmax.f32 %v3184_v56, 0.0 }
 0x3db   : > { %v2699_v43 = vmul.f32 %v16669_v54, %v16668_v26  ;;  %v16671_v38 = vld [vmem:[#allocation206_spill] sm:$0xff]  ;;  %v3150_v13 = vadd.f32 %v16673_v3, %v16672_v47  ;;  %v16674_v44 = vld [vmem:[#allocation159_spill] sm:$0xff]  ;;  %v3182_v55 = vadd.f32 %v12123_v50, %v16678_v30  ;;  %v16679_v17 = vld [vmem:[#allocation76_spill] sm:$0xff]  ;;  %v3374_v56 = vpack.c.bf16 %v3282_v39, %v3280_v25 }
 0x3dc   : > { %v3148_v62 = vadd.f32 %v16671_v38, %v16670_v61  ;;  %v3180_v41 = vadd.f32 %v16675_v0, %v16674_v44  ;;  %v16676_v49 = vld [vmem:[#allocation35_spill] sm:$0xff]  ;;  %v3145_v53 = vadd.f32 %v16543_v15, %v2697_v35  ;;  %4229 = vmatpush.bf16.msrb.mxu2 %v3376_v33  ;;  %v16681_v42 = vld [vmem:[#allocation42_spill] sm:$0xff]  ;;  %v16682_v59 = vld [vmem:[#allocation20_spill] sm:$0xff]  ;;  %v3243_v15 = vmax.f32 %v3115_v11, 0.0 }
 0x3dd   : > { %v3113_v46 = vadd.f32 %v16676_v49, %v2665_v24  ;;  %v7451_v37 = vld [vmem:[%s15047_s6 + $0xd0] sm:$0xff]  ;;  %v3147_v60 = vadd.f32 %v16681_v42, %v2699_v43  ;;  %v2695_v7 = vmul.f32 %v16549_v6, %v16682_v59  ;;  %v7450_v50 = vld [vmem:[%s15047_s6 + $0xc8] sm:$0xff]  ;;  %v16685_v32 = vld [vmem:[#allocation17_spill] sm:$0xff]  ;;  %4318 = vmatpush.bf16.msrb.mxu3 %v3392_v8  ;;  %v3278_v1 = vmax.f32 %v3150_v13, 0.0 }
 0x3de   : > { %v16680_v58 = vld [vmem:[#allocation131_spill] sm:$0xff]  ;;  %v16684_v5 = vld [vmem:[#allocation128_spill] sm:$0xff]  ;;  %v16686_v14 = vld [vmem:[#allocation121_spill] sm:$0xff]  ;;  %v3276_v27 = vmax.f32 %v3148_v62, 0.0  ;;  %6356 = vperm.xlu2 %7695, %v7451_v37   ;;  %v3390_v35 = vpack.c.bf16 %v3314_v16, %v3312_v23  ;;  %v3308_v26 = vmax.f32 %v3180_v41, 0.0  ;;  %v3310_v54 = vmax.f32 %v3182_v55, 0.0  ;;  %6351 = vperm.xlu1 %7694, %v7450_v50  }
 0x3df   : > { %v2693_v24 = vmul.f32 %v16680_v58, %v16679_v17  ;;  %v16683_v34 = vld [vmem:[#allocation63_spill] sm:$0xff]  ;;  %v2691_v2 = vmul.f32 %v16686_v14, %v16685_v32  ;;  %v16687_v31 = vld [vmem:[#allocation16_spill] sm:$0xff]  ;;  %v3241_v20 = vmax.f32 %v3113_v46, 0.0  ;;  %v7449_v6 = vld [vmem:[%s15047_s6 + $0xc0] sm:$0xff]  ;;  %v3273_v62 = vmax.f32 %v3145_v53, 0.0 }
 0x3e0   : > { %v2689_v48 = vmul.f32 %v16684_v5, %v16683_v34  ;;  %v3109_v18 = vadd.f32 %v16687_v31, %v2661_v19  ;;  %v16688_v63 = vld [vmem:[#allocation24_spill] sm:$0xff]  ;;  %v7219_v19 = vld [vmem:[%s15044_s3 + $0x40] sm:$0xf]  ;;  %v7567_v43 = vld [vmem:[%s15044_s3 + $0x4c] sm:$0xf0]  ;;  %4230 = vmatpush.bf16.msrb.mxu2 %v3374_v56  ;;  %v3275_v47 = vmax.f32 %v3147_v60, 0.0  ;;  %v3143_v3 = vadd.f32 %v16552_v40, %v2695_v7  ;;  %6346 = vperm.xlu0 %7693, %v7449_v6  }
 0x3e1   : > { %v3111_v29 = vadd.f32 %v16688_v63, %v2663_v10  ;;  %v16689_v61 = vld [vmem:[#allocation73_spill] sm:$0xff]  ;;  %v7221_v13 = vld [vmem:[%s15044_s3 + $0x50] sm:$0xf0]  ;;  %v16690_v44 = vld [vmem:[#allocation58_spill] sm:$0xff]  ;;  %4319 = vmatpush.bf16.msrb.mxu3 %v3390_v35  ;;  %v3372_v39 = vpack.c.bf16 %v3278_v1, %v3276_v27  ;;  %v12400_v30 = vor.u32 %v7567_v43, %v7219_v19  ;;  %v3355_v8 = vpack.c.bf16 %v3243_v15, %v3241_v20 }
 0x3e2   : > { %v3141_v38 = vadd.f32 %v16689_v61, %v2693_v24  ;;  %v7565_v10 = vld [vmem:[%s15044_s3 + $0x44] sm:$0xf]  ;;  %v16692_v49 = vld [vmem:[#allocation23_spill] sm:$0xff]  ;;  %v3237_v25 = vmax.f32 %v3109_v18, 0.0  ;;  %v3388_v23 = vpack.c.bf16 %v3310_v54, %v3308_v26  ;;  %v16695_v37 = vld [vmem:[#allocation124_spill] sm:$0xff]  ;;  %v3271_v24 = vmax.f32 %v3143_v3, 0.0 }
 0x3e3   : > { %v16691_v0 = vld [vmem:[#allocation125_spill] sm:$0xff]  ;;  %v3105_v46 = vadd.f32 %v16692_v49, %v12295_v28  ;;  %v16693_v57 = vld [vmem:[#allocation90_spill] sm:$0xff]  ;;  %v3239_v55 = vmax.f32 %v3111_v29, 0.0  ;;  %v12402_v16 = vor.u32 %v7565_v10, %v7221_v13  ;;  %v3139_v17 = vadd.f32 %v16695_v37, %v2691_v2  ;;  %v16697_v42 = vld [vmem:[#allocation83_spill] sm:$0xff]  ;;  %4064 = vmatmul.bf16.gmra.mxu2 %v12400_v30 }
 0x3e4   : > { %v2687_v41 = vmul.f32 %v16691_v0, %v16690_v44  ;;  %v3107_v11 = vadd.f32 %v16693_v57, %v12315_v52  ;;  %v16694_v40 = vld [vmem:[#allocation34_spill] sm:$0xff]  ;;  %v3269_v58 = vmax.f32 %v3141_v38, 0.0  ;;  %4231 = vmatpush.bf16.msrb.mxu2 %v3372_v39  ;;  %v3371_v28 = vpack.c.bf16 %v3275_v47, %v3273_v62  ;;  %v16696_v53 = vld [vmem:[#allocation137_spill] sm:$0xff]  ;;  %v16699_v7 = vld [vmem:[#allocation92_spill] sm:$0xff] }
 0x3e5   : > { %v3137_v33 = vadd.f32 %v16694_v40, %v2689_v48  ;;  %v7454_v52 = vld [vmem:[%s15047_s6 + $0xe8] sm:$0xff]  ;;  %v2649_v60 = vmul.f32 %v16697_v42, %v16696_v53  ;;  %v16700_v34 = vld [vmem:[#allocation185_spill] sm:$0xff]  ;;  %4320 = vmatpush.bf16.msrb.mxu3 %v3388_v23  ;;  %v16702_v14 = vld [vmem:[#allocation8_spill] sm:$0xff]  ;;  %v3233_v63 = vmax.f32 %v3105_v46, 0.0  ;;  %v3353_v35 = vpack.c.bf16 %v3239_v55, %v3237_v25 }
 0x3e6   : > { %v16698_v59 = vld [vmem:[#allocation142_spill] sm:$0xff]  ;;  %v16701_v5 = vld [vmem:[#allocation119_spill] sm:$0xff]  ;;  %v7452_v27 = vld [vmem:[%s15047_s6 + $0xd8] sm:$0xff]  ;;  %v3235_v29 = vmax.f32 %v3107_v11, 0.0  ;;  %4153 = vmatmul.bf16.gmra.mxu3 %v12402_v16  ;;  %6371 = vperm.xlu2 %7695, %v7454_v52   ;;  %v3369_v19 = vpack.c.bf16 %v3271_v24, %v3269_v58 }
 0x3e7   : > { %v2651_v50 = vmul.f32 %v16699_v7, %v16698_v59  ;;  %v2681_v48 = vmul.f32 %v16701_v5, %v16700_v34  ;;  %v7453_v32 = vld [vmem:[%s15047_s6 + $0xe0] sm:$0xff]  ;;  %v3265_v54 = vmax.f32 %v3137_v33, 0.0  ;;  %v16708_v43 = vld [vmem:[#allocation32_spill] sm:$0xff]  ;;  %v16711_v47 = vld [vmem:[#allocation67_spill] sm:$0xff] }
 0x3e8   : > { %4402 = vmatpush.bf16.msra.mxu2 %v3355_v8  ;;  %v16703_v2 = vld [vmem:[#allocation122_spill] sm:$0xff]  ;;  %v16706_v1 = vld [vmem:[#allocation141_spill] sm:$0xff]  ;;  %6366 = vperm.xlu1 %7694, %v7453_v32   ;;  %v16709_v61 = vld [vmem:[#allocation208_spill] sm:$0xff] }
 0x3e9   : > { %v2683_v31 = vmul.f32 %v16703_v2, %v16702_v14  ;;  %v16704_v18 = vld [vmem:[#allocation86_spill] sm:$0xff]  ;;  %4491 = vmatpush.bf16.msra.mxu3 %v3371_v28  ;;  %v3133_v6 = vadd.f32 %v16706_v1, %v12342_v36  ;;  %v16710_v38 = vsub.f32 %v16708_v43, %v16709_v61  ;;  %v16712_v3 = vld [vmem:[#allocation87_spill] sm:$0xff]  ;;  %v16713_v10 = vld [vmem:[#allocation136_spill] sm:$0xff]  ;;  %6361 = vperm.xlu0 %7693, %v7452_v27  }
 0x3ea   : > { %v3101_v20 = vadd.f32 %v16704_v18, %v12278_v12  ;;  %v16705_v15 = vld [vmem:[#allocation134_spill] sm:$0xff]  ;;  %v16707_v12 = vld [vmem:[#allocation101_spill] sm:$0xff]  ;;  %v2645_v36 = vmul.f32 %v16712_v3, %v16711_v47  ;;  %v16716_v49 = vld [vmem:[#allocation116_spill] sm:$0xff] }
 0x3eb   : > { %v3103_v56 = vadd.f32 %v16705_v15, %v12291_v45  ;;  %v3135_v26 = vadd.f32 %v16707_v12, %v2687_v41  ;;  %v3267_v45 = vmax.f32 %v3139_v17, 0.0  ;;  %v2227_v62 = vmul.f32 %v16710_v38, %v16527_v22  ;;  %v16714_v13 = vld [vmem:[#allocation89_spill] sm:$0xff]  ;;  %v16718_v57 = vld [vmem:[#allocation110_spill] sm:$0xff]  ;;  %v16719_v40 = vld [vmem:[#allocation123_spill] sm:$0xff] }
 0x3ec   : > { %v2647_v44 = vmul.f32 %v16714_v13, %v16713_v10  ;;  %4403 = vmatpush.bf16.msra.mxu2 %v3353_v35  ;;  %v16715_v0 = vld [vmem:[#allocation173_spill] sm:$0xff]  ;;  %v3097_v33 = vadd.f32 %v16719_v40, %v2649_v60  ;;  %v16720_v25 = vld [vmem:[#allocation48_spill] sm:$0xff]  ;;  %v3229_v23 = vmax.f32 %v3101_v20, 0.0  ;;  %v3351_v17 = vpack.c.bf16 %v3235_v29, %v3233_v63  ;;  %v16723_v59 = vld [vmem:[#allocation191_spill] sm:$0xff] }
 0x3ed   : > { %v2677_v41 = vmul.f32 %v16716_v49, %v16715_v0  ;;  %v16717_v46 = vld [vmem:[#allocation177_spill] sm:$0xff]  ;;  %v3099_v39 = vadd.f32 %v16720_v25, %v2651_v50  ;;  %4492 = vmatpush.bf16.msra.mxu3 %v3369_v19  ;;  %v16721_v55 = vld [vmem:[#allocation108_spill] sm:$0xff]  ;;  %v3231_v37 = vmax.f32 %v3103_v56, 0.0  ;;  %v3261_v24 = vmax.f32 %v3133_v6, 0.0  ;;  %v16725_v50 = vld [vmem:[#allocation19_spill] sm:$0xff] }
 0x3ee   : > { %v2679_v11 = vmul.f32 %v16718_v57, %v16717_v46  ;;  %v3129_v8 = vadd.f32 %v16721_v55, %v2681_v48  ;;  %v16722_v58 = vld [vmem:[#allocation53_spill] sm:$0xff]  ;;  %v3263_v52 = vmax.f32 %v3135_v26, 0.0  ;;  %v3367_v53 = vpack.c.bf16 %v3267_v45, %v3265_v54  ;;  %v16726_v34 = vld [vmem:[#allocation71_spill] sm:$0xff]  ;;  %v16728_v32 = vld [vmem:[#allocation84_spill] sm:$0xff] }
 0x3ef   : > { %v3131_v28 = vadd.f32 %v16722_v58, %v2683_v31  ;;  %v7457_v42 = vld [vmem:[%s15047_s6 + $0x100] sm:$0xff]  ;;  %v16724_v60 = vsub.f32 %v16723_v59, %v16709_v61  ;;  %v2637_v5 = vmul.f32 %v16726_v34, %v16725_v50  ;;  %v16727_v48 = vld [vmem:[#allocation143_spill] sm:$0xff]  ;;  %v7456_v20 = vld [vmem:[%s15047_s6 + $0xf8] sm:$0xff]  ;;  %v3225_v45 = vmax.f32 %v3097_v33, 0.0 }
 0x3f0   : > { %v2641_v14 = vmul.f32 %v16728_v32, %v16727_v48  ;;  %v16729_v2 = vld [vmem:[#allocation62_spill] sm:$0xff]  ;;  %v16730_v31 = vld [vmem:[#allocation77_spill] sm:$0xff]  ;;  %4404 = vmatpush.bf16.msra.mxu2 %v3351_v17  ;;  %v16735_v29 = vld [vmem:[#allocation39_spill] sm:$0xff]  ;;  %v3227_v19 = vmax.f32 %v3099_v39, 0.0  ;;  %v3349_v43 = vpack.c.bf16 %v3231_v37, %v3229_v23  ;;  %6418 = vperm.xlu2 %7695, %v7457_v42   ;;  %v3257_v3 = vmax.f32 %v3129_v8, 0.0 }
 0x3f1   : > { %v2223_v7 = vmul.f32 %v16724_v60, %v16527_v22  ;;  %v2643_v18 = vmul.f32 %v16730_v31, %v16729_v2  ;;  %v16731_v15 = vld [vmem:[#allocation170_spill] sm:$0xff]  ;;  %v16732_v56 = vld [vmem:[#allocation105_spill] sm:$0xff]  ;;  %v16734_v22 = vld [vmem:[#allocation59_spill] sm:$0xff]  ;;  %v3095_v35 = vadd.f32 %v16735_v29, %v2647_v44  ;;  %4493 = vmatpush.bf16.msra.mxu3 %v3367_v53  ;;  %v3365_v10 = vpack.c.bf16 %v3263_v52, %v3261_v24 }
 0x3f2   : > { %v2673_v27 = vmul.f32 %v16732_v56, %v16731_v15  ;;  %v16733_v1 = vld [vmem:[#allocation114_spill] sm:$0xff]  ;;  %v3093_v63 = vadd.f32 %v16734_v22, %v2645_v36  ;;  %v7455_v12 = vld [vmem:[%s15047_s6 + $0xf0] sm:$0xff]  ;;  %v7235_v61 = vld [vmem:[%s15044_s3 + $0x60] sm:$0xf]  ;;  %v3259_v36 = vmax.f32 %v3131_v28, 0.0  ;;  %6381 = vperm.xlu1 %7694, %v7456_v20   ;;  %v3347_v24 = vpack.c.bf16 %v3227_v19, %v3225_v45 }
 0x3f3   : > { %v2675_v6 = vmul.f32 %v16733_v1, %v2227_v62  ;;  %v16736_v26 = vld [vmem:[#allocation70_spill] sm:$0xff]  ;;  %v7571_v38 = vld [vmem:[%s15044_s3 + $0x6c] sm:$0xf0]  ;;  %v7237_v44 = vld [vmem:[%s15044_s3 + $0x70] sm:$0xf0]  ;;  %6376 = vperm.xlu0 %7693, %v7455_v12   ;;  %v3223_v28 = vmax.f32 %v3095_v35, 0.0 }
 0x3f4   : > { %v3125_v54 = vadd.f32 %v16736_v26, %v2677_v41  ;;  %v16737_v62 = vld [vmem:[#allocation66_spill] sm:$0xff]  ;;  %v16739_v49 = vld [vmem:[#allocation81_spill] sm:$0xff]  ;;  %v16740_v46 = vld [vmem:[#allocation164_spill] sm:$0xff]  ;;  %4405 = vmatpush.bf16.msra.mxu2 %v3349_v43  ;;  %v12493_v17 = vor.u32 %v7571_v38, %v7235_v61  ;;  %v3221_v58 = vmax.f32 %v3093_v63, 0.0 }
 0x3f5   : > { %v3127_v47 = vadd.f32 %v16737_v62, %v2679_v11  ;;  %v7569_v13 = vld [vmem:[%s15044_s3 + $0x64] sm:$0xf]  ;;  %v16742_v33 = vld [vmem:[#allocation111_spill] sm:$0xff]  ;;  %v16743_v25 = vld [vmem:[#allocation56_spill] sm:$0xff]  ;;  %4494 = vmatpush.bf16.msra.mxu3 %v3365_v10 }
 0x3f6   : > { %v16738_v0 = vld [vmem:[#allocation50_spill] sm:$0xff]  ;;  %v16741_v57 = vld [vmem:[#allocation109_spill] sm:$0xff]  ;;  %v2671_v11 = vmul.f32 %v16742_v33, %v2223_v7  ;;  %v3089_v39 = vadd.f32 %v16743_v25, %v2641_v14  ;;  %v16745_v23 = vld [vmem:[#allocation196_spill] sm:$0xff]  ;;  %v12495_v52 = vor.u32 %v7569_v13, %v7237_v44  ;;  %v3253_v59 = vmax.f32 %v3125_v54, 0.0  ;;  %4069 = vmatmul.bf16.gmra.mxu2 %v12493_v17 }
 0x3f7   : > { %v2639_v41 = vmul.f32 %v16739_v49, %v16738_v0  ;;  %v2669_v40 = vmul.f32 %v16741_v57, %v16740_v46  ;;  %v16744_v55 = vld [vmem:[#allocation193_spill] sm:$0xff]  ;;  %v3121_v37 = vadd.f32 %v16745_v23, %v2673_v27  ;;  %v16746_v53 = vld [vmem:[#allocation72_spill] sm:$0xff]  ;;  %v3255_v60 = vmax.f32 %v3127_v47, 0.0  ;;  %v16747_v48 = vld [vmem:[#allocation198_spill] sm:$0xff] }
 0x3f8   : > { %v3091_v8 = vadd.f32 %v16744_v55, %v2643_v18  ;;  %v3123_v42 = vadd.f32 %v16746_v53, %v2675_v6  ;;  %v3363_v7 = vpack.c.bf16 %v3259_v36, %v3257_v3  ;;  %v7460_v50 = vld [vmem:[%s15047_s6 + $0x118] sm:$0xff]  ;;  %4406 = vmatpush.bf16.msra.mxu2 %v3347_v24  ;;  %v7459_v34 = vld [vmem:[%s15047_s6 + $0x110] sm:$0xff]  ;;  %v3085_v32 = vadd.f32 %v16747_v48, %v2637_v5  ;;  %v7458_v31 = vld [vmem:[%s15047_s6 + $0x108] sm:$0xff]  ;;  %v12610_v48 = vpop.permute.xlu0 %3568 }
 0x3f9   : > { %v16748_v14 = vld [vmem:[#allocation200_spill] sm:$0xff]  ;;  %v16749_v18 = vld [vmem:[#allocation195_spill] sm:$0xff]  ;;  %v3217_v15 = vmax.f32 %v3089_v39, 0.0  ;;  %v3345_v27 = vpack.c.bf16 %v3223_v28, %v3221_v58  ;;  %4158 = vmatmul.bf16.gmra.mxu3 %v12495_v52  ;;  %6433 = vperm.xlu2 %7695, %v7460_v50   ;;  %v16750_v1 = vld [vmem:[#allocation202_spill] sm:$0xff]  ;;  %v3249_v5 = vmax.f32 %v3121_v37, 0.0  ;;  %v3361_v63 = vpack.c.bf16 %v3255_v60, %v3253_v59  ;;  %v12600_v60 = vpop.permute.xlu1 %3573  ;;  %16753 = vst [vmem:[#allocation41_spill] sm:$0xff] %v12610_v48 }
 0x3fa   : > { %v3087_v2 = vadd.f32 %v16748_v14, %v2639_v41  ;;  %4495 = vmatpush.bf16.msra.mxu3 %v3363_v7  ;;  %v3117_v20 = vadd.f32 %v16749_v18, %v2669_v40  ;;  %v3219_v56 = vmax.f32 %v3091_v8, 0.0  ;;  %v3119_v6 = vadd.f32 %v16750_v1, %v2671_v11  ;;  %6428 = vperm.xlu1 %7694, %v7459_v34   ;;  %v7463_v19 = vld [vmem:[%s15047_s6 + $0x130] sm:$0xff]  ;;  %v7462_v43 = vld [vmem:[%s15047_s6 + $0x128] sm:$0xff]  ;;  %v7461_v61 = vld [vmem:[%s15047_s6 + $0x120] sm:$0xff]  ;;  %v12608_v34 = vpop.permute.xlu2 %3578 }
 0x3fb   : > { %v3251_v22 = vmax.f32 %v3123_v42, 0.0  ;;  %6423 = vperm.xlu0 %7693, %v7458_v31   ;;  %v3213_v29 = vmax.f32 %v3085_v32, 0.0  ;;  %v7251_v62 = vld [vmem:[%s15044_s3 + $0x80] sm:$0xf]  ;;  %v7575_v47 = vld [vmem:[%s15044_s3 + $0x8c] sm:$0xf0] }
 0x3fc   : > { %4407 = vmatpush.bf16.msra.mxu2 %v3345_v27  ;;  %v3215_v35 = vmax.f32 %v3087_v2, 0.0  ;;  %v3343_v12 = vpack.c.bf16 %v3219_v56, %v3217_v15  ;;  %v3245_v26 = vmax.f32 %v3117_v20, 0.0  ;;  %v3247_v54 = vmax.f32 %v3119_v6, 0.0  ;;  %v7573_v36 = vld [vmem:[%s15044_s3 + $0x84] sm:$0xf]  ;;  %v7466_v0 = vld [vmem:[%s15047_s6 + $0x148] sm:$0xff] }
 0x3fd   : > { %v3359_v45 = vpack.c.bf16 %v3251_v22, %v3249_v5  ;;  %v7253_v10 = vld [vmem:[%s15044_s3 + $0x90] sm:$0xf0]  ;;  %v12534_v13 = vor.u32 %v7575_v47, %v7251_v62  ;;  %v7465_v49 = vld [vmem:[%s15047_s6 + $0x140] sm:$0xff]  ;;  %v7464_v41 = vld [vmem:[%s15047_s6 + $0x138] sm:$0xff]  ;;  %16751 = vst [vmem:[#allocation102_spill] sm:$0xff] %v12600_v60 }
 0x3fe   : > { %4496 = vmatpush.bf16.msra.mxu3 %v3361_v63  ;;  %v3341_v38 = vpack.c.bf16 %v3215_v35, %v3213_v29  ;;  %v3357_v3 = vpack.c.bf16 %v3247_v54, %v3245_v26  ;;  %v12536_v44 = vor.u32 %v7573_v36, %v7253_v10  ;;  %v7469_v46 = vld [vmem:[%s15047_s6 + $0x160] sm:$0xff]  ;;  %v7468_v57 = vld [vmem:[%s15047_s6 + $0x158] sm:$0xff]  ;;  %v7467_v40 = vld [vmem:[%s15047_s6 + $0x150] sm:$0xff]  ;;  %16752 = vst [vmem:[#allocation31_spill] sm:$0xff] %v12608_v34 }
 0x3ff   : > { %v7267_v33 = vld [vmem:[%s15044_s3 + $0xa0] sm:$0xf]  ;;  %v7579_v11 = vld [vmem:[%s15044_s3 + $0xac] sm:$0xf0]  ;;  %v7577_v25 = vld [vmem:[%s15044_s3 + $0xa4] sm:$0xf] }
 0x400   : > { %4408 = vmatpush.bf16.msra.mxu2 %v3343_v12  ;;  %v7269_v39 = vld [vmem:[%s15044_s3 + $0xb0] sm:$0xf0]  ;;  %v12570_v55 = vor.u32 %v7579_v11, %v7267_v33  ;;  %v7472_v23 = vld [vmem:[%s15047_s6 + $0x178] sm:$0xff]  ;;  %v7470_v58 = vld [vmem:[%s15047_s6 + $0x168] sm:$0xff]  ;;  %v12631_v56 = vpop.permute.xlu0 %3583 }
 0x401   : > { %6448 = vperm.xlu2 %7695, %v7463_v19   ;;  %v12572_v8 = vor.u32 %v7577_v25, %v7269_v39  ;;  %v7471_v37 = vld [vmem:[%s15047_s6 + $0x170] sm:$0xff]  ;;  %v7538_v24 = vld [vmem:[%s15047_s6 + $0x188] sm:$0xff]  ;;  %v7537_v53 = vld [vmem:[%s15047_s6 + $0x180] sm:$0xff]  ;;  %v12627_v20 = vpop.permute.xlu1 %3588  ;;  %16756 = vst [vmem:[#allocation201_spill] sm:$0xff] %v12631_v56 }
 0x402   : > { %4497 = vmatpush.bf16.msra.mxu3 %v3359_v45  ;;  %6443 = vperm.xlu1 %7694, %v7462_v43   ;;  %v7539_v28 = vld [vmem:[%s15047_s6 + $0x190] sm:$0xff]  ;;  %v7283_v42 = vld [vmem:[%s15044_s3 + $0xc0] sm:$0xf]  ;;  %v7581_v7 = vld [vmem:[%s15044_s3 + $0xc4] sm:$0xf]  ;;  %16754 = vst [vmem:[#allocation9_spill] sm:$0xff] %v12627_v20  ;;  %v12629_v15 = vpop.permute.xlu2 %3593 }
 0x403   : > { %6438 = vperm.xlu0 %7693, %v7461_v61   ;;  %v7583_v59 = vld [vmem:[%s15044_s3 + $0xcc] sm:$0xf0]  ;;  %v7285_v50 = vld [vmem:[%s15044_s3 + $0xd0] sm:$0xf0]  ;;  %v7542_v2 = vld [vmem:[%s15047_s6 + $0x1a8] sm:$0xff]  ;;  %16755 = vst [vmem:[#allocation57_spill] sm:$0xff] %v12629_v15 }
 0x404   : > { %4409 = vmatpush.bf16.msra.mxu2 %v3341_v38  ;;  %v12612_v32 = vor.u32 %v7583_v59, %v7283_v42  ;;  %v12614_v14 = vor.u32 %v7581_v7, %v7285_v50  ;;  %v7541_v31 = vld [vmem:[%s15047_s6 + $0x1a0] sm:$0xff]  ;;  %v7540_v18 = vld [vmem:[%s15047_s6 + $0x198] sm:$0xff]  ;;  %v7543_v6 = vld [vmem:[%s15047_s6 + $0x1b0] sm:$0xff] }
 0x405   : > { %v7545_v27 = vld [vmem:[%s15047_s6 + $0x1c0] sm:$0xff]  ;;  %v7544_v1 = vld [vmem:[%s15047_s6 + $0x1b8] sm:$0xff]  ;;  %v7587_v22 = vld [vmem:[%s15044_s3 + $0xec] sm:$0xf0] }
 0x406   : > { %4498 = vmatpush.bf16.msra.mxu3 %v3357_v3  ;;  %4074 = vmatmul.bf16.gmra.mxu2 %v12534_v13  ;;  %v7299_v5 = vld [vmem:[%s15044_s3 + $0xe0] sm:$0xf]  ;;  %v7585_v63 = vld [vmem:[%s15044_s3 + $0xe4] sm:$0xf]  ;;  %v7301_v29 = vld [vmem:[%s15044_s3 + $0xf0] sm:$0xf0] }
 0x407   : > { %v12654_v35 = vor.u32 %v7587_v22, %v7299_v5  ;;  %v12656_v12 = vor.u32 %v7585_v63, %v7301_v29  ;;  %v7548_v54 = vld [vmem:[%s15047_s6 + $0x1d8] sm:$0xff]  ;;  %v7547_v43 = vld [vmem:[%s15047_s6 + $0x1d0] sm:$0xff]  ;;  %v7546_v61 = vld [vmem:[%s15047_s6 + $0x1c8] sm:$0xff] }
 0x408   : > { %v12665_v19 = vpop.permute.xlu0 %3598  ;;  %v7551_v38 = vld [vmem:[%s15047_s6 + $0x1f0] sm:$0xff]  ;;  %v7550_v62 = vld [vmem:[%s15047_s6 + $0x1e8] sm:$0xff]  ;;  %v7549_v3 = vld [vmem:[%s15047_s6 + $0x1e0] sm:$0xff] }
 0x409   : > { %4163 = vmatmul.bf16.gmra.mxu3 %v12536_v44  ;;  %6463 = vperm.xlu2 %7695, %v7466_v0   ;;  %v12658_v26 = vpop.permute.xlu1 %3603  ;;  %16759 = vst [vmem:[#allocation126_spill] sm:$0xff] %v12665_v19  ;;  %v7315_v0 = vld [vmem:[%s15044_s3 + $0x100] sm:$0xf]  ;;  %v7552_v11 = vld [vmem:[%s15047_s6 + $0x1f8] sm:$0xff]  ;;  %v7595_v42 = vld [vmem:[%s15044_s3 + $0x12c] sm:$0xf0] }
 0x40a   : > { %6458 = vperm.xlu1 %7694, %v7465_v49   ;;  %16757 = vst [vmem:[#allocation60_spill] sm:$0xff] %v12658_v26  ;;  %v12663_v45 = vpop.permute.xlu2 %3608  ;;  %v7591_v49 = vld [vmem:[%s15044_s3 + $0x10c] sm:$0xf0]  ;;  %v6731_v33 = vld [vmem:[#allocation2] sm:$0x1] }
 0x40b   : > { %6453 = vperm.xlu0 %7693, %v7464_v41   ;;  %16758 = vst [vmem:[#allocation182_spill] sm:$0xff] %v12663_v45  ;;  %v7589_v41 = vld [vmem:[%s15044_s3 + $0x104] sm:$0xf]  ;;  %v7333_v50 = vld [vmem:[%s15044_s3 + $0x130] sm:$0xf0] }
 0x40c   : > { %v7593_v7 = vld [vmem:[%s15044_s3 + $0x124] sm:$0xf]  ;;  %v7347_v63 = vld [vmem:[%s15044_s3 + $0x140] sm:$0xf]  ;;  %v7599_v29 = vld [vmem:[%s15044_s3 + $0x14c] sm:$0xf0] }
 0x410   : > { %v12688_v10 = vpop.permute.xlu0 %3613 }
 0x411   : > { %6478 = vperm.xlu2 %7695, %v7469_v46   ;;  %v12681_v47 = vpop.permute.xlu1 %3618  ;;  %16762 = vst [vmem:[#allocation33_spill] sm:$0xff] %v12688_v10  ;;  %v7317_v46 = vld [vmem:[%s15044_s3 + $0x110] sm:$0xf0] }
 0x412   : > { %6473 = vperm.xlu1 %7694, %v7468_v57   ;;  %16760 = vst [vmem:[#allocation28_spill] sm:$0xff] %v12681_v47  ;;  %v12686_v36 = vpop.permute.xlu2 %3623  ;;  %v12702_v57 = vor.u32 %v7591_v49, %v7315_v0 }
 0x413   : > { %6468 = vperm.xlu0 %7693, %v7467_v40   ;;  %16761 = vst [vmem:[#allocation197_spill] sm:$0xff] %v12686_v36  ;;  %v12704_v40 = vor.u32 %v7589_v41, %v7317_v46 }
 0x414   : > { %16763 = vst [vmem:[#allocation180_spill] sm:$0xff] %v12702_v57 }
 0x415   : > { %16764 = vst [vmem:[#allocation166_spill] sm:$0xff] %v12704_v40 }
 0x416   : > { %4079 = vmatmul.bf16.gmra.mxu2 %v12570_v55 }
 0x419   : > { %4168 = vmatmul.bf16.gmra.mxu3 %v12572_v8  ;;  %6493 = vperm.xlu2 %7695, %v7472_v23   ;;  %v12711_v39 = vpop.permute.xlu1 %3633 }
 0x41a   : > { %6488 = vperm.xlu1 %7694, %v7471_v37   ;;  %16765 = vst [vmem:[#allocation211_spill] sm:$0xff] %v12711_v39  ;;  %v12714_v37 = vpop.permute.xlu0 %3628 }
 0x41b   : > { %6483 = vperm.xlu0 %7693, %v7470_v58   ;;  %16766 = vst [vmem:[#allocation162_spill] sm:$0xff] %v12714_v37 }
 0x421   : > { %6589 = vperm.xlu2 %7695, %v7539_v28  }
 0x422   : > { %6584 = vperm.xlu1 %7694, %v7538_v24  }
 0x423   : > { %6579 = vperm.xlu0 %7693, %v7537_v53   ;;  %v7331_v53 = vld [vmem:[%s15044_s3 + $0x120] sm:$0xf] }
 0x426   : > { %4084 = vmatmul.bf16.gmra.mxu2 %v12612_v32 }
 0x429   : > { %4173 = vmatmul.bf16.gmra.mxu3 %v12614_v14  ;;  %6604 = vperm.xlu2 %7695, %v7542_v2  }
 0x42a   : > { %6599 = vperm.xlu1 %7694, %v7541_v31  }
 0x42b   : > { %6594 = vperm.xlu0 %7693, %v7540_v18   ;;  %v12733_v18 = vor.u32 %v7595_v42, %v7331_v53 }
 0x42d   : > { %16767 = vst [vmem:[#allocation18_spill] sm:$0xff] %v12733_v18 }
 0x431   : > { %6619 = vperm.xlu2 %7695, %v7545_v27   ;;  %v12735_v27 = vor.u32 %v7593_v7, %v7333_v50 }
 0x432   : > { %6614 = vperm.xlu1 %7694, %v7544_v1  }
 0x433   : > { %6609 = vperm.xlu0 %7693, %v7543_v6   ;;  %16768 = vst [vmem:[#allocation171_spill] sm:$0xff] %v12735_v27 }
 0x436   : > { %4089 = vmatmul.bf16.gmra.mxu2 %v12654_v35 }
 0x439   : > { %4178 = vmatmul.bf16.gmra.mxu3 %v12656_v12  ;;  %6634 = vperm.xlu2 %7695, %v7548_v54  }
 0x43a   : > { %6629 = vperm.xlu1 %7694, %v7547_v43   ;;  %v7597_v43 = vld [vmem:[%s15044_s3 + $0x144] sm:$0xf] }
 0x43b   : > { %6624 = vperm.xlu0 %7693, %v7546_v61   ;;  %v7349_v61 = vld [vmem:[%s15044_s3 + $0x150] sm:$0xf0] }
 0x43c   : > { %v12759_v49 = vor.u32 %v7597_v43, %v7349_v61  ;;  %v7605_v43 = vld [vmem:[%s15044_s3 + $0x184] sm:$0xf]  ;;  %v7381_v61 = vld [vmem:[%s15044_s3 + $0x190] sm:$0xf0] }
 0x43e   : > { %16770 = vst [vmem:[#allocation52_spill] sm:$0xff] %v12759_v49 }
 0x441   : > { %6649 = vperm.xlu2 %7695, %v7551_v38  }
 0x442   : > { %6644 = vperm.xlu1 %7694, %v7550_v62  }
 0x443   : > { %6639 = vperm.xlu0 %7693, %v7549_v3   ;;  %v4055_v25 = vpop.f32.mrf.mxu2  ;;  %v12755_v3 = vor.u32 %v7599_v29, %v7347_v63  ;;  %v7379_v29 = vld [vmem:[%s15044_s3 + $0x180] sm:$0xf] }
 0x444   : > { %v4056_v23 = vadd.f32 %v4055_v25, %v12610_v48  ;;  %v7363_v25 = vld [vmem:[%s15044_s3 + $0x160] sm:$0xf] }
 0x445   : > { %16769 = vst [vmem:[#allocation69_spill] sm:$0xff] %v12755_v3 }
 0x446   : > { %4094 = vmatmul.bf16.gmra.mxu2 %v12702_v57  ;;  %v4144_v58 = vpop.f32.mrf.mxu3 }
 0x447   : > { %v12716_v28 = vadd.f32 %v4144_v58, %v4056_v23  ;;  %v7603_v23 = vld [vmem:[%s15044_s3 + $0x16c] sm:$0xf0]  ;;  %v7601_v58 = vld [vmem:[%s15044_s3 + $0x164] sm:$0xf] }
 0x448   : > { %v12779_v7 = vor.u32 %v7603_v23, %v7363_v25 }
 0x449   : > { %4183 = vmatmul.bf16.gmra.mxu3 %v12704_v40 }
 0x44a   : > { %6734 = vperm.xlu1 %7694, %v6731_v33   ;;  %16771 = vst [vmem:[#allocation133_spill] sm:$0xff] %v12779_v7 }
 0x44b   : > { %6654 = vperm.xlu0 %7693, %v7552_v11   ;;  %v4057_v24 = vpop.f32.mrf.mxu2 }
 0x44c   : > { %v4058_v59 = vadd.f32 %v4057_v24, %v12600_v60  ;;  %v7365_v24 = vld [vmem:[%s15044_s3 + $0x170] sm:$0xf0] }
 0x44d   : > { %v12781_v50 = vor.u32 %v7601_v58, %v7365_v24 }
 0x44e   : > { %v4146_v2 = vpop.f32.mrf.mxu3 }
 0x44f   : > { %v12731_v31 = vadd.f32 %v4146_v2, %v4058_v59  ;;  %16772 = vst [vmem:[#allocation194_spill] sm:$0xff] %v12781_v50 }
 0x456   : > { %4099 = vmatmul.bf16.gmra.mxu2 %v12733_v18  ;;  %v4060_v1 = vpop.f32.mrf.mxu2 }
 0x457   : > { %v4061_v6 = vadd.f32 %v4060_v1, %v12608_v34 }
 0x459   : > { %4188 = vmatmul.bf16.gmra.mxu3 %v12735_v27  ;;  %v4149_v5 = vpop.f32.mrf.mxu3 }
 0x45a   : > { %v12740_v22 = vadd.f32 %v4149_v5, %v4061_v6 }
 0x45e   : > { %v4062_v54 = vpop.f32.mrf.mxu2 }
 0x45f   : > { %v4063_v38 = vadd.f32 %v4062_v54, %v12631_v56  ;;  %v7607_v54 = vld [vmem:[%s15044_s3 + $0x18c] sm:$0xf0] }
 0x461   : > { %v4151_v62 = vpop.f32.mrf.mxu3 }
 0x462   : > { %v12757_v0 = vadd.f32 %v4151_v62, %v4063_v38 }
 0x466   : > { %4104 = vmatmul.bf16.gmra.mxu2 %v12755_v3  ;;  %v4065_v41 = vpop.f32.mrf.mxu2 }
 0x467   : > { %v4066_v46 = vadd.f32 %v4065_v41, %v12627_v20 }
 0x469   : > { %4193 = vmatmul.bf16.gmra.mxu3 %v12759_v49  ;;  %v4154_v33 = vpop.f32.mrf.mxu3 }
 0x46a   : > { %v12764_v11 = vadd.f32 %v4154_v33, %v4066_v46  ;;  %v12803_v46 = vor.u32 %v7607_v54, %v7379_v29  ;;  %v12805_v33 = vor.u32 %v7605_v43, %v7381_v61 }
 0x46c   : > { %16773 = vst [vmem:[#allocation82_spill] sm:$0xff] %v12803_v46 }
 0x46d   : > { %16774 = vst [vmem:[#allocation40_spill] sm:$0xff] %v12805_v33 }
 0x46e   : > { %v4067_v53 = vpop.f32.mrf.mxu2 }
 0x46f   : > { %v4068_v42 = vadd.f32 %v4067_v53, %v12629_v15 }
 0x471   : > { %v4156_v59 = vpop.f32.mrf.mxu3 }
 0x472   : > { %v12783_v2 = vadd.f32 %v4156_v59, %v4068_v42  ;;  %v7395_v42 = vld [vmem:[%s15044_s3 + $0x1a0] sm:$0xf]  ;;  %v7611_v59 = vld [vmem:[%s15044_s3 + $0x1ac] sm:$0xf0] }
 0x473   : > { %v12827_v43 = vor.u32 %v7611_v59, %v7395_v42  ;;  %v7615_v42 = vld [vmem:[%s15044_s3 + $0x1cc] sm:$0xf0]  ;;  %v7613_v59 = vld [vmem:[%s15044_s3 + $0x1c4] sm:$0xf] }
 0x475   : > { %16775 = vst [vmem:[#allocation207_spill] sm:$0xff] %v12827_v43 }
 0x476   : > { %4109 = vmatmul.bf16.gmra.mxu2 %v12779_v7 }
 0x479   : > { %4198 = vmatmul.bf16.gmra.mxu3 %v12781_v50  ;;  %v4070_v1 = vpop.f32.mrf.mxu2 }
 0x47a   : > { %v4071_v6 = vadd.f32 %v4070_v1, %v12665_v19  ;;  %v7609_v1 = vld [vmem:[%s15044_s3 + $0x1a4] sm:$0xf] }
 0x47c   : > { %v4159_v5 = vpop.f32.mrf.mxu3 }
 0x47d   : > { %v12788_v63 = vadd.f32 %v4159_v5, %v4071_v6  ;;  %v7397_v6 = vld [vmem:[%s15044_s3 + $0x1b0] sm:$0xf0] }
 0x47e   : > { %v12829_v61 = vor.u32 %v7609_v1, %v7397_v6  ;;  %v7413_v1 = vld [vmem:[%s15044_s3 + $0x1d0] sm:$0xf0] }
 0x480   : > { %16776 = vst [vmem:[#allocation203_spill] sm:$0xff] %v12829_v61 }
 0x481   : > { %v4072_v38 = vpop.f32.mrf.mxu2 }
 0x482   : > { %v4073_v62 = vadd.f32 %v4072_v38, %v12658_v26 }
 0x484   : > { %v4161_v41 = vpop.f32.mrf.mxu3 }
 0x485   : > { %v12807_v25 = vadd.f32 %v4161_v41, %v4073_v62 }
 0x486   : > { %4114 = vmatmul.bf16.gmra.mxu2 %v12803_v46 }
 0x489   : > { %4203 = vmatmul.bf16.gmra.mxu3 %v12805_v33  ;;  %v4075_v23 = vpop.f32.mrf.mxu2 }
 0x48a   : > { %v4076_v58 = vadd.f32 %v4075_v23, %v12663_v45  ;;  %v7564_v45 = vld [vmem:[%s15044_s3 + $0x34] sm:$0xf0] }
 0x48c   : > { %v4164_v24 = vpop.f32.mrf.mxu3 }
 0x48d   : > { %v12812_v53 = vadd.f32 %v4164_v24, %v4076_v58  ;;  %v7411_v24 = vld [vmem:[%s15044_s3 + $0x1c0] sm:$0xf] }
 0x491   : > { %v4077_v5 = vpop.f32.mrf.mxu2 }
 0x492   : > { %v4078_v29 = vadd.f32 %v4077_v5, %v12688_v10 }
 0x494   : > { %v4166_v54 = vpop.f32.mrf.mxu3 }
 0x495   : > { %v12831_v38 = vadd.f32 %v4166_v54, %v4078_v29  ;;  %v12851_v54 = vor.u32 %v7615_v42, %v7411_v24  ;;  %v7558_v24 = vld [vmem:[%s15044_s3 + $0xc] sm:$0xf]  ;;  %v7197_v42 = vld [vmem:[%s15044_s3 + $0x18] sm:$0xf0] }
 0x496   : > { %4119 = vmatmul.bf16.gmra.mxu2 %v12827_v43 }
 0x497   : > { %16777 = vst [vmem:[#allocation107_spill] sm:$0xff] %v12851_v54 }
 0x499   : > { %4208 = vmatmul.bf16.gmra.mxu3 %v12829_v61  ;;  %v4080_v62 = vpop.f32.mrf.mxu2 }
 0x49a   : > { %v4081_v41 = vadd.f32 %v4080_v62, %v12681_v47  ;;  %v12853_v62 = vor.u32 %v7613_v59, %v7413_v1  ;;  %v7560_v47 = vld [vmem:[%s15044_s3 + $0x14] sm:$0xf0]  ;;  %v7200_v59 = vor.u32 %v7558_v24, %v7197_v42  ;;  %v7617_v24 = vld [vmem:[%s15044_s3 + $0x1e4] sm:$0xf]  ;;  %v7429_v42 = vld [vmem:[%s15044_s3 + $0x1f0] sm:$0xf0] }
 0x49c   : > { %v4169_v23 = vpop.f32.mrf.mxu3  ;;  %16778 = vst [vmem:[#allocation117_spill] sm:$0xff] %v12853_v62  ;;  %4677 = vmatmul.bf16.vlgmr.msrb.gmra.mxu1 %v7200_v59 }
 0x49d   : > { %v12836_v58 = vadd.f32 %v4169_v23, %v4081_v41  ;;  %v7195_v23 = vld [vmem:[%s15044_s3 + $0x8] sm:$0xf] }
 0x49e   : > { %v7196_v10 = vor.u32 %v7560_v47, %v7195_v23  ;;  %v7619_v23 = vld [vmem:[%s15044_s3 + $0x1ec] sm:$0xf0] }
 0x4a0   : > { %4588 = vmatmul.bf16.vlgmr.msrb.gmra.mxu0 %v7196_v10 }
 0x4a1   : > { %v4082_v6 = vpop.f32.mrf.mxu2 }
 0x4a2   : > { %v4083_v5 = vadd.f32 %v4082_v6, %v12686_v36  ;;  %v12889_v36 = vor.u32 %v7617_v24, %v7429_v42  ;;  %v12907_v42 = vpop.permute.xlu2 %3638 }
 0x4a3   : > { %16781 = vst [vmem:[#allocation199_spill] sm:$0xff] %v12907_v42 }
 0x4a4   : > { %v4171_v29 = vpop.f32.mrf.mxu3  ;;  %16780 = vst [vmem:[#allocation129_spill] sm:$0xff] %v12889_v36 }
 0x4a5   : > { %v12855_v41 = vadd.f32 %v4171_v29, %v4083_v5  ;;  %v7427_v29 = vld [vmem:[%s15044_s3 + $0x1e0] sm:$0xf] }
 0x4a6   : > { %4124 = vmatmul.bf16.gmra.mxu2 %v12851_v54  ;;  %v7211_v54 = vld [vmem:[%s15044_s3 + $0x28] sm:$0xf] }
 0x4a7   : > { %v7212_v61 = vor.u32 %v7564_v45, %v7211_v54 }
 0x4a9   : > { %4213 = vmatmul.bf16.gmra.mxu3 %v12853_v62  ;;  %v4085_v1 = vpop.f32.mrf.mxu2 }
 0x4aa   : > { %v4086_v6 = vadd.f32 %v4085_v1, %v12714_v37  ;;  %v12887_v37 = vor.u32 %v7619_v23, %v7427_v29  ;;  %v7562_v29 = vld [vmem:[%s15044_s3 + $0x2c] sm:$0xf]  ;;  %v7213_v23 = vld [vmem:[%s15044_s3 + $0x38] sm:$0xf0] }
 0x4ab   : > { %v7216_v24 = vor.u32 %v7562_v29, %v7213_v23  ;;  %v7227_v29 = vld [vmem:[%s15044_s3 + $0x48] sm:$0xf]  ;;  %v7568_v23 = vld [vmem:[%s15044_s3 + $0x54] sm:$0xf0] }
 0x4ac   : > { %v4174_v5 = vpop.f32.mrf.mxu3  ;;  %16779 = vst [vmem:[#allocation192_spill] sm:$0xff] %v12887_v37 }
 0x4ad   : > { %v12872_v47 = vadd.f32 %v4174_v5, %v4086_v6  ;;  %4682 = vmatmul.bf16.gmra.mxu1 %v7216_v24 }
 0x4b0   : > { %4593 = vmatmul.bf16.gmra.mxu0 %v7212_v61 }
 0x4b1   : > { %v4087_v1 = vpop.f32.mrf.mxu2 }
 0x4b2   : > { %v4088_v6 = vadd.f32 %v4087_v1, %v12711_v39 }
 0x4b4   : > { %v4176_v5 = vpop.f32.mrf.mxu3 }
 0x4b5   : > { %v12891_v62 = vadd.f32 %v4176_v5, %v4088_v6  ;;  %v12912_v5 = vpop.permute.xlu0 %3643 }
 0x4b6   : > { %4129 = vmatmul.bf16.gmra.mxu2 %v12887_v37  ;;  %16782 = vst [vmem:[#allocation205_spill] sm:$0xff] %v12912_v5 }
 0x4b9   : > { %4218 = vmatmul.bf16.gmra.mxu3 %v12889_v36  ;;  %v4090_v1 = vpop.f32.mrf.mxu2 }
 0x4ba   : > { %v4091_v45 = vadd.f32 %v4090_v1, %v12907_v42  ;;  %v7228_v1 = vor.u32 %v7568_v23, %v7227_v29 }
 0x4bc   : > { %v4179_v54 = vpop.f32.mrf.mxu3 }
 0x4bd   : > { %v12910_v6 = vadd.f32 %v4179_v54, %v4091_v45  ;;  %v7566_v45 = vld [vmem:[%s15044_s3 + $0x4c] sm:$0xf] }
 0x4c0   : > { %4598 = vmatmul.bf16.gmra.mxu0 %v7228_v1 }
 0x4c1   : > { %v4092_v39 = vpop.f32.mrf.mxu2 }
 0x4c2   : > { %v4093_v37 = vadd.f32 %v4092_v39, %v12912_v5  ;;  %v7229_v39 = vld [vmem:[%s15044_s3 + $0x58] sm:$0xf0] }
 0x4c4   : > { %v4181_v43 = vpop.f32.mrf.mxu3 }
 0x4c5   : > { %v12915_v26 = vadd.f32 %v4181_v43, %v4093_v37  ;;  %v7232_v37 = vor.u32 %v7566_v45, %v7229_v39  ;;  %v12929_v43 = vpop.permute.xlu1 %3648  ;;  %v7572_v45 = vld [vmem:[%s15044_s3 + $0x74] sm:$0xf0] }
 0x4c6   : > { %4232 = vmatmul.bf16.vlgmr.msrb.gmra.mxu2 %v7196_v10  ;;  %16783 = vst [vmem:[#allocation95_spill] sm:$0xff] %v12929_v43  ;;  %v12934_v10 = vpop.permute.xlu2 %3653 }
 0x4c7   : > { %4687 = vmatmul.bf16.gmra.mxu1 %v7232_v37  ;;  %16784 = vst [vmem:[#allocation96_spill] sm:$0xff] %v12934_v10 }
 0x4c9   : > { %4321 = vmatmul.bf16.vlgmr.msrb.gmra.mxu3 %v7200_v59  ;;  %v4095_v54 = vpop.f32.mrf.mxu2  ;;  %v7243_v59 = vld [vmem:[%s15044_s3 + $0x68] sm:$0xf] }
 0x4ca   : > { %v4096_v5 = vadd.f32 %v4095_v54, %v12929_v43  ;;  %v7244_v39 = vor.u32 %v7572_v45, %v7243_v59 }
 0x4cc   : > { %v4184_v42 = vpop.f32.mrf.mxu3 }
 0x4cd   : > { %v12932_v29 = vadd.f32 %v4184_v42, %v4096_v5  ;;  %v7570_v42 = vld [vmem:[%s15044_s3 + $0x6c] sm:$0xf]  ;;  %v7245_v5 = vld [vmem:[%s15044_s3 + $0x78] sm:$0xf0] }
 0x4d0   : > { %4603 = vmatmul.bf16.gmra.mxu0 %v7244_v39 }
 0x4d1   : > { %v4097_v23 = vpop.f32.mrf.mxu2 }
 0x4d2   : > { %v4098_v36 = vadd.f32 %v4097_v23, %v12934_v10 }
 0x4d4   : > { %v4186_v19 = vpop.f32.mrf.mxu3 }
 0x4d5   : > { %v12937_v33 = vadd.f32 %v4186_v19, %v4098_v36  ;;  %v7248_v19 = vor.u32 %v7570_v42, %v7245_v5  ;;  %v12951_v36 = vpop.permute.xlu0 %3658  ;;  %v7576_v42 = vld [vmem:[%s15044_s3 + $0x94] sm:$0xf0] }
 0x4d6   : > { %4237 = vmatmul.bf16.gmra.mxu2 %v7212_v61  ;;  %16785 = vst [vmem:[#allocation75_spill] sm:$0xff] %v12951_v36  ;;  %v12956_v61 = vpop.permute.xlu1 %3663 }
 0x4d7   : > { %4692 = vmatmul.bf16.gmra.mxu1 %v7248_v19  ;;  %16786 = vst [vmem:[#allocation37_spill] sm:$0xff] %v12956_v61 }
 0x4d9   : > { %4326 = vmatmul.bf16.gmra.mxu3 %v7216_v24  ;;  %v4100_v54 = vpop.f32.mrf.mxu2  ;;  %v7259_v24 = vld [vmem:[%s15044_s3 + $0x88] sm:$0xf] }
 0x4da   : > { %v4101_v23 = vadd.f32 %v4100_v54, %v12951_v36  ;;  %v7260_v5 = vor.u32 %v7576_v42, %v7259_v24  ;;  %v7261_v54 = vld [vmem:[%s15044_s3 + $0x98] sm:$0xf0] }
 0x4dc   : > { %v4189_v10 = vpop.f32.mrf.mxu3 }
 0x4dd   : > { %v12954_v59 = vadd.f32 %v4189_v10, %v4101_v23  ;;  %v7574_v10 = vld [vmem:[%s15044_s3 + $0x8c] sm:$0xf] }
 0x4e0   : > { %4608 = vmatmul.bf16.gmra.mxu0 %v7260_v5 }
 0x4e1   : > { %v4102_v45 = vpop.f32.mrf.mxu2 }
 0x4e2   : > { %v4103_v43 = vadd.f32 %v4102_v45, %v12956_v61 }
 0x4e4   : > { %v4191_v46 = vpop.f32.mrf.mxu3 }
 0x4e5   : > { %v12959_v15 = vadd.f32 %v4191_v46, %v4103_v43  ;;  %v7264_v46 = vor.u32 %v7574_v10, %v7261_v54  ;;  %v12973_v43 = vpop.permute.xlu2 %3668  ;;  %v7580_v10 = vld [vmem:[%s15044_s3 + $0xb4] sm:$0xf0] }
 0x4e6   : > { %4242 = vmatmul.bf16.gmra.mxu2 %v7228_v1  ;;  %16787 = vst [vmem:[#allocation54_spill] sm:$0xff] %v12973_v43  ;;  %v12978_v1 = vpop.permute.xlu0 %3673 }
 0x4e7   : > { %4697 = vmatmul.bf16.gmra.mxu1 %v7264_v46  ;;  %16788 = vst [vmem:[#allocation204_spill] sm:$0xff] %v12978_v1 }
 0x4e9   : > { %4331 = vmatmul.bf16.gmra.mxu3 %v7232_v37  ;;  %v4105_v23 = vpop.f32.mrf.mxu2  ;;  %v7275_v37 = vld [vmem:[%s15044_s3 + $0xa8] sm:$0xf] }
 0x4ea   : > { %v4106_v45 = vadd.f32 %v4105_v23, %v12973_v43  ;;  %v7276_v54 = vor.u32 %v7580_v10, %v7275_v37  ;;  %v7277_v23 = vld [vmem:[%s15044_s3 + $0xb8] sm:$0xf0] }
 0x4ec   : > { %v4194_v61 = vpop.f32.mrf.mxu3 }
 0x4ed   : > { %v12976_v24 = vadd.f32 %v4194_v61, %v4106_v45  ;;  %v7578_v61 = vld [vmem:[%s15044_s3 + $0xac] sm:$0xf] }
 0x4f0   : > { %4613 = vmatmul.bf16.gmra.mxu0 %v7276_v54 }
 0x4f1   : > { %v4107_v42 = vpop.f32.mrf.mxu2 }
 0x4f2   : > { %v4108_v36 = vadd.f32 %v4107_v42, %v12978_v1 }
 0x4f4   : > { %v4196_v20 = vpop.f32.mrf.mxu3 }
 0x4f5   : > { %v12981_v50 = vadd.f32 %v4196_v20, %v4108_v36  ;;  %v7280_v20 = vor.u32 %v7578_v61, %v7277_v23  ;;  %v12995_v36 = vpop.permute.xlu1 %3678  ;;  %v7584_v61 = vld [vmem:[%s15044_s3 + $0xd4] sm:$0xf0] }
 0x4f6   : > { %4247 = vmatmul.bf16.gmra.mxu2 %v7244_v39  ;;  %16789 = vst [vmem:[#allocation10_spill] sm:$0xff] %v12995_v36  ;;  %v13000_v39 = vpop.permute.xlu2 %3683 }
 0x4f7   : > { %4702 = vmatmul.bf16.gmra.mxu1 %v7280_v20  ;;  %16790 = vst [vmem:[#allocation113_spill] sm:$0xff] %v13000_v39 }
 0x4f9   : > { %4336 = vmatmul.bf16.gmra.mxu3 %v7248_v19  ;;  %v4110_v45 = vpop.f32.mrf.mxu2  ;;  %v7291_v19 = vld [vmem:[%s15044_s3 + $0xc8] sm:$0xf] }
 0x4fa   : > { %v4111_v42 = vadd.f32 %v4110_v45, %v12995_v36  ;;  %v7292_v23 = vor.u32 %v7584_v61, %v7291_v19  ;;  %v7293_v45 = vld [vmem:[%s15044_s3 + $0xd8] sm:$0xf0] }
 0x4fc   : > { %v4199_v1 = vpop.f32.mrf.mxu3 }
 0x4fd   : > { %v12998_v37 = vadd.f32 %v4199_v1, %v4111_v42  ;;  %v7582_v1 = vld [vmem:[%s15044_s3 + $0xcc] sm:$0xf] }
 0x500   : > { %4618 = vmatmul.bf16.gmra.mxu0 %v7292_v23 }
 0x501   : > { %v4112_v10 = vpop.f32.mrf.mxu2 }
 0x502   : > { %v4113_v43 = vadd.f32 %v4112_v10, %v13000_v39 }
 0x504   : > { %v4201_v56 = vpop.f32.mrf.mxu3 }
 0x505   : > { %v13003_v7 = vadd.f32 %v4201_v56, %v4113_v43  ;;  %v7296_v56 = vor.u32 %v7582_v1, %v7293_v45  ;;  %v13017_v43 = vpop.permute.xlu0 %3688  ;;  %v7588_v1 = vld [vmem:[%s15044_s3 + $0xf4] sm:$0xf0] }
 0x506   : > { %4252 = vmatmul.bf16.gmra.mxu2 %v7260_v5  ;;  %16791 = vst [vmem:[#allocation61_spill] sm:$0xff] %v13017_v43  ;;  %v13022_v5 = vpop.permute.xlu1 %3693 }
 0x507   : > { %4707 = vmatmul.bf16.gmra.mxu1 %v7296_v56  ;;  %16792 = vst [vmem:[#allocation27_spill] sm:$0xff] %v13022_v5 }
 0x509   : > { %4341 = vmatmul.bf16.gmra.mxu3 %v7264_v46  ;;  %v4115_v42 = vpop.f32.mrf.mxu2  ;;  %v7307_v46 = vld [vmem:[%s15044_s3 + $0xe8] sm:$0xf] }
 0x50a   : > { %v4116_v10 = vadd.f32 %v4115_v42, %v13017_v43  ;;  %v7308_v45 = vor.u32 %v7588_v1, %v7307_v46  ;;  %v7309_v42 = vld [vmem:[%s15044_s3 + $0xf8] sm:$0xf0] }
 0x50c   : > { %v4204_v39 = vpop.f32.mrf.mxu3 }
 0x50d   : > { %v13020_v19 = vadd.f32 %v4204_v39, %v4116_v10  ;;  %v7586_v39 = vld [vmem:[%s15044_s3 + $0xec] sm:$0xf] }
 0x510   : > { %4623 = vmatmul.bf16.gmra.mxu0 %v7308_v45 }
 0x511   : > { %v4117_v61 = vpop.f32.mrf.mxu2 }
 0x512   : > { %v4118_v36 = vadd.f32 %v4117_v61, %v13022_v5 }
 0x514   : > { %v4206_v34 = vpop.f32.mrf.mxu3 }
 0x515   : > { %v13025_v49 = vadd.f32 %v4206_v34, %v4118_v36  ;;  %v7312_v34 = vor.u32 %v7586_v39, %v7309_v42  ;;  %v13039_v36 = vpop.permute.xlu2 %3698  ;;  %v7592_v39 = vld [vmem:[%s15044_s3 + $0x114] sm:$0xf0] }
 0x516   : > { %4257 = vmatmul.bf16.gmra.mxu2 %v7276_v54  ;;  %16793 = vst [vmem:[#allocation188_spill] sm:$0xff] %v13039_v36  ;;  %v13044_v54 = vpop.permute.xlu0 %3703 }
 0x517   : > { %4712 = vmatmul.bf16.gmra.mxu1 %v7312_v34  ;;  %16794 = vst [vmem:[#allocation46_spill] sm:$0xff] %v13044_v54 }
 0x519   : > { %4346 = vmatmul.bf16.gmra.mxu3 %v7280_v20  ;;  %v4120_v10 = vpop.f32.mrf.mxu2  ;;  %v7323_v20 = vld [vmem:[%s15044_s3 + $0x108] sm:$0xf] }
 0x51a   : > { %v4121_v61 = vadd.f32 %v4120_v10, %v13039_v36  ;;  %v7324_v42 = vor.u32 %v7592_v39, %v7323_v20  ;;  %v7325_v10 = vld [vmem:[%s15044_s3 + $0x118] sm:$0xf0] }
 0x51c   : > { %v4209_v5 = vpop.f32.mrf.mxu3 }
 0x51d   : > { %v13042_v46 = vadd.f32 %v4209_v5, %v4121_v61  ;;  %v7590_v5 = vld [vmem:[%s15044_s3 + $0x10c] sm:$0xf] }
 0x520   : > { %4628 = vmatmul.bf16.gmra.mxu0 %v7324_v42 }
 0x521   : > { %v4122_v1 = vpop.f32.mrf.mxu2 }
 0x522   : > { %v4123_v43 = vadd.f32 %v4122_v1, %v13044_v54 }
 0x524   : > { %v4211_v3 = vpop.f32.mrf.mxu3 }
 0x525   : > { %v13047_v60 = vadd.f32 %v4211_v3, %v4123_v43  ;;  %v7328_v3 = vor.u32 %v7590_v5, %v7325_v10  ;;  %v13061_v43 = vpop.permute.xlu1 %3708  ;;  %v7596_v5 = vld [vmem:[%s15044_s3 + $0x134] sm:$0xf0]  ;;  %v13080_v10 = vpop.permute.xlu0 %3718 }
 0x526   : > { %4262 = vmatmul.bf16.gmra.mxu2 %v7292_v23  ;;  %16795 = vst [vmem:[#allocation55_spill] sm:$0xff] %v13061_v43  ;;  %v13066_v23 = vpop.permute.xlu2 %3713 }
 0x527   : > { %4717 = vmatmul.bf16.gmra.mxu1 %v7328_v3  ;;  %16796 = vst [vmem:[#allocation120_spill] sm:$0xff] %v13066_v23 }
 0x528   : > { %16797 = vst [vmem:[#allocation29_spill] sm:$0xff] %v13080_v10 }
 0x529   : > { %4351 = vmatmul.bf16.gmra.mxu3 %v7296_v56  ;;  %v4125_v61 = vpop.f32.mrf.mxu2  ;;  %v7339_v56 = vld [vmem:[%s15044_s3 + $0x128] sm:$0xf] }
 0x52a   : > { %v4126_v1 = vadd.f32 %v4125_v61, %v13061_v43 }
 0x52c   : > { %v4214_v54 = vpop.f32.mrf.mxu3 }
 0x52d   : > { %v13064_v20 = vadd.f32 %v4214_v54, %v4126_v1  ;;  %v7594_v54 = vld [vmem:[%s15044_s3 + $0x12c] sm:$0xf]  ;;  %v7340_v1 = vor.u32 %v7596_v5, %v7339_v56  ;;  %v7355_v56 = vld [vmem:[%s15044_s3 + $0x148] sm:$0xf]  ;;  %v7600_v5 = vld [vmem:[%s15044_s3 + $0x154] sm:$0xf0] }
 0x530   : > { %4633 = vmatmul.bf16.gmra.mxu0 %v7340_v1 }
 0x531   : > { %v4127_v39 = vpop.f32.mrf.mxu2 }
 0x532   : > { %v4128_v36 = vadd.f32 %v4127_v39, %v13066_v23  ;;  %v13088_v23 = vpop.permute.xlu1 %3723 }
 0x533   : > { %16799 = vst [vmem:[#allocation169_spill] sm:$0xff] %v13088_v23 }
 0x534   : > { %v4216_v48 = vpop.f32.mrf.mxu3 }
 0x535   : > { %v13069_v27 = vadd.f32 %v4216_v48, %v4128_v36  ;;  %v7341_v48 = vld [vmem:[%s15044_s3 + $0x138] sm:$0xf0] }
 0x536   : > { %4267 = vmatmul.bf16.gmra.mxu2 %v7308_v45  ;;  %v7344_v36 = vor.u32 %v7594_v54, %v7341_v48  ;;  %v7598_v54 = vld [vmem:[%s15044_s3 + $0x14c] sm:$0xf]  ;;  %v7356_v48 = vor.u32 %v7600_v5, %v7355_v56  ;;  %v7371_v56 = vld [vmem:[%s15044_s3 + $0x168] sm:$0xf] }
 0x537   : > { %v7602_v5 = vld [vmem:[%s15044_s3 + $0x16c] sm:$0xf] }
 0x538   : > { %4722 = vmatmul.bf16.gmra.mxu1 %v7344_v36 }
 0x539   : > { %4356 = vmatmul.bf16.gmra.mxu3 %v7312_v34  ;;  %v4130_v61 = vpop.f32.mrf.mxu2 }
 0x53a   : > { %v4131_v45 = vadd.f32 %v4130_v61, %v13080_v10 }
 0x53c   : > { %v4219_v34 = vpop.f32.mrf.mxu3 }
 0x53d   : > { %v13086_v39 = vadd.f32 %v4219_v34, %v4131_v45 }
 0x53f   : > { %16798 = vst [vmem:[#allocation36_spill] sm:$0xff] %v13086_v39 }
 0x540   : > { %4638 = vmatmul.bf16.gmra.mxu0 %v7356_v48 }
 0x541   : > { %v4132_v43 = vpop.f32.mrf.mxu2 }
 0x542   : > { %v4133_v18 = vadd.f32 %v4132_v43, %v13088_v23 }
 0x544   : > { %v4221_v40 = vpop.f32.mrf.mxu3 }
 0x545   : > { %v13091_v57 = vadd.f32 %v4221_v40, %v4133_v18  ;;  %v7357_v40 = vld [vmem:[%s15044_s3 + $0x158] sm:$0xf0] }
 0x546   : > { %4272 = vmatmul.bf16.gmra.mxu2 %v7324_v42 }
 0x547   : > { %16800 = vst [vmem:[#allocation158_spill] sm:$0xff] %v13091_v57 }
 0x549   : > { %4361 = vmatmul.bf16.gmra.mxu3 %v7328_v3  ;;  %v4233_v61 = vpop.f32.mrf.mxu2  ;;  %v7360_v3 = vor.u32 %v7598_v54, %v7357_v40 }
 0x54a   : > { %v4234_v18 = vadd.f32 %v4233_v61, %v12716_v28  ;;  %v7604_v28 = vld [vmem:[%s15044_s3 + $0x174] sm:$0xf0] }
 0x54b   : > { %4727 = vmatmul.bf16.gmra.mxu1 %v7360_v3  ;;  %v7372_v61 = vor.u32 %v7604_v28, %v7371_v56 }
 0x54c   : > { %v4322_v42 = vpop.f32.mrf.mxu3 }
 0x54d   : > { %v13106_v43 = vadd.f32 %v4322_v42, %v4234_v18 }
 0x550   : > { %4643 = vmatmul.bf16.gmra.mxu0 %v7372_v61 }
 0x551   : > { %v4235_v45 = vpop.f32.mrf.mxu2 }
 0x552   : > { %v4236_v34 = vadd.f32 %v4235_v45, %v12731_v31  ;;  %v7373_v31 = vld [vmem:[%s15044_s3 + $0x178] sm:$0xf0] }
 0x554   : > { %v4324_v23 = vpop.f32.mrf.mxu3 }
 0x555   : > { %v13109_v10 = vadd.f32 %v4324_v23, %v4236_v34 }
 0x556   : > { %4277 = vmatmul.bf16.gmra.mxu2 %v7340_v1 }
 0x559   : > { %4366 = vmatmul.bf16.gmra.mxu3 %v7344_v36  ;;  %v4238_v54 = vpop.f32.mrf.mxu2  ;;  %v7376_v36 = vor.u32 %v7602_v5, %v7373_v31 }
 0x55a   : > { %v4239_v23 = vadd.f32 %v4238_v54, %v12740_v22 }
 0x55b   : > { %4732 = vmatmul.bf16.gmra.mxu1 %v7376_v36 }
 0x55c   : > { %v4327_v1 = vpop.f32.mrf.mxu3 }
 0x55d   : > { %v13124_v40 = vadd.f32 %v4327_v1, %v4239_v23 }
 0x561   : > { %v4240_v18 = vpop.f32.mrf.mxu2 }
 0x562   : > { %v4241_v42 = vadd.f32 %v4240_v18, %v12757_v0 }
 0x564   : > { %v4329_v45 = vpop.f32.mrf.mxu3 }
 0x565   : > { %v13127_v34 = vadd.f32 %v4329_v45, %v4241_v42 }
 0x566   : > { %4282 = vmatmul.bf16.gmra.mxu2 %v7356_v48 }
 0x569   : > { %4371 = vmatmul.bf16.gmra.mxu3 %v7360_v3  ;;  %v4243_v56 = vpop.f32.mrf.mxu2  ;;  %v7389_v3 = vld [vmem:[%s15044_s3 + $0x198] sm:$0xf0] }
 0x56a   : > { %v4244_v28 = vadd.f32 %v4243_v56, %v12764_v11  ;;  %v7387_v11 = vld [vmem:[%s15044_s3 + $0x188] sm:$0xf] }
 0x56c   : > { %v4332_v57 = vpop.f32.mrf.mxu3 }
 0x56d   : > { %v13130_v39 = vadd.f32 %v4332_v57, %v4244_v28  ;;  %v7608_v57 = vld [vmem:[%s15044_s3 + $0x194] sm:$0xf0] }
 0x56e   : > { %v13151_v18 = vor.u32 %v7608_v57, %v7387_v11 }
 0x571   : > { %v4245_v22 = vpop.f32.mrf.mxu2 }
 0x572   : > { %v4246_v5 = vadd.f32 %v4245_v22, %v12783_v2  ;;  %v7606_v2 = vld [vmem:[%s15044_s3 + $0x18c] sm:$0xf] }
 0x573   : > { %v13153_v42 = vor.u32 %v7606_v2, %v7389_v3 }
 0x574   : > { %v4334_v54 = vpop.f32.mrf.mxu3 }
 0x575   : > { %v13133_v31 = vadd.f32 %v4334_v54, %v4246_v5  ;;  %v7612_v54 = vld [vmem:[%s15044_s3 + $0x1b4] sm:$0xf0] }
 0x576   : > { %4287 = vmatmul.bf16.gmra.mxu2 %v7372_v61 }
 0x579   : > { %4376 = vmatmul.bf16.gmra.mxu3 %v7376_v36  ;;  %v4248_v0 = vpop.f32.mrf.mxu2 }
 0x57a   : > { %v4249_v23 = vadd.f32 %v4248_v0, %v12788_v63  ;;  %v7610_v0 = vld [vmem:[%s15044_s3 + $0x1ac] sm:$0xf] }
 0x57c   : > { %v4337_v1 = vpop.f32.mrf.mxu3 }
 0x57d   : > { %v13136_v48 = vadd.f32 %v4337_v1, %v4249_v23  ;;  %v7405_v23 = vld [vmem:[%s15044_s3 + $0x1b8] sm:$0xf0] }
 0x57e   : > { %v13177_v2 = vor.u32 %v7610_v0, %v7405_v23 }
 0x580   : > { %16801 = vst [vmem:[#allocation183_spill] sm:$0xff] %v13177_v2 }
 0x581   : > { %v4250_v63 = vpop.f32.mrf.mxu2 }
 0x582   : > { %v4251_v61 = vadd.f32 %v4250_v63, %v12807_v25  ;;  %v7403_v25 = vld [vmem:[%s15044_s3 + $0x1a8] sm:$0xf] }
 0x583   : > { %v13175_v57 = vor.u32 %v7612_v54, %v7403_v25  ;;  %v7421_v25 = vld [vmem:[%s15044_s3 + $0x1d8] sm:$0xf0] }
 0x584   : > { %v4339_v36 = vpop.f32.mrf.mxu3 }
 0x585   : > { %v13155_v45 = vadd.f32 %v4339_v36, %v4251_v61 }
 0x586   : > { %4292 = vmatmul.bf16.gmra.mxu2 %v13151_v18 }
 0x589   : > { %4381 = vmatmul.bf16.gmra.mxu3 %v13153_v42  ;;  %v4253_v56 = vpop.f32.mrf.mxu2 }
 0x58a   : > { %v4254_v28 = vadd.f32 %v4253_v56, %v12812_v53 }
 0x58c   : > { %v4342_v22 = vpop.f32.mrf.mxu3 }
 0x58d   : > { %v13160_v5 = vadd.f32 %v4342_v22, %v4254_v28  ;;  %v7616_v28 = vld [vmem:[%s15044_s3 + $0x1d4] sm:$0xf0]  ;;  %v7614_v22 = vld [vmem:[%s15044_s3 + $0x1cc] sm:$0xf] }
 0x591   : > { %v4255_v53 = vpop.f32.mrf.mxu2 }
 0x592   : > { %v4256_v1 = vadd.f32 %v4255_v53, %v12831_v38  ;;  %v7419_v38 = vld [vmem:[%s15044_s3 + $0x1c8] sm:$0xf]  ;;  %v13201_v53 = vor.u32 %v7614_v22, %v7421_v25  ;;  %v7437_v22 = vld [vmem:[%s15044_s3 + $0x1f8] sm:$0xf0] }
 0x593   : > { %v13199_v23 = vor.u32 %v7616_v28, %v7419_v38  ;;  %v7620_v38 = vld [vmem:[%s15044_s3 + $0x1f4] sm:$0xf0]  ;;  %v7618_v28 = vld [vmem:[%s15044_s3 + $0x1ec] sm:$0xf] }
 0x594   : > { %v4344_v11 = vpop.f32.mrf.mxu3  ;;  %16803 = vst [vmem:[#allocation176_spill] sm:$0xff] %v13201_v53 }
 0x595   : > { %v13179_v3 = vadd.f32 %v4344_v11, %v4256_v1  ;;  %16802 = vst [vmem:[#allocation212_spill] sm:$0xff] %v13199_v23 }
 0x596   : > { %4297 = vmatmul.bf16.gmra.mxu2 %v13175_v57 }
 0x599   : > { %4386 = vmatmul.bf16.gmra.mxu3 %v13177_v2  ;;  %v4258_v63 = vpop.f32.mrf.mxu2  ;;  %v13234_v2 = vpop.permute.xlu0 %5135 }
 0x59a   : > { %v4259_v61 = vadd.f32 %v4258_v63, %v12836_v58  ;;  %16807 = vst [vmem:[#allocation152_spill] sm:$0xff] %v13234_v2 }
 0x59c   : > { %v4347_v36 = vpop.f32.mrf.mxu3 }
 0x59d   : > { %v13184_v56 = vadd.f32 %v4347_v36, %v4259_v61 }
 0x5a1   : > { %v4260_v58 = vpop.f32.mrf.mxu2 }
 0x5a2   : > { %v4261_v54 = vadd.f32 %v4260_v58, %v12855_v41  ;;  %v7435_v41 = vld [vmem:[%s15044_s3 + $0x1e8] sm:$0xf] }
 0x5a4   : > { %v4349_v0 = vpop.f32.mrf.mxu3 }
 0x5a5   : > { %v13203_v1 = vadd.f32 %v4349_v0, %v4261_v54  ;;  %v13223_v54 = vor.u32 %v7620_v38, %v7435_v41  ;;  %v13225_v0 = vor.u32 %v7618_v28, %v7437_v22  ;;  %v13238_v41 = vpop.permute.xlu1 %5140 }
 0x5a6   : > { %4302 = vmatmul.bf16.gmra.mxu2 %v13199_v23  ;;  %16808 = vst [vmem:[#allocation112_spill] sm:$0xff] %v13238_v41 }
 0x5a7   : > { %16804 = vst [vmem:[#allocation25_spill] sm:$0xff] %v13223_v54 }
 0x5a8   : > { %16805 = vst [vmem:[#allocation213_spill] sm:$0xff] %v13225_v0 }
 0x5a9   : > { %4391 = vmatmul.bf16.gmra.mxu3 %v13201_v53  ;;  %v4263_v11 = vpop.f32.mrf.mxu2 }
 0x5aa   : > { %v4264_v63 = vadd.f32 %v4263_v11, %v12872_v47 }
 0x5ac   : > { %v4352_v61 = vpop.f32.mrf.mxu3 }
 0x5ad   : > { %v13208_v36 = vadd.f32 %v4352_v61, %v4264_v63  ;;  %v13230_v63 = vpop.permute.xlu2 %5130 }
 0x5ae   : > { %16806 = vst [vmem:[#allocation179_spill] sm:$0xff] %v13230_v63 }
 0x5b1   : > { %v4265_v47 = vpop.f32.mrf.mxu2 }
 0x5b2   : > { %v4266_v25 = vadd.f32 %v4265_v47, %v12891_v62 }
 0x5b4   : > { %v4354_v58 = vpop.f32.mrf.mxu3 }
 0x5b5   : > { %v13227_v11 = vadd.f32 %v4354_v58, %v4266_v25  ;;  %v13240_v38 = vpop.permute.xlu2 %5145  ;;  %v13245_v58 = vpop.permute.xlu0 %5150 }
 0x5b6   : > { %4307 = vmatmul.bf16.gmra.mxu2 %v13223_v54  ;;  %16809 = vst [vmem:[#allocation190_spill] sm:$0xff] %v13240_v38 }
 0x5b7   : > { %16810 = vst [vmem:[#allocation165_spill] sm:$0xff] %v13245_v58 }
 0x5b9   : > { %4396 = vmatmul.bf16.gmra.mxu3 %v13225_v0  ;;  %v4268_v61 = vpop.f32.mrf.mxu2 }
 0x5ba   : > { %v4269_v53 = vadd.f32 %v4268_v61, %v12910_v6  ;;  %v13248_v6 = vpop.permute.xlu1 %5155 }
 0x5bb   : > { %16811 = vst [vmem:[#allocation30_spill] sm:$0xff] %v13248_v6 }
 0x5bc   : > { %v4357_v23 = vpop.f32.mrf.mxu3 }
 0x5bd   : > { %v13236_v62 = vadd.f32 %v4357_v23, %v4269_v53  ;;  %v13252_v2 = vpop.permute.xlu2 %5160 }
 0x5be   : > { %16812 = vst [vmem:[#allocation167_spill] sm:$0xff] %v13252_v2 }
 0x5c1   : > { %v4270_v28 = vpop.f32.mrf.mxu2 }
 0x5c2   : > { %v4271_v22 = vadd.f32 %v4270_v28, %v12915_v26  ;;  %v13256_v26 = vpop.permute.xlu0 %5165  ;;  %v13258_v28 = vpop.permute.xlu1 %5170 }
 0x5c3   : > { %16813 = vst [vmem:[#allocation186_spill] sm:$0xff] %v13256_v26  ;;  %v4842_v26 = vmul.f32 %v13130_v39, %v13130_v39 }
 0x5c4   : > { %v4359_v47 = vpop.f32.mrf.mxu3  ;;  %16814 = vst [vmem:[#allocation118_spill] sm:$0xff] %v13258_v28 }
 0x5c5   : > { %v13243_v25 = vadd.f32 %v4359_v47, %v4271_v22  ;;  %v13263_v0 = vpop.permute.xlu2 %5175 }
 0x5c6   : > { %4410 = vmatmul.bf16.vlgmr.msra.gmra.mxu2 %v12184_v51  ;;  %16815 = vst [vmem:[#allocation172_spill] sm:$0xff] %v13263_v0 }
 0x5c9   : > { %4499 = vmatmul.bf16.vlgmr.msra.gmra.mxu3 %v12191_v9  ;;  %v4273_v23 = vpop.f32.mrf.mxu2 }
 0x5ca   : > { %v4274_v53 = vadd.f32 %v4273_v23, %v12932_v29  ;;  %v13267_v9 = vpop.permute.xlu0 %5180 }
 0x5cb   : > { %16816 = vst [vmem:[#allocation156_spill] sm:$0xff] %v13267_v9 }
 0x5cc   : > { %v4362_v61 = vpop.f32.mrf.mxu3 }
 0x5cd   : > { %v13254_v63 = vadd.f32 %v4362_v61, %v4274_v53  ;;  %v13270_v61 = vpop.permute.xlu1 %5185 }
 0x5ce   : > { %16817 = vst [vmem:[#allocation168_spill] sm:$0xff] %v13270_v61 }
 0x5d1   : > { %v4275_v22 = vpop.f32.mrf.mxu2 }
 0x5d2   : > { %v4276_v47 = vadd.f32 %v4275_v22, %v12937_v33  ;;  %v13274_v33 = vpop.permute.xlu2 %5190  ;;  %v13277_v6 = vpop.permute.xlu0 %5195 }
 0x5d3   : > { %16818 = vst [vmem:[#allocation104_spill] sm:$0xff] %v13274_v33 }
 0x5d4   : > { %v4364_v51 = vpop.f32.mrf.mxu3  ;;  %16819 = vst [vmem:[#allocation79_spill] sm:$0xff] %v13277_v6 }
 0x5d5   : > { %v13261_v38 = vadd.f32 %v4364_v51, %v4276_v47 }
 0x5d6   : > { %4415 = vmatmul.bf16.gmra.mxu2 %v12302_v4 }
 0x5d9   : > { %4504 = vmatmul.bf16.gmra.mxu3 %v12304_v21  ;;  %v4278_v29 = vpop.f32.mrf.mxu2  ;;  %v13281_v21 = vpop.permute.xlu1 %5200 }
 0x5da   : > { %v4279_v23 = vadd.f32 %v4278_v29, %v12954_v59  ;;  %16820 = vst [vmem:[#allocation11_spill] sm:$0xff] %v13281_v21  ;;  %v13285_v59 = vpop.permute.xlu2 %5205 }
 0x5db   : > { %16821 = vst [vmem:[#allocation175_spill] sm:$0xff] %v13285_v59 }
 0x5dc   : > { %v4367_v53 = vpop.f32.mrf.mxu3 }
 0x5dd   : > { %v13272_v41 = vadd.f32 %v4367_v53, %v4279_v23 }
 0x5e1   : > { %v4280_v22 = vpop.f32.mrf.mxu2 }
 0x5e2   : > { %v4281_v47 = vadd.f32 %v4280_v22, %v12959_v15  ;;  %v13290_v15 = vpop.permute.xlu0 %5210  ;;  %v13292_v22 = vpop.permute.xlu1 %5215 }
 0x5e3   : > { %16822 = vst [vmem:[#allocation78_spill] sm:$0xff] %v13290_v15 }
 0x5e4   : > { %v4369_v51 = vpop.f32.mrf.mxu3  ;;  %16823 = vst [vmem:[#allocation64_spill] sm:$0xff] %v13292_v22  ;;  %v4840_v22 = vmul.f32 %v13127_v34, %v13127_v34 }
 0x5e5   : > { %v13279_v4 = vadd.f32 %v4369_v51, %v4281_v47  ;;  %v4836_v47 = vmul.f32 %v13109_v10, %v13109_v10 }
 0x5e6   : > { %4420 = vmatmul.bf16.gmra.mxu2 %v12400_v30  ;;  %v4834_v30 = vmul.f32 %v13106_v43, %v13106_v43 }
 0x5e7   : > { %v4872_v33 = vmul.f32 %v13279_v4, %v13279_v4 }
 0x5e9   : > { %4509 = vmatmul.bf16.gmra.mxu3 %v12402_v16  ;;  %v4283_v29 = vpop.f32.mrf.mxu2  ;;  %v4838_v16 = vmul.f32 %v13124_v40, %v13124_v40 }
 0x5ea   : > { %v4284_v23 = vadd.f32 %v4283_v29, %v12976_v24  ;;  %v4758_v24 = vadd.f32 %v13109_v10, %v13106_v43  ;;  %v13315_v0 = vpop.permute.xlu0 %5225 }
 0x5eb   : > { %16825 = vst [vmem:[#allocation65_spill] sm:$0xff] %v13315_v0 }
 0x5ec   : > { %v4372_v53 = vpop.f32.mrf.mxu3  ;;  %v4759_v15 = vadd.f32 %v4758_v24, %v13124_v40  ;;  %v4846_v24 = vmul.f32 %v13136_v48, %v13136_v48 }
 0x5ed   : > { %v13288_v58 = vadd.f32 %v4372_v53, %v4284_v23  ;;  %v13306_v23 = vpop.permute.xlu2 %5220  ;;  %v4898_v53 = vadd.f32 %v4836_v47, %v4834_v30  ;;  %v13321_v30 = vpop.permute.xlu1 %5230 }
 0x5ee   : > { %16824 = vst [vmem:[#allocation209_spill] sm:$0xff] %v13306_v23  ;;  %v4760_v2 = vadd.f32 %v4759_v15, %v13127_v34  ;;  %v4844_v23 = vmul.f32 %v13133_v31, %v13133_v31 }
 0x5ef   : > { %v4899_v54 = vadd.f32 %v4898_v53, %v4838_v16  ;;  %16826 = vst [vmem:[#allocation147_spill] sm:$0xff] %v13321_v30 }
 0x5f0   : > { %v4761_v47 = vadd.f32 %v4760_v2, %v13130_v39 }
 0x5f1   : > { %v13300_v51 = vpop.f32.mrf.mxu2  ;;  %v4900_v28 = vadd.f32 %v4899_v54, %v4840_v22  ;;  %v4848_v54 = vmul.f32 %v13155_v45, %v13155_v45 }
 0x5f2   : > { %v4762_v15 = vadd.f32 %v4761_v47, %v13133_v31  ;;  %v4852_v47 = vmul.f32 %v13179_v3, %v13179_v3 }
 0x5f3   : > { %v4901_v16 = vadd.f32 %v4900_v28, %v4842_v26  ;;  %v4850_v26 = vmul.f32 %v13160_v5, %v13160_v5 }
 0x5f4   : > { %v13304_v29 = vpop.f32.mrf.mxu3  ;;  %v4763_v22 = vadd.f32 %v4762_v15, %v13136_v48  ;;  %v4854_v15 = vmul.f32 %v13184_v56, %v13184_v56 }
 0x5f5   : > { %v4902_v0 = vadd.f32 %v4901_v16, %v4844_v23  ;;  %v13339_v23 = vpop.permute.xlu0 %5240 }
 0x5f6   : > { %4425 = vmatmul.bf16.gmra.mxu2 %v12493_v17  ;;  %v4764_v28 = vadd.f32 %v4763_v22, %v13155_v45  ;;  %16828 = vst [vmem:[#allocation80_spill] sm:$0xff] %v13339_v23 }
 0x5f7   : > { %v4903_v2 = vadd.f32 %v4902_v0, %v4846_v24 }
 0x5f8   : > { %v4765_v61 = vadd.f32 %v4764_v28, %v13160_v5  ;;  %v4858_v28 = vmul.f32 %v13208_v36, %v13208_v36 }
 0x5f9   : > { %4514 = vmatmul.bf16.gmra.mxu3 %v12495_v52  ;;  %v4288_v53 = vpop.f32.mrf.mxu2  ;;  %v13331_v52 = vpop.permute.xlu2 %5235  ;;  %v4904_v30 = vadd.f32 %v4903_v2, %v4848_v54  ;;  %v4856_v54 = vmul.f32 %v13203_v1, %v13203_v1 }
 0x5fa   : > { %16827 = vst [vmem:[#allocation6_spill] sm:$0xff] %v13331_v52  ;;  %v4766_v0 = vadd.f32 %v4765_v61, %v13179_v3  ;;  %v13344_v52 = vpop.permute.xlu1 %5245 }
 0x5fb   : > { %v4905_v16 = vadd.f32 %v4904_v30, %v4850_v26  ;;  %16829 = vst [vmem:[#allocation43_spill] sm:$0xff] %v13344_v52  ;;  %v4860_v52 = vmul.f32 %v13227_v11, %v13227_v11 }
 0x5fc   : > { %v13326_v17 = vpop.f32.mrf.mxu3  ;;  %v4767_v22 = vadd.f32 %v4766_v0, %v13184_v56 }
 0x5fd   : > { %v4906_v6 = vadd.f32 %v4905_v16, %v4852_v47  ;;  %v13362_v23 = vpop.permute.xlu0 %5255 }
 0x5fe   : > { %v4768_v30 = vadd.f32 %v4767_v22, %v13203_v1  ;;  %16831 = vst [vmem:[#allocation47_spill] sm:$0xff] %v13362_v23 }
 0x5ff   : > { %v4907_v2 = vadd.f32 %v4906_v6, %v4854_v15  ;;  %v4862_v6 = vmul.f32 %v13236_v62, %v13236_v62 }
 0x600   : > { %v4769_v47 = vadd.f32 %v4768_v30, %v13208_v36 }
 0x601   : > { %v4290_v9 = vpop.f32.mrf.mxu2  ;;  %v13353_v26 = vpop.permute.xlu2 %5250  ;;  %v4908_v61 = vadd.f32 %v4907_v2, %v4856_v54  ;;  %v4864_v54 = vmul.f32 %v13243_v25, %v13243_v25 }
 0x602   : > { %16830 = vst [vmem:[#allocation49_spill] sm:$0xff] %v13353_v26  ;;  %v4770_v0 = vadd.f32 %v4769_v47, %v13227_v11  ;;  %v13367_v26 = vpop.permute.xlu1 %5260  ;;  %v4868_v47 = vmul.f32 %v13261_v38, %v13261_v38 }
 0x603   : > { %v4909_v16 = vadd.f32 %v4908_v61, %v4858_v28  ;;  %16832 = vst [vmem:[#allocation151_spill] sm:$0xff] %v13367_v26  ;;  %v4866_v28 = vmul.f32 %v13254_v63, %v13254_v63 }
 0x604   : > { %v4379_v24 = vpop.f32.mrf.mxu3  ;;  %v4771_v2 = vadd.f32 %v4770_v0, %v13236_v62 }
 0x606   : > { %4430 = vmatmul.bf16.gmra.mxu2 %v12534_v13  ;;  %v4910_v13 = vadd.f32 %v4909_v16, %v4860_v52  ;;  %v4772_v30 = vadd.f32 %v4771_v2, %v13243_v25  ;;  %v4286_v52 = vadd.f32 %v13300_v51, %v12981_v50  ;;  %v4289_v2 = vadd.f32 %v4288_v53, %v12998_v37 }
 0x607   : > { %v4291_v51 = vadd.f32 %v4290_v9, %v13003_v7 }
 0x608   : > { %v4773_v23 = vadd.f32 %v4772_v30, %v13254_v63  ;;  %v13387_v50 = vadd.f32 %v13304_v29, %v4286_v52  ;;  %v13396_v53 = vadd.f32 %v13326_v17, %v4289_v2 }
 0x609   : > { %4519 = vmatmul.bf16.gmra.mxu3 %v12536_v44  ;;  %v4293_v15 = vpop.f32.mrf.mxu2  ;;  %v4911_v44 = vadd.f32 %v4910_v13, %v4862_v6  ;;  %v13377_v16 = vpop.permute.xlu2 %5265  ;;  %v4870_v6 = vmul.f32 %v13272_v41, %v13272_v41  ;;  %v13406_v52 = vadd.f32 %v4379_v24, %v4291_v51 }
 0x60a   : > { %16833 = vst [vmem:[#allocation85_spill] sm:$0xff] %v13377_v16  ;;  %v4774_v26 = vadd.f32 %v4773_v23, %v13261_v38  ;;  %v4874_v23 = vmul.f32 %v13288_v58, %v13288_v58  ;;  %v4876_v9 = vmul.f32 %v13387_v50, %v13387_v50 }
 0x60b   : > { %v4912_v61 = vadd.f32 %v4911_v44, %v4864_v54 }
 0x60c   : > { %v4382_v22 = vpop.f32.mrf.mxu3  ;;  %v4775_v30 = vadd.f32 %v4774_v26, %v13272_v41  ;;  %v13400_v26 = vpop.permute.xlu1 %5275 }
 0x60d   : > { %v4913_v0 = vadd.f32 %v4912_v61, %v4866_v28  ;;  %v13390_v28 = vpop.permute.xlu0 %5270  ;;  %16835 = vst [vmem:[#allocation26_spill] sm:$0xff] %v13400_v26 }
 0x60e   : > { %16834 = vst [vmem:[#allocation153_spill] sm:$0xff] %v13390_v28  ;;  %v4776_v37 = vadd.f32 %v4775_v30, %v13279_v4 }
 0x60f   : > { %v4914_v44 = vadd.f32 %v4913_v0, %v4868_v47  ;;  %v4294_v47 = vadd.f32 %v4293_v15, %v13020_v19 }
 0x610   : > { %v4777_v7 = vadd.f32 %v4776_v37, %v13288_v58 }
 0x611   : > { %v4295_v13 = vpop.f32.mrf.mxu2  ;;  %v4915_v61 = vadd.f32 %v4914_v44, %v4870_v6  ;;  %v13412_v15 = vadd.f32 %v4382_v22, %v4294_v47  ;;  %v13415_v2 = vpop.permute.xlu2 %5280 }
 0x612   : > { %v4296_v0 = vadd.f32 %v4295_v13, %v13025_v49  ;;  %v4778_v19 = vadd.f32 %v4777_v7, %v13387_v50  ;;  %16836 = vst [vmem:[#allocation135_spill] sm:$0xff] %v13415_v2  ;;  %v4880_v49 = vmul.f32 %v13406_v52, %v13406_v52 }
 0x613   : > { %v4916_v29 = vadd.f32 %v4915_v61, %v4872_v33  ;;  %v4882_v22 = vmul.f32 %v13412_v15, %v13412_v15 }
 0x614   : > { %v4384_v54 = vpop.f32.mrf.mxu3  ;;  %v4779_v24 = vadd.f32 %v4778_v19, %v13396_v53 }
 0x615   : > { %v4917_v17 = vadd.f32 %v4916_v29, %v4874_v23  ;;  %v13420_v13 = vadd.f32 %v4384_v54, %v4296_v0  ;;  %v13432_v29 = vpop.permute.xlu1 %5354 }
 0x616   : > { %4435 = vmatmul.bf16.gmra.mxu2 %v12570_v55  ;;  %v4878_v55 = vmul.f32 %v13396_v53, %v13396_v53  ;;  %v4780_v51 = vadd.f32 %v4779_v24, %v13406_v52  ;;  %16838 = vst [vmem:[#allocation15_spill] sm:$0xff] %v13432_v29  ;;  %v16853_v29 = vld [vmem:[#allocation166_spill] sm:$0xff] }
 0x617   : > { %v4918_v44 = vadd.f32 %v4917_v17, %v4876_v9  ;;  %v4884_v47 = vmul.f32 %v13420_v13, %v13420_v13 }
 0x618   : > { %v4781_v37 = vadd.f32 %v4780_v51, %v13412_v15 }
 0x619   : > { %4524 = vmatmul.bf16.gmra.mxu3 %v12572_v8  ;;  %v4298_v6 = vpop.f32.mrf.mxu2  ;;  %v4919_v30 = vadd.f32 %v4918_v44, %v4878_v55 }
 0x61a   : > { %v4299_v8 = vadd.f32 %v4298_v6, %v13042_v46  ;;  %v13427_v46 = vpop.permute.xlu0 %5285  ;;  %v4782_v9 = vadd.f32 %v4781_v37, %v13420_v13 }
 0x61b   : > { %16837 = vst [vmem:[#allocation13_spill] sm:$0xff] %v13427_v46  ;;  %v4920_v23 = vadd.f32 %v4919_v30, %v4880_v49 }
 0x61c   : > { %v4387_v33 = vpop.f32.mrf.mxu3 }
 0x61d   : > { %v13425_v61 = vadd.f32 %v4387_v33, %v4299_v8  ;;  %v4921_v7 = vadd.f32 %v4920_v23, %v4882_v22  ;;  %v13441_v33 = vpop.permute.xlu2 %5359  ;;  %v13451_v37 = vpop.permute.xlu1 %5369 }
 0x61e   : > { %16839 = vst [vmem:[#allocation7_spill] sm:$0xff] %v13441_v33 }
 0x61f   : > { %v4886_v0 = vmul.f32 %v13425_v61, %v13425_v61  ;;  %v4922_v19 = vadd.f32 %v4921_v7, %v4884_v47  ;;  %v4783_v55 = vadd.f32 %v4782_v9, %v13425_v61  ;;  %16841 = vst [vmem:[#allocation130_spill] sm:$0xff] %v13451_v37 }
 0x621   : > { %v4300_v54 = vpop.f32.mrf.mxu2  ;;  %v4923_v44 = vadd.f32 %v4922_v19, %v4886_v0 }
 0x622   : > { %v4301_v17 = vadd.f32 %v4300_v54, %v13047_v60  ;;  %v13448_v60 = vpop.permute.xlu0 %5364 }
 0x623   : > { %16840 = vst [vmem:[#allocation178_spill] sm:$0xff] %v13448_v60 }
 0x624   : > { %v4389_v6 = vpop.f32.mrf.mxu3 }
 0x625   : > { %v13439_v8 = vadd.f32 %v4389_v6, %v4301_v17  ;;  %v13458_v9 = vpop.permute.xlu2 %5374  ;;  %v13465_v19 = vpop.permute.xlu1 %5384 }
 0x626   : > { %4440 = vmatmul.bf16.gmra.mxu2 %v12612_v32  ;;  %16842 = vst [vmem:[#allocation148_spill] sm:$0xff] %v13458_v9 }
 0x627   : > { %v4784_v24 = vadd.f32 %v4783_v55, %v13439_v8  ;;  %v4888_v49 = vmul.f32 %v13439_v8, %v13439_v8  ;;  %16844 = vst [vmem:[#allocation139_spill] sm:$0xff] %v13465_v19  ;;  %v4589_v19 = vpop.f32.mrf.mxu0 }
 0x629   : > { %4529 = vmatmul.bf16.gmra.mxu3 %v12614_v14  ;;  %v4924_v30 = vadd.f32 %v4923_v44, %v4888_v49  ;;  %v4303_v51 = vpop.f32.mrf.mxu2 }
 0x62a   : > { %v4304_v22 = vadd.f32 %v4303_v51, %v13064_v20  ;;  %v13461_v6 = vpop.permute.xlu0 %5379 }
 0x62b   : > { %16843 = vst [vmem:[#allocation174_spill] sm:$0xff] %v13461_v6 }
 0x62c   : > { %v4392_v23 = vpop.f32.mrf.mxu3 }
 0x62d   : > { %v13453_v47 = vadd.f32 %v4392_v23, %v4304_v22  ;;  %v13472_v49 = vpop.permute.xlu2 %5389 }
 0x62e   : > { %16845 = vst [vmem:[#allocation98_spill] sm:$0xff] %v13472_v49 }
 0x62f   : > { %v4785_v54 = vadd.f32 %v4784_v24, %v13453_v47  ;;  %v4890_v7 = vmul.f32 %v13453_v47, %v13453_v47 }
 0x631   : > { %v4925_v32 = vadd.f32 %v4924_v30, %v4890_v7  ;;  %v4305_v14 = vpop.f32.mrf.mxu2  ;;  %v16846_v30 = vld [vmem:[#allocation36_spill] sm:$0xff] }
 0x632   : > { %v4306_v0 = vadd.f32 %v4305_v14, %v13069_v27  ;;  %v13477_v7 = vpop.permute.xlu0 %5394 }
 0x633   : > { %16847 = vst [vmem:[#allocation14_spill] sm:$0xff] %v13477_v7 }
 0x634   : > { %v4394_v17 = vpop.f32.mrf.mxu3 }
 0x635   : > { %v13463_v20 = vadd.f32 %v4394_v17, %v4306_v0  ;;  %v13482_v0 = vpop.permute.xlu1 %5399 }
 0x636   : > { %4445 = vmatmul.bf16.gmra.mxu2 %v12654_v35  ;;  %16848 = vst [vmem:[#allocation45_spill] sm:$0xff] %v13482_v0 }
 0x637   : > { %v4786_v55 = vadd.f32 %v4785_v54, %v13463_v20  ;;  %v4892_v44 = vmul.f32 %v13463_v20, %v13463_v20 }
 0x639   : > { %4534 = vmatmul.bf16.gmra.mxu3 %v12656_v12  ;;  %v4926_v24 = vadd.f32 %v4925_v32, %v4892_v44  ;;  %v4308_v27 = vpop.f32.mrf.mxu2  ;;  %v16849_v32 = vld [vmem:[#allocation158_spill] sm:$0xff]  ;;  %v13485_v44 = vpop.permute.xlu2 %5404 }
 0x63a   : > { %v4309_v51 = vadd.f32 %v4308_v27, %v16846_v30  ;;  %16850 = vst [vmem:[#allocation144_spill] sm:$0xff] %v13485_v44 }
 0x63c   : > { %v4397_v22 = vpop.f32.mrf.mxu3 }
 0x63d   : > { %v13475_v23 = vadd.f32 %v4397_v22, %v4309_v51  ;;  %v13493_v22 = vpop.permute.xlu0 %5409  ;;  %v13496_v37 = vpop.permute.xlu1 %5414 }
 0x63e   : > { %16852 = vst [vmem:[#allocation94_spill] sm:$0xff] %v13493_v22 }
 0x63f   : > { %v4787_v54 = vadd.f32 %v4786_v55, %v13475_v23  ;;  %v4894_v14 = vmul.f32 %v13475_v23, %v13475_v23  ;;  %v16851_v55 = vld [vmem:[#allocation180_spill] sm:$0xff]  ;;  %16854 = vst [vmem:[#allocation51_spill] sm:$0xff] %v13496_v37 }
 0x641   : > { %v4927_v35 = vadd.f32 %v4926_v24, %v4894_v14  ;;  %v4310_v12 = vpop.f32.mrf.mxu2 }
 0x642   : > { %v4311_v17 = vadd.f32 %v4310_v12, %v16849_v32 }
 0x644   : > { %v4399_v33 = vpop.f32.mrf.mxu3 }
 0x645   : > { %v13487_v27 = vadd.f32 %v4399_v33, %v4311_v17  ;;  %v13498_v17 = vpop.permute.xlu2 %5419 }
 0x646   : > { %4450 = vmatmul.bf16.gmra.mxu2 %v16851_v55  ;;  %16855 = vst [vmem:[#allocation146_spill] sm:$0xff] %v13498_v17  ;;  %v13500_v55 = vpop.permute.xlu0 %5424 }
 0x647   : > { %v4788_v30 = vadd.f32 %v4787_v54, %v13487_v27  ;;  %v4896_v51 = vmul.f32 %v13487_v27, %v13487_v27  ;;  %16856 = vst [vmem:[#allocation88_spill] sm:$0xff] %v13500_v55 }
 0x649   : > { %4539 = vmatmul.bf16.gmra.mxu3 %v16853_v29  ;;  %v4789_v24 = vrot.slane %v4788_v30, 4  ;;  %v4928_v14 = vadd.f32 %v4927_v35, %v4896_v51  ;;  %v13502_v29 = vpop.permute.xlu1 %5429 }
 0x64a   : > { %16857 = vst [vmem:[#allocation149_spill] sm:$0xff] %v13502_v29 }
 0x64b   : > { %v4790_v12 = vadd.f32 %v4789_v24, %v4788_v30  ;;  %v4929_v32 = vrot.slane %v4928_v14, 4 }
 0x64d   : > { %v4791_v60 = vrot.slane %v4790_v12, 2  ;;  %v4930_v33 = vadd.f32 %v4929_v32, %v4928_v14  ;;  %v16858_v14 = vld [vmem:[#allocation18_spill] sm:$0xff]  ;;  %v4678_v32 = vpop.f32.mrf.mxu1 }
 0x64f   : > { %v4792_v54 = vadd.f32 %v4791_v60, %v4790_v12  ;;  %v4931_v6 = vrot.slane %v4930_v33, 2  ;;  %v16860_v12 = vld [vmem:[#allocation171_spill] sm:$0xff] }
 0x651   : > { %v4793_v9 = vrot.slane %v4792_v54, 1  ;;  %v4932_v49 = vadd.f32 %v4931_v6, %v4930_v33  ;;  %v13511_v6 = vpop.permute.xlu2 %5434  ;;  %v4411_v33 = vpop.f32.mrf.mxu2 }
 0x652   : > { %16859 = vst [vmem:[#allocation97_spill] sm:$0xff] %v13511_v6 }
 0x653   : > { %v4794_v0 = vadd.f32 %v4793_v9, %v4792_v54  ;;  %v4933_v7 = vrot.slane %v4932_v49, 1  ;;  %v4500_v54 = vpop.f32.mrf.mxu3 }
 0x655   : > { %v13504_v35 = vmul.f32 0.005, %v4794_v0  ;;  %v4934_v51 = vadd.f32 %v4933_v7, %v4932_v49  ;;  %v4591_v0 = vpop.f32.mrf.mxu0  ;;  %4648 = vmatmul.bf16.gmra.mxu0 %v13151_v18  ;;  %v13515_v7 = vpop.permute.xlu0 %5439 }
 0x656   : > { %4455 = vmatmul.bf16.gmra.mxu2 %v16858_v14  ;;  %16861 = vst [vmem:[#allocation132_spill] sm:$0xff] %v13515_v7  ;;  %v4680_v7 = vpop.f32.mrf.mxu1  ;;  %4737 = vmatmul.bf16.gmra.mxu1 %v13153_v42  ;;  %v16864_v14 = vld [vmem:[#allocation102_spill] sm:$0xff] }
 0x657   : > { %v4972_v30 = vmul.f32 0.005, %v4934_v51  ;;  %v4974_v24 = vmul.f32 %v13504_v35, %v13504_v35  ;;  %v13517_v51 = vpop.permute.xlu1 %5444  ;;  %v5000_v18 = vsub.f32 %v13106_v43, %v13504_v35  ;;  %v5004_v42 = vsub.f32 %v13124_v40, %v13504_v35 }
 0x658   : > { %16862 = vst [vmem:[#allocation91_spill] sm:$0xff] %v13517_v51  ;;  %v5010_v43 = vsub.f32 %v13133_v31, %v13504_v35  ;;  %v5014_v40 = vsub.f32 %v13155_v45, %v13504_v35  ;;  %v16871_v31 = vld [vmem:[#allocation52_spill] sm:$0xff]  ;;  %v5022_v45 = vsub.f32 %v13203_v1, %v13504_v35  ;;  %v5030_v1 = vsub.f32 %v13243_v25, %v13504_v35 }
 0x659   : > { %4544 = vmatmul.bf16.gmra.mxu3 %v16860_v12  ;;  %v4976_v9 = vsub.f32 %v4972_v30, %v4974_v24  ;;  %v16863_v12 = vld [vmem:[#allocation41_spill] sm:$0xff]  ;;  %v4413_v6 = vpop.f32.mrf.mxu2  ;;  %v13532_v26 = vpop.permute.xlu2 %5449  ;;  %v5042_v25 = vsub.f32 %v13387_v50, %v13504_v35 }
 0x65a   : > { %v4414_v16 = vadd.f32 %v4413_v6, %v16864_v14  ;;  %16865 = vst [vmem:[#allocation145_spill] sm:$0xff] %v13532_v26  ;;  %v5006_v14 = vsub.f32 %v13127_v34, %v13504_v35 }
 0x65b   : > { %v4978_v49 = vadd.f32 1e-05, %v4976_v9  ;;  %v4412_v9 = vadd.f32 %v4411_v33, %v16863_v12  ;;  %v4502_v22 = vpop.f32.mrf.mxu3  ;;  %v5002_v33 = vsub.f32 %v13109_v10, %v13504_v35  ;;  %v5012_v10 = vsub.f32 %v13136_v48, %v13504_v35 }
 0x65c   : > { %v4503_v24 = vadd.f32 %v4502_v22, %v4414_v16  ;;  %v5008_v16 = vsub.f32 %v13130_v39, %v13504_v35  ;;  %v5018_v39 = vsub.f32 %v13179_v3, %v13504_v35  ;;  %v5020_v48 = vsub.f32 %v13184_v56, %v13504_v35 }
 0x65d   : > { %7700 = vrsqrt.f32 %v4978_v49  ;;  %v4501_v51 = vadd.f32 %v4500_v54, %v4412_v9  ;;  %v4594_v60 = vpop.f32.mrf.mxu0  ;;  %v13540_v54 = vpop.permute.xlu0 %5454  ;;  %vm4986_vm8 = vweird.f32 %v4978_v49 }
 0x65e   : > { %16866 = vst [vmem:[#allocation44_spill] sm:$0xff] %v13540_v54  ;;  %v4592_v9 = vadd.f32 %v4591_v0, %v4503_v24  ;;  %v5024_v0 = vsub.f32 %v13208_v36, %v13504_v35  ;;  %v16872_v24 = vld [vmem:[#allocation31_spill] sm:$0xff]  ;;  %v5032_v36 = vsub.f32 %v13254_v63, %v13504_v35  ;;  %v5044_v63 = vsub.f32 %v13396_v53, %v13504_v35 }
 0x65f   : > { %v4590_v28 = vadd.f32 %v4589_v19, %v4501_v51  ;;  %v16868_v19 = vld [vmem:[#allocation69_spill] sm:$0xff]  ;;  %v13555_v22 = vpop.permute.xlu1 %5459  ;;  %v5026_v51 = vsub.f32 %v13227_v11, %v13504_v35  ;;  %v5034_v11 = vsub.f32 %v13261_v38, %v13504_v35  ;;  %v5046_v38 = vsub.f32 %v13406_v52, %v13504_v35 }
 0x660   : > { %16869 = vst [vmem:[#allocation150_spill] sm:$0xff] %v13555_v22 }
 0x661   : > { %v13544_v12 = vadd.f32 %v4678_v32, %v4590_v28  ;;  %v5016_v28 = vsub.f32 %v13160_v5, %v13504_v35  ;;  %v13561_v32 = vadd.f32 %v4680_v7, %v4592_v9  ;;  %v13572_v5 = vpop.f32.mrf.mxu1  ;;  %v5028_v7 = vsub.f32 %v13236_v62, %v13504_v35 }
 0x663   : > { %v7701_v44 = vpop.eup %7700  ;;  %16867 = vst [vmem:[#allocation38_spill] sm:$0xff] %v13544_v12  ;;  %v4505_v56 = vpop.f32.mrf.mxu3 }
 0x664   : > { %v4981_v30 = vmul.f32 %v7701_v44, %v4978_v49  ;;  %16870 = vst [vmem:[#allocation100_spill] sm:$0xff] %v13561_v32  ;;  %vm4987_vm7 = vweird.f32 %v7701_v44 }
 0x665   : > { %v13577_v9 = vpop.f32.mrf.mxu0  ;;  %4653 = vmatmul.bf16.gmra.mxu0 %v13175_v57  ;;  %vm4988_vm9 = vmor %vm4986_vm8, %vm4987_vm7  ;;  %v5040_v57 = vsub.f32 %v13288_v58, %v13504_v35  ;;  %v16874_v58 = vsub.f32 %v13487_v27, %v13504_v35  ;;  %v13613_v52 = vpop.permute.xlu0 %5504 }
 0x666   : > { %v4982_v6 = vmul.f32 %v7701_v44, %v4981_v30  ;;  %4460 = vmatmul.bf16.gmra.mxu2 %v16868_v19  ;;  %v4416_v30 = vpop.f32.mrf.mxu2  ;;  %v5036_v19 = vsub.f32 %v13272_v41, %v13504_v35  ;;  %v13598_v41 = vpop.permute.xlu2 %5464  ;;  %16876 = vst [vmem:[#allocation155_spill] sm:$0xff] %v13613_v52 }
 0x667   : > { %16873 = vst [vmem:[#allocation154_spill] sm:$0xff] %v13598_v41  ;;  %v13635_v32 = vpop.permute.xlu1 %5509 }
 0x668   : > { %v4983_v34 = vmul.f32 0.5, %v4982_v6  ;;  %v4417_v6 = vadd.f32 %v4416_v30, %v16872_v24  ;;  %v5050_v30 = vsub.f32 %v13420_v13, %v13504_v35  ;;  %16878 = vst [vmem:[#allocation103_spill] sm:$0xff] %v13635_v32 }
 0x669   : > { %4549 = vmatmul.bf16.gmra.mxu3 %v16871_v31 }
 0x66a   : > { %v4984_v3 = vsub.f32 1.5, %v4983_v34  ;;  %v5038_v34 = vsub.f32 %v13279_v4, %v13504_v35  ;;  %v4506_v31 = vadd.f32 %v4505_v56, %v4417_v6  ;;  %v5048_v4 = vsub.f32 %v13412_v15, %v13504_v35 }
 0x66c   : > { %v4985_v62 = vmul.f32 %v7701_v44, %v4984_v3  ;;  %v4595_v3 = vadd.f32 %v4594_v60, %v4506_v31  ;;  %v16877_v31 = vld [vmem:[#allocation183_spill] sm:$0xff] }
 0x66d   : > { %v4599_v12 = vpop.f32.mrf.mxu0 }
 0x66e   : > { %v4989_v49 = vsel %vm4988_vm9, %v7701_v44, %v4985_v62  ;;  %v4418_v62 = vpop.f32.mrf.mxu2 }
 0x66f   : > { %v5126_v50 = vmul.f32 %v16874_v58, %v4989_v49  ;;  %v13607_v24 = vmul.f32 %v5000_v18, %v4989_v49  ;;  %v13609_v53 = vmul.f32 %v5002_v33, %v4989_v49  ;;  %v13611_v6 = vmul.f32 %v5004_v42, %v4989_v49  ;;  %v4685_v42 = vpop.f32.mrf.mxu1  ;;  %4742 = vmatmul.bf16.gmra.mxu1 %v16877_v31 }
 0x670   : > { %v13615_v44 = vmul.f32 %v5006_v14, %v4989_v49  ;;  %v13617_v56 = vmul.f32 %v5008_v16, %v4989_v49  ;;  %v13619_v15 = vmul.f32 %v5010_v43, %v4989_v49  ;;  %v13621_v13 = vmul.f32 %v5012_v10, %v4989_v49  ;;  %v4507_v10 = vpop.f32.mrf.mxu3 }
 0x671   : > { %16875 = vst [vmem:[#allocation93_spill] sm:$0xff] %v13609_v53  ;;  %v5350_v60 = vmul.f32 %v13427_v46, %v5126_v50  ;;  %v13624_v27 = vmul.f32 %v5014_v40, %v4989_v49  ;;  %v13626_v18 = vmul.f32 %v5016_v28, %v4989_v49  ;;  %v13628_v33 = vmul.f32 %v5018_v39, %v4989_v49 }
 0x672   : > { %v13631_v14 = vmul.f32 %v5020_v48, %v4989_v49  ;;  %v13633_v16 = vmul.f32 %v5022_v45, %v4989_v49  ;;  %v5088_v43 = vmul.f32 %v5024_v0, %v4989_v49  ;;  %v5090_v58 = vmul.f32 %v5026_v51, %v4989_v49 }
 0x673   : > { %v5092_v40 = vmul.f32 %v5028_v7, %v4989_v49  ;;  %v5094_v50 = vmul.f32 %v5030_v1, %v4989_v49  ;;  %v13637_v28 = vmul.f32 %v5032_v36, %v4989_v49  ;;  %v13639_v39 = vmul.f32 %v5034_v11, %v4989_v49 }
 0x674   : > { %v13641_v46 = vmul.f32 %v5036_v19, %v4989_v49  ;;  %v13643_v53 = vmul.f32 %v5038_v34, %v4989_v49  ;;  %v13645_v48 = vmul.f32 %v5040_v57, %v4989_v49  ;;  %v13647_v45 = vmul.f32 %v5042_v25, %v4989_v49 }
 0x675   : > { %16879 = vst [vmem:[#allocation157_spill] sm:$0xff] %v13639_v39  ;;  %v13649_v0 = vmul.f32 %v5044_v63, %v4989_v49  ;;  %v13651_v51 = vmul.f32 %v5046_v38, %v4989_v49  ;;  %v13653_v31 = vmul.f32 %v5048_v4, %v4989_v49  ;;  %v13655_v7 = vmul.f32 %v5050_v30, %v4989_v49  ;;  %v16889_v39 = vld [vmem:[#allocation194_spill] sm:$0xff] }
 0x676   : > { %v16880_v1 = vsub.f32 %v13425_v61, %v13504_v35  ;;  %v16881_v11 = vsub.f32 %v13439_v8, %v13504_v35  ;;  %v16882_v34 = vsub.f32 %v13453_v47, %v13504_v35  ;;  %v16883_v25 = vsub.f32 %v13463_v20, %v13504_v35  ;;  %v16888_v47 = vld [vmem:[#allocation201_spill] sm:$0xff] }
 0x677   : > { %v16884_v38 = vsub.f32 %v13475_v23, %v13504_v35  ;;  %v5316_v61 = vmul.f32 %v13281_v21, %v5092_v40  ;;  %v5318_v30 = vmul.f32 %v13285_v59, %v5094_v50  ;;  %v13679_v8 = vadd.f32 %v13572_v5, %v4595_v3  ;;  %v16891_v35 = vld [vmem:[#allocation79_spill] sm:$0xff]  ;;  %v4688_v50 = vpop.f32.mrf.mxu1 }
 0x678   : > { %v13660_v36 = vmul.f32 %v16880_v1, %v4989_v49  ;;  %v13665_v19 = vmul.f32 %v16881_v11, %v4989_v49  ;;  %v5120_v57 = vmul.f32 %v16882_v34, %v4989_v49  ;;  %v5122_v63 = vmul.f32 %v16883_v25, %v4989_v49  ;;  %v16886_v1 = vld [vmem:[#allocation133_spill] sm:$0xff]  ;;  %v13682_v11 = vpop.permute.xlu2 %5494  ;;  %v16890_v25 = vld [vmem:[#allocation104_spill] sm:$0xff]  ;;  %v4510_v21 = vpop.f32.mrf.mxu3 }
 0x679   : > { %v5124_v4 = vmul.f32 %v16884_v38, %v4989_v49  ;;  %16885 = vst [vmem:[#allocation106_spill] sm:$0xff] %v13679_v8  ;;  %4465 = vmatmul.bf16.gmra.mxu2 %v16886_v1  ;;  %v4419_v34 = vadd.f32 %v4418_v62, %v16888_v47  ;;  %4554 = vmatmul.bf16.gmra.mxu3 %v16889_v39  ;;  %v4421_v38 = vpop.f32.mrf.mxu2  ;;  %v16892_v1 = vld [vmem:[#allocation9_spill] sm:$0xff]  ;;  %v4601_v8 = vpop.f32.mrf.mxu0  ;;  %v16893_v39 = vld [vmem:[#allocation212_spill] sm:$0xff] }
 0x67a   : > { %16887 = vst [vmem:[#allocation161_spill] sm:$0xff] %v13682_v11  ;;  %v5574_v20 = vadd.f32 %v13635_v32, %v5350_v60  ;;  %v5312_v23 = vmul.f32 %v16890_v25, %v5088_v43  ;;  %v5314_v49 = vmul.f32 %v16891_v35, %v5090_v58  ;;  %v5540_v5 = vadd.f32 %v13500_v55, %v5316_v61 }
 0x67b   : > { %v5348_v40 = vmul.f32 %v13415_v2, %v5124_v4  ;;  %v4508_v3 = vadd.f32 %v4507_v10, %v4419_v34  ;;  %v4422_v59 = vadd.f32 %v4421_v38, %v16892_v1  ;;  %v5542_v62 = vadd.f32 %v13502_v29, %v5318_v30  ;;  %4658 = vmatmul.bf16.gmra.mxu0 %v16893_v39  ;;  %v13696_v4 = vpop.permute.xlu0 %5499  ;;  %v13700_v38 = vpop.permute.xlu1 %5484  ;;  %v16896_v29 = vld [vmem:[#allocation153_spill] sm:$0xff] }
 0x67c   : > { %v5604_v60 = vmax.f32 %v5540_v5, 0.0  ;;  %v5638_v47 = vmax.f32 %v5574_v20, 0.0  ;;  %v5536_v58 = vadd.f32 %v13496_v37, %v5312_v23  ;;  %16894 = vst [vmem:[#allocation99_spill] sm:$0xff] %v13696_v4  ;;  %v5538_v34 = vadd.f32 %v13498_v17, %v5314_v49  ;;  %v16897_v5 = vld [vmem:[#allocation26_spill] sm:$0xff] }
 0x67d   : > { %v5572_v43 = vadd.f32 %v13613_v52, %v5348_v40  ;;  %v4597_v32 = vadd.f32 %v13577_v9, %v4508_v3  ;;  %v4511_v61 = vadd.f32 %v4510_v21, %v4422_v59  ;;  %v5606_v10 = vmax.f32 %v5542_v62, 0.0  ;;  %16895 = vst [vmem:[#allocation189_spill] sm:$0xff] %v13700_v38  ;;  %v16899_v59 = vld [vmem:[#allocation156_spill] sm:$0xff] }
 0x67e   : > { %v5600_v30 = vmax.f32 %v5536_v58, 0.0  ;;  %v5344_v39 = vmul.f32 %v16896_v29, %v5120_v57  ;;  %v5346_v55 = vmul.f32 %v16897_v5, %v5122_v63  ;;  %v5602_v37 = vmax.f32 %v5538_v34, 0.0  ;;  %v16902_v58 = vld [vmem:[#allocation176_spill] sm:$0xff] }
 0x67f   : > { %v5636_v1 = vmax.f32 %v5572_v43, 0.0  ;;  %v13704_v40 = vadd.f32 %v4685_v42, %v4597_v32  ;;  %v4600_v20 = vadd.f32 %v4599_v12, %v4511_v61  ;;  %v5654_v23 = vpack.c.bf16 %v5606_v10, %v5604_v60  ;;  %v4690_v57 = vpop.f32.mrf.mxu1  ;;  %v16900_v12 = vld [vmem:[#allocation168_spill] sm:$0xff]  ;;  %4747 = vmatmul.bf16.gmra.mxu1 %v16902_v58 }
 0x680   : > { %v5568_v9 = vadd.f32 %v13682_v11, %v5344_v39  ;;  %v5570_v21 = vadd.f32 %v13696_v4, %v5346_v55  ;;  %v5308_v49 = vmul.f32 %v16899_v59, %v13631_v14  ;;  %v5652_v62 = vpack.c.bf16 %v5602_v37, %v5600_v30  ;;  %v16901_v60 = vld [vmem:[#allocation144_spill] sm:$0xff]  ;;  %v16903_v55 = vld [vmem:[#allocation57_spill] sm:$0xff]  ;;  %v4512_v10 = vpop.f32.mrf.mxu3  ;;  %v16905_v37 = vld [vmem:[#allocation94_spill] sm:$0xff] }
 0x681   : > { %16898 = vst [vmem:[#allocation163_spill] sm:$0xff] %v13704_v40  ;;  %v5670_v52 = vpack.c.bf16 %v5638_v47, %v5636_v1  ;;  %v13710_v3 = vadd.f32 %v4688_v50, %v4600_v20  ;;  %5898 = vmatpush.bf16.msrb.mxu2 %v5654_v23  ;;  %v4423_v43 = vpop.f32.mrf.mxu2  ;;  %v5310_v63 = vmul.f32 %v16900_v12, %v13633_v16  ;;  %v4604_v14 = vpop.f32.mrf.mxu0  ;;  %v16907_v16 = vld [vmem:[#allocation85_spill] sm:$0xff]  ;;  %v16986_v59 = vld [vmem:[#allocation38_spill] sm:$0xff] }
 0x682   : > { %v5632_v32 = vmax.f32 %v5568_v9, 0.0  ;;  %v5634_v42 = vmax.f32 %v5570_v21, 0.0  ;;  %v5532_v47 = vadd.f32 %v16901_v60, %v5308_v49  ;;  %v4424_v61 = vadd.f32 %v4423_v43, %v16903_v55  ;;  %v13717_v50 = vpop.permute.xlu2 %5489  ;;  %v16908_v9 = vld [vmem:[#allocation118_spill] sm:$0xff] }
 0x683   : > { %5947 = vmatpush.bf16.msrb.mxu3 %v5670_v52  ;;  %16904 = vst [vmem:[#allocation140_spill] sm:$0xff] %v13717_v50  ;;  %v5534_v1 = vadd.f32 %v16905_v37, %v5310_v63  ;;  %v16906_v52 = vld [vmem:[#allocation151_spill] sm:$0xff]  ;;  %v5342_v23 = vmul.f32 %v16907_v16, %v13665_v19  ;;  %v5304_v21 = vmul.f32 %v16908_v9, %v13626_v18  ;;  %v16910_v63 = vld [vmem:[#allocation49_spill] sm:$0xff]  ;;  %v13731_v58 = vpop.permute.xlu0 %5474  ;;  %v16912_v55 = vld [vmem:[#allocation14_spill] sm:$0xff] }
 0x684   : > { %v5668_v34 = vpack.c.bf16 %v5634_v42, %v5632_v32  ;;  %v5596_v30 = vmax.f32 %v5532_v47, 0.0  ;;  %v5340_v39 = vmul.f32 %v16906_v52, %v13660_v36  ;;  %v4513_v20 = vadd.f32 %v4512_v10, %v4424_v61  ;;  %v16909_v32 = vld [vmem:[#allocation172_spill] sm:$0xff]  ;;  %16911 = vst [vmem:[#allocation210_spill] sm:$0xff] %v13731_v58  ;;  %v16913_v61 = vld [vmem:[#allocation47_spill] sm:$0xff]  ;;  %v13737_v10 = vpop.permute.xlu1 %5479 }
 0x685   : > { %5899 = vmatpush.bf16.msrb.mxu2 %v5652_v62  ;;  %v5598_v49 = vmax.f32 %v5534_v1, 0.0  ;;  %v5306_v42 = vmul.f32 %v16909_v32, %v13628_v33  ;;  %v5336_v47 = vmul.f32 %v16910_v63, %v13653_v31  ;;  %v5566_v62 = vadd.f32 %v13717_v50, %v5342_v23  ;;  %16914 = vst [vmem:[#allocation12_spill] sm:$0xff] %v13737_v10  ;;  %v16916_v32 = vld [vmem:[#allocation82_spill] sm:$0xff]  ;;  %v16985_v37 = vld [vmem:[#allocation100_spill] sm:$0xff] }
 0x686   : > { %v5564_v43 = vadd.f32 %v13700_v38, %v5340_v39  ;;  %v4602_v36 = vadd.f32 %v4601_v8, %v4513_v20  ;;  %v5528_v19 = vadd.f32 %v16912_v55, %v5304_v21  ;;  %v5338_v18 = vmul.f32 %v16913_v61, %v13655_v7  ;;  %v16915_v39 = vld [vmem:[#allocation45_spill] sm:$0xff]  ;;  %v16917_v21 = vld [vmem:[#allocation40_spill] sm:$0xff] }
 0x687   : > { %5948 = vmatpush.bf16.msrb.mxu3 %v5668_v34  ;;  %v5650_v34 = vpack.c.bf16 %v5598_v49, %v5596_v30  ;;  %v5530_v9 = vadd.f32 %v16915_v39, %v5306_v42  ;;  %v5560_v33 = vadd.f32 %v13731_v58, %v5336_v47  ;;  %v5630_v8 = vmax.f32 %v5566_v62, 0.0  ;;  %v4693_v63 = vpop.f32.mrf.mxu1  ;;  %v16918_v49 = vld [vmem:[#allocation167_spill] sm:$0xff]  ;;  %v16919_v42 = vld [vmem:[#allocation186_spill] sm:$0xff]  ;;  %v16921_v58 = vld [vmem:[#allocation25_spill] sm:$0xff] }
 0x688   : > { %v5628_v1 = vmax.f32 %v5564_v43, 0.0  ;;  %v13742_v31 = vadd.f32 %v4690_v57, %v4602_v36  ;;  %v5592_v20 = vmax.f32 %v5528_v19, 0.0  ;;  %v5562_v23 = vadd.f32 %v13737_v10, %v5338_v18  ;;  %v4515_v36 = vpop.f32.mrf.mxu3  ;;  %v16922_v10 = vld [vmem:[#allocation139_spill] sm:$0xff] }
 0x689   : > { %4470 = vmatmul.bf16.gmra.mxu2 %v16916_v32  ;;  %4559 = vmatmul.bf16.gmra.mxu3 %v16917_v21  ;;  %v4426_v7 = vpop.f32.mrf.mxu2  ;;  %v5594_v61 = vmax.f32 %v5530_v9, 0.0  ;;  %v5624_v30 = vmax.f32 %v5560_v33, 0.0  ;;  %v5300_v43 = vmul.f32 %v16918_v49, %v13621_v13  ;;  %v5302_v47 = vmul.f32 %v16919_v42, %v13624_v27  ;;  %v16920_v32 = vld [vmem:[#allocation126_spill] sm:$0xff]  ;;  %v4606_v62 = vpop.f32.mrf.mxu0  ;;  %v16924_v13 = vld [vmem:[#allocation80_spill] sm:$0xff]  ;;  %v16925_v27 = vld [vmem:[#allocation43_spill] sm:$0xff] }
 0x68a   : > { %5900 = vmatpush.bf16.msrb.mxu2 %v5650_v34  ;;  %v4427_v57 = vadd.f32 %v4426_v7, %v16920_v32  ;;  %v5666_v19 = vpack.c.bf16 %v5630_v8, %v5628_v1  ;;  %v5626_v21 = vmax.f32 %v5562_v23, 0.0  ;;  %v16923_v34 = vld [vmem:[#allocation98_spill] sm:$0xff]  ;;  %v5332_v49 = vmul.f32 %v16924_v13, %v13649_v0  ;;  %v13758_v7 = vpop.permute.xlu2 %5469 }
 0x68b   : > { %4663 = vmatmul.bf16.gmra.mxu0 %v16921_v58  ;;  %v5648_v18 = vpack.c.bf16 %v5594_v61, %v5592_v20  ;;  %v5524_v39 = vadd.f32 %v16922_v10, %v5300_v43  ;;  %v5526_v9 = vadd.f32 %v16923_v34, %v5302_v47  ;;  %v5334_v42 = vmul.f32 %v16925_v27, %v13651_v51  ;;  %v16927_v61 = vld [vmem:[#allocation165_spill] sm:$0xff]  ;;  %v16928_v32 = vld [vmem:[#allocation30_spill] sm:$0xff] }
 0x68c   : > { %v4516_v33 = vadd.f32 %v4515_v36, %v4427_v57  ;;  %5949 = vmatpush.bf16.msrb.mxu3 %v5666_v19  ;;  %16926 = vst [vmem:[#allocation115_spill] sm:$0xff] %v13758_v7  ;;  %v5664_v1 = vpack.c.bf16 %v5626_v21, %v5624_v30  ;;  %v5296_v20 = vmul.f32 %v16927_v61, %v13617_v56  ;;  %v16929_v36 = vld [vmem:[#allocation148_spill] sm:$0xff]  ;;  %v16930_v19 = vld [vmem:[#allocation147_spill] sm:$0xff] }
 0x68d   : > { %v5588_v8 = vmax.f32 %v5524_v39, 0.0  ;;  %v5590_v58 = vmax.f32 %v5526_v9, 0.0  ;;  %v5556_v43 = vadd.f32 %v13598_v41, %v5332_v49  ;;  %v5558_v47 = vadd.f32 %v13758_v7, %v5334_v42  ;;  %v16931_v39 = vld [vmem:[#allocation6_spill] sm:$0xff] }
 0x68e   : > { %5901 = vmatpush.bf16.msrb.mxu2 %v5648_v18  ;;  %v4605_v23 = vadd.f32 %v4604_v14, %v4516_v33  ;;  %v5298_v0 = vmul.f32 %v16928_v32, %v13619_v15  ;;  %v5520_v51 = vadd.f32 %v16929_v36, %v5296_v20  ;;  %v5328_v18 = vmul.f32 %v16930_v19, %v13645_v48  ;;  %v16932_v49 = vld [vmem:[#allocation174_spill] sm:$0xff]  ;;  %v16933_v48 = vld [vmem:[#allocation112_spill] sm:$0xff]  ;;  %v16934_v19 = vld [vmem:[#allocation213_spill] sm:$0xff] }
 0x68f   : > { %v5646_v57 = vpack.c.bf16 %v5590_v58, %v5588_v8  ;;  %v5330_v30 = vmul.f32 %v16931_v39, %v13647_v45  ;;  %v5620_v56 = vmax.f32 %v5556_v43, 0.0  ;;  %v5622_v14 = vmax.f32 %v5558_v47, 0.0  ;;  %v4695_v42 = vpop.f32.mrf.mxu1  ;;  %4752 = vmatmul.bf16.gmra.mxu1 %v16934_v19  ;;  %v16935_v45 = vld [vmem:[#allocation60_spill] sm:$0xff] }
 0x690   : > { %v13771_v21 = vadd.f32 %v4693_v63, %v4605_v23  ;;  %5950 = vmatpush.bf16.msrb.mxu3 %v5664_v1  ;;  %v5522_v9 = vadd.f32 %v16932_v49, %v5298_v0  ;;  %v5584_v15 = vmax.f32 %v5520_v51, 0.0  ;;  %v5552_v8 = vadd.f32 %v13540_v54, %v5328_v18  ;;  %v4517_v1 = vpop.f32.mrf.mxu3  ;;  %v16937_v18 = vld [vmem:[#allocation178_spill] sm:$0xff] }
 0x691   : > { %v4428_v33 = vpop.f32.mrf.mxu2  ;;  %v5554_v58 = vadd.f32 %v13555_v22, %v5330_v30  ;;  %v5292_v20 = vmul.f32 %v16933_v48, %v13611_v6  ;;  %v4609_v23 = vpop.f32.mrf.mxu0  ;;  %v5662_v43 = vpack.c.bf16 %v5622_v14, %v5620_v56  ;;  %v16938_v22 = vld [vmem:[#allocation209_spill] sm:$0xff]  ;;  %v16939_v54 = vld [vmem:[#allocation130_spill] sm:$0xff]  ;;  %v4837_v52 = vmul.f32 %v16985_v37, %v16985_v37 }
 0x692   : > { %5902 = vmatpush.bf16.msrb.mxu2 %v5646_v57  ;;  %v4429_v63 = vadd.f32 %v4428_v33, %v16935_v45  ;;  %v5586_v47 = vmax.f32 %v5522_v9, 0.0  ;;  %v5616_v0 = vmax.f32 %v5552_v8, 0.0  ;;  %v16936_v57 = vld [vmem:[#allocation190_spill] sm:$0xff]  ;;  %v5324_v6 = vmul.f32 %v16938_v22, %v13641_v46  ;;  %v16940_v45 = vld [vmem:[#allocation65_spill] sm:$0xff]  ;;  %v16941_v8 = vld [vmem:[#allocation91_spill] sm:$0xff] }
 0x693   : > { %v5618_v39 = vmax.f32 %v5554_v58, 0.0  ;;  %v5294_v51 = vmul.f32 %v16936_v57, %v13615_v44  ;;  %v5516_v30 = vadd.f32 %v16937_v18, %v5292_v20  ;;  %v5326_v56 = vmul.f32 %v16940_v45, %v13643_v53  ;;  %v16942_v44 = vld [vmem:[#allocation179_spill] sm:$0xff]  ;;  %v16944_v46 = vld [vmem:[#allocation152_spill] sm:$0xff] }
 0x694   : > { %v4518_v49 = vadd.f32 %v4517_v1, %v4429_v63  ;;  %5951 = vmatpush.bf16.msrb.mxu3 %v5662_v43  ;;  %v5644_v48 = vpack.c.bf16 %v5586_v47, %v5584_v15  ;;  %v5548_v58 = vadd.f32 %v16941_v8, %v5324_v6  ;;  %v5288_v63 = vmul.f32 %v16942_v44, %v13607_v24  ;;  %v16943_v43 = vld [vmem:[#allocation93_spill] sm:$0xff]  ;;  %v16949_v24 = vld [vmem:[#allocation207_spill] sm:$0xff] }
 0x695   : > { %v5660_v19 = vpack.c.bf16 %v5618_v39, %v5616_v0  ;;  %v5518_v33 = vadd.f32 %v16939_v54, %v5294_v51  ;;  %v5580_v9 = vmax.f32 %v5516_v30, 0.0  ;;  %v5550_v20 = vadd.f32 %v13532_v26, %v5326_v56  ;;  %v16945_v39 = vld [vmem:[#allocation78_spill] sm:$0xff]  ;;  %v16947_v51 = vld [vmem:[#allocation157_spill] sm:$0xff]  ;;  %v16948_v30 = vld [vmem:[#allocation64_spill] sm:$0xff] }
 0x696   : > { %v4607_v14 = vadd.f32 %v4606_v62, %v4518_v49  ;;  %5903 = vmatpush.bf16.msrb.mxu2 %v5644_v48  ;;  %v5290_v15 = vmul.f32 %v16944_v46, %v16943_v43  ;;  %v5320_v47 = vmul.f32 %v16945_v39, %v13637_v28  ;;  %v5612_v53 = vmax.f32 %v5548_v58, 0.0  ;;  %v16946_v62 = vld [vmem:[#allocation15_spill] sm:$0xff]  ;;  %v16951_v46 = vld [vmem:[#allocation97_spill] sm:$0xff] }
 0x697   : > { %v5582_v1 = vmax.f32 %v5518_v33, 0.0  ;;  %v5512_v49 = vadd.f32 %v16946_v62, %v5288_v63  ;;  %v5322_v6 = vmul.f32 %v16948_v30, %v16947_v51  ;;  %v4698_v48 = vpop.f32.mrf.mxu1  ;;  %v5614_v26 = vmax.f32 %v5550_v20, 0.0  ;;  %v16950_v44 = vld [vmem:[#allocation7_spill] sm:$0xff] }
 0x698   : > { %v13796_v0 = vadd.f32 %v4695_v42, %v4607_v14  ;;  %5952 = vmatpush.bf16.msrb.mxu3 %v5660_v19  ;;  %v5514_v43 = vadd.f32 %v16950_v44, %v5290_v15  ;;  %v5544_v8 = vadd.f32 %v16951_v46, %v5320_v47  ;;  %v16952_v28 = vld [vmem:[#allocation203_spill] sm:$0xff]  ;;  %v16953_v42 = vld [vmem:[#allocation182_spill] sm:$0xff]  ;;  %v4520_v14 = vpop.f32.mrf.mxu3  ;;  %v4843_v5 = vmul.f32 %v13710_v3, %v13710_v3 }
 0x699   : > { %4475 = vmatmul.bf16.gmra.mxu2 %v16949_v24  ;;  %v4431_v33 = vpop.f32.mrf.mxu2  ;;  %v5642_v56 = vpack.c.bf16 %v5582_v1, %v5580_v9  ;;  %4564 = vmatmul.bf16.gmra.mxu3 %v16952_v28  ;;  %v13806_v58 = vpop.f32.mrf.mxu0  ;;  %v5576_v63 = vmax.f32 %v5512_v49, 0.0  ;;  %v5658_v51 = vpack.c.bf16 %v5614_v26, %v5612_v53  ;;  %v16954_v24 = vld [vmem:[#allocation132_spill] sm:$0xff]  ;;  %v16955_v49 = vld [vmem:[#allocation33_spill] sm:$0xff] }
 0x69a   : > { %v4432_v19 = vadd.f32 %v4431_v33, %v16953_v42  ;;  %v5578_v30 = vmax.f32 %v5514_v43, 0.0  ;;  %v5546_v39 = vadd.f32 %v16954_v24, %v5322_v6  ;;  %v5608_v62 = vmax.f32 %v5544_v8, 0.0  ;;  %v16956_v8 = vld [vmem:[#allocation107_spill] sm:$0xff] }
 0x69b   : > { %5904 = vmatpush.bf16.msrb.mxu2 %v5642_v56 }
 0x69c   : > { %v4521_v9 = vadd.f32 %v4520_v14, %v4432_v19  ;;  %5953 = vmatpush.bf16.msrb.mxu3 %v5658_v51  ;;  %v5640_v1 = vpack.c.bf16 %v5578_v30, %v5576_v63  ;;  %v5610_v20 = vmax.f32 %v5546_v39, 0.0  ;;  %v16957_v39 = vld [vmem:[#allocation117_spill] sm:$0xff] }
 0x69e   : > { %v4610_v15 = vadd.f32 %v4609_v23, %v4521_v9  ;;  %v5656_v47 = vpack.c.bf16 %v5610_v20, %v5608_v62  ;;  %v16958_v23 = vld [vmem:[#allocation28_spill] sm:$0xff]  ;;  %v16960_v20 = vld [vmem:[#allocation197_spill] sm:$0xff] }
 0x69f   : > { %5905 = vmatpush.bf16.msrb.mxu2 %v5640_v1  ;;  %v13811_v33 = vpop.f32.mrf.mxu1 }
 0x6a0   : > { %v13809_v28 = vadd.f32 %v4698_v48, %v4610_v15  ;;  %5954 = vmatpush.bf16.msrb.mxu3 %v5656_v47  ;;  %v4522_v26 = vpop.f32.mrf.mxu3 }
 0x6a1   : > { %v4433_v42 = vpop.f32.mrf.mxu2  ;;  %v4614_v53 = vpop.f32.mrf.mxu0 }
 0x6a2   : > { %v4434_v56 = vadd.f32 %v4433_v42, %v16955_v49 }
 0x6a4   : > { %v13814_v43 = vadd.f32 %v4522_v26, %v4434_v56  ;;  %v16961_v56 = vld [vmem:[#allocation192_spill] sm:$0xff] }
 0x6a7   : > { %v4703_v6 = vpop.f32.mrf.mxu1 }
 0x6a8   : > { %v4525_v48 = vpop.f32.mrf.mxu3 }
 0x6a9   : > { %4480 = vmatmul.bf16.gmra.mxu2 %v16956_v8  ;;  %v4436_v30 = vpop.f32.mrf.mxu2  ;;  %4569 = vmatmul.bf16.gmra.mxu3 %v16957_v39  ;;  %v13819_v19 = vpop.f32.mrf.mxu0  ;;  %v16963_v39 = vld [vmem:[#allocation162_spill] sm:$0xff] }
 0x6aa   : > { %v4437_v62 = vadd.f32 %v4436_v30, %v16958_v23  ;;  %v16962_v30 = vld [vmem:[#allocation129_spill] sm:$0xff] }
 0x6ac   : > { %v4526_v14 = vadd.f32 %v4525_v48, %v4437_v62 }
 0x6ae   : > { %v4615_v63 = vadd.f32 %v4614_v53, %v4526_v14 }
 0x6af   : > { %v13823_v9 = vpop.f32.mrf.mxu1 }
 0x6b0   : > { %v13821_v51 = vadd.f32 %v4703_v6, %v4615_v63  ;;  %v4527_v47 = vpop.f32.mrf.mxu3 }
 0x6b1   : > { %v4438_v1 = vpop.f32.mrf.mxu2  ;;  %v4619_v42 = vpop.f32.mrf.mxu0 }
 0x6b2   : > { %16959 = vst [vmem:[#allocation22_spill] sm:$0xff] %v13821_v51  ;;  %v4439_v15 = vadd.f32 %v4438_v1, %v16960_v20  ;;  %v7475_v20 = vld [vmem:[%s15046_s5] sm:$0xf] }
 0x6b4   : > { %v13826_v49 = vadd.f32 %v4527_v47, %v4439_v15  ;;  %v7622_v15 = vld [vmem:[%s15046_s5 + $0x4] sm:$0xf0]  ;;  %v16964_v47 = vld [vmem:[#allocation211_spill] sm:$0xff] }
 0x6b7   : > { %v4708_v26 = vpop.f32.mrf.mxu1 }
 0x6b8   : > { %v4530_v53 = vpop.f32.mrf.mxu3 }
 0x6b9   : > { %4485 = vmatmul.bf16.gmra.mxu2 %v16961_v56  ;;  %v4441_v8 = vpop.f32.mrf.mxu2  ;;  %4574 = vmatmul.bf16.gmra.mxu3 %v16962_v30  ;;  %v13831_v6 = vpop.f32.mrf.mxu0 }
 0x6ba   : > { %v4442_v23 = vadd.f32 %v4441_v8, %v16963_v39 }
 0x6bc   : > { %v4531_v62 = vadd.f32 %v4530_v53, %v4442_v23  ;;  %v13852_v23 = vor.u32 %v7622_v15, %v7475_v20  ;;  %v7483_v15 = vld [vmem:[%s15046_s5 + $0x10] sm:$0xf] }
 0x6be   : > { %v4620_v48 = vadd.f32 %v4619_v42, %v4531_v62  ;;  %v7621_v42 = vld [vmem:[%s15046_s5 + $0x4] sm:$0xf]  ;;  %16965 = vst [vmem:[#allocation127_spill] sm:$0xff] %v13852_v23 }
 0x6bf   : > { %v13835_v63 = vpop.f32.mrf.mxu1 }
 0x6c0   : > { %v13833_v14 = vadd.f32 %v4708_v26, %v4620_v48  ;;  %v4532_v8 = vpop.f32.mrf.mxu3  ;;  %v7477_v26 = vld [vmem:[%s15046_s5 + $0x8] sm:$0xf0] }
 0x6c1   : > { %v4443_v1 = vpop.f32.mrf.mxu2  ;;  %v4624_v30 = vpop.f32.mrf.mxu0  ;;  %v13854_v53 = vor.u32 %v7621_v42, %v7477_v26  ;;  %v16968_v42 = vld [vmem:[#allocation205_spill] sm:$0xff] }
 0x6c2   : > { %v4444_v56 = vadd.f32 %v4443_v1, %v16964_v47  ;;  %v16967_v1 = vld [vmem:[#allocation199_spill] sm:$0xff] }
 0x6c3   : > { %16966 = vst [vmem:[#allocation74_spill] sm:$0xff] %v13854_v53 }
 0x6c4   : > { %v13850_v39 = vadd.f32 %v4532_v8, %v4444_v56  ;;  %v7624_v8 = vld [vmem:[%s15046_s5 + $0x14] sm:$0xf0] }
 0x6c7   : > { %v4713_v62 = vpop.f32.mrf.mxu1 }
 0x6c8   : > { %v4535_v24 = vpop.f32.mrf.mxu3 }
 0x6c9   : > { %5906 = vmatmul.bf16.vlgmr.msrb.gmra.mxu2 %v13852_v23  ;;  %v4446_v48 = vpop.f32.mrf.mxu2  ;;  %5955 = vmatmul.bf16.vlgmr.msrb.gmra.mxu3 %v13854_v53  ;;  %v13859_v46 = vpop.f32.mrf.mxu0 }
 0x6ca   : > { %v4447_v47 = vadd.f32 %v4446_v48, %v16967_v1 }
 0x6cc   : > { %v4536_v44 = vadd.f32 %v4535_v24, %v4447_v47 }
 0x6ce   : > { %v4625_v45 = vadd.f32 %v4624_v30, %v4536_v44  ;;  %v7485_v44 = vld [vmem:[%s15046_s5 + $0x18] sm:$0xf0]  ;;  %v13880_v30 = vor.u32 %v7624_v8, %v7483_v15  ;;  %v7491_v8 = vld [vmem:[%s15046_s5 + $0x20] sm:$0xf] }
 0x6cf   : > { %v13863_v56 = vpop.f32.mrf.mxu1 }
 0x6d0   : > { %v13861_v22 = vadd.f32 %v4713_v62, %v4625_v45  ;;  %v4537_v48 = vpop.f32.mrf.mxu3  ;;  %v7623_v45 = vld [vmem:[%s15046_s5 + $0x14] sm:$0xf]  ;;  %16969 = vst [vmem:[#allocation138_spill] sm:$0xff] %v13880_v30 }
 0x6d1   : > { %v4448_v20 = vpop.f32.mrf.mxu2  ;;  %v4629_v1 = vpop.f32.mrf.mxu0  ;;  %v13882_v62 = vor.u32 %v7623_v45, %v7485_v44  ;;  %v16972_v45 = vld [vmem:[#allocation96_spill] sm:$0xff] }
 0x6d2   : > { %v4449_v26 = vadd.f32 %v4448_v20, %v16968_v42  ;;  %v16971_v42 = vld [vmem:[#allocation95_spill] sm:$0xff] }
 0x6d3   : > { %16970 = vst [vmem:[#allocation184_spill] sm:$0xff] %v13882_v62 }
 0x6d4   : > { %v13878_v24 = vadd.f32 %v4537_v48, %v4449_v26  ;;  %v7626_v48 = vld [vmem:[%s15046_s5 + $0x24] sm:$0xf0] }
 0x6d7   : > { %v4718_v47 = vpop.f32.mrf.mxu1 }
 0x6d8   : > { %v4540_v23 = vpop.f32.mrf.mxu3 }
 0x6d9   : > { %5911 = vmatmul.bf16.gmra.mxu2 %v13880_v30  ;;  %v4451_v20 = vpop.f32.mrf.mxu2  ;;  %5960 = vmatmul.bf16.gmra.mxu3 %v13882_v62  ;;  %v13887_v54 = vpop.f32.mrf.mxu0 }
 0x6da   : > { %v4452_v53 = vadd.f32 %v4451_v20, %v16971_v42 }
 0x6dc   : > { %v4541_v18 = vadd.f32 %v4540_v23, %v4452_v53  ;;  %v13908_v53 = vor.u32 %v7626_v48, %v7491_v8  ;;  %v7499_v48 = vld [vmem:[%s15046_s5 + $0x30] sm:$0xf] }
 0x6de   : > { %v4630_v57 = vadd.f32 %v4629_v1, %v4541_v18  ;;  %v7493_v18 = vld [vmem:[%s15046_s5 + $0x28] sm:$0xf0]  ;;  %16973 = vst [vmem:[#allocation206_spill] sm:$0xff] %v13908_v53 }
 0x6df   : > { %v13891_v26 = vpop.f32.mrf.mxu1 }
 0x6e0   : > { %v13889_v36 = vadd.f32 %v4718_v47, %v4630_v57  ;;  %v4542_v20 = vpop.f32.mrf.mxu3  ;;  %v7625_v57 = vld [vmem:[%s15046_s5 + $0x24] sm:$0xf] }
 0x6e1   : > { %v4453_v15 = vpop.f32.mrf.mxu2  ;;  %v4634_v42 = vpop.f32.mrf.mxu0  ;;  %v13910_v1 = vor.u32 %v7625_v57, %v7493_v18  ;;  %v16976_v57 = vld [vmem:[#allocation37_spill] sm:$0xff] }
 0x6e2   : > { %v4454_v44 = vadd.f32 %v4453_v15, %v16972_v45  ;;  %v16975_v45 = vld [vmem:[#allocation75_spill] sm:$0xff] }
 0x6e3   : > { %16974 = vst [vmem:[#allocation187_spill] sm:$0xff] %v13910_v1 }
 0x6e4   : > { %v13906_v23 = vadd.f32 %v4542_v20, %v4454_v44  ;;  %v7628_v20 = vld [vmem:[%s15046_s5 + $0x34] sm:$0xf0] }
 0x6e7   : > { %v4723_v47 = vpop.f32.mrf.mxu1 }
 0x6e8   : > { %v4545_v30 = vpop.f32.mrf.mxu3 }
 0x6e9   : > { %5916 = vmatmul.bf16.gmra.mxu2 %v13908_v53  ;;  %v4456_v15 = vpop.f32.mrf.mxu2  ;;  %5965 = vmatmul.bf16.gmra.mxu3 %v13910_v1  ;;  %v13915_v32 = vpop.f32.mrf.mxu0 }
 0x6ea   : > { %v4457_v62 = vadd.f32 %v4456_v15, %v16975_v45 }
 0x6ec   : > { %v4546_v61 = vadd.f32 %v4545_v30, %v4457_v62  ;;  %v13936_v62 = vor.u32 %v7628_v20, %v7499_v48  ;;  %v7507_v20 = vld [vmem:[%s15046_s5 + $0x40] sm:$0xf] }
 0x6ee   : > { %v4635_v7 = vadd.f32 %v4634_v42, %v4546_v61  ;;  %v7501_v61 = vld [vmem:[%s15046_s5 + $0x38] sm:$0xf0]  ;;  %16977 = vst [vmem:[#allocation160_spill] sm:$0xff] %v13936_v62 }
 0x6ef   : > { %v13919_v44 = vpop.f32.mrf.mxu1 }
 0x6f0   : > { %v13917_v41 = vadd.f32 %v4723_v47, %v4635_v7  ;;  %v4547_v15 = vpop.f32.mrf.mxu3  ;;  %v7627_v7 = vld [vmem:[%s15046_s5 + $0x34] sm:$0xf] }
 0x6f1   : > { %v4458_v8 = vpop.f32.mrf.mxu2  ;;  %v4639_v45 = vpop.f32.mrf.mxu0  ;;  %v13938_v42 = vor.u32 %v7627_v7, %v7501_v61 }
 0x6f2   : > { %v4459_v18 = vadd.f32 %v4458_v8, %v16976_v57  ;;  %v16979_v57 = vld [vmem:[#allocation54_spill] sm:$0xff] }
 0x6f3   : > { %16978 = vst [vmem:[#allocation159_spill] sm:$0xff] %v13938_v42 }
 0x6f4   : > { %v13934_v30 = vadd.f32 %v4547_v15, %v4459_v18  ;;  %v7630_v15 = vld [vmem:[%s15046_s5 + $0x44] sm:$0xf0] }
 0x6f7   : > { %v4728_v47 = vpop.f32.mrf.mxu1 }
 0x6f8   : > { %v4550_v53 = vpop.f32.mrf.mxu3 }
 0x6f9   : > { %5921 = vmatmul.bf16.gmra.mxu2 %v13936_v62  ;;  %v4461_v8 = vpop.f32.mrf.mxu2  ;;  %5970 = vmatmul.bf16.gmra.mxu3 %v13938_v42  ;;  %v13943_v27 = vpop.f32.mrf.mxu0 }
 0x6fa   : > { %v4462_v1 = vadd.f32 %v4461_v8, %v16979_v57 }
 0x6fc   : > { %v4551_v34 = vadd.f32 %v4550_v53, %v4462_v1  ;;  %v13967_v53 = vor.u32 %v7630_v15, %v7507_v20  ;;  %v7515_v20 = vld [vmem:[%s15046_s5 + $0x50] sm:$0xf]  ;;  %v7632_v15 = vld [vmem:[%s15046_s5 + $0x54] sm:$0xf0] }
 0x6fd   : > { %v14001_v55 = vor.u32 %v7632_v15, %v7515_v20  ;;  %v4835_v20 = vmul.f32 %v16986_v59, %v16986_v59  ;;  %v4795_v15 = vadd.f32 %v16985_v37, %v16986_v59  ;;  %v7523_v37 = vld [vmem:[%s15046_s5 + $0x60] sm:$0xf] }
 0x6fe   : > { %v4640_v13 = vadd.f32 %v4639_v45, %v4551_v34  ;;  %v7629_v34 = vld [vmem:[%s15046_s5 + $0x44] sm:$0xf]  ;;  %16980 = vst [vmem:[#allocation181_spill] sm:$0xff] %v13967_v53 }
 0x6ff   : > { %v13947_v18 = vpop.f32.mrf.mxu1  ;;  %16982 = vst [vmem:[#allocation68_spill] sm:$0xff] %v14001_v55 }
 0x700   : > { %v13945_v10 = vadd.f32 %v4728_v47, %v4640_v13  ;;  %v13957_v7 = vpop.f32.mrf.mxu3  ;;  %v7509_v13 = vld [vmem:[%s15046_s5 + $0x48] sm:$0xf0] }
 0x701   : > { %v13949_v48 = vpop.f32.mrf.mxu2  ;;  %v13959_v61 = vpop.f32.mrf.mxu0  ;;  %v13969_v1 = vor.u32 %v7629_v34, %v7509_v13 }
 0x703   : > { %16981 = vst [vmem:[#allocation35_spill] sm:$0xff] %v13969_v1 }
 0x707   : > { %v13972_v45 = vpop.f32.mrf.mxu1 }
 0x708   : > { %v13977_v8 = vpop.f32.mrf.mxu3 }
 0x709   : > { %5926 = vmatmul.bf16.gmra.mxu2 %v13967_v53  ;;  %v13974_v47 = vpop.f32.mrf.mxu2  ;;  %5975 = vmatmul.bf16.gmra.mxu3 %v13969_v1  ;;  %v13979_v57 = vpop.f32.mrf.mxu0  ;;  %v7631_v1 = vld [vmem:[%s15046_s5 + $0x54] sm:$0xf]  ;;  %v7517_v53 = vld [vmem:[%s15046_s5 + $0x58] sm:$0xf0] }
 0x70a   : > { %v14003_v50 = vor.u32 %v7631_v1, %v7517_v53  ;;  %v16987_v53 = vld [vmem:[#allocation106_spill] sm:$0xff] }
 0x70b   : > { %v4839_v1 = vmul.f32 %v16987_v53, %v16987_v53  ;;  %v4796_v4 = vadd.f32 %v4795_v15, %v16987_v53  ;;  %v7633_v15 = vld [vmem:[%s15046_s5 + $0x64] sm:$0xf] }
 0x70c   : > { %16983 = vst [vmem:[#allocation21_spill] sm:$0xff] %v14003_v50 }
 0x70d   : > { %v4797_v29 = vadd.f32 %v4796_v4, %v13704_v40 }
 0x70f   : > { %v13981_v42 = vpop.f32.mrf.mxu1  ;;  %v4798_v53 = vadd.f32 %v4797_v29, %v13710_v3  ;;  %v4617_v29 = vadd.f32 %v13819_v19, %v13826_v49 }
 0x710   : > { %v13991_v34 = vpop.f32.mrf.mxu3 }
 0x711   : > { %v13983_v62 = vpop.f32.mrf.mxu2  ;;  %v13993_v13 = vpop.f32.mrf.mxu0  ;;  %v14081_v49 = vadd.f32 %v13823_v9, %v4617_v29 }
 0x713   : > { %16991 = vst [vmem:[#allocation63_spill] sm:$0xff] %v14081_v49  ;;  %v4857_v9 = vmul.f32 %v14081_v49, %v14081_v49 }
 0x717   : > { %v14006_v38 = vpop.f32.mrf.mxu1 }
 0x718   : > { %16984 = vst [vmem:[#allocation76_spill] sm:$0xff] %v14006_v38  ;;  %v14013_v60 = vpop.f32.mrf.mxu3 }
 0x719   : > { %5931 = vmatmul.bf16.gmra.mxu2 %v14001_v55  ;;  %v14008_v16 = vpop.f32.mrf.mxu2  ;;  %5980 = vmatmul.bf16.gmra.mxu3 %v14003_v50  ;;  %v14015_v12 = vpop.f32.mrf.mxu0  ;;  %v4935_v55 = vadd.f32 %v4837_v52, %v4835_v20  ;;  %v4841_v50 = vmul.f32 %v13704_v40, %v13704_v40  ;;  %v7634_v52 = vld [vmem:[%s15046_s5 + $0x64] sm:$0xf0]  ;;  %v7525_v40 = vld [vmem:[%s15046_s5 + $0x68] sm:$0xf0] }
 0x71a   : > { %v14056_v2 = vor.u32 %v7634_v52, %v7523_v37  ;;  %v4851_v37 = vmul.f32 %v13809_v28, %v13809_v28 }
 0x71b   : > { %v4936_v11 = vadd.f32 %v4935_v55, %v4839_v1  ;;  %v4845_v55 = vmul.f32 %v13742_v31, %v13742_v31  ;;  %v4612_v1 = vadd.f32 %v13806_v58, %v13814_v43  ;;  %v4799_v58 = vadd.f32 %v4798_v53, %v13742_v31 }
 0x71c   : > { %16989 = vst [vmem:[#allocation42_spill] sm:$0xff] %v14056_v2  ;;  %v14059_v43 = vor.u32 %v7633_v15, %v7525_v40 }
 0x71d   : > { %v4937_v20 = vadd.f32 %v4936_v11, %v4841_v50  ;;  %v4847_v50 = vmul.f32 %v13771_v21, %v13771_v21  ;;  %v14064_v38 = vadd.f32 %v13811_v33, %v4612_v1 }
 0x71e   : > { %16990 = vst [vmem:[#allocation20_spill] sm:$0xff] %v14059_v43 }
 0x71f   : > { %v14029_v17 = vpop.f32.mrf.mxu1  ;;  %v4938_v11 = vadd.f32 %v4937_v20, %v4843_v5  ;;  %v4800_v5 = vadd.f32 %v4799_v58, %v13771_v21  ;;  %v4853_v19 = vmul.f32 %v14064_v38, %v14064_v38 }
 0x720   : > { %16988 = vst [vmem:[#allocation131_spill] sm:$0xff] %v14029_v17  ;;  %v14043_v4 = vpop.f32.mrf.mxu3  ;;  %v4849_v17 = vmul.f32 %v13796_v0, %v13796_v0 }
 0x721   : > { %v14031_v35 = vpop.f32.mrf.mxu2  ;;  %v14052_v25 = vpop.f32.mrf.mxu0  ;;  %v4939_v59 = vadd.f32 %v4938_v11, %v4845_v55  ;;  %v4801_v40 = vadd.f32 %v4800_v5, %v13796_v0  ;;  %v4855_v11 = vmul.f32 %v13821_v51, %v13821_v51 }
 0x723   : > { %v4940_v20 = vadd.f32 %v4939_v59, %v4847_v50  ;;  %v4622_v59 = vadd.f32 %v13831_v6, %v13850_v39  ;;  %v4802_v1 = vadd.f32 %v4801_v40, %v13809_v28  ;;  %v4627_v6 = vadd.f32 %v13859_v46, %v13878_v24 }
 0x725   : > { %v4941_v33 = vadd.f32 %v4940_v20, %v4849_v17  ;;  %v4803_v50 = vadd.f32 %v4802_v1, %v14064_v38  ;;  %v14096_v29 = vadd.f32 %v13835_v63, %v4622_v59  ;;  %v4859_v20 = vmul.f32 %v13833_v14, %v13833_v14  ;;  %v7636_v63 = vld [vmem:[%s15046_s5 + $0x74] sm:$0xf0] }
 0x726   : > { %v14115_v59 = vadd.f32 %v13863_v56, %v4627_v6  ;;  %v4632_v1 = vadd.f32 %v13887_v54, %v13906_v23  ;;  %v4863_v6 = vmul.f32 %v13861_v22, %v13861_v22  ;;  %v16993_v23 = vld [vmem:[#allocation10_spill] sm:$0xff] }
 0x727   : > { %v14073_v53 = vpop.f32.mrf.mxu1  ;;  %v4942_v15 = vadd.f32 %v4941_v33, %v4851_v37  ;;  %v4804_v39 = vadd.f32 %v4803_v50, %v13821_v51  ;;  %v4861_v24 = vmul.f32 %v14096_v29, %v14096_v29  ;;  %v7533_v50 = vld [vmem:[%s15046_s5 + $0x78] sm:$0xf0] }
 0x728   : > { %v14085_v55 = vpop.f32.mrf.mxu3  ;;  %v4865_v51 = vmul.f32 %v14115_v59, %v14115_v59 }
 0x729   : > { %5936 = vmatmul.bf16.gmra.mxu2 %v14056_v2  ;;  %v14075_v52 = vpop.f32.mrf.mxu2  ;;  %5985 = vmatmul.bf16.gmra.mxu3 %v14059_v43  ;;  %v14091_v17 = vpop.f32.mrf.mxu0  ;;  %v4943_v58 = vadd.f32 %v4942_v15, %v4853_v19  ;;  %v4805_v37 = vadd.f32 %v4804_v39, %v14081_v49  ;;  %v7531_v19 = vld [vmem:[%s15046_s5 + $0x70] sm:$0xf] }
 0x72a   : > { %v14132_v54 = vor.u32 %v7636_v63, %v7531_v19  ;;  %v16994_v19 = vld [vmem:[#allocation113_spill] sm:$0xff] }
 0x72b   : > { %v4944_v5 = vadd.f32 %v4943_v58, %v4855_v11  ;;  %v7635_v11 = vld [vmem:[%s15046_s5 + $0x74] sm:$0xf]  ;;  %v4806_v39 = vadd.f32 %v4805_v37, %v13833_v14  ;;  %v4469_v63 = vadd.f32 %v13983_v62, %v16994_v19 }
 0x72c   : > { %v16992_v58 = vld [vmem:[#allocation204_spill] sm:$0xff]  ;;  %v14136_v43 = vor.u32 %v7635_v11, %v7533_v50 }
 0x72d   : > { %v4945_v46 = vadd.f32 %v4944_v5, %v4857_v9  ;;  %v4464_v9 = vadd.f32 %v13949_v48, %v16992_v58  ;;  %v4467_v5 = vadd.f32 %v13974_v47, %v16993_v23  ;;  %v4807_v2 = vadd.f32 %v4806_v39, %v14096_v29  ;;  %v16997_v19 = vld [vmem:[#allocation188_spill] sm:$0xff] }
 0x72e   : > { %v14142_v48 = vadd.f32 %v13891_v26, %v4632_v1  ;;  %v16995_v1 = vld [vmem:[#allocation61_spill] sm:$0xff] }
 0x72f   : > { %v14104_v40 = vpop.f32.mrf.mxu1  ;;  %v4946_v56 = vadd.f32 %v4945_v46, %v4859_v20  ;;  %v4637_v20 = vadd.f32 %v13915_v32, %v13934_v30  ;;  %v4553_v37 = vadd.f32 %v13957_v7, %v4464_v9  ;;  %v4808_v46 = vadd.f32 %v4807_v2, %v13861_v22 }
 0x730   : > { %v14119_v15 = vpop.f32.mrf.mxu3  ;;  %v4556_v26 = vadd.f32 %v13977_v8, %v4467_v5  ;;  %v4472_v32 = vadd.f32 %v14008_v16, %v16995_v1  ;;  %v4869_v2 = vmul.f32 %v14142_v48, %v14142_v48  ;;  %v4558_v9 = vadd.f32 %v13991_v34, %v4469_v63  ;;  %v16996_v16 = vld [vmem:[#allocation27_spill] sm:$0xff] }
 0x731   : > { %v4478_v33 = vpop.f32.mrf.mxu2  ;;  %v4947_v49 = vadd.f32 %v4946_v56, %v4861_v24  ;;  %v14149_v47 = vpop.f32.mrf.mxu0  ;;  %v4867_v24 = vmul.f32 %v13889_v36, %v13889_v36  ;;  %v4809_v62 = vadd.f32 %v4808_v46, %v14115_v59  ;;  %v14165_v58 = vadd.f32 %v13919_v44, %v4637_v20 }
 0x732   : > { %v4642_v8 = vadd.f32 %v13943_v27, %v4553_v37  ;;  %v4474_v39 = vadd.f32 %v14031_v35, %v16996_v16  ;;  %v4645_v23 = vadd.f32 %v13959_v61, %v4556_v26  ;;  %v4561_v5 = vadd.f32 %v14013_v60, %v4472_v32  ;;  %v16998_v60 = vld [vmem:[#allocation46_spill] sm:$0xff]  ;;  %v17000_v16 = vld [vmem:[#allocation120_spill] sm:$0xff] }
 0x733   : > { %v4948_v11 = vadd.f32 %v4947_v49, %v4863_v6  ;;  %v4810_v56 = vadd.f32 %v4809_v62, %v13889_v36  ;;  %v4477_v44 = vadd.f32 %v14075_v52, %v16997_v19  ;;  %v4873_v34 = vmul.f32 %v14165_v58, %v14165_v58 }
 0x734   : > { %v14182_v35 = vadd.f32 %v13947_v18, %v4642_v8  ;;  %v4647_v37 = vadd.f32 %v13979_v57, %v4558_v9  ;;  %v4563_v63 = vadd.f32 %v14043_v4, %v4474_v39  ;;  %v4875_v52 = vmul.f32 %v13945_v10, %v13945_v10  ;;  %v16999_v4 = vld [vmem:[#allocation55_spill] sm:$0xff] }
 0x735   : > { %v4949_v50 = vadd.f32 %v4948_v11, %v4865_v51  ;;  %v4871_v51 = vmul.f32 %v13917_v41, %v13917_v41  ;;  %v4811_v27 = vadd.f32 %v4810_v56, %v14142_v48  ;;  %v4479_v11 = vadd.f32 %v4478_v33, %v16998_v60  ;;  %v17003_v60 = vld [vmem:[#allocation29_spill] sm:$0xff] }
 0x736   : > { %v4650_v26 = vadd.f32 %v13993_v13, %v4561_v5  ;;  %v4566_v18 = vadd.f32 %v14085_v55, %v4477_v44  ;;  %v4877_v33 = vmul.f32 %v14182_v35, %v14182_v35  ;;  %v14200_v8 = vadd.f32 %v13981_v42, %v4647_v37  ;;  %v17002_v44 = vld [vmem:[#allocation131_spill] sm:$0xff] }
 0x737   : > { %v14158_v30 = vpop.f32.mrf.mxu1  ;;  %v4950_v6 = vadd.f32 %v4949_v50, %v4867_v24  ;;  %v4812_v61 = vadd.f32 %v4811_v27, %v13917_v41  ;;  %v14191_v24 = vadd.f32 %v13972_v45, %v4645_v23  ;;  %v4652_v45 = vadd.f32 %v14015_v12, %v4563_v63 }
 0x738   : > { %v4570_v49 = vpop.f32.mrf.mxu3  ;;  %v4568_v55 = vadd.f32 %v14119_v15, %v4479_v11  ;;  %v4655_v23 = vadd.f32 %v14052_v25, %v4566_v18  ;;  %v4881_v19 = vmul.f32 %v14200_v8, %v14200_v8 }
 0x739   : > { %5941 = vmatmul.bf16.gmra.mxu2 %v14132_v54  ;;  %v4481_v7 = vpop.f32.mrf.mxu2  ;;  %5990 = vmatmul.bf16.gmra.mxu3 %v14136_v43  ;;  %v4951_v20 = vadd.f32 %v4950_v6, %v4869_v2  ;;  %v4661_v1 = vpop.f32.mrf.mxu0  ;;  %v4813_v57 = vadd.f32 %v4812_v61, %v14165_v58  ;;  %v17001_v6 = vld [vmem:[#allocation76_spill] sm:$0xff]  ;;  %v14216_v15 = vadd.f32 %v17002_v44, %v4652_v45 }
 0x73a   : > { %v4482_v62 = vadd.f32 %v4481_v7, %v16999_v4  ;;  %v4879_v7 = vmul.f32 %v14191_v24, %v14191_v24  ;;  %v14223_v25 = vadd.f32 %v14073_v53, %v4655_v23 }
 0x73b   : > { %v4952_v46 = vadd.f32 %v4951_v20, %v4871_v51  ;;  %v4814_v13 = vadd.f32 %v4813_v57, %v13945_v10  ;;  %v14209_v51 = vadd.f32 %v17001_v6, %v4650_v26  ;;  %v4657_v20 = vadd.f32 %v14091_v17, %v4568_v55 }
 0x73c   : > { %v4571_v5 = vadd.f32 %v4570_v49, %v4482_v62  ;;  %v4885_v17 = vmul.f32 %v14216_v15, %v14216_v15 }
 0x73d   : > { %v4953_v2 = vadd.f32 %v4952_v46, %v4873_v34  ;;  %v4815_v42 = vadd.f32 %v4814_v13, %v14182_v35  ;;  %v4883_v63 = vmul.f32 %v14209_v51, %v14209_v51  ;;  %v14232_v57 = vadd.f32 %v14104_v40, %v4657_v20 }
 0x73e   : > { %v4660_v46 = vadd.f32 %v14149_v47, %v4571_v5 }
 0x73f   : > { %v4750_v9 = vpop.f32.mrf.mxu1  ;;  %v4954_v56 = vadd.f32 %v4953_v2, %v4875_v52  ;;  %v4816_v27 = vadd.f32 %v4815_v42, %v14191_v24  ;;  %v4889_v40 = vmul.f32 %v14232_v57, %v14232_v57 }
 0x740   : > { %v4572_v50 = vpop.f32.mrf.mxu3 }
 0x741   : > { %v4483_v32 = vpop.f32.mrf.mxu2  ;;  %v4955_v12 = vadd.f32 %v4954_v56, %v4877_v33  ;;  %v4817_v61 = vadd.f32 %v4816_v27, %v14200_v8  ;;  %v4664_v18 = vpop.f32.mrf.mxu0  ;;  %v14238_v33 = vadd.f32 %v14158_v30, %v4660_v46  ;;  %v17004_v30 = vld [vmem:[#allocation169_spill] sm:$0xff] }
 0x742   : > { %v4484_v39 = vadd.f32 %v4483_v32, %v17000_v16 }
 0x743   : > { %v4956_v37 = vadd.f32 %v4955_v12, %v4879_v7  ;;  %v4818_v32 = vadd.f32 %v4817_v61, %v14209_v51  ;;  %v4891_v7 = vmul.f32 %v14238_v33, %v14238_v33 }
 0x744   : > { %v4573_v34 = vadd.f32 %v4572_v50, %v4484_v39  ;;  %v4887_v50 = vmul.f32 %v14223_v25, %v14223_v25 }
 0x745   : > { %v4957_v26 = vadd.f32 %v4956_v37, %v4881_v19  ;;  %v4819_v2 = vadd.f32 %v4818_v32, %v14216_v15 }
 0x746   : > { %v4662_v53 = vadd.f32 %v4661_v1, %v4573_v34 }
 0x747   : > { %v4958_v62 = vadd.f32 %v4957_v26, %v4883_v63  ;;  %v4753_v47 = vpop.f32.mrf.mxu1  ;;  %v4820_v55 = vadd.f32 %v4819_v2, %v14223_v25 }
 0x748   : > { %v4575_v52 = vpop.f32.mrf.mxu3  ;;  %v14243_v16 = vadd.f32 %v4750_v9, %v4662_v53  ;;  %v14263_v53 = vpop.permute.xlu0 %5740 }
 0x749   : > { %v4486_v49 = vpop.f32.mrf.mxu2  ;;  %v4959_v13 = vadd.f32 %v4958_v62, %v4885_v17  ;;  %v4821_v56 = vadd.f32 %v4820_v55, %v14232_v57  ;;  %v4666_v44 = vpop.f32.mrf.mxu0 }
 0x74a   : > { %v4487_v11 = vadd.f32 %v4486_v49, %v17003_v60  ;;  %v4893_v19 = vmul.f32 %v14243_v16, %v14243_v16 }
 0x74b   : > { %v4960_v1 = vadd.f32 %v4959_v13, %v4887_v50  ;;  %v4822_v12 = vadd.f32 %v4821_v56, %v14238_v33 }
 0x74c   : > { %v4576_v4 = vadd.f32 %v4575_v52, %v4487_v11 }
 0x74d   : > { %v4961_v5 = vadd.f32 %v4960_v1, %v4889_v40  ;;  %v4823_v20 = vadd.f32 %v4822_v12, %v14243_v16 }
 0x74e   : > { %v4665_v45 = vadd.f32 %v4664_v18, %v4576_v4 }
 0x74f   : > { %v4962_v27 = vadd.f32 %v4961_v5, %v4891_v7  ;;  %v4755_v63 = vpop.f32.mrf.mxu1 }
 0x750   : > { %v14248_v6 = vadd.f32 %v4753_v47, %v4665_v45  ;;  %v4577_v42 = vpop.f32.mrf.mxu3  ;;  %v14274_v12 = vpop.permute.xlu0 %5755 }
 0x751   : > { %v4488_v39 = vpop.f32.mrf.mxu2  ;;  %v4963_v49 = vadd.f32 %v4962_v27, %v4893_v19  ;;  %17007 = vst [vmem:[#allocation121_spill] sm:$0xff] %v14274_v12 }
 0x752   : > { %v4489_v23 = vadd.f32 %v4488_v39, %v17004_v30  ;;  %v4895_v34 = vmul.f32 %v14248_v6, %v14248_v6  ;;  %v4824_v61 = vadd.f32 %v4823_v20, %v14248_v6  ;;  %v14268_v39 = vpop.permute.xlu1 %5745  ;;  %v14270_v30 = vpop.permute.xlu2 %5750 }
 0x753   : > { %17005 = vst [vmem:[#allocation128_spill] sm:$0xff] %v14268_v39 }
 0x754   : > { %v4578_v9 = vadd.f32 %v4577_v42, %v4489_v23  ;;  %v4964_v60 = vadd.f32 %v4963_v49, %v4895_v34  ;;  %17006 = vst [vmem:[#allocation17_spill] sm:$0xff] %v14270_v30 }
 0x756   : > { %v4667_v37 = vadd.f32 %v4666_v44, %v4578_v9 }
 0x758   : > { %v14258_v46 = vadd.f32 %v4755_v63, %v4667_v37  ;;  %v5956_v13 = vpop.f32.mrf.mxu3 }
 0x759   : > { %v5907_v50 = vpop.f32.mrf.mxu2 }
 0x75a   : > { %v4825_v11 = vadd.f32 %v4824_v61, %v14258_v46  ;;  %v4897_v52 = vmul.f32 %v14258_v46, %v14258_v46  ;;  %v5908_v47 = vadd.f32 %v5907_v50, %v14263_v53  ;;  %v14279_v37 = vpop.permute.xlu1 %5760  ;;  %v14281_v49 = vpop.permute.xlu2 %5765 }
 0x75b   : > { %17008 = vst [vmem:[#allocation16_spill] sm:$0xff] %v14279_v37 }
 0x75c   : > { %v4826_v26 = vrot.slane %v4825_v11, 4  ;;  %v4965_v17 = vadd.f32 %v4964_v60, %v4897_v52  ;;  %v14266_v55 = vadd.f32 %v5956_v13, %v5908_v47  ;;  %v14286_v52 = vpop.permute.xlu0 %5770 }
 0x75d   : > { %17009 = vst [vmem:[#allocation24_spill] sm:$0xff] %v14286_v52 }
 0x75e   : > { %v4827_v18 = vadd.f32 %v4826_v26, %v4825_v11  ;;  %v4966_v32 = vrot.slane %v4965_v17, 4 }
 0x760   : > { %v4828_v4 = vrot.slane %v4827_v18, 2  ;;  %v4967_v62 = vadd.f32 %v4966_v32, %v4965_v17  ;;  %v5958_v44 = vpop.f32.mrf.mxu3 }
 0x761   : > { %v5909_v5 = vpop.f32.mrf.mxu2 }
 0x762   : > { %v4829_v2 = vadd.f32 %v4828_v4, %v4827_v18  ;;  %v4968_v45 = vrot.slane %v4967_v62, 2  ;;  %v5910_v34 = vadd.f32 %v5909_v5, %v14268_v39  ;;  %v14291_v50 = vpop.permute.xlu1 %5775  ;;  %v14295_v13 = vpop.permute.xlu2 %5780 }
 0x763   : > { %17010 = vst [vmem:[#allocation73_spill] sm:$0xff] %v14291_v50 }
 0x764   : > { %v4830_v40 = vrot.slane %v4829_v2, 1  ;;  %v4969_v1 = vadd.f32 %v4968_v45, %v4967_v62  ;;  %v14283_v60 = vadd.f32 %v5958_v44, %v5910_v34  ;;  %17011 = vst [vmem:[#allocation58_spill] sm:$0xff] %v14295_v13  ;;  %v17019_v44 = vld [vmem:[#allocation135_spill] sm:$0xff] }
 0x766   : > { %v4831_v56 = vadd.f32 %v4830_v40, %v4829_v2  ;;  %v4970_v7 = vrot.slane %v4969_v1, 1 }
 0x768   : > { %v14272_v23 = vmul.f32 0.005, %v4831_v56  ;;  %v4971_v42 = vadd.f32 %v4970_v7, %v4969_v1  ;;  %v5961_v61 = vpop.f32.mrf.mxu3  ;;  %v17012_v1 = vld [vmem:[#allocation38_spill] sm:$0xff] }
 0x769   : > { %v5912_v63 = vpop.f32.mrf.mxu2 }
 0x76a   : > { %v4973_v19 = vmul.f32 0.005, %v4971_v42  ;;  %v4975_v9 = vmul.f32 %v14272_v23, %v14272_v23  ;;  %v5913_v11 = vadd.f32 %v5912_v63, %v14270_v30  ;;  %v5063_v40 = vsub.f32 %v14258_v46, %v14272_v23  ;;  %v17014_v63 = vld [vmem:[#allocation22_spill] sm:$0xff]  ;;  %v14344_v5 = vpop.permute.xlu1 %5790  ;;  %v17018_v42 = vld [vmem:[#allocation175_spill] sm:$0xff] }
 0x76b   : > { %17016 = vst [vmem:[#allocation23_spill] sm:$0xff] %v14344_v5 }
 0x76c   : > { %v4977_v27 = vsub.f32 %v4973_v19, %v4975_v9  ;;  %v14288_v26 = vadd.f32 %v5961_v61, %v5913_v11  ;;  %v14305_v19 = vpop.permute.xlu0 %5785  ;;  %v5021_v61 = vsub.f32 %v17014_v63, %v14272_v23  ;;  %v17015_v11 = vld [vmem:[#allocation63_spill] sm:$0xff]  ;;  %v17020_v9 = vld [vmem:[#allocation13_spill] sm:$0xff] }
 0x76d   : > { %17013 = vst [vmem:[#allocation125_spill] sm:$0xff] %v14305_v19 }
 0x76e   : > { %v4979_v20 = vadd.f32 1e-05, %v4977_v27  ;;  %v5059_v27 = vsub.f32 %v14243_v16, %v14272_v23  ;;  %v17028_v16 = vld [vmem:[#allocation51_spill] sm:$0xff] }
 0x770   : > { %7702 = vrsqrt.f32 %v4979_v20  ;;  %v5963_v47 = vpop.f32.mrf.mxu3  ;;  %vm4996_vm11 = vweird.f32 %v4979_v20 }
 0x771   : > { %v5914_v32 = vpop.f32.mrf.mxu2 }
 0x772   : > { %v5915_v62 = vadd.f32 %v5914_v32, %v14274_v12  ;;  %v5025_v32 = vsub.f32 %v13833_v14, %v14272_v23 }
 0x774   : > { %v14293_v45 = vadd.f32 %v5963_v47, %v5915_v62  ;;  %v5031_v62 = vsub.f32 %v14115_v59, %v14272_v23  ;;  %v5061_v47 = vsub.f32 %v14248_v6, %v14272_v23 }
 0x776   : > { %v7703_v17 = vpop.eup %7702 }
 0x777   : > { %v4991_v18 = vmul.f32 %v7703_v17, %v4979_v20  ;;  %vm4997_vm10 = vweird.f32 %v7703_v17 }
 0x778   : > { %vm4998_vm12 = vmor %vm4996_vm11, %vm4997_vm10  ;;  %v5966_v6 = vpop.f32.mrf.mxu3 }
 0x779   : > { %v4992_v4 = vmul.f32 %v7703_v17, %v4991_v18  ;;  %v5023_v18 = vsub.f32 %v17015_v11, %v14272_v23  ;;  %v5917_v20 = vpop.f32.mrf.mxu2 }
 0x77a   : > { %v5918_v14 = vadd.f32 %v5917_v20, %v14279_v37  ;;  %v17017_v20 = vld [vmem:[#allocation11_spill] sm:$0xff]  ;;  %v17024_v37 = vld [vmem:[#allocation88_spill] sm:$0xff] }
 0x77b   : > { %v4993_v2 = vmul.f32 0.5, %v4992_v4  ;;  %v5029_v4 = vsub.f32 %v13861_v22, %v14272_v23 }
 0x77d   : > { %v4994_v7 = vsub.f32 1.5, %v4993_v2 }
 0x77f   : > { %v4995_v34 = vmul.f32 %v7703_v17, %v4994_v7  ;;  %v5027_v7 = vsub.f32 %v14096_v29, %v14272_v23 }
 0x781   : > { %v14327_v2 = vsel %vm4998_vm12, %v7703_v17, %v4995_v34  ;;  %v5057_v17 = vsub.f32 %v14238_v33, %v14272_v23  ;;  %v14340_v34 = vadd.f32 %v5966_v6, %v5918_v14  ;;  %v17021_v33 = vld [vmem:[#allocation104_spill] sm:$0xff]  ;;  %v17022_v6 = vld [vmem:[#allocation79_spill] sm:$0xff] }
 0x782   : > { %v5127_v11 = vmul.f32 %v5063_v40, %v14327_v2  ;;  %v5093_v22 = vmul.f32 %v5029_v4, %v14327_v2  ;;  %v5095_v59 = vmul.f32 %v5031_v62, %v14327_v2  ;;  %v5125_v56 = vmul.f32 %v5061_v47, %v14327_v2 }
 0x783   : > { %v5089_v29 = vmul.f32 %v5025_v32, %v14327_v2  ;;  %v5091_v63 = vmul.f32 %v5027_v7, %v14327_v2  ;;  %v5121_v32 = vmul.f32 %v5057_v17, %v14327_v2  ;;  %v14355_v7 = vpop.permute.xlu2 %5795  ;;  %v14366_v17 = vpop.permute.xlu0 %5800 }
 0x784   : > { %v5317_v40 = vmul.f32 %v17017_v20, %v5093_v22  ;;  %v5319_v4 = vmul.f32 %v17018_v42, %v5095_v59  ;;  %v5349_v62 = vmul.f32 %v17019_v44, %v5125_v56  ;;  %v5351_v47 = vmul.f32 %v17020_v9, %v5127_v11  ;;  %17023 = vst [vmem:[#allocation90_spill] sm:$0xff] %v14355_v7  ;;  %v17025_v22 = vld [vmem:[#allocation149_spill] sm:$0xff]  ;;  %v17026_v42 = vld [vmem:[#allocation155_spill] sm:$0xff] }
 0x785   : > { %v5313_v14 = vmul.f32 %v17021_v33, %v5089_v29  ;;  %v5315_v46 = vmul.f32 %v17022_v6, %v5091_v63  ;;  %v17027_v56 = vld [vmem:[#allocation103_spill] sm:$0xff]  ;;  %v5053_v9 = vsub.f32 %v14223_v25, %v14272_v23  ;;  %v17029_v29 = vld [vmem:[#allocation146_spill] sm:$0xff]  ;;  %v5123_v63 = vmul.f32 %v5059_v27, %v14327_v2  ;;  %17030 = vst [vmem:[#allocation34_spill] sm:$0xff] %v14366_v17  ;;  %v5919_v6 = vpop.f32.mrf.mxu2  ;;  %v5968_v25 = vpop.f32.mrf.mxu3 }
 0x786   : > { %v5541_v12 = vadd.f32 %v17024_v37, %v5317_v40  ;;  %v5543_v20 = vadd.f32 %v17025_v22, %v5319_v4  ;;  %v5573_v59 = vadd.f32 %v17026_v42, %v5349_v62  ;;  %v5575_v44 = vadd.f32 %v17027_v56, %v5351_v47  ;;  %v17031_v42 = vld [vmem:[#allocation153_spill] sm:$0xff] }
 0x787   : > { %v5537_v11 = vadd.f32 %v17028_v16, %v5313_v14  ;;  %v5539_v33 = vadd.f32 %v17029_v29, %v5315_v46  ;;  %v5920_v62 = vadd.f32 %v5919_v6, %v14281_v49  ;;  %v5345_v56 = vmul.f32 %v17031_v42, %v5121_v32  ;;  %v17032_v16 = vld [vmem:[#allocation26_spill] sm:$0xff] }
 0x788   : > { %v5605_v30 = vmax.f32 %v5541_v12, 0.0  ;;  %v5607_v37 = vmax.f32 %v5543_v20, 0.0  ;;  %v5637_v40 = vmax.f32 %v5573_v59, 0.0  ;;  %v5639_v4 = vmax.f32 %v5575_v44, 0.0  ;;  %v17033_v20 = vld [vmem:[#allocation161_spill] sm:$0xff] }
 0x789   : > { %v5601_v22 = vmax.f32 %v5537_v11, 0.0  ;;  %v5603_v47 = vmax.f32 %v5539_v33, 0.0  ;;  %v5347_v46 = vmul.f32 %v17032_v16, %v5123_v63  ;;  %v5085_v27 = vmul.f32 %v5021_v61, %v14327_v2  ;;  %v17034_v11 = vld [vmem:[#allocation99_spill] sm:$0xff]  ;;  %v17035_v33 = vld [vmem:[#allocation156_spill] sm:$0xff]  ;;  %v17040_v16 = vld [vmem:[#allocation94_spill] sm:$0xff] }
 0x78a   : > { %v5655_v39 = vpack.c.bf16 %v5607_v37, %v5605_v30  ;;  %v5671_v14 = vpack.c.bf16 %v5639_v4, %v5637_v40  ;;  %v5055_v29 = vsub.f32 %v14232_v57, %v14272_v23  ;;  %v14374_v12 = vadd.f32 %v5968_v25, %v5920_v62  ;;  %v17036_v37 = vld [vmem:[#allocation168_spill] sm:$0xff]  ;;  %v14384_v4 = vpop.permute.xlu1 %5805 }
 0x78b   : > { %v5569_v59 = vadd.f32 %v17033_v20, %v5345_v56  ;;  %v5087_v44 = vmul.f32 %v5023_v18, %v14327_v2  ;;  %v5571_v32 = vadd.f32 %v17034_v11, %v5347_v46  ;;  %v5309_v30 = vmul.f32 %v17035_v33, %v5085_v27  ;;  %17037 = vst [vmem:[#allocation124_spill] sm:$0xff] %v14384_v4  ;;  %v17038_v62 = vld [vmem:[#allocation144_spill] sm:$0xff]  ;;  %v17039_v56 = vld [vmem:[#allocation151_spill] sm:$0xff]  ;;  %v14400_v27 = vpop.permute.xlu2 %5810  ;;  %v17045_v11 = vld [vmem:[#allocation189_spill] sm:$0xff] }
 0x78c   : > { %5996 = vmatpush.bf16.msra.mxu0 %v5655_v39  ;;  %7637 = vmatpush.bf16.msra.mxu2 %v5655_v39  ;;  %v5117_v6 = vmul.f32 %v5053_v9, %v14327_v2  ;;  %v5049_v61 = vsub.f32 %v14209_v51, %v14272_v23  ;;  %v5653_v57 = vpack.c.bf16 %v5603_v47, %v5601_v22 }
 0x78d   : > { %6045 = vmatpush.bf16.msra.mxu1 %v5671_v14  ;;  %7645 = vmatpush.bf16.msra.mxu3 %v5671_v14  ;;  %v5633_v63 = vmax.f32 %v5569_v59, 0.0  ;;  %v5311_v40 = vmul.f32 %v17036_v37, %v5087_v44  ;;  %v5635_v18 = vmax.f32 %v5571_v32, 0.0  ;;  %v5533_v39 = vadd.f32 %v17038_v62, %v5309_v30  ;;  %17043 = vst [vmem:[#allocation137_spill] sm:$0xff] %v14400_v27  ;;  %v17046_v30 = vld [vmem:[#allocation118_spill] sm:$0xff]  ;;  %v17047_v37 = vld [vmem:[#allocation172_spill] sm:$0xff]  ;;  %v5971_v62 = vpop.f32.mrf.mxu3 }
 0x78e   : > { %v5119_v42 = vmul.f32 %v5055_v29, %v14327_v2  ;;  %v5341_v25 = vmul.f32 %v17039_v56, %v5117_v6  ;;  %v5051_v9 = vsub.f32 %v14216_v15, %v14272_v23  ;;  %v17041_v22 = vsub.f32 %v13809_v28, %v14272_v23  ;;  %v5922_v29 = vpop.f32.mrf.mxu2  ;;  %v17044_v15 = vld [vmem:[#allocation85_spill] sm:$0xff]  ;;  %v17049_v56 = vld [vmem:[#allocation140_spill] sm:$0xff] }
 0x78f   : > { %v5535_v51 = vadd.f32 %v17040_v16, %v5311_v40  ;;  %v17042_v14 = vsub.f32 %v14064_v38, %v14272_v23  ;;  %v5669_v20 = vpack.c.bf16 %v5635_v18, %v5633_v63  ;;  %v5597_v59 = vmax.f32 %v5533_v39, 0.0  ;;  %v14407_v38 = vpop.permute.xlu0 %5815  ;;  %v17050_v16 = vld [vmem:[#allocation14_spill] sm:$0xff] }
 0x790   : > { %v5081_v47 = vmul.f32 %v17041_v22, %v14327_v2  ;;  %5997 = vmatpush.bf16.msra.mxu0 %v5653_v57  ;;  %7638 = vmatpush.bf16.msra.mxu2 %v5653_v57  ;;  %v5343_v44 = vmul.f32 %v17044_v15, %v5119_v42  ;;  %v5565_v32 = vadd.f32 %v17045_v11, %v5341_v25  ;;  %v17051_v22 = vld [vmem:[#allocation45_spill] sm:$0xff]  ;;  %v17053_v15 = vld [vmem:[#allocation47_spill] sm:$0xff] }
 0x791   : > { %v5083_v46 = vmul.f32 %v17042_v14, %v14327_v2  ;;  %v5923_v33 = vadd.f32 %v5922_v29, %v14286_v52  ;;  %v5599_v28 = vmax.f32 %v5535_v51, 0.0  ;;  %17048 = vst [vmem:[#allocation83_spill] sm:$0xff] %v14407_v38  ;;  %6046 = vmatpush.bf16.msra.mxu1 %v5669_v20  ;;  %7646 = vmatpush.bf16.msra.mxu3 %v5669_v20  ;;  %v17120_v52 = vld [vmem:[#allocation21_spill] sm:$0xff] }
 0x792   : > { %v5305_v6 = vmul.f32 %v17046_v30, %v5081_v47  ;;  %v5567_v57 = vadd.f32 %v17049_v56, %v5343_v44  ;;  %v5629_v63 = vmax.f32 %v5565_v32, 0.0  ;;  %v5113_v18 = vmul.f32 %v5049_v61, %v14327_v2  ;;  %v17058_v56 = vld [vmem:[#allocation167_spill] sm:$0xff] }
 0x793   : > { %v5307_v40 = vmul.f32 %v17047_v37, %v5083_v46  ;;  %v5115_v39 = vmul.f32 %v5051_v9, %v14327_v2  ;;  %v14412_v42 = vadd.f32 %v5971_v62, %v5923_v33  ;;  %v5651_v25 = vpack.c.bf16 %v5599_v28, %v5597_v59  ;;  %v17052_v46 = vld [vmem:[#allocation49_spill] sm:$0xff]  ;;  %v17055_v28 = vld [vmem:[#allocation210_spill] sm:$0xff] }
 0x794   : > { %v5529_v51 = vadd.f32 %v17050_v16, %v5305_v6  ;;  %v5631_v14 = vmax.f32 %v5567_v57, 0.0  ;;  %v5337_v29 = vmul.f32 %v17052_v46, %v5113_v18  ;;  %v17054_v20 = vsub.f32 %v13771_v21, %v14272_v23  ;;  %v17056_v6 = vld [vmem:[#allocation12_spill] sm:$0xff]  ;;  %v14436_v18 = vpop.permute.xlu1 %6306  ;;  %v17060_v16 = vld [vmem:[#allocation186_spill] sm:$0xff] }
 0x795   : > { %v5531_v47 = vadd.f32 %v17051_v22, %v5307_v40  ;;  %v5339_v11 = vmul.f32 %v17053_v15, %v5115_v39  ;;  %v5045_v61 = vsub.f32 %v14191_v24, %v14272_v23  ;;  %v5047_v9 = vsub.f32 %v14200_v8, %v14272_v23  ;;  %5998 = vmatpush.bf16.msra.mxu0 %v5651_v25  ;;  %v5973_v15 = vpop.f32.mrf.mxu3 }
 0x796   : > { %v5077_v44 = vmul.f32 %v17054_v20, %v14327_v2  ;;  %7639 = vmatpush.bf16.msra.mxu2 %v5651_v25  ;;  %v5593_v59 = vmax.f32 %v5529_v51, 0.0  ;;  %v5667_v33 = vpack.c.bf16 %v5631_v14, %v5629_v63  ;;  %v5561_v30 = vadd.f32 %v17055_v28, %v5337_v29  ;;  %17059 = vst [vmem:[#allocation142_spill] sm:$0xff] %v14436_v18  ;;  %v5924_v63 = vpop.f32.mrf.mxu2  ;;  %v17062_v14 = vld [vmem:[#allocation80_spill] sm:$0xff]  ;;  %v14443_v29 = vpop.permute.xlu2 %6311  ;;  %v17064_v20 = vld [vmem:[#allocation98_spill] sm:$0xff] }
 0x797   : > { %v5595_v32 = vmax.f32 %v5531_v47, 0.0  ;;  %v5563_v37 = vadd.f32 %v17056_v6, %v5339_v11  ;;  %v17057_v21 = vsub.f32 %v13796_v0, %v14272_v23  ;;  %v5043_v24 = vsub.f32 %v14182_v35, %v14272_v23  ;;  %v17061_v35 = vld [vmem:[#allocation139_spill] sm:$0xff]  ;;  %17063 = vst [vmem:[#allocation92_spill] sm:$0xff] %v14443_v29 }
 0x798   : > { %v5301_v8 = vmul.f32 %v17058_v56, %v5077_v44  ;;  %v5109_v57 = vmul.f32 %v5045_v61, %v14327_v2  ;;  %6047 = vmatpush.bf16.msra.mxu1 %v5667_v33  ;;  %7647 = vmatpush.bf16.msra.mxu3 %v5667_v33  ;;  %v5625_v39 = vmax.f32 %v5561_v30, 0.0  ;;  %v5111_v0 = vmul.f32 %v5047_v9, %v14327_v2  ;;  %v17065_v61 = vld [vmem:[#allocation43_spill] sm:$0xff]  ;;  %v17067_v30 = vld [vmem:[#allocation154_spill] sm:$0xff] }
 0x799   : > { %v5079_v40 = vmul.f32 %v17057_v21, %v14327_v2  ;;  %v5649_v62 = vpack.c.bf16 %v5595_v32, %v5593_v59  ;;  %v5627_v25 = vmax.f32 %v5563_v37, 0.0  ;;  %v5925_v22 = vadd.f32 %v5924_v63, %v14291_v50  ;;  %v17069_v56 = vld [vmem:[#allocation115_spill] sm:$0xff]  ;;  %v17119_v50 = vld [vmem:[#allocation68_spill] sm:$0xff] }
 0x79a   : > { %v5525_v47 = vadd.f32 %v17061_v35, %v5301_v8  ;;  %v5333_v46 = vmul.f32 %v17062_v14, %v5109_v57  ;;  %v5335_v59 = vmul.f32 %v17065_v61, %v5111_v0  ;;  %v17066_v9 = vsub.f32 %v13710_v3, %v14272_v23  ;;  %v17070_v57 = vld [vmem:[#allocation165_spill] sm:$0xff]  ;;  %v17077_v61 = vld [vmem:[#allocation147_spill] sm:$0xff] }
 0x79b   : > { %v5303_v51 = vmul.f32 %v17060_v16, %v5079_v40  ;;  %5999 = vmatpush.bf16.msra.mxu0 %v5649_v62  ;;  %7640 = vmatpush.bf16.msra.mxu2 %v5649_v62  ;;  %v5665_v11 = vpack.c.bf16 %v5627_v25, %v5625_v39  ;;  %v14451_v33 = vadd.f32 %v5973_v15, %v5925_v22  ;;  %v14458_v40 = vpop.permute.xlu0 %6316  ;;  %v17072_v25 = vld [vmem:[#allocation106_spill] sm:$0xff] }
 0x79c   : > { %v5073_v32 = vmul.f32 %v17066_v9, %v14327_v2  ;;  %v5589_v28 = vmax.f32 %v5525_v47, 0.0  ;;  %v5557_v6 = vadd.f32 %v17067_v30, %v5333_v46  ;;  %v17068_v37 = vsub.f32 %v13742_v31, %v14272_v23  ;;  %v17073_v31 = vld [vmem:[#allocation163_spill] sm:$0xff]  ;;  %v17074_v22 = vld [vmem:[#allocation30_spill] sm:$0xff]  ;;  %v17075_v46 = vld [vmem:[#allocation148_spill] sm:$0xff] }
 0x79d   : > { %v5527_v44 = vadd.f32 %v17064_v20, %v5303_v51  ;;  %6048 = vmatpush.bf16.msra.mxu1 %v5665_v11  ;;  %7648 = vmatpush.bf16.msra.mxu3 %v5665_v11  ;;  %v5559_v8 = vadd.f32 %v17069_v56, %v5335_v59  ;;  %v17071_v63 = vsub.f32 %v13945_v10, %v14272_v23  ;;  %v17076_v10 = vld [vmem:[#allocation174_spill] sm:$0xff] }
 0x79e   : > { %v5075_v21 = vmul.f32 %v17068_v37, %v14327_v2  ;;  %v5297_v3 = vmul.f32 %v17070_v57, %v5073_v32  ;;  %v5005_v16 = vsub.f32 %v17072_v25, %v14272_v23  ;;  %v5007_v51 = vsub.f32 %v17073_v31, %v14272_v23  ;;  %v14478_v32 = vpop.f32.mrf.mxu2 }
 0x79f   : > { %v5591_v62 = vmax.f32 %v5527_v44, 0.0  ;;  %v5105_v39 = vmul.f32 %v17071_v63, %v14327_v2  ;;  %v5621_v0 = vmax.f32 %v5557_v6, 0.0  ;;  %v5623_v14 = vmax.f32 %v5559_v8, 0.0  ;;  %v17078_v6 = vld [vmem:[#allocation6_spill] sm:$0xff]  ;;  %v17080_v8 = vld [vmem:[#allocation112_spill] sm:$0xff]  ;;  %v14488_v63 = vpop.f32.mrf.mxu3 }
 0x7a0   : > { %v5299_v35 = vmul.f32 %v17074_v22, %v5075_v21  ;;  %v5521_v15 = vadd.f32 %v17075_v46, %v5297_v3  ;;  %v5107_v11 = vmul.f32 %v5043_v24, %v14327_v2  ;;  %v5037_v20 = vsub.f32 %v13917_v41, %v14272_v23  ;;  %v14486_v3 = vpop.permute.xlu1 %6321  ;;  %v14496_v46 = vpop.permute.xlu2 %6326 }
 0x7a1   : > { %v5647_v47 = vpack.c.bf16 %v5591_v62, %v5589_v28  ;;  %v5329_v59 = vmul.f32 %v17077_v61, %v5105_v39  ;;  %v5069_v9 = vmul.f32 %v5005_v16, %v14327_v2  ;;  %v5663_v30 = vpack.c.bf16 %v5623_v14, %v5621_v0  ;;  %v17079_v62 = vld [vmem:[#allocation44_spill] sm:$0xff]  ;;  %17081 = vst [vmem:[#allocation185_spill] sm:$0xff] %v14486_v3  ;;  %v17082_v39 = vld [vmem:[#allocation150_spill] sm:$0xff]  ;;  %v17087_v61 = vld [vmem:[#allocation209_spill] sm:$0xff] }
 0x7a2   : > { %v5523_v44 = vadd.f32 %v17076_v10, %v5299_v35  ;;  %v5585_v28 = vmax.f32 %v5521_v15, 0.0  ;;  %v5331_v37 = vmul.f32 %v17078_v6, %v5107_v11  ;;  %v5071_v21 = vmul.f32 %v5007_v51, %v14327_v2  ;;  %v17083_v16 = vld [vmem:[#allocation190_spill] sm:$0xff]  ;;  %v17084_v0 = vld [vmem:[#allocation100_spill] sm:$0xff] }
 0x7a3   : > { %6000 = vmatpush.bf16.msra.mxu0 %v5647_v47  ;;  %7641 = vmatpush.bf16.msra.mxu2 %v5647_v47  ;;  %v5039_v24 = vsub.f32 %v14165_v58, %v14272_v23  ;;  %v5553_v56 = vadd.f32 %v17079_v62, %v5329_v59  ;;  %v5293_v57 = vmul.f32 %v17080_v8, %v5069_v9  ;;  %v17085_v47 = vld [vmem:[#allocation178_spill] sm:$0xff] }
 0x7a4   : > { %v5587_v41 = vmax.f32 %v5523_v44, 0.0  ;;  %6049 = vmatpush.bf16.msra.mxu1 %v5663_v30  ;;  %7649 = vmatpush.bf16.msra.mxu3 %v5663_v30  ;;  %v5555_v25 = vadd.f32 %v17082_v39, %v5331_v37  ;;  %v5295_v31 = vmul.f32 %v17083_v16, %v5071_v21  ;;  %v5101_v51 = vmul.f32 %v5037_v20, %v14327_v2  ;;  %v17086_v11 = vld [vmem:[#allocation130_spill] sm:$0xff]  ;;  %v14509_v37 = vpop.permute.xlu0 %6331 }
 0x7a5   : > { %v5003_v58 = vsub.f32 %v17084_v0, %v14272_v23  ;;  %v5617_v35 = vmax.f32 %v5553_v56, 0.0  ;;  %v5517_v14 = vadd.f32 %v17085_v47, %v5293_v57  ;;  %v5103_v44 = vmul.f32 %v5039_v24, %v14327_v2  ;;  %17089 = vst [vmem:[#allocation119_spill] sm:$0xff] %v14509_v37  ;;  %v17091_v56 = vld [vmem:[#allocation91_spill] sm:$0xff]  ;;  %v17094_v0 = vld [vmem:[#allocation152_spill] sm:$0xff] }
 0x7a6   : > { %v5645_v22 = vpack.c.bf16 %v5587_v41, %v5585_v28  ;;  %v5619_v15 = vmax.f32 %v5555_v25, 0.0  ;;  %v5519_v10 = vadd.f32 %v17086_v11, %v5295_v31  ;;  %v5325_v59 = vmul.f32 %v17087_v61, %v5101_v51  ;;  %v17090_v41 = vld [vmem:[#allocation65_spill] sm:$0xff]  ;;  %v17092_v57 = vld [vmem:[#allocation179_spill] sm:$0xff]  ;;  %v14516_v25 = vpop.f32.mrf.mxu2 }
 0x7a7   : > { %v5033_v9 = vsub.f32 %v13889_v36, %v14272_v23  ;;  %v5035_v20 = vsub.f32 %v14142_v48, %v14272_v23  ;;  %v5581_v30 = vmax.f32 %v5517_v14, 0.0  ;;  %v17088_v28 = vsub.f32 %v17012_v1, %v14272_v23  ;;  %v17093_v1 = vld [vmem:[#allocation145_spill] sm:$0xff]  ;;  %v17096_v14 = vld [vmem:[#allocation78_spill] sm:$0xff]  ;;  %v17098_v61 = vld [vmem:[#allocation7_spill] sm:$0xff] }
 0x7a8   : > { %6001 = vmatpush.bf16.msra.mxu0 %v5645_v22  ;;  %7642 = vmatpush.bf16.msra.mxu2 %v5645_v22  ;;  %v5661_v21 = vpack.c.bf16 %v5619_v15, %v5617_v35  ;;  %v5583_v24 = vmax.f32 %v5519_v10, 0.0  ;;  %v5327_v62 = vmul.f32 %v17090_v41, %v5103_v44  ;;  %v5549_v8 = vadd.f32 %v17091_v56, %v5325_v59  ;;  %v17095_v35 = vld [vmem:[#allocation15_spill] sm:$0xff]  ;;  %v14523_v15 = vpop.f32.mrf.mxu3  ;;  %v17097_v10 = vld [vmem:[#allocation64_spill] sm:$0xff] }
 0x7a9   : > { %v5065_v6 = vmul.f32 %v17088_v28, %v14327_v2  ;;  %v5067_v36 = vmul.f32 %v5003_v58, %v14327_v2  ;;  %v5097_v39 = vmul.f32 %v5033_v9, %v14327_v2  ;;  %v5099_v51 = vmul.f32 %v5035_v20, %v14327_v2  ;;  %v17101_v20 = vld [vmem:[#allocation132_spill] sm:$0xff] }
 0x7aa   : > { %6050 = vmatpush.bf16.msra.mxu1 %v5661_v21  ;;  %7650 = vmatpush.bf16.msra.mxu3 %v5661_v21  ;;  %v5643_v23 = vpack.c.bf16 %v5583_v24, %v5581_v30  ;;  %v5551_v16 = vadd.f32 %v17093_v1, %v5327_v62  ;;  %v5613_v31 = vmax.f32 %v5549_v8, 0.0  ;;  %v17099_v30 = vld [vmem:[#allocation97_spill] sm:$0xff]  ;;  %v14531_v62 = vpop.permute.xlu2 %6341  ;;  %v17103_v1 = vld [vmem:[#allocation74_spill] sm:$0xff] }
 0x7ab   : > { %v5289_v48 = vmul.f32 %v17092_v57, %v5065_v6  ;;  %v5291_v22 = vmul.f32 %v17094_v0, %v5067_v36  ;;  %v5321_v58 = vmul.f32 %v17096_v14, %v5097_v39  ;;  %v5323_v44 = vmul.f32 %v17097_v10, %v5099_v51  ;;  %v14528_v6 = vpop.permute.xlu1 %6336 }
 0x7ac   : > { %6002 = vmatpush.bf16.msra.mxu0 %v5643_v23  ;;  %7643 = vmatpush.bf16.msra.mxu2 %v5643_v23  ;;  %v5615_v11 = vmax.f32 %v5551_v16, 0.0  ;;  %17100 = vst [vmem:[#allocation8_spill] sm:$0xff] %v14528_v6  ;;  %v14533_v36 = vpop.permute.xlu0 %6346  ;;  %v17102_v23 = vld [vmem:[#allocation127_spill] sm:$0xff]  ;;  %v6142_v14 = vmul.f32 %v14288_v26, %v14288_v26 }
 0x7ad   : > { %v5513_v47 = vadd.f32 %v17095_v35, %v5289_v48  ;;  %v5515_v59 = vadd.f32 %v17098_v61, %v5291_v22  ;;  %v5545_v28 = vadd.f32 %v17099_v30, %v5321_v58  ;;  %v5547_v21 = vadd.f32 %v17101_v20, %v5323_v44  ;;  %v17105_v20 = vld [vmem:[#allocation138_spill] sm:$0xff] }
 0x7ae   : > { %v5659_v2 = vpack.c.bf16 %v5615_v11, %v5613_v31  ;;  %v5932_v48 = vpop.f32.mrf.mxu2  ;;  %v6140_v35 = vmul.f32 %v14283_v60, %v14283_v60  ;;  %v6094_v58 = vadd.f32 %v14283_v60, %v14266_v55  ;;  %v6144_v44 = vmul.f32 %v14293_v45, %v14293_v45 }
 0x7af   : > { %v5577_v9 = vmax.f32 %v5513_v47, 0.0  ;;  %v5579_v24 = vmax.f32 %v5515_v59, 0.0  ;;  %v5609_v41 = vmax.f32 %v5545_v28, 0.0  ;;  %v5611_v56 = vmax.f32 %v5547_v21, 0.0 }
 0x7b0   : > { %6051 = vmatpush.bf16.msra.mxu1 %v5659_v2  ;;  %7651 = vmatpush.bf16.msra.mxu3 %v5659_v2  ;;  %v5981_v39 = vpop.f32.mrf.mxu3  ;;  %v6095_v59 = vadd.f32 %v6094_v58, %v14288_v26  ;;  %v6146_v28 = vmul.f32 %v14340_v34, %v14340_v34  ;;  %v5928_v2 = vadd.f32 %v14478_v32, %v14295_v13 }
 0x7b1   : > { %v5641_v8 = vpack.c.bf16 %v5579_v24, %v5577_v9  ;;  %v5657_v57 = vpack.c.bf16 %v5611_v56, %v5609_v41  ;;  %v17106_v24 = vld [vmem:[#allocation184_spill] sm:$0xff]  ;;  %v6148_v56 = vmul.f32 %v14374_v12, %v14374_v12 }
 0x7b2   : > { %v14541_v31 = vpop.permute.xlu2 %6356  ;;  %v6096_v21 = vadd.f32 %v6095_v59, %v14293_v45  ;;  %v14577_v32 = vadd.f32 %v14488_v63, %v5928_v2 }
 0x7b3   : > { %6003 = vmatpush.bf16.msra.mxu0 %v5641_v8  ;;  %7644 = vmatpush.bf16.msra.mxu2 %v5641_v8  ;;  %v14539_v16 = vpop.permute.xlu1 %6351 }
 0x7b4   : > { %6052 = vmatpush.bf16.msra.mxu1 %v5657_v57  ;;  %7652 = vmatpush.bf16.msra.mxu3 %v5657_v57  ;;  %v14543_v0 = vpop.permute.xlu0 %6361  ;;  %v6097_v8 = vadd.f32 %v6096_v21, %v14340_v34  ;;  %v5930_v57 = vadd.f32 %v14516_v25, %v14305_v19 }
 0x7b6   : > { %6004 = vmatmul.bf16.vlgmr.msra.gmra.mxu0 %v17102_v23  ;;  %6039 = vmatmul.bf16.vlgmr.msra.gmra.mxu2 %v14132_v54  ;;  %v5934_v51 = vpop.f32.mrf.mxu2  ;;  %v6138_v54 = vmul.f32 %v14266_v55, %v14266_v55 }
 0x7b7   : > { %6053 = vmatmul.bf16.vlgmr.msra.gmra.mxu1 %v17103_v1  ;;  %6088 = vmatmul.bf16.vlgmr.msra.gmra.mxu3 %v14136_v43  ;;  %v6150_v1 = vmul.f32 %v14412_v42, %v14412_v42  ;;  %v5935_v63 = vadd.f32 %v5934_v51, %v14355_v7 }
 0x7b8   : > { %v5983_v22 = vpop.f32.mrf.mxu3  ;;  %v6170_v10 = vadd.f32 %v6140_v35, %v6138_v54  ;;  %v6098_v54 = vadd.f32 %v6097_v8, %v14374_v12 }
 0x7b9   : > { %v14603_v8 = vadd.f32 %v5983_v22, %v5935_v63 }
 0x7ba   : > { %v14555_v11 = vpop.permute.xlu2 %6371  ;;  %v6171_v30 = vadd.f32 %v6170_v10, %v6142_v14  ;;  %v5933_v14 = vadd.f32 %v5932_v48, %v14344_v5  ;;  %v6099_v25 = vadd.f32 %v6098_v54, %v14412_v42  ;;  %v6154_v48 = vmul.f32 %v14577_v32, %v14577_v32 }
 0x7bb   : > { %v14547_v47 = vpop.permute.xlu1 %6366  ;;  %v6160_v22 = vmul.f32 %v14603_v8, %v14603_v8 }
 0x7bc   : > { %v14560_v9 = vpop.permute.xlu0 %6376  ;;  %v6172_v41 = vadd.f32 %v6171_v30, %v6144_v44  ;;  %v6152_v44 = vmul.f32 %v14451_v33, %v14451_v33  ;;  %v14587_v30 = vadd.f32 %v14523_v15, %v5930_v57  ;;  %v14595_v21 = vadd.f32 %v5981_v39, %v5933_v14 }
 0x7bd   : > { %17104 = vst [vmem:[#allocation122_spill] sm:$0xff] %v14560_v9 }
 0x7be   : > { %v5937_v43 = vpop.f32.mrf.mxu2  ;;  %v6173_v23 = vadd.f32 %v6172_v41, %v6146_v28  ;;  %v6156_v51 = vmul.f32 %v14587_v30, %v14587_v30  ;;  %v6158_v39 = vmul.f32 %v14595_v21, %v14595_v21 }
 0x7c0   : > { %v5986_v61 = vpop.f32.mrf.mxu3  ;;  %v6174_v10 = vadd.f32 %v6173_v23, %v6148_v56 }
 0x7c2   : > { %v14590_v28 = vpop.permute.xlu2 %6418  ;;  %v6175_v2 = vadd.f32 %v6174_v10, %v6150_v1 }
 0x7c3   : > { %v14581_v58 = vpop.permute.xlu1 %6381 }
 0x7c4   : > { %17107 = vst [vmem:[#allocation86_spill] sm:$0xff] %v14581_v58  ;;  %v14598_v41 = vpop.permute.xlu0 %6423  ;;  %v6176_v56 = vadd.f32 %v6175_v2, %v6152_v44  ;;  %v17109_v2 = vld [vmem:[#allocation206_spill] sm:$0xff] }
 0x7c5   : > { %17108 = vst [vmem:[#allocation134_spill] sm:$0xff] %v14598_v41 }
 0x7c6   : > { %6009 = vmatmul.bf16.gmra.mxu0 %v17105_v20  ;;  %v5939_v35 = vpop.f32.mrf.mxu2  ;;  %v6100_v20 = vadd.f32 %v6099_v25, %v14451_v33  ;;  %v6177_v23 = vadd.f32 %v6176_v56, %v6154_v48  ;;  %v17110_v56 = vld [vmem:[#allocation187_spill] sm:$0xff] }
 0x7c7   : > { %6058 = vmatmul.bf16.gmra.mxu1 %v17106_v24  ;;  %v5938_v24 = vadd.f32 %v5937_v43, %v14366_v17  ;;  %v5940_v57 = vadd.f32 %v5939_v35, %v14384_v4 }
 0x7c8   : > { %v5988_v59 = vpop.f32.mrf.mxu3  ;;  %v6101_v15 = vadd.f32 %v6100_v20, %v14577_v32  ;;  %v6178_v44 = vadd.f32 %v6177_v23, %v6156_v51 }
 0x7c9   : > { %v14609_v43 = vadd.f32 %v5986_v61, %v5938_v24  ;;  %v14615_v63 = vadd.f32 %v5988_v59, %v5940_v57 }
 0x7ca   : > { %v6102_v54 = vadd.f32 %v6101_v15, %v14587_v30  ;;  %v6179_v48 = vadd.f32 %v6178_v44, %v6158_v39  ;;  %v14626_v15 = vpop.permute.xlu2 %6433 }
 0x7cb   : > { %v14617_v35 = vpop.permute.xlu1 %6428  ;;  %v6162_v61 = vmul.f32 %v14609_v43, %v14609_v43  ;;  %v6164_v57 = vmul.f32 %v14615_v63, %v14615_v63 }
 0x7cc   : > { %v6103_v25 = vadd.f32 %v6102_v54, %v14595_v21  ;;  %v6180_v51 = vadd.f32 %v6179_v48, %v6160_v22  ;;  %v14631_v23 = vpop.permute.xlu0 %6438 }
 0x7ce   : > { %v5942_v1 = vpop.f32.mrf.mxu2  ;;  %v6104_v20 = vadd.f32 %v6103_v25, %v14603_v8  ;;  %v6181_v54 = vadd.f32 %v6180_v51, %v6162_v61 }
 0x7cf   : > { %v5943_v14 = vadd.f32 %v5942_v1, %v14400_v27 }
 0x7d0   : > { %v5991_v10 = vpop.f32.mrf.mxu3  ;;  %v6105_v59 = vadd.f32 %v6104_v20, %v14609_v43  ;;  %v6182_v25 = vadd.f32 %v6181_v54, %v6164_v57 }
 0x7d1   : > { %v14623_v24 = vadd.f32 %v5991_v10, %v5943_v14 }
 0x7d2   : > { %v6106_v39 = vadd.f32 %v6105_v59, %v14615_v63  ;;  %v14645_v4 = vpop.permute.xlu2 %6448 }
 0x7d3   : > { %v6166_v14 = vmul.f32 %v14623_v24, %v14623_v24  ;;  %v14643_v61 = vpop.permute.xlu1 %6443 }
 0x7d4   : > { %v6107_v22 = vadd.f32 %v6106_v39, %v14623_v24  ;;  %v17111_v39 = vld [vmem:[#allocation160_spill] sm:$0xff] }
 0x7d5   : > { %v6183_v48 = vadd.f32 %v6182_v25, %v6166_v14 }
 0x7d6   : > { %6014 = vmatmul.bf16.gmra.mxu0 %v17109_v2  ;;  %v5944_v1 = vpop.f32.mrf.mxu2 }
 0x7d7   : > { %6063 = vmatmul.bf16.gmra.mxu1 %v17110_v56  ;;  %v5945_v10 = vadd.f32 %v5944_v1, %v14407_v38  ;;  %v14647_v38 = vpop.permute.xlu0 %6453 }
 0x7d8   : > { %v5993_v44 = vpop.f32.mrf.mxu3 }
 0x7d9   : > { %v14638_v2 = vadd.f32 %v5993_v44, %v5945_v10  ;;  %v17112_v44 = vld [vmem:[#allocation159_spill] sm:$0xff] }
 0x7db   : > { %v6108_v20 = vadd.f32 %v6107_v22, %v14638_v2  ;;  %v6168_v56 = vmul.f32 %v14638_v2, %v14638_v2  ;;  %v14651_v17 = vpop.permute.xlu1 %6458 }
 0x7dd   : > { %v6109_v51 = vrot.slane %v6108_v20, 4  ;;  %v6184_v59 = vadd.f32 %v6183_v48, %v6168_v56  ;;  %v14653_v56 = vpop.permute.xlu2 %6463 }
 0x7df   : > { %v6110_v27 = vadd.f32 %v6109_v51, %v6108_v20  ;;  %v6185_v1 = vrot.slane %v6184_v59, 4  ;;  %v14657_v5 = vpop.permute.xlu0 %6468 }
 0x7e1   : > { %v6111_v57 = vrot.slane %v6110_v27, 2  ;;  %v6186_v54 = vadd.f32 %v6185_v1, %v6184_v59 }
 0x7e3   : > { %v6112_v14 = vadd.f32 %v6111_v57, %v6110_v27  ;;  %v6187_v10 = vrot.slane %v6186_v54, 2 }
 0x7e5   : > { %v6113_v25 = vrot.slane %v6112_v14, 1  ;;  %v6188_v22 = vadd.f32 %v6187_v10, %v6186_v54  ;;  %v14663_v54 = vpop.permute.xlu2 %6478  ;;  %v17115_v10 = vld [vmem:[#allocation35_spill] sm:$0xff] }
 0x7e6   : > { %6019 = vmatmul.bf16.gmra.mxu0 %v17111_v39  ;;  %v14661_v39 = vpop.permute.xlu1 %6473  ;;  %17113 = vst [vmem:[#allocation141_spill] sm:$0xff] %v14663_v54 }
 0x7e7   : > { %6068 = vmatmul.bf16.gmra.mxu1 %v17112_v44  ;;  %v6114_v7 = vadd.f32 %v6113_v25, %v6112_v14  ;;  %v6189_v48 = vrot.slane %v6188_v22, 1  ;;  %v17114_v14 = vld [vmem:[#allocation181_spill] sm:$0xff] }
 0x7e9   : > { %v14655_v20 = vmul.f32 0.01, %v6114_v7  ;;  %v6190_v51 = vadd.f32 %v6189_v48, %v6188_v22  ;;  %v14667_v7 = vpop.permute.xlu0 %6483 }
 0x7ea   : > { %17116 = vst [vmem:[#allocation101_spill] sm:$0xff] %v14667_v7 }
 0x7eb   : > { %v6212_v59 = vmul.f32 0.01, %v6190_v51  ;;  %v6214_v27 = vmul.f32 %v14655_v20, %v14655_v20 }
 0x7ed   : > { %v6216_v1 = vsub.f32 %v6212_v59, %v6214_v27  ;;  %v14671_v51 = vpop.permute.xlu2 %6493 }
 0x7ee   : > { %v14669_v22 = vpop.permute.xlu1 %6488  ;;  %17118 = vst [vmem:[#allocation208_spill] sm:$0xff] %v14671_v51 }
 0x7ef   : > { %v6218_v57 = vadd.f32 1e-05, %v6216_v1  ;;  %17117 = vst [vmem:[#allocation32_spill] sm:$0xff] %v14669_v22 }
 0x7f1   : > { %7704 = vrsqrt.f32 %v6218_v57  ;;  %v14673_v27 = vpop.permute.xlu0 %6579  ;;  %vm6226_vm14 = vweird.f32 %v6218_v57 }
 0x7f6   : > { %6024 = vmatmul.bf16.gmra.mxu0 %v17114_v14  ;;  %v6240_v14 = vsub.f32 %v14266_v55, %v14655_v20  ;;  %v6246_v55 = vsub.f32 %v14293_v45, %v14655_v20 }
 0x7f7   : > { %6073 = vmatmul.bf16.gmra.mxu1 %v17115_v10  ;;  %v7705_v44 = vpop.eup %7704  ;;  %v6242_v10 = vsub.f32 %v14283_v60, %v14655_v20 }
 0x7f8   : > { %v6221_v25 = vmul.f32 %v7705_v44, %v6218_v57  ;;  %vm6227_vm13 = vweird.f32 %v7705_v44  ;;  %v6244_v57 = vsub.f32 %v14288_v26, %v14655_v20  ;;  %v6250_v26 = vsub.f32 %v14374_v12, %v14655_v20 }
 0x7f9   : > { %vm6228_vm15 = vmor %vm6226_vm14, %vm6227_vm13  ;;  %v6254_v12 = vsub.f32 %v14451_v33, %v14655_v20 }
 0x7fa   : > { %v6222_v48 = vmul.f32 %v7705_v44, %v6221_v25 }
 0x7fc   : > { %v6223_v59 = vmul.f32 0.5, %v6222_v48 }
 0x7fe   : > { %v6224_v1 = vsub.f32 1.5, %v6223_v59  ;;  %v14685_v59 = vpop.permute.xlu1 %6584 }
 0x7ff   : > { %17121 = vst [vmem:[#allocation67_spill] sm:$0xff] %v14685_v59 }
 0x800   : > { %v6225_v19 = vmul.f32 %v7705_v44, %v6224_v1  ;;  %v14689_v1 = vpop.permute.xlu2 %6589 }
 0x802   : > { %v14679_v13 = vsel %vm6228_vm15, %v7705_v44, %v6225_v19  ;;  %v14696_v44 = vpop.permute.xlu0 %6594 }
 0x803   : > { %v6272_v25 = vmul.f32 %v6240_v14, %v14679_v13  ;;  %v6274_v48 = vmul.f32 %v6242_v10, %v14679_v13  ;;  %v6276_v60 = vmul.f32 %v6244_v57, %v14679_v13  ;;  %v6278_v14 = vmul.f32 %v6246_v55, %v14679_v13 }
 0x805   : > { %v6386_v19 = vmul.f32 %v14443_v29, %v6274_v48  ;;  %v6388_v45 = vmul.f32 %v14458_v40, %v6276_v60  ;;  %v6252_v48 = vsub.f32 %v14412_v42, %v14655_v20  ;;  %v6282_v29 = vmul.f32 %v6250_v26, %v14679_v13 }
 0x806   : > { %6029 = vmatmul.bf16.gmra.mxu0 %v17119_v50  ;;  %v6384_v50 = vmul.f32 %v14436_v18, %v6272_v25  ;;  %v14711_v18 = vpop.permute.xlu1 %6599  ;;  %v6256_v42 = vsub.f32 %v14577_v32, %v14655_v20 }
 0x807   : > { %6078 = vmatmul.bf16.gmra.mxu1 %v17120_v52  ;;  %v6248_v52 = vsub.f32 %v14340_v34, %v14655_v20  ;;  %v6498_v25 = vadd.f32 %v14598_v41, %v6386_v19  ;;  %v6390_v34 = vmul.f32 %v14486_v3, %v6278_v14  ;;  %v6284_v55 = vmul.f32 %v6252_v48, %v14679_v13 }
 0x808   : > { %v6496_v57 = vadd.f32 %v14590_v28, %v6384_v50  ;;  %v6500_v50 = vadd.f32 %v14617_v35, %v6388_v45  ;;  %v14718_v41 = vpop.permute.xlu2 %6604  ;;  %v6286_v14 = vmul.f32 %v6254_v12, %v14679_v13  ;;  %v6394_v26 = vmul.f32 %v14509_v37, %v6282_v29  ;;  %v17123_v37 = vld [vmem:[#allocation20_spill] sm:$0xff] }
 0x809   : > { %v6280_v10 = vmul.f32 %v6248_v52, %v14679_v13  ;;  %v6530_v19 = vmax.f32 %v6498_v25, 0.0  ;;  %v6502_v3 = vadd.f32 %v14626_v15, %v6390_v34  ;;  %v6288_v45 = vmul.f32 %v6256_v42, %v14679_v13  ;;  %v17122_v25 = vld [vmem:[#allocation42_spill] sm:$0xff] }
 0x80a   : > { %v6528_v52 = vmax.f32 %v6496_v57, 0.0  ;;  %v14725_v33 = vpop.permute.xlu0 %6609  ;;  %v6396_v57 = vmul.f32 %v14528_v6, %v6284_v55  ;;  %v6532_v32 = vmax.f32 %v6500_v50, 0.0  ;;  %v6260_v34 = vsub.f32 %v14595_v21, %v14655_v20 }
 0x80b   : > { %v6392_v60 = vmul.f32 %v14496_v46, %v6280_v10  ;;  %v6258_v10 = vsub.f32 %v14587_v30, %v14655_v20  ;;  %v6659_v29 = vmul.f32 %v14685_v59, %v6530_v19  ;;  %v6398_v42 = vmul.f32 %v14531_v62, %v6286_v14 }
 0x80c   : > { %v6657_v12 = vmul.f32 %v14673_v27, %v6528_v52  ;;  %v6506_v55 = vadd.f32 %v14643_v61, %v6394_v26  ;;  %v6534_v6 = vmax.f32 %v6502_v3, 0.0  ;;  %v6292_v50 = vmul.f32 %v6260_v34, %v14679_v13 }
 0x80d   : > { %v6504_v48 = vadd.f32 %v14631_v23, %v6392_v60  ;;  %v6290_v30 = vmul.f32 %v6258_v10, %v14679_v13  ;;  %v6262_v60 = vsub.f32 %v14603_v8, %v14655_v20  ;;  %v6400_v52 = vmul.f32 %v14533_v36, %v6288_v45 }
 0x80e   : > { %v6508_v19 = vadd.f32 %v14645_v4, %v6396_v57  ;;  %v6689_v21 = vadd.f32 %v6659_v29, %v6657_v12  ;;  %v14747_v59 = vpop.permute.xlu1 %6614  ;;  %v6264_v14 = vsub.f32 %v14609_v43, %v14655_v20  ;;  %v6510_v8 = vadd.f32 %v14647_v38, %v6398_v42 }
 0x80f   : > { %v6294_v3 = vmul.f32 %v6262_v60, %v14679_v13  ;;  %v6402_v26 = vmul.f32 %v14539_v16, %v6290_v30  ;;  %v6538_v10 = vmax.f32 %v6506_v55, 0.0  ;;  %v6663_v45 = vmul.f32 %v14696_v44, %v6534_v6 }
 0x810   : > { %v14755_v57 = vpop.permute.xlu2 %6619  ;;  %v6404_v12 = vmul.f32 %v14541_v31, %v6292_v50  ;;  %v6512_v43 = vadd.f32 %v14651_v17, %v6400_v52  ;;  %v6540_v29 = vmax.f32 %v6508_v19, 0.0  ;;  %v6268_v6 = vsub.f32 %v14623_v24, %v14655_v20 }
 0x811   : > { %17124 = vst [vmem:[#allocation87_spill] sm:$0xff] %v14755_v57  ;;  %v6667_v50 = vmul.f32 %v14718_v41, %v6538_v10  ;;  %v6270_v52 = vsub.f32 %v14638_v2, %v14655_v20 }
 0x812   : > { %v14763_v42 = vpop.permute.xlu0 %6624  ;;  %v6300_v19 = vmul.f32 %v6268_v6, %v14679_v13  ;;  %v6544_v24 = vmax.f32 %v6512_v43, 0.0 }
 0x813   : > { %17125 = vst [vmem:[#allocation136_spill] sm:$0xff] %v14763_v42 }
 0x816   : > { %6034 = vmatmul.bf16.gmra.mxu0 %v17122_v25  ;;  %v6661_v25 = vmul.f32 %v14689_v1, %v6532_v32  ;;  %v6296_v32 = vmul.f32 %v6264_v14, %v14679_v13 }
 0x817   : > { %6083 = vmatmul.bf16.gmra.mxu1 %v17123_v37  ;;  %v6536_v37 = vmax.f32 %v6504_v48, 0.0  ;;  %v6266_v48 = vsub.f32 %v14615_v63, %v14655_v20  ;;  %v6514_v63 = vadd.f32 %v14653_v56, %v6402_v26  ;;  %v14781_v20 = vpop.permute.xlu1 %6629 }
 0x818   : > { %v6690_v34 = vadd.f32 %v6689_v21, %v6661_v25  ;;  %v6406_v25 = vmul.f32 %v14543_v0, %v6294_v3  ;;  %v6542_v21 = vmax.f32 %v6510_v8, 0.0  ;;  %v6302_v3 = vmul.f32 %v6270_v52, %v14679_v13  ;;  %17126 = vst [vmem:[#allocation89_spill] sm:$0xff] %v14781_v20  ;;  %v14786_v6 = vpop.permute.xlu2 %6634 }
 0x819   : > { %v6665_v30 = vmul.f32 %v14711_v18, %v6536_v37  ;;  %v6298_v55 = vmul.f32 %v6266_v48, %v14679_v13  ;;  %v6408_v37 = vmul.f32 %v14547_v47, %v6296_v32  ;;  %v6546_v10 = vmax.f32 %v6514_v63, 0.0  ;;  %17127 = vst [vmem:[#allocation173_spill] sm:$0xff] %v14786_v6 }
 0x81a   : > { %v6691_v60 = vadd.f32 %v6690_v34, %v6663_v45  ;;  %v6516_v45 = vadd.f32 %v14657_v5, %v6404_v12  ;;  %v6669_v34 = vmul.f32 %v14725_v33, %v6540_v29  ;;  %v6518_v8 = vadd.f32 %v14661_v39, %v6406_v25 }
 0x81b   : > { %v6410_v26 = vmul.f32 %v14555_v11, %v6298_v55  ;;  %v6412_v32 = vmul.f32 %v14560_v9, %v6300_v19  ;;  %v6520_v12 = vadd.f32 %v14663_v54, %v6408_v37  ;;  %v6673_v29 = vmul.f32 %v14755_v57, %v6544_v24 }
 0x81c   : > { %v6692_v14 = vadd.f32 %v6691_v60, %v6665_v30  ;;  %v6671_v30 = vmul.f32 %v14747_v59, %v6542_v21  ;;  %v6548_v43 = vmax.f32 %v6516_v45, 0.0  ;;  %v6414_v13 = vmul.f32 %v14581_v58, %v6302_v3 }
 0x81d   : > { %v6522_v55 = vadd.f32 %v14667_v7, %v6410_v26  ;;  %v6550_v25 = vmax.f32 %v6518_v8, 0.0  ;;  %v6675_v63 = vmul.f32 %v14763_v42, %v6546_v10  ;;  %v6552_v52 = vmax.f32 %v6520_v12, 0.0  ;;  %v17139_v42 = vld [vmem:[#allocation58_spill] sm:$0xff] }
 0x81e   : > { %v6693_v48 = vadd.f32 %v6692_v14, %v6667_v50  ;;  %v14791_v50 = vpop.permute.xlu0 %6639  ;;  %v6524_v14 = vadd.f32 %v14669_v22, %v6412_v32  ;;  %v6677_v19 = vmul.f32 %v14781_v20, %v6548_v43  ;;  %v6526_v45 = vadd.f32 %v14671_v51, %v6414_v13 }
 0x81f   : > { %17128 = vst [vmem:[#allocation116_spill] sm:$0xff] %v14791_v50  ;;  %v6554_v24 = vmax.f32 %v6522_v55, 0.0  ;;  %v6681_v26 = vmul.f32 %v14791_v50, %v6552_v52  ;;  %v14798_v10 = vpop.permute.xlu1 %6644 }
 0x820   : > { %v6694_v2 = vadd.f32 %v6693_v48, %v6669_v34  ;;  %v6679_v34 = vmul.f32 %v14786_v6, %v6550_v25  ;;  %v6556_v3 = vmax.f32 %v6524_v14, 0.0  ;;  %17129 = vst [vmem:[#allocation177_spill] sm:$0xff] %v14798_v10  ;;  %v14801_v12 = vpop.permute.xlu2 %6649 }
 0x821   : > { %17130 = vst [vmem:[#allocation110_spill] sm:$0xff] %v14801_v12 }
 0x822   : > { %v6695_v60 = vadd.f32 %v6694_v2, %v6671_v30  ;;  %v6558_v30 = vmax.f32 %v6526_v45, 0.0  ;;  %v6683_v2 = vmul.f32 %v14798_v10, %v6554_v24  ;;  %v6685_v43 = vmul.f32 %v14801_v12, %v6556_v3  ;;  %v17134_v3 = vld [vmem:[#allocation17_spill] sm:$0xff] }
 0x824   : > { %v6696_v21 = vadd.f32 %v6695_v60, %v6673_v29 }
 0x826   : > { %v6697_v37 = vadd.f32 %v6696_v21, %v6675_v63  ;;  %v14804_v13 = vpop.permute.xlu0 %6654 }
 0x827   : > { %17131 = vst [vmem:[#allocation123_spill] sm:$0xff] %v14804_v13  ;;  %v6687_v63 = vmul.f32 %v14804_v13, %v6558_v30  ;;  %v17135_v13 = vld [vmem:[#allocation121_spill] sm:$0xff] }
 0x828   : > { %v6698_v48 = vadd.f32 %v6697_v37, %v6677_v19  ;;  %v17133_v37 = vld [vmem:[#allocation128_spill] sm:$0xff] }
 0x82a   : > { %v6699_v8 = vadd.f32 %v6698_v48, %v6679_v34 }
 0x82c   : > { %v6700_v32 = vadd.f32 %v6699_v8, %v6681_v26 }
 0x82e   : > { %v6701_v29 = vadd.f32 %v6700_v32, %v6683_v2 }
 0x830   : > { %v6702_v21 = vadd.f32 %v6701_v29, %v6685_v43 }
 0x832   : > { %v14810_v52 = vadd.f32 %v6702_v21, %v6687_v63 }
 0x833   : > { %v6005_v60 = vpop.f32.mrf.mxu0 }
 0x834   : > { %v6006_v55 = vadd.f32 %v6005_v60, %v14263_v53  ;;  %v6054_v25 = vpop.f32.mrf.mxu1  ;;  %17132 = vst [vmem:[#allocation48_spill] sm:$0xff] %v14810_v52 }
 0x836   : > { %v14808_v14 = vadd.f32 %v6054_v25, %v6006_v55 }
 0x838   : > { %v6139_v51 = vmul.f32 %v14808_v14, %v14808_v14 }
 0x83b   : > { %v6007_v19 = vpop.f32.mrf.mxu0 }
 0x83c   : > { %v6008_v45 = vadd.f32 %v6007_v19, %v17133_v37  ;;  %v6056_v24 = vpop.f32.mrf.mxu1 }
 0x83e   : > { %v14813_v34 = vadd.f32 %v6056_v24, %v6008_v45 }
 0x840   : > { %v6141_v10 = vmul.f32 %v14813_v34, %v14813_v34 }
 0x843   : > { %v6010_v48 = vpop.f32.mrf.mxu0 }
 0x844   : > { %v6011_v26 = vadd.f32 %v6010_v48, %v17134_v3  ;;  %v6059_v8 = vpop.f32.mrf.mxu1  ;;  %v17136_v48 = vld [vmem:[#allocation16_spill] sm:$0xff] }
 0x846   : > { %v14816_v2 = vadd.f32 %v6059_v8, %v6011_v26 }
 0x848   : > { %v6143_v6 = vmul.f32 %v14816_v2, %v14816_v2 }
 0x84b   : > { %v6012_v53 = vpop.f32.mrf.mxu0 }
 0x84c   : > { %v6061_v32 = vpop.f32.mrf.mxu1  ;;  %v6013_v12 = vadd.f32 %v6012_v53, %v17135_v13  ;;  %v17137_v13 = vld [vmem:[#allocation24_spill] sm:$0xff] }
 0x84e   : > { %v14822_v50 = vadd.f32 %v6061_v32, %v6013_v12 }
 0x850   : > { %v6145_v12 = vmul.f32 %v14822_v50, %v14822_v50 }
 0x853   : > { %v6015_v30 = vpop.f32.mrf.mxu0 }
 0x854   : > { %v6064_v43 = vpop.f32.mrf.mxu1  ;;  %v6016_v3 = vadd.f32 %v6015_v30, %v17136_v48  ;;  %v6115_v30 = vadd.f32 %v14813_v34, %v14808_v14  ;;  %v6191_v48 = vadd.f32 %v6141_v10, %v6139_v51 }
 0x856   : > { %v14829_v20 = vadd.f32 %v6064_v43, %v6016_v3  ;;  %v6192_v58 = vadd.f32 %v6191_v48, %v6143_v6  ;;  %v17140_v6 = vld [vmem:[#allocation125_spill] sm:$0xff] }
 0x858   : > { %v6147_v43 = vmul.f32 %v14829_v20, %v14829_v20  ;;  %v6193_v7 = vadd.f32 %v6192_v58, %v6145_v12 }
 0x85b   : > { %v6017_v29 = vpop.f32.mrf.mxu0 }
 0x85c   : > { %v6066_v60 = vpop.f32.mrf.mxu1  ;;  %v6018_v52 = vadd.f32 %v6017_v29, %v14281_v49  ;;  %v6116_v49 = vadd.f32 %v6115_v30, %v14816_v2  ;;  %v17138_v29 = vld [vmem:[#allocation73_spill] sm:$0xff] }
 0x85e   : > { %v14836_v32 = vadd.f32 %v6066_v60, %v6018_v52  ;;  %v6040_v60 = vpop.f32.mrf.mxu2 }
 0x860   : > { %v6149_v52 = vmul.f32 %v14836_v32, %v14836_v32 }
 0x863   : > { %v6020_v55 = vpop.f32.mrf.mxu0 }
 0x864   : > { %v6069_v25 = vpop.f32.mrf.mxu1  ;;  %v6021_v53 = vadd.f32 %v6020_v55, %v17137_v13  ;;  %v6117_v13 = vadd.f32 %v6116_v49, %v14822_v50 }
 0x866   : > { %v14842_v3 = vadd.f32 %v6069_v25, %v6021_v53  ;;  %v6118_v30 = vadd.f32 %v6117_v13, %v14829_v20 }
 0x868   : > { %v6151_v25 = vmul.f32 %v14842_v3, %v14842_v3  ;;  %v6119_v53 = vadd.f32 %v6118_v30, %v14836_v32 }
 0x86a   : > { %v6120_v12 = vadd.f32 %v6119_v53, %v14842_v3 }
 0x86b   : > { %v6022_v63 = vpop.f32.mrf.mxu0 }
 0x86c   : > { %v6071_v21 = vpop.f32.mrf.mxu1  ;;  %v6023_v22 = vadd.f32 %v6022_v63, %v17138_v29  ;;  %v6194_v29 = vadd.f32 %v6193_v7, %v6147_v43  ;;  %v6089_v7 = vpop.f32.mrf.mxu3 }
 0x86e   : > { %v14849_v63 = vadd.f32 %v6071_v21, %v6023_v22  ;;  %v17142_v21 = vld [vmem:[#allocation90_spill] sm:$0xff] }
 0x870   : > { %v6153_v13 = vmul.f32 %v14849_v63, %v14849_v63  ;;  %v6121_v57 = vadd.f32 %v6120_v12, %v14849_v63 }
 0x873   : > { %v6025_v19 = vpop.f32.mrf.mxu0 }
 0x874   : > { %v6074_v37 = vpop.f32.mrf.mxu1  ;;  %v6026_v51 = vadd.f32 %v6025_v19, %v17139_v42  ;;  %v17141_v42 = vld [vmem:[#allocation23_spill] sm:$0xff]  ;;  %v6195_v19 = vadd.f32 %v6194_v29, %v6149_v52 }
 0x876   : > { %v14855_v49 = vadd.f32 %v6074_v37, %v6026_v51  ;;  %v6196_v43 = vadd.f32 %v6195_v19, %v6151_v25 }
 0x878   : > { %v6155_v37 = vmul.f32 %v14855_v49, %v14855_v49  ;;  %v6197_v29 = vadd.f32 %v6196_v43, %v6153_v13  ;;  %v6122_v53 = vadd.f32 %v6121_v57, %v14855_v49  ;;  %v17145_v43 = vld [vmem:[#allocation83_spill] sm:$0xff] }
 0x87a   : > { %v6198_v25 = vadd.f32 %v6197_v29, %v6155_v37  ;;  %v17146_v29 = vld [vmem:[#allocation124_spill] sm:$0xff] }
 0x87b   : > { %v6027_v45 = vpop.f32.mrf.mxu0 }
 0x87c   : > { %v6076_v24 = vpop.f32.mrf.mxu1  ;;  %v6028_v48 = vadd.f32 %v6027_v45, %v17140_v6 }
 0x87e   : > { %v14861_v22 = vadd.f32 %v6076_v24, %v6028_v48  ;;  %v6042_v48 = vpop.f32.mrf.mxu2 }
 0x880   : > { %v6157_v24 = vmul.f32 %v14861_v22, %v14861_v22 }
 0x883   : > { %v6030_v26 = vpop.f32.mrf.mxu0 }
 0x884   : > { %v6079_v8 = vpop.f32.mrf.mxu1  ;;  %v6031_v58 = vadd.f32 %v6030_v26, %v17141_v42  ;;  %v17143_v26 = vld [vmem:[#allocation34_spill] sm:$0xff]  ;;  %v6123_v42 = vadd.f32 %v6122_v53, %v14861_v22 }
 0x886   : > { %v14867_v51 = vadd.f32 %v6079_v8, %v6031_v58  ;;  %v17144_v58 = vld [vmem:[#allocation137_spill] sm:$0xff] }
 0x887   : > { %v6041_v12 = vadd.f32 %v6040_v60, %v17144_v58 }
 0x888   : > { %v6159_v19 = vmul.f32 %v14867_v51, %v14867_v51  ;;  %v6124_v13 = vadd.f32 %v6123_v42, %v14867_v51 }
 0x889   : > { %v14889_v60 = vadd.f32 %v6089_v7, %v6041_v12 }
 0x88b   : > { %v6032_v55 = vpop.f32.mrf.mxu0 }
 0x88c   : > { %v6081_v10 = vpop.f32.mrf.mxu1  ;;  %v6033_v45 = vadd.f32 %v6032_v55, %v17142_v21  ;;  %v6199_v21 = vadd.f32 %v6198_v25, %v6157_v24 }
 0x88e   : > { %v14873_v55 = vadd.f32 %v6081_v10, %v6033_v45  ;;  %v6043_v10 = vadd.f32 %v6042_v48, %v17145_v43 }
 0x890   : > { %v6161_v57 = vmul.f32 %v14873_v55, %v14873_v55  ;;  %v6125_v37 = vadd.f32 %v6124_v13, %v14873_v55  ;;  %v6167_v13 = vmul.f32 %v14889_v60, %v14889_v60 }
 0x893   : > { %v6035_v6 = vpop.f32.mrf.mxu0 }
 0x894   : > { %v6036_v52 = vadd.f32 %v6035_v6, %v17143_v26  ;;  %v6084_v30 = vpop.f32.mrf.mxu1  ;;  %v6200_v6 = vadd.f32 %v6199_v21, %v6159_v19 }
 0x896   : > { %v14878_v8 = vadd.f32 %v6084_v30, %v6036_v52  ;;  %v6091_v30 = vpop.f32.mrf.mxu3  ;;  %v6201_v24 = vadd.f32 %v6200_v6, %v6161_v57 }
 0x897   : > { %v14894_v58 = vadd.f32 %v6091_v30, %v6043_v10 }
 0x898   : > { %v6163_v26 = vmul.f32 %v14878_v8, %v14878_v8  ;;  %v6126_v25 = vadd.f32 %v6125_v37, %v14878_v8 }
 0x899   : > { %v6169_v12 = vmul.f32 %v14894_v58, %v14894_v58 }
 0x89a   : > { %v6202_v48 = vadd.f32 %v6201_v24, %v6163_v26 }
 0x89b   : > { %v6037_v45 = vpop.f32.mrf.mxu0 }
 0x89c   : > { %v6038_v52 = vadd.f32 %v6037_v45, %v17146_v29  ;;  %v6086_v53 = vpop.f32.mrf.mxu1 }
 0x89e   : > { %v14892_v42 = vadd.f32 %v6086_v53, %v6038_v52 }
 0x8a0   : > { %v6127_v19 = vadd.f32 %v6126_v25, %v14892_v42  ;;  %v6165_v21 = vmul.f32 %v14892_v42, %v14892_v42 }
 0x8a2   : > { %v6128_v43 = vadd.f32 %v6127_v19, %v14889_v60  ;;  %v6203_v7 = vadd.f32 %v6202_v48, %v6165_v21 }
 0x8a4   : > { %v6129_v57 = vadd.f32 %v6128_v43, %v14894_v58  ;;  %v6204_v45 = vadd.f32 %v6203_v7, %v6167_v13 }
 0x8a6   : > { %v6130_v10 = vrot.slane %v6129_v57, 4  ;;  %v6205_v6 = vadd.f32 %v6204_v45, %v6169_v12 }
 0x8a8   : > { %v6131_v37 = vadd.f32 %v6130_v10, %v6129_v57  ;;  %v6206_v26 = vrot.slane %v6205_v6, 4 }
 0x8aa   : > { %v6132_v29 = vrot.slane %v6131_v37, 2  ;;  %v6207_v52 = vadd.f32 %v6206_v26, %v6205_v6 }
 0x8ac   : > { %v6133_v30 = vadd.f32 %v6132_v29, %v6131_v37  ;;  %v6208_v53 = vrot.slane %v6207_v52, 2 }
 0x8ae   : > { %v6134_v24 = vrot.slane %v6133_v30, 1  ;;  %v6209_v25 = vadd.f32 %v6208_v53, %v6207_v52 }
 0x8b0   : > { %v6135_v54 = vadd.f32 %v6134_v24, %v6133_v30  ;;  %v6210_v9 = vrot.slane %v6209_v25, 1 }
 0x8b2   : > { %v14905_v19 = vmul.f32 0.01, %v6135_v54  ;;  %v6211_v48 = vadd.f32 %v6210_v9, %v6209_v25  ;;  %v17147_v25 = vld [vmem:[#allocation142_spill] sm:$0xff] }
 0x8b4   : > { %v6213_v21 = vmul.f32 0.01, %v6211_v48  ;;  %v6215_v43 = vmul.f32 %v14905_v19, %v14905_v19  ;;  %v6241_v54 = vsub.f32 %v14808_v14, %v14905_v19  ;;  %v6243_v9 = vsub.f32 %v14813_v34, %v14905_v19 }
 0x8b5   : > { %v6245_v29 = vsub.f32 %v14816_v2, %v14905_v19  ;;  %v6247_v53 = vsub.f32 %v14822_v50, %v14905_v19  ;;  %v6249_v14 = vsub.f32 %v14829_v20, %v14905_v19  ;;  %v6251_v2 = vsub.f32 %v14836_v32, %v14905_v19 }
 0x8b6   : > { %v6217_v13 = vsub.f32 %v6213_v21, %v6215_v43  ;;  %v17148_v21 = vld [vmem:[#allocation92_spill] sm:$0xff] }
 0x8b8   : > { %v6219_v7 = vadd.f32 1e-05, %v6217_v13 }
 0x8ba   : > { %7706 = vrsqrt.f32 %v6219_v7  ;;  %vm6236_vm1 = vweird.f32 %v6219_v7 }
 0x8c0   : > { %v7707_v12 = vpop.eup %7706 }
 0x8c1   : > { %v6231_v57 = vmul.f32 %v7707_v12, %v6219_v7  ;;  %vm6237_vm0 = vweird.f32 %v7707_v12 }
 0x8c2   : > { %vm6238_vm2 = vmor %vm6236_vm1, %vm6237_vm0 }
 0x8c3   : > { %v6232_v45 = vmul.f32 %v7707_v12, %v6231_v57 }
 0x8c5   : > { %v6233_v10 = vmul.f32 0.5, %v6232_v45  ;;  %v6253_v45 = vsub.f32 %v14842_v3, %v14905_v19 }
 0x8c7   : > { %v6234_v6 = vsub.f32 1.5, %v6233_v10  ;;  %v17150_v10 = vld [vmem:[#allocation185_spill] sm:$0xff] }
 0x8c9   : > { %v6235_v37 = vmul.f32 %v7707_v12, %v6234_v6 }
 0x8cb   : > { %v14913_v26 = vsel %vm6238_vm2, %v7707_v12, %v6235_v37  ;;  %v17149_v12 = vld [vmem:[#allocation134_spill] sm:$0xff]  ;;  %v6255_v37 = vsub.f32 %v14849_v63, %v14905_v19  ;;  %v6259_v63 = vsub.f32 %v14861_v22, %v14905_v19 }
 0x8cc   : > { %v6273_v52 = vmul.f32 %v6241_v54, %v14913_v26  ;;  %v6275_v30 = vmul.f32 %v6243_v9, %v14913_v26  ;;  %v6277_v24 = vmul.f32 %v6245_v29, %v14913_v26  ;;  %v6279_v34 = vmul.f32 %v6247_v53, %v14913_v26 }
 0x8cd   : > { %v6281_v13 = vmul.f32 %v6249_v14, %v14913_v26  ;;  %v6283_v20 = vmul.f32 %v6251_v2, %v14913_v26  ;;  %v6285_v32 = vmul.f32 %v6253_v45, %v14913_v26  ;;  %v6287_v3 = vmul.f32 %v6255_v37, %v14913_v26 }
 0x8ce   : > { %v6385_v48 = vmul.f32 %v17147_v25, %v6273_v52  ;;  %v6387_v43 = vmul.f32 %v17148_v21, %v6275_v30  ;;  %v6389_v7 = vmul.f32 %v14458_v40, %v6277_v24  ;;  %v6391_v6 = vmul.f32 %v17150_v10, %v6279_v34  ;;  %v17151_v52 = vld [vmem:[#allocation119_spill] sm:$0xff]  ;;  %v17152_v25 = vld [vmem:[#allocation8_spill] sm:$0xff] }
 0x8cf   : > { %v6393_v54 = vmul.f32 %v14496_v46, %v6281_v13  ;;  %v6395_v30 = vmul.f32 %v17151_v52, %v6283_v20  ;;  %v6397_v46 = vmul.f32 %v17152_v25, %v6285_v32  ;;  %v6291_v14 = vmul.f32 %v6259_v63, %v14913_v26  ;;  %v17153_v21 = vld [vmem:[#allocation67_spill] sm:$0xff] }
 0x8d0   : > { %v6497_v50 = vadd.f32 %v14590_v28, %v6385_v48  ;;  %v6499_v57 = vadd.f32 %v17149_v12, %v6387_v43  ;;  %v6501_v40 = vadd.f32 %v14617_v35, %v6389_v7  ;;  %v6257_v28 = vsub.f32 %v14855_v49, %v14905_v19 }
 0x8d1   : > { %v6503_v53 = vadd.f32 %v14626_v15, %v6391_v6  ;;  %v6505_v35 = vadd.f32 %v14631_v23, %v6393_v54  ;;  %v6261_v49 = vsub.f32 %v14867_v51, %v14905_v19  ;;  %v6399_v15 = vmul.f32 %v14531_v62, %v6287_v3 }
 0x8d2   : > { %v6529_v9 = vmax.f32 %v6497_v50, 0.0  ;;  %v6531_v29 = vmax.f32 %v6499_v57, 0.0  ;;  %v6289_v24 = vmul.f32 %v6257_v28, %v14913_v26  ;;  %v6533_v48 = vmax.f32 %v6501_v40, 0.0 }
 0x8d3   : > { %v6507_v22 = vadd.f32 %v14643_v61, %v6395_v30  ;;  %v6535_v2 = vmax.f32 %v6503_v53, 0.0  ;;  %v6263_v13 = vsub.f32 %v14873_v55, %v14905_v19  ;;  %v6293_v23 = vmul.f32 %v6261_v49, %v14913_v26 }
 0x8d4   : > { %v6658_v34 = vmul.f32 %v14673_v27, %v6529_v9  ;;  %v6660_v43 = vmul.f32 %v17153_v21, %v6531_v29  ;;  %v6401_v7 = vmul.f32 %v14533_v36, %v6289_v24  ;;  %v6509_v51 = vadd.f32 %v14645_v4, %v6397_v46  ;;  %v17155_v24 = vld [vmem:[#allocation141_spill] sm:$0xff] }
 0x8d5   : > { %v6537_v50 = vmax.f32 %v6505_v35, 0.0  ;;  %v6662_v12 = vmul.f32 %v14689_v1, %v6533_v48  ;;  %v6265_v57 = vsub.f32 %v14878_v8, %v14905_v19  ;;  %v6295_v62 = vmul.f32 %v6263_v13, %v14913_v26  ;;  %v17162_v13 = vld [vmem:[#allocation173_spill] sm:$0xff] }
 0x8d6   : > { %v6710_v27 = vadd.f32 %v6660_v43, %v6658_v34  ;;  %v6403_v61 = vmul.f32 %v14539_v16, %v6291_v14  ;;  %v6511_v45 = vadd.f32 %v14647_v38, %v6399_v15  ;;  %v6539_v55 = vmax.f32 %v6507_v22, 0.0  ;;  %v17159_v14 = vld [vmem:[#allocation86_spill] sm:$0xff] }
 0x8d7   : > { %v6664_v20 = vmul.f32 %v14696_v44, %v6535_v2  ;;  %v6267_v4 = vsub.f32 %v14892_v42, %v14905_v19  ;;  %v6297_v36 = vmul.f32 %v6265_v57, %v14913_v26  ;;  %v6405_v1 = vmul.f32 %v14541_v31, %v6293_v23 }
 0x8d8   : > { %v6711_v10 = vadd.f32 %v6710_v27, %v6662_v12  ;;  %v6513_v6 = vadd.f32 %v14651_v17, %v6401_v7  ;;  %v6541_v8 = vmax.f32 %v6509_v51, 0.0  ;;  %v6666_v37 = vmul.f32 %v14711_v18, %v6537_v50  ;;  %v17163_v51 = vld [vmem:[#allocation208_spill] sm:$0xff] }
 0x8d9   : > { %v6269_v38 = vsub.f32 %v14889_v60, %v14905_v19  ;;  %v6299_v16 = vmul.f32 %v6267_v4, %v14913_v26  ;;  %v6407_v44 = vmul.f32 %v14543_v0, %v6295_v62  ;;  %v6515_v54 = vadd.f32 %v14653_v56, %v6403_v61  ;;  %v17164_v12 = vld [vmem:[#allocation48_spill] sm:$0xff] }
 0x8da   : > { %v6712_v32 = vadd.f32 %v6711_v10, %v6664_v20  ;;  %v6543_v42 = vmax.f32 %v6511_v45, 0.0  ;;  %v6668_v40 = vmul.f32 %v14718_v41, %v6539_v55  ;;  %v6409_v17 = vmul.f32 %v14547_v47, %v6297_v36  ;;  %v17154_v47 = vld [vmem:[#allocation122_spill] sm:$0xff]  ;;  %v17165_v62 = vld [vmem:[#allocation116_spill] sm:$0xff]  ;;  %v17166_v55 = vld [vmem:[#allocation177_spill] sm:$0xff] }
 0x8db   : > { %v6301_v31 = vmul.f32 %v6269_v38, %v14913_v26  ;;  %v6271_v18 = vsub.f32 %v14894_v58, %v14905_v19  ;;  %v6517_v9 = vadd.f32 %v14657_v5, %v6405_v1  ;;  %v6545_v60 = vmax.f32 %v6513_v6, 0.0  ;;  %v17156_v5 = vld [vmem:[#allocation87_spill] sm:$0xff]  ;;  %v17167_v36 = vld [vmem:[#allocation110_spill] sm:$0xff] }
 0x8dc   : > { %v6713_v28 = vadd.f32 %v6712_v32, %v6666_v37  ;;  %v6670_v29 = vmul.f32 %v14725_v33, %v6541_v8  ;;  %v6411_v0 = vmul.f32 %v14555_v11, %v6299_v16  ;;  %v6519_v56 = vadd.f32 %v14661_v39, %v6407_v44  ;;  %v17157_v33 = vld [vmem:[#allocation101_spill] sm:$0xff]  ;;  %v17158_v11 = vld [vmem:[#allocation136_spill] sm:$0xff]  ;;  %v17168_v32 = vld [vmem:[#allocation123_spill] sm:$0xff] }
 0x8dd   : > { %v6547_v52 = vmax.f32 %v6515_v54, 0.0  ;;  %v6672_v41 = vmul.f32 %v14747_v59, %v6543_v42  ;;  %v6303_v53 = vmul.f32 %v6271_v18, %v14913_v26  ;;  %v6413_v63 = vmul.f32 %v17154_v47, %v6301_v31  ;;  %v17160_v59 = vld [vmem:[#allocation32_spill] sm:$0xff]  ;;  %v17161_v26 = vld [vmem:[#allocation89_spill] sm:$0xff]  ;;  %v6735_v18 = vpop.permute.xlu1 %6734 }
 0x8de   : > { %v6714_v3 = vadd.f32 %v6713_v28, %v6668_v40  ;;  %v6521_v58 = vadd.f32 %v17155_v24, %v6409_v17  ;;  %v6549_v19 = vmax.f32 %v6517_v9, 0.0  ;;  %v6674_v25 = vmul.f32 %v17156_v5, %v6545_v60 }
 0x8df   : > { %v6523_v35 = vadd.f32 %v17157_v33, %v6411_v0  ;;  %v6551_v48 = vmax.f32 %v6519_v56, 0.0  ;;  %v6676_v49 = vmul.f32 %v17158_v11, %v6547_v52  ;;  %v6415_v34 = vmul.f32 %v17159_v14, %v6303_v53 }
 0x8e0   : > { %v6715_v30 = vadd.f32 %v6714_v3, %v6670_v29  ;;  %v6525_v21 = vadd.f32 %v17160_v59, %v6413_v63  ;;  %v6553_v43 = vmax.f32 %v6521_v58, 0.0  ;;  %v6678_v15 = vmul.f32 %v17161_v26, %v6549_v19 }
 0x8e1   : > { %v6555_v2 = vmax.f32 %v6523_v35, 0.0  ;;  %v6680_v23 = vmul.f32 %v17162_v13, %v6551_v48  ;;  %v6527_v50 = vadd.f32 %v17163_v51, %v6415_v34  ;;  %v6704_v27 = vrot.slane %v17164_v12, 4 }
 0x8e2   : > { %v6716_v46 = vadd.f32 %v6715_v30, %v6672_v41  ;;  %v6557_v57 = vmax.f32 %v6525_v21, 0.0  ;;  %v6682_v61 = vmul.f32 %v17165_v62, %v6553_v43  ;;  %v6737_v60 = vperm.slane %v6735_v18, 0 }
 0x8e3   : > { %v6684_v20 = vmul.f32 %v17166_v55, %v6555_v2  ;;  %v6559_v4 = vmax.f32 %v6527_v50, 0.0  ;;  %v6705_v8 = vadd.f32 %v6704_v27, %v17164_v12  ;;  %v6746_v0 = vlaneseq }
 0x8e4   : > { %v6717_v39 = vadd.f32 %v6716_v46, %v6674_v25  ;;  %v6686_v1 = vmul.f32 %v17167_v36, %v6557_v57 }
 0x8e5   : > { %v6688_v38 = vmul.f32 %v17168_v32, %v6559_v4  ;;  %v6706_v16 = vrot.slane %v6705_v8, 2  ;;  %vm6748_vm4 = vcmp.lt.s32.totalorder %v6746_v0, 256 }
 0x8e6   : > { %v6718_v22 = vadd.f32 %v6717_v39, %v6676_v49 }
 0x8e7   : > { %v6707_v42 = vadd.f32 %v6706_v16, %v6705_v8 }
 0x8e8   : > { %v6719_v7 = vadd.f32 %v6718_v22, %v6678_v15 }
 0x8e9   : > { %v6708_v31 = vrot.slane %v6707_v42, 1 }
 0x8ea   : > { %v6720_v45 = vadd.f32 %v6719_v7, %v6680_v23 }
 0x8eb   : > { %v6709_v29 = vadd.f32 %v6708_v31, %v6707_v42 }
 0x8ec   : > { %v6721_v10 = vadd.f32 %v6720_v45, %v6682_v61 }
 0x8ed   : > { %v6738_v52 = vadd.f32 %v6737_v60, %v6709_v29 }
 0x8ee   : > { %v6722_v6 = vadd.f32 %v6721_v10, %v6684_v20 }
 0x8f0   : > { %v6723_v37 = vadd.f32 %v6722_v6, %v6686_v1 }
 0x8f2   : > { %v6724_v44 = vadd.f32 %v6723_v37, %v6688_v38 }
 0x8f4   : > { %v6725_v54 = vrot.slane %v6724_v44, 4 }
 0x8f6   : > { %v6726_v40 = vadd.f32 %v6725_v54, %v6724_v44 }
 0x8f8   : > { %v6727_v28 = vrot.slane %v6726_v40, 2 }
 0x8fa   : > { %v6728_v17 = vadd.f32 %v6727_v28, %v6726_v40 }
 0x8fc   : > { %v6729_v9 = vrot.slane %v6728_v17, 1 }
 0x8fe   : > { %v6730_v3 = vadd.f32 %v6729_v9, %v6728_v17 }
 0x900   : > { %v6739_v56 = vadd.f32 %v6737_v60, %v6730_v3 }
 0x902   : > { %v6742_v41 = vrot.slane %v6739_v56, 7 }
 0x904   : > { %v6744_v30 = vsel %vm6743_vm3, %v6738_v52, %v6742_v41 }
 0x905   : > { %6750 = vst.msk [vmem:[%s301_s22] sm:$0x3] %vm6748_vm4, %v6744_v30 }
 0x906   : > { %7735 = shalt.err (!%p7732_p3)
}
 0x907   : > { %7653 = dma.vmem_to_hbm [thread:$0]  (%p7859_p5), %s6765_s23, 32, %s6767_s24, %s6752_s7  }
 0x908 PF: > { %p7659_p4 = scmp.ge.s32.totalorder %s7770_s10, 2  ;;  %s6778_s13 = sand.u32 1, %s7758_s29  }
 0x909   : > { %s6779_s19 = scalar_lea.sflag [#allocation4], %s6778_s13 }
 0x90a   : > { %p7656_p7 = pnand %p7659_p4, %p7863_p6 }
 0x90c   : > { %p7657_p8 = pneg %p7656_p7 }
 0x90e   : > { %7753 = dma.done.wait (%p7657_p8), %s6779_s19, 32  }
 0x90f   : > { %7755 = vsyncadd (%p7657_p8), %s6779_s19, 4294967264  ;;  %p20_p9 = scmp.ge.s32.totalorder %s7846_s12, 4   ;;  %s17169_s29 = smov %s7762_s30 }
 0x910   : > { %s17170_s30 = smov %s7766_s9  ;;  %s17171_s9 = smov %s7857_s15 }
 0x911   : > { %s17172_s10 = smov %s7846_s12  ;;  %22 = sbr.rel (!%p20_p9) target bundleno = 6 (0x6), region = 94 }
 0x916   :  { %6785 = vsyncpa [#allocation4], 1 }
 0x917   :  { %6787 = vsyncpa [#allocation4 + $0x1], 1 }

</bundles_post_ra>
